<compile_context>
chip_gen: v6e
topology: v6e:2x2x1
jax: 0.10.0
libtpu: 0.0.40
codegen_flags: <defaults>
</compile_context>

<pallas_src>
import numpy as np
import jax
import jax.numpy as jnp
from jax import lax
from jax.experimental import pallas as pl
from jax.experimental.pallas import tpu as pltpu


# Fixed SimpleCNN geometry (flatten_dim = 16*5*5 implies 32x32 inputs).
_CIN, _C1, _C2 = 3, 6, 16
_K = 5                         # conv kernel size
_H0 = _W0 = 32                 # input spatial size
_P1 = 14                       # pool1 output (valid part)
_G1 = 16                       # padded grid that stores the pool1 output
_P2 = 5                        # pool2 output
_FLAT = _C2 * _P2 * _P2        # 400 (PyTorch flatten order: c*25 + py*5 + px)
_TAPS = _K * _K                # 25
_CPAD = 8                      # sublane-aligned channel group per tap


def _shift_up(v, d):
    """result[..., i] = v[..., i + d]  (lane roll; wrapped lanes are only ever
    read at positions later discarded by the one-hot pool selections)."""
    if d == 0:
        return v
    n = v.shape[-1]
    return pltpu.roll(v, shift=(n - d) % n, axis=v.ndim - 1)


# ----------------------------------------------------------------------------
# Fused kernel: whole forward pass on VMEM-resident data.
# ----------------------------------------------------------------------------
def _simple_cnn_kernel(x_ref, w1_ref, b1_ref, w2_ref, b2_ref,
                       sel1_ref, sel2_ref, cmask_ref, esel_ref,
                       fc1w_ref, fc1b_ref, fc2w_ref, fc2b_ref,
                       fc3w_ref, fc3b_ref,
                       out_ref, stk1_ref, stk2_ref):
    f32 = jnp.float32
    batch = out_ref.shape[0]
    img1 = _H0 * _W0            # 1024
    img2 = _G1 * _G1            # 256

    # ---------------- conv1 + ReLU: stack 25 rolled taps, one K=200 matmul --
    x = x_ref[...]                                          # (8, B*1024), ch 3..7 = 0
    for dy in range(_K):
        for dx in range(_K):
            t = dy * _K + dx
            stk1_ref[t * _CPAD:(t + 1) * _CPAD, :] = _shift_up(x, dy * _W0 + dx)
    a1 = jnp.maximum(
        jnp.dot(w1_ref[...], stk1_ref[...], preferred_element_type=f32)
        + b1_ref[...], 0.0)                                 # (8, B*1024), rows 6..7 = 0

    # ---------------- pool1: 2x2 max + shared per-image stride-2 gather -----
    m1 = jnp.maximum(jnp.maximum(a1, _shift_up(a1, 1)),
                     jnp.maximum(_shift_up(a1, _W0), _shift_up(a1, _W0 + 1)))
    p1 = jnp.concatenate(
        [jnp.dot(m1[:, b * img1:(b + 1) * img1], sel1_ref[...],
                 preferred_element_type=f32)
         for b in range(batch)], axis=1)                    # (8, B*256)

    # ---------------- conv2 + ReLU: stack 25 rolled taps, one K=200 matmul --
    for dy in range(_K):
        for dx in range(_K):
            t = dy * _K + dx
            stk2_ref[t * _CPAD:(t + 1) * _CPAD, :] = _shift_up(p1, dy * _G1 + dx)
    a2 = jnp.maximum(
        jnp.dot(w2_ref[...], stk2_ref[...], preferred_element_type=f32)
        + b2_ref[...], 0.0)                                 # (16, B*256)

    # ---------------- pool2 + PyTorch-order flatten (batched) ---------------
    m2 = jnp.maximum(jnp.maximum(a2, _shift_up(a2, 1)),
                     jnp.maximum(_shift_up(a2, _G1), _shift_up(a2, _G1 + 1)))
    cmask = cmask_ref[...]                                  # (16, 400)
    gm = jnp.concatenate(
        [jnp.dot(m2[:, b * img2:(b + 1) * img2], sel2_ref[...],
                 preferred_element_type=f32) * cmask
         for b in range(batch)], axis=0)                    # (B*16, 400)
    feat = jnp.dot(esel_ref[...], gm, preferred_element_type=f32)   # (B, 400)

    # ---------------- fc1/fc2/fc3, batched over the whole (B, 400) ----------
    h = jnp.maximum(jnp.dot(feat, fc1w_ref[...], preferred_element_type=f32)
                    + fc1b_ref[...], 0.0)                   # (B, 120)
    h = jnp.maximum(jnp.dot(h, fc2w_ref[...], preferred_element_type=f32)
                    + fc2b_ref[...], 0.0)                   # (B, 84)
    out_ref[...] = (jnp.dot(h, fc3w_ref[...], preferred_element_type=f32)
                    + fc3b_ref[...]).astype(out_ref.dtype)  # (B, 10)


# ----------------------------------------------------------------------------
# Host-side precomputed one-hot selections / masks (shared across the batch).
# ----------------------------------------------------------------------------
def _pool1_selection():
    """(1024, 256): 32x32 lane of a 2x2 window start -> padded-16x16 column."""
    sel = np.zeros((_H0 * _W0, _G1 * _G1), np.float32)
    for y in range(_P1):
        for x in range(_P1):
            sel[(2 * y) * _W0 + 2 * x, y * _G1 + x] = 1.0
    return sel


def _pool2_selection():
    """(256, 400): padded-16x16 lane of a 2x2 window start -> feature column
    c*25 + py*5 + px (same lane replicated for every channel c)."""
    sel = np.zeros((_G1 * _G1, _FLAT), np.float32)
    for c in range(_C2):
        for py in range(_P2):
            for px in range(_P2):
                sel[(2 * py) * _G1 + 2 * px, c * _P2 * _P2 + py * _P2 + px] = 1.0
    return sel


def _channel_mask():
    """(16, 400): mask[c, f] = 1 where flattened feature f belongs to chan c."""
    m = np.zeros((_C2, _FLAT), np.float32)
    for c in range(_C2):
        m[c, c * _P2 * _P2:(c + 1) * _P2 * _P2] = 1.0
    return m


def _batch_row_selector(batch):
    """(B, B*16): sums the 16 masked channel rows of each batch block."""
    e = np.zeros((batch, batch * _C2), np.float32)
    for b in range(batch):
        e[b, b * _C2:(b + 1) * _C2] = 1.0
    return e


def _stacked_conv_weights(w, cin):
    """(O, I, 5, 5) -> (O, 25*8): column t*8+c holds w[o, c, dy, dx] (t=dy*5+dx),
    zero in the per-tap pad columns c >= cin."""
    out_c = w.shape[0]
    wt = jnp.transpose(w, (2, 3, 0, 1)).reshape(_TAPS, out_c, cin)     # (25,O,I)
    wp = jnp.zeros((_TAPS, out_c, _CPAD), w.dtype).at[:, :, :cin].set(wt)
    return jnp.transpose(wp, (1, 0, 2)).reshape(out_c, _TAPS * _CPAD)  # (O,200)


# ----------------------------------------------------------------------------
# Wrapper: layout prep (tiny, one-time XLA ops) + single pallas_call.
# ----------------------------------------------------------------------------
def simple_cnn_forward(x_nchw, p):
    """Exact SimpleCNN.forward semantics; output (B, 10) float32."""
    batch = x_nchw.shape[0]
    n1 = batch * _H0 * _W0
    n2 = batch * _G1 * _G1

    # Lane-dense (channels, batch*H*W) input, zero-padded to 8 channels.
    x2 = jnp.transpose(x_nchw, (1, 0, 2, 3)).reshape(_CIN, n1)
    x2 = jnp.zeros((_CPAD, n1), jnp.float32).at[:_CIN].set(x2)

    # Tap-stacked conv weights (conv1 output channels padded 6 -> 8).
    w1 = _stacked_conv_weights(p["conv1_w"], _CIN)                     # (6, 200)
    w1 = jnp.zeros((_CPAD, _TAPS * _CPAD), jnp.float32).at[:_C1].set(w1)
    b1 = jnp.zeros((_CPAD, 1), jnp.float32).at[:_C1, 0].set(p["conv1_b"])
    w2 = _stacked_conv_weights(p["conv2_w"], _C1)                      # (16, 200)
    b2 = p["conv2_b"].reshape(_C2, 1)

    fc1w, fc2w, fc3w = p["fc1_w"].T, p["fc2_w"].T, p["fc3_w"].T
    fc1b = p["fc1_b"].reshape(1, -1)
    fc2b = p["fc2_b"].reshape(1, -1)
    fc3b = p["fc3_b"].reshape(1, -1)
    out_dim = fc3w.shape[1]

    sel1 = jnp.asarray(_pool1_selection())       # (1024, 256), shared per image
    sel2 = jnp.asarray(_pool2_selection())       # (256, 400),  shared per image
    cmask = jnp.asarray(_channel_mask())         # (16, 400)
    esel = jnp.asarray(_batch_row_selector(batch))   # (B, B*16)

    vmem = pl.BlockSpec(memory_space=pltpu.MemorySpace.VMEM)
    return pl.pallas_call(
        _simple_cnn_kernel,
        out_shape=jax.ShapeDtypeStruct((batch, out_dim), jnp.float32),
        in_specs=[vmem] * 15,
        out_specs=vmem,
        scratch_shapes=[
            pltpu.VMEM((_TAPS * _CPAD, n1), jnp.float32),   # conv1 tap stack
            pltpu.VMEM((_TAPS * _CPAD, n2), jnp.float32),   # conv2 tap stack
        ],
    )(x2, w1, b1, w2, b2, sel1, sel2, cmask, esel,
      fc1w, fc1b, fc2w, fc2b, fc3w, fc3b)


# ----------------------------------------------------------------------------
# Pure-JAX reference (correctness check only; HIGHEST precision for f32 math)
# ----------------------------------------------------------------------------
def reference_forward(x_nchw, p):
    dn = ("NCHW", "OIHW", "NCHW")
    hi = lax.Precision.HIGHEST
    y = lax.conv_general_dilated(x_nchw, p["conv1_w"], (1, 1), "VALID",
                                 dimension_numbers=dn, precision=hi)
    y = jnp.maximum(y + p["conv1_b"][None, :, None, None], 0.0)
    y = lax.reduce_window(y, -jnp.inf, lax.max, (1, 1, 2, 2), (1, 1, 2, 2),
                          "VALID")
    y = lax.conv_general_dilated(y, p["conv2_w"], (1, 1), "VALID",
                                 dimension_numbers=dn, precision=hi)
    y = jnp.maximum(y + p["conv2_b"][None, :, None, None], 0.0)
    y = lax.reduce_window(y, -jnp.inf, lax.max, (1, 1, 2, 2), (1, 1, 2, 2),
                          "VALID")
    y = y.reshape(y.shape[0], -1)
    y = jnp.maximum(jnp.dot(y, p["fc1_w"].T, precision=hi) + p["fc1_b"], 0.0)
    y = jnp.maximum(jnp.dot(y, p["fc2_w"].T, precision=hi) + p["fc2_b"], 0.0)
    return jnp.dot(y, p["fc3_w"].T, precision=hi) + p["fc3_b"]


# ----------------------------------------------------------------------------
# Deterministic parameter init (PyTorch parameter shapes)
# ----------------------------------------------------------------------------
def init_params(key, output_dim=10):
    ks = jax.random.split(key, 10)
    s = 0.1
    return {
        "conv1_w": s * jax.random.normal(ks[0], (6, 3, 5, 5), jnp.float32),
        "conv1_b": s * jax.random.normal(ks[1], (6,), jnp.float32),
        "conv2_w": s * jax.random.normal(ks[2], (16, 6, 5, 5), jnp.float32),
        "conv2_b": s * jax.random.normal(ks[3], (16,), jnp.float32),
        "fc1_w": s * jax.random.normal(ks[4], (120, 16 * 5 * 5), jnp.float32),
        "fc1_b": s * jax.random.normal(ks[5], (120,), jnp.float32),
        "fc2_w": s * jax.random.normal(ks[6], (84, 120), jnp.float32),
        "fc2_b": s * jax.random.normal(ks[7], (84,), jnp.float32),
        "fc3_w": s * jax.random.normal(ks[8], (output_dim, 84), jnp.float32),
        "fc3_b": s * jax.random.normal(ks[9], (output_dim,), jnp.float32),
    }


if __name__ == "__main__":
    key = jax.random.PRNGKey(0)
    k_x, k_p = jax.random.split(key)
    # SimpleCNN implies 32x32 inputs (flatten_dim = 16*5*5); small batch=2.
    x = jax.random.normal(k_x, (2, 3, 32, 32), jnp.float32)   # NCHW like PyTorch
    params = init_params(k_p, output_dim=10)

    out = jax.block_until_ready(jax.jit(simple_cnn_forward)(x, params))
    ref = jax.block_until_ready(jax.jit(reference_forward)(x, params))

    assert out.shape == (2, 10), out.shape
    assert jnp.allclose(out, ref, atol=1e-4, rtol=1e-4), (
        f"max abs err = {jnp.max(jnp.abs(out - ref))}")
    print("KERNEL_OK")
</pallas_src>

<mosaic_0001>
module attributes {stable_mosaic.version = 11 : i64} {
  func.func @_simple_cnn_kernel(%arg0: memref<8x2048xf32, #tpu.memory_space<vmem>>, %arg1: memref<8x200xf32, #tpu.memory_space<vmem>>, %arg2: memref<8x1xf32, #tpu.memory_space<vmem>>, %arg3: memref<16x200xf32, #tpu.memory_space<vmem>>, %arg4: memref<16x1xf32, #tpu.memory_space<vmem>>, %arg5: memref<1024x256xf32, #tpu.memory_space<vmem>>, %arg6: memref<256x400xf32, #tpu.memory_space<vmem>>, %arg7: memref<16x400xf32, #tpu.memory_space<vmem>>, %arg8: memref<2x32xf32, #tpu.memory_space<vmem>>, %arg9: memref<400x120xf32, #tpu.memory_space<vmem>>, %arg10: memref<1x120xf32, #tpu.memory_space<vmem>>, %arg11: memref<120x84xf32, #tpu.memory_space<vmem>>, %arg12: memref<1x84xf32, #tpu.memory_space<vmem>>, %arg13: memref<84x10xf32, #tpu.memory_space<vmem>>, %arg14: memref<1x10xf32, #tpu.memory_space<vmem>>, %arg15: memref<2x10xf32, #tpu.memory_space<vmem>>, %arg16: memref<200x2048xf32, #tpu.memory_space<vmem>>, %arg17: memref<200x512xf32, #tpu.memory_space<vmem>>) attributes {dimension_semantics = [], scalar_prefetch = 0 : i64, scratch_operands = 2 : i64, tpu.core_type = #tpu.core_type<tc>} {
    %c0 = arith.constant 0 : index
    %c0_0 = arith.constant 0 : index
    %0 = vector.load %arg0[%c0, %c0_0] : memref<8x2048xf32, #tpu.memory_space<vmem>>, vector<8x2048xf32>
    %c0_1 = arith.constant 0 : index
    %c0_2 = arith.constant 0 : index
    %1 = vector.load %arg16[%c0_1, %c0_2] : memref<200x2048xf32, #tpu.memory_space<vmem>>, vector<8x2048xf32>
    tpu.vector_store %arg16[%c0_1, %c0_2], %0 {strides = array<i32>} : memref<200x2048xf32, #tpu.memory_space<vmem>>, vector<8x2048xf32>,
    %c2047_i32 = arith.constant 2047 : i32
    %2 = tpu.dynamic_rotate %0 by %c2047_i32 dim 1 : vector<8x2048xf32>, i32 -> vector<8x2048xf32>
    %c8 = arith.constant 8 : index
    %c0_3 = arith.constant 0 : index
    %3 = vector.load %arg16[%c8, %c0_3] : memref<200x2048xf32, #tpu.memory_space<vmem>>, vector<8x2048xf32>
    tpu.vector_store %arg16[%c8, %c0_3], %2 {strides = array<i32>} : memref<200x2048xf32, #tpu.memory_space<vmem>>, vector<8x2048xf32>,
    %c2046_i32 = arith.constant 2046 : i32
    %4 = tpu.dynamic_rotate %0 by %c2046_i32 dim 1 : vector<8x2048xf32>, i32 -> vector<8x2048xf32>
    %c16 = arith.constant 16 : index
    %c0_4 = arith.constant 0 : index
    %5 = vector.load %arg16[%c16, %c0_4] : memref<200x2048xf32, #tpu.memory_space<vmem>>, vector<8x2048xf32>
    tpu.vector_store %arg16[%c16, %c0_4], %4 {strides = array<i32>} : memref<200x2048xf32, #tpu.memory_space<vmem>>, vector<8x2048xf32>,
    %c2045_i32 = arith.constant 2045 : i32
    %6 = tpu.dynamic_rotate %0 by %c2045_i32 dim 1 : vector<8x2048xf32>, i32 -> vector<8x2048xf32>
    %c24 = arith.constant 24 : index
    %c0_5 = arith.constant 0 : index
    %7 = vector.load %arg16[%c24, %c0_5] : memref<200x2048xf32, #tpu.memory_space<vmem>>, vector<8x2048xf32>
    tpu.vector_store %arg16[%c24, %c0_5], %6 {strides = array<i32>} : memref<200x2048xf32, #tpu.memory_space<vmem>>, vector<8x2048xf32>,
    %c2044_i32 = arith.constant 2044 : i32
    %8 = tpu.dynamic_rotate %0 by %c2044_i32 dim 1 : vector<8x2048xf32>, i32 -> vector<8x2048xf32>
    %c32 = arith.constant 32 : index
    %c0_6 = arith.constant 0 : index
    %9 = vector.load %arg16[%c32, %c0_6] : memref<200x2048xf32, #tpu.memory_space<vmem>>, vector<8x2048xf32>
    tpu.vector_store %arg16[%c32, %c0_6], %8 {strides = array<i32>} : memref<200x2048xf32, #tpu.memory_space<vmem>>, vector<8x2048xf32>,
    %c2016_i32 = arith.constant 2016 : i32
    %10 = tpu.dynamic_rotate %0 by %c2016_i32 dim 1 : vector<8x2048xf32>, i32 -> vector<8x2048xf32>
    %c40 = arith.constant 40 : index
    %c0_7 = arith.constant 0 : index
    %11 = vector.load %arg16[%c40, %c0_7] : memref<200x2048xf32, #tpu.memory_space<vmem>>, vector<8x2048xf32>
    tpu.vector_store %arg16[%c40, %c0_7], %10 {strides = array<i32>} : memref<200x2048xf32, #tpu.memory_space<vmem>>, vector<8x2048xf32>,
    %c2015_i32 = arith.constant 2015 : i32
    %12 = tpu.dynamic_rotate %0 by %c2015_i32 dim 1 : vector<8x2048xf32>, i32 -> vector<8x2048xf32>
    %c48 = arith.constant 48 : index
    %c0_8 = arith.constant 0 : index
    %13 = vector.load %arg16[%c48, %c0_8] : memref<200x2048xf32, #tpu.memory_space<vmem>>, vector<8x2048xf32>
    tpu.vector_store %arg16[%c48, %c0_8], %12 {strides = array<i32>} : memref<200x2048xf32, #tpu.memory_space<vmem>>, vector<8x2048xf32>,
    %c2014_i32 = arith.constant 2014 : i32
    %14 = tpu.dynamic_rotate %0 by %c2014_i32 dim 1 : vector<8x2048xf32>, i32 -> vector<8x2048xf32>
    %c56 = arith.constant 56 : index
    %c0_9 = arith.constant 0 : index
    %15 = vector.load %arg16[%c56, %c0_9] : memref<200x2048xf32, #tpu.memory_space<vmem>>, vector<8x2048xf32>
    tpu.vector_store %arg16[%c56, %c0_9], %14 {strides = array<i32>} : memref<200x2048xf32, #tpu.memory_space<vmem>>, vector<8x2048xf32>,
    %c2013_i32 = arith.constant 2013 : i32
    %16 = tpu.dynamic_rotate %0 by %c2013_i32 dim 1 : vector<8x2048xf32>, i32 -> vector<8x2048xf32>
    %c64 = arith.constant 64 : index
    %c0_10 = arith.constant 0 : index
    %17 = vector.load %arg16[%c64, %c0_10] : memref<200x2048xf32, #tpu.memory_space<vmem>>, vector<8x2048xf32>
    tpu.vector_store %arg16[%c64, %c0_10], %16 {strides = array<i32>} : memref<200x2048xf32, #tpu.memory_space<vmem>>, vector<8x2048xf32>,
    %c2012_i32 = arith.constant 2012 : i32
    %18 = tpu.dynamic_rotate %0 by %c2012_i32 dim 1 : vector<8x2048xf32>, i32 -> vector<8x2048xf32>
    %c72 = arith.constant 72 : index
    %c0_11 = arith.constant 0 : index
    %19 = vector.load %arg16[%c72, %c0_11] : memref<200x2048xf32, #tpu.memory_space<vmem>>, vector<8x2048xf32>
    tpu.vector_store %arg16[%c72, %c0_11], %18 {strides = array<i32>} : memref<200x2048xf32, #tpu.memory_space<vmem>>, vector<8x2048xf32>,
    %c1984_i32 = arith.constant 1984 : i32
    %20 = tpu.dynamic_rotate %0 by %c1984_i32 dim 1 : vector<8x2048xf32>, i32 -> vector<8x2048xf32>
    %c80 = arith.constant 80 : index
    %c0_12 = arith.constant 0 : index
    %21 = vector.load %arg16[%c80, %c0_12] : memref<200x2048xf32, #tpu.memory_space<vmem>>, vector<8x2048xf32>
    tpu.vector_store %arg16[%c80, %c0_12], %20 {strides = array<i32>} : memref<200x2048xf32, #tpu.memory_space<vmem>>, vector<8x2048xf32>,
    %c1983_i32 = arith.constant 1983 : i32
    %22 = tpu.dynamic_rotate %0 by %c1983_i32 dim 1 : vector<8x2048xf32>, i32 -> vector<8x2048xf32>
    %c88 = arith.constant 88 : index
    %c0_13 = arith.constant 0 : index
    %23 = vector.load %arg16[%c88, %c0_13] : memref<200x2048xf32, #tpu.memory_space<vmem>>, vector<8x2048xf32>
    tpu.vector_store %arg16[%c88, %c0_13], %22 {strides = array<i32>} : memref<200x2048xf32, #tpu.memory_space<vmem>>, vector<8x2048xf32>,
    %c1982_i32 = arith.constant 1982 : i32
    %24 = tpu.dynamic_rotate %0 by %c1982_i32 dim 1 : vector<8x2048xf32>, i32 -> vector<8x2048xf32>
    %c96 = arith.constant 96 : index
    %c0_14 = arith.constant 0 : index
    %25 = vector.load %arg16[%c96, %c0_14] : memref<200x2048xf32, #tpu.memory_space<vmem>>, vector<8x2048xf32>
    tpu.vector_store %arg16[%c96, %c0_14], %24 {strides = array<i32>} : memref<200x2048xf32, #tpu.memory_space<vmem>>, vector<8x2048xf32>,
    %c1981_i32 = arith.constant 1981 : i32
    %26 = tpu.dynamic_rotate %0 by %c1981_i32 dim 1 : vector<8x2048xf32>, i32 -> vector<8x2048xf32>
    %c104 = arith.constant 104 : index
    %c0_15 = arith.constant 0 : index
    %27 = vector.load %arg16[%c104, %c0_15] : memref<200x2048xf32, #tpu.memory_space<vmem>>, vector<8x2048xf32>
    tpu.vector_store %arg16[%c104, %c0_15], %26 {strides = array<i32>} : memref<200x2048xf32, #tpu.memory_space<vmem>>, vector<8x2048xf32>,
    %c1980_i32 = arith.constant 1980 : i32
    %28 = tpu.dynamic_rotate %0 by %c1980_i32 dim 1 : vector<8x2048xf32>, i32 -> vector<8x2048xf32>
    %c112 = arith.constant 112 : index
    %c0_16 = arith.constant 0 : index
    %29 = vector.load %arg16[%c112, %c0_16] : memref<200x2048xf32, #tpu.memory_space<vmem>>, vector<8x2048xf32>
    tpu.vector_store %arg16[%c112, %c0_16], %28 {strides = array<i32>} : memref<200x2048xf32, #tpu.memory_space<vmem>>, vector<8x2048xf32>,
    %c1952_i32 = arith.constant 1952 : i32
    %30 = tpu.dynamic_rotate %0 by %c1952_i32 dim 1 : vector<8x2048xf32>, i32 -> vector<8x2048xf32>
    %c120 = arith.constant 120 : index
    %c0_17 = arith.constant 0 : index
    %31 = vector.load %arg16[%c120, %c0_17] : memref<200x2048xf32, #tpu.memory_space<vmem>>, vector<8x2048xf32>
    tpu.vector_store %arg16[%c120, %c0_17], %30 {strides = array<i32>} : memref<200x2048xf32, #tpu.memory_space<vmem>>, vector<8x2048xf32>,
    %c1951_i32 = arith.constant 1951 : i32
    %32 = tpu.dynamic_rotate %0 by %c1951_i32 dim 1 : vector<8x2048xf32>, i32 -> vector<8x2048xf32>
    %c128 = arith.constant 128 : index
    %c0_18 = arith.constant 0 : index
    %33 = vector.load %arg16[%c128, %c0_18] : memref<200x2048xf32, #tpu.memory_space<vmem>>, vector<8x2048xf32>
    tpu.vector_store %arg16[%c128, %c0_18], %32 {strides = array<i32>} : memref<200x2048xf32, #tpu.memory_space<vmem>>, vector<8x2048xf32>,
    %c1950_i32 = arith.constant 1950 : i32
    %34 = tpu.dynamic_rotate %0 by %c1950_i32 dim 1 : vector<8x2048xf32>, i32 -> vector<8x2048xf32>
    %c136 = arith.constant 136 : index
    %c0_19 = arith.constant 0 : index
    %35 = vector.load %arg16[%c136, %c0_19] : memref<200x2048xf32, #tpu.memory_space<vmem>>, vector<8x2048xf32>
    tpu.vector_store %arg16[%c136, %c0_19], %34 {strides = array<i32>} : memref<200x2048xf32, #tpu.memory_space<vmem>>, vector<8x2048xf32>,
    %c1949_i32 = arith.constant 1949 : i32
    %36 = tpu.dynamic_rotate %0 by %c1949_i32 dim 1 : vector<8x2048xf32>, i32 -> vector<8x2048xf32>
    %c144 = arith.constant 144 : index
    %c0_20 = arith.constant 0 : index
    %37 = vector.load %arg16[%c144, %c0_20] : memref<200x2048xf32, #tpu.memory_space<vmem>>, vector<8x2048xf32>
    tpu.vector_store %arg16[%c144, %c0_20], %36 {strides = array<i32>} : memref<200x2048xf32, #tpu.memory_space<vmem>>, vector<8x2048xf32>,
    %c1948_i32 = arith.constant 1948 : i32
    %38 = tpu.dynamic_rotate %0 by %c1948_i32 dim 1 : vector<8x2048xf32>, i32 -> vector<8x2048xf32>
    %c152 = arith.constant 152 : index
    %c0_21 = arith.constant 0 : index
    %39 = vector.load %arg16[%c152, %c0_21] : memref<200x2048xf32, #tpu.memory_space<vmem>>, vector<8x2048xf32>
    tpu.vector_store %arg16[%c152, %c0_21], %38 {strides = array<i32>} : memref<200x2048xf32, #tpu.memory_space<vmem>>, vector<8x2048xf32>,
    %c1920_i32 = arith.constant 1920 : i32
    %40 = tpu.dynamic_rotate %0 by %c1920_i32 dim 1 : vector<8x2048xf32>, i32 -> vector<8x2048xf32>
    %c160 = arith.constant 160 : index
    %c0_22 = arith.constant 0 : index
    %41 = vector.load %arg16[%c160, %c0_22] : memref<200x2048xf32, #tpu.memory_space<vmem>>, vector<8x2048xf32>
    tpu.vector_store %arg16[%c160, %c0_22], %40 {strides = array<i32>} : memref<200x2048xf32, #tpu.memory_space<vmem>>, vector<8x2048xf32>,
    %c1919_i32 = arith.constant 1919 : i32
    %42 = tpu.dynamic_rotate %0 by %c1919_i32 dim 1 : vector<8x2048xf32>, i32 -> vector<8x2048xf32>
    %c168 = arith.constant 168 : index
    %c0_23 = arith.constant 0 : index
    %43 = vector.load %arg16[%c168, %c0_23] : memref<200x2048xf32, #tpu.memory_space<vmem>>, vector<8x2048xf32>
    tpu.vector_store %arg16[%c168, %c0_23], %42 {strides = array<i32>} : memref<200x2048xf32, #tpu.memory_space<vmem>>, vector<8x2048xf32>,
    %c1918_i32 = arith.constant 1918 : i32
    %44 = tpu.dynamic_rotate %0 by %c1918_i32 dim 1 : vector<8x2048xf32>, i32 -> vector<8x2048xf32>
    %c176 = arith.constant 176 : index
    %c0_24 = arith.constant 0 : index
    %45 = vector.load %arg16[%c176, %c0_24] : memref<200x2048xf32, #tpu.memory_space<vmem>>, vector<8x2048xf32>
    tpu.vector_store %arg16[%c176, %c0_24], %44 {strides = array<i32>} : memref<200x2048xf32, #tpu.memory_space<vmem>>, vector<8x2048xf32>,
    %c1917_i32 = arith.constant 1917 : i32
    %46 = tpu.dynamic_rotate %0 by %c1917_i32 dim 1 : vector<8x2048xf32>, i32 -> vector<8x2048xf32>
    %c184 = arith.constant 184 : index
    %c0_25 = arith.constant 0 : index
    %47 = vector.load %arg16[%c184, %c0_25] : memref<200x2048xf32, #tpu.memory_space<vmem>>, vector<8x2048xf32>
    tpu.vector_store %arg16[%c184, %c0_25], %46 {strides = array<i32>} : memref<200x2048xf32, #tpu.memory_space<vmem>>, vector<8x2048xf32>,
    %c1916_i32 = arith.constant 1916 : i32
    %48 = tpu.dynamic_rotate %0 by %c1916_i32 dim 1 : vector<8x2048xf32>, i32 -> vector<8x2048xf32>
    %c192 = arith.constant 192 : index
    %c0_26 = arith.constant 0 : index
    %49 = vector.load %arg16[%c192, %c0_26] : memref<200x2048xf32, #tpu.memory_space<vmem>>, vector<8x2048xf32>
    tpu.vector_store %arg16[%c192, %c0_26], %48 {strides = array<i32>} : memref<200x2048xf32, #tpu.memory_space<vmem>>, vector<8x2048xf32>,
    %c0_27 = arith.constant 0 : index
    %c0_28 = arith.constant 0 : index
    %50 = vector.load %arg1[%c0_27, %c0_28] : memref<8x200xf32, #tpu.memory_space<vmem>>, vector<8x200xf32>
    %c0_29 = arith.constant 0 : index
    %c0_30 = arith.constant 0 : index
    %51 = vector.load %arg16[%c0_29, %c0_30] : memref<200x2048xf32, #tpu.memory_space<vmem>>, vector<200x2048xf32>
    %cst = arith.constant dense<0.000000e+00> : vector<8x2048xf32>
    %52 = tpu.matmul %50, %51, %cst {dimension_numbers = #tpu.dot_dimension_numbers<[1], [0], [0], [1], [0, 0, 1, 1], [], []>} : vector<8x200xf32>, vector<200x2048xf32>, vector<8x2048xf32> -> vector<8x2048xf32>
    %c0_31 = arith.constant 0 : index
    %c0_32 = arith.constant 0 : index
    %53 = vector.load %arg2[%c0_31, %c0_32] : memref<8x1xf32, #tpu.memory_space<vmem>>, vector<8x1xf32>
    %54 = vector.broadcast %53 : vector<8x1xf32> to vector<8x2048xf32>
    %55 = arith.addf %52, %54 : vector<8x2048xf32>
    %cst_33 = arith.constant 0.000000e+00 : f32
    %56 = vector.broadcast %cst_33 : f32 to vector<8x2048xf32>
    %57 = arith.maximumf %55, %56 : vector<8x2048xf32>
    %c2047_i32_34 = arith.constant 2047 : i32
    %58 = tpu.dynamic_rotate %57 by %c2047_i32_34 dim 1 : vector<8x2048xf32>, i32 -> vector<8x2048xf32>
    %59 = arith.maximumf %57, %58 : vector<8x2048xf32>
    %c2016_i32_35 = arith.constant 2016 : i32
    %60 = tpu.dynamic_rotate %57 by %c2016_i32_35 dim 1 : vector<8x2048xf32>, i32 -> vector<8x2048xf32>
    %c2015_i32_36 = arith.constant 2015 : i32
    %61 = tpu.dynamic_rotate %57 by %c2015_i32_36 dim 1 : vector<8x2048xf32>, i32 -> vector<8x2048xf32>
    %62 = arith.maximumf %60, %61 : vector<8x2048xf32>
    %63 = arith.maximumf %59, %62 : vector<8x2048xf32>
    %64 = vector.extract_strided_slice %63 {offsets = [0, 0], sizes = [8, 1024], strides = [1, 1]} : vector<8x2048xf32> to vector<8x1024xf32>
    %c0_37 = arith.constant 0 : index
    %c0_38 = arith.constant 0 : index
    %65 = vector.load %arg5[%c0_37, %c0_38] : memref<1024x256xf32, #tpu.memory_space<vmem>>, vector<1024x256xf32>
    %cst_39 = arith.constant dense<0.000000e+00> : vector<8x256xf32>
    %66 = tpu.matmul %64, %65, %cst_39 {dimension_numbers = #tpu.dot_dimension_numbers<[1], [0], [0], [1], [0, 0, 1, 1], [], []>} : vector<8x1024xf32>, vector<1024x256xf32>, vector<8x256xf32> -> vector<8x256xf32>
    %67 = vector.extract_strided_slice %63 {offsets = [0, 1024], sizes = [8, 1024], strides = [1, 1]} : vector<8x2048xf32> to vector<8x1024xf32>
    %c0_40 = arith.constant 0 : index
    %c0_41 = arith.constant 0 : index
    %68 = vector.load %arg5[%c0_40, %c0_41] : memref<1024x256xf32, #tpu.memory_space<vmem>>, vector<1024x256xf32>
    %cst_42 = arith.constant dense<0.000000e+00> : vector<8x256xf32>
    %69 = tpu.matmul %67, %68, %cst_42 {dimension_numbers = #tpu.dot_dimension_numbers<[1], [0], [0], [1], [0, 0, 1, 1], [], []>} : vector<8x1024xf32>, vector<1024x256xf32>, vector<8x256xf32> -> vector<8x256xf32>
    %70 = tpu.concatenate %66, %69 in 1 : vector<8x256xf32>, vector<8x256xf32> -> vector<8x512xf32>
    %c0_43 = arith.constant 0 : index
    %c0_44 = arith.constant 0 : index
    %71 = vector.load %arg17[%c0_43, %c0_44] : memref<200x512xf32, #tpu.memory_space<vmem>>, vector<8x512xf32>
    tpu.vector_store %arg17[%c0_43, %c0_44], %70 {strides = array<i32>} : memref<200x512xf32, #tpu.memory_space<vmem>>, vector<8x512xf32>,
    %c511_i32 = arith.constant 511 : i32
    %72 = tpu.dynamic_rotate %70 by %c511_i32 dim 1 : vector<8x512xf32>, i32 -> vector<8x512xf32>
    %c8_45 = arith.constant 8 : index
    %c0_46 = arith.constant 0 : index
    %73 = vector.load %arg17[%c8_45, %c0_46] : memref<200x512xf32, #tpu.memory_space<vmem>>, vector<8x512xf32>
    tpu.vector_store %arg17[%c8_45, %c0_46], %72 {strides = array<i32>} : memref<200x512xf32, #tpu.memory_space<vmem>>, vector<8x512xf32>,
    %c510_i32 = arith.constant 510 : i32
    %74 = tpu.dynamic_rotate %70 by %c510_i32 dim 1 : vector<8x512xf32>, i32 -> vector<8x512xf32>
    %c16_47 = arith.constant 16 : index
    %c0_48 = arith.constant 0 : index
    %75 = vector.load %arg17[%c16_47, %c0_48] : memref<200x512xf32, #tpu.memory_space<vmem>>, vector<8x512xf32>
    tpu.vector_store %arg17[%c16_47, %c0_48], %74 {strides = array<i32>} : memref<200x512xf32, #tpu.memory_space<vmem>>, vector<8x512xf32>,
    %c509_i32 = arith.constant 509 : i32
    %76 = tpu.dynamic_rotate %70 by %c509_i32 dim 1 : vector<8x512xf32>, i32 -> vector<8x512xf32>
    %c24_49 = arith.constant 24 : index
    %c0_50 = arith.constant 0 : index
    %77 = vector.load %arg17[%c24_49, %c0_50] : memref<200x512xf32, #tpu.memory_space<vmem>>, vector<8x512xf32>
    tpu.vector_store %arg17[%c24_49, %c0_50], %76 {strides = array<i32>} : memref<200x512xf32, #tpu.memory_space<vmem>>, vector<8x512xf32>,
    %c508_i32 = arith.constant 508 : i32
    %78 = tpu.dynamic_rotate %70 by %c508_i32 dim 1 : vector<8x512xf32>, i32 -> vector<8x512xf32>
    %c32_51 = arith.constant 32 : index
    %c0_52 = arith.constant 0 : index
    %79 = vector.load %arg17[%c32_51, %c0_52] : memref<200x512xf32, #tpu.memory_space<vmem>>, vector<8x512xf32>
    tpu.vector_store %arg17[%c32_51, %c0_52], %78 {strides = array<i32>} : memref<200x512xf32, #tpu.memory_space<vmem>>, vector<8x512xf32>,
    %c496_i32 = arith.constant 496 : i32
    %80 = tpu.dynamic_rotate %70 by %c496_i32 dim 1 : vector<8x512xf32>, i32 -> vector<8x512xf32>
    %c40_53 = arith.constant 40 : index
    %c0_54 = arith.constant 0 : index
    %81 = vector.load %arg17[%c40_53, %c0_54] : memref<200x512xf32, #tpu.memory_space<vmem>>, vector<8x512xf32>
    tpu.vector_store %arg17[%c40_53, %c0_54], %80 {strides = array<i32>} : memref<200x512xf32, #tpu.memory_space<vmem>>, vector<8x512xf32>,
    %c495_i32 = arith.constant 495 : i32
    %82 = tpu.dynamic_rotate %70 by %c495_i32 dim 1 : vector<8x512xf32>, i32 -> vector<8x512xf32>
    %c48_55 = arith.constant 48 : index
    %c0_56 = arith.constant 0 : index
    %83 = vector.load %arg17[%c48_55, %c0_56] : memref<200x512xf32, #tpu.memory_space<vmem>>, vector<8x512xf32>
    tpu.vector_store %arg17[%c48_55, %c0_56], %82 {strides = array<i32>} : memref<200x512xf32, #tpu.memory_space<vmem>>, vector<8x512xf32>,
    %c494_i32 = arith.constant 494 : i32
    %84 = tpu.dynamic_rotate %70 by %c494_i32 dim 1 : vector<8x512xf32>, i32 -> vector<8x512xf32>
    %c56_57 = arith.constant 56 : index
    %c0_58 = arith.constant 0 : index
    %85 = vector.load %arg17[%c56_57, %c0_58] : memref<200x512xf32, #tpu.memory_space<vmem>>, vector<8x512xf32>
    tpu.vector_store %arg17[%c56_57, %c0_58], %84 {strides = array<i32>} : memref<200x512xf32, #tpu.memory_space<vmem>>, vector<8x512xf32>,
    %c493_i32 = arith.constant 493 : i32
    %86 = tpu.dynamic_rotate %70 by %c493_i32 dim 1 : vector<8x512xf32>, i32 -> vector<8x512xf32>
    %c64_59 = arith.constant 64 : index
    %c0_60 = arith.constant 0 : index
    %87 = vector.load %arg17[%c64_59, %c0_60] : memref<200x512xf32, #tpu.memory_space<vmem>>, vector<8x512xf32>
    tpu.vector_store %arg17[%c64_59, %c0_60], %86 {strides = array<i32>} : memref<200x512xf32, #tpu.memory_space<vmem>>, vector<8x512xf32>,
    %c492_i32 = arith.constant 492 : i32
    %88 = tpu.dynamic_rotate %70 by %c492_i32 dim 1 : vector<8x512xf32>, i32 -> vector<8x512xf32>
    %c72_61 = arith.constant 72 : index
    %c0_62 = arith.constant 0 : index
    %89 = vector.load %arg17[%c72_61, %c0_62] : memref<200x512xf32, #tpu.memory_space<vmem>>, vector<8x512xf32>
    tpu.vector_store %arg17[%c72_61, %c0_62], %88 {strides = array<i32>} : memref<200x512xf32, #tpu.memory_space<vmem>>, vector<8x512xf32>,
    %c480_i32 = arith.constant 480 : i32
    %90 = tpu.dynamic_rotate %70 by %c480_i32 dim 1 : vector<8x512xf32>, i32 -> vector<8x512xf32>
    %c80_63 = arith.constant 80 : index
    %c0_64 = arith.constant 0 : index
    %91 = vector.load %arg17[%c80_63, %c0_64] : memref<200x512xf32, #tpu.memory_space<vmem>>, vector<8x512xf32>
    tpu.vector_store %arg17[%c80_63, %c0_64], %90 {strides = array<i32>} : memref<200x512xf32, #tpu.memory_space<vmem>>, vector<8x512xf32>,
    %c479_i32 = arith.constant 479 : i32
    %92 = tpu.dynamic_rotate %70 by %c479_i32 dim 1 : vector<8x512xf32>, i32 -> vector<8x512xf32>
    %c88_65 = arith.constant 88 : index
    %c0_66 = arith.constant 0 : index
    %93 = vector.load %arg17[%c88_65, %c0_66] : memref<200x512xf32, #tpu.memory_space<vmem>>, vector<8x512xf32>
    tpu.vector_store %arg17[%c88_65, %c0_66], %92 {strides = array<i32>} : memref<200x512xf32, #tpu.memory_space<vmem>>, vector<8x512xf32>,
    %c478_i32 = arith.constant 478 : i32
    %94 = tpu.dynamic_rotate %70 by %c478_i32 dim 1 : vector<8x512xf32>, i32 -> vector<8x512xf32>
    %c96_67 = arith.constant 96 : index
    %c0_68 = arith.constant 0 : index
    %95 = vector.load %arg17[%c96_67, %c0_68] : memref<200x512xf32, #tpu.memory_space<vmem>>, vector<8x512xf32>
    tpu.vector_store %arg17[%c96_67, %c0_68], %94 {strides = array<i32>} : memref<200x512xf32, #tpu.memory_space<vmem>>, vector<8x512xf32>,
    %c477_i32 = arith.constant 477 : i32
    %96 = tpu.dynamic_rotate %70 by %c477_i32 dim 1 : vector<8x512xf32>, i32 -> vector<8x512xf32>
    %c104_69 = arith.constant 104 : index
    %c0_70 = arith.constant 0 : index
    %97 = vector.load %arg17[%c104_69, %c0_70] : memref<200x512xf32, #tpu.memory_space<vmem>>, vector<8x512xf32>
    tpu.vector_store %arg17[%c104_69, %c0_70], %96 {strides = array<i32>} : memref<200x512xf32, #tpu.memory_space<vmem>>, vector<8x512xf32>,
    %c476_i32 = arith.constant 476 : i32
    %98 = tpu.dynamic_rotate %70 by %c476_i32 dim 1 : vector<8x512xf32>, i32 -> vector<8x512xf32>
    %c112_71 = arith.constant 112 : index
    %c0_72 = arith.constant 0 : index
    %99 = vector.load %arg17[%c112_71, %c0_72] : memref<200x512xf32, #tpu.memory_space<vmem>>, vector<8x512xf32>
    tpu.vector_store %arg17[%c112_71, %c0_72], %98 {strides = array<i32>} : memref<200x512xf32, #tpu.memory_space<vmem>>, vector<8x512xf32>,
    %c464_i32 = arith.constant 464 : i32
    %100 = tpu.dynamic_rotate %70 by %c464_i32 dim 1 : vector<8x512xf32>, i32 -> vector<8x512xf32>
    %c120_73 = arith.constant 120 : index
    %c0_74 = arith.constant 0 : index
    %101 = vector.load %arg17[%c120_73, %c0_74] : memref<200x512xf32, #tpu.memory_space<vmem>>, vector<8x512xf32>
    tpu.vector_store %arg17[%c120_73, %c0_74], %100 {strides = array<i32>} : memref<200x512xf32, #tpu.memory_space<vmem>>, vector<8x512xf32>,
    %c463_i32 = arith.constant 463 : i32
    %102 = tpu.dynamic_rotate %70 by %c463_i32 dim 1 : vector<8x512xf32>, i32 -> vector<8x512xf32>
    %c128_75 = arith.constant 128 : index
    %c0_76 = arith.constant 0 : index
    %103 = vector.load %arg17[%c128_75, %c0_76] : memref<200x512xf32, #tpu.memory_space<vmem>>, vector<8x512xf32>
    tpu.vector_store %arg17[%c128_75, %c0_76], %102 {strides = array<i32>} : memref<200x512xf32, #tpu.memory_space<vmem>>, vector<8x512xf32>,
    %c462_i32 = arith.constant 462 : i32
    %104 = tpu.dynamic_rotate %70 by %c462_i32 dim 1 : vector<8x512xf32>, i32 -> vector<8x512xf32>
    %c136_77 = arith.constant 136 : index
    %c0_78 = arith.constant 0 : index
    %105 = vector.load %arg17[%c136_77, %c0_78] : memref<200x512xf32, #tpu.memory_space<vmem>>, vector<8x512xf32>
    tpu.vector_store %arg17[%c136_77, %c0_78], %104 {strides = array<i32>} : memref<200x512xf32, #tpu.memory_space<vmem>>, vector<8x512xf32>,
    %c461_i32 = arith.constant 461 : i32
    %106 = tpu.dynamic_rotate %70 by %c461_i32 dim 1 : vector<8x512xf32>, i32 -> vector<8x512xf32>
    %c144_79 = arith.constant 144 : index
    %c0_80 = arith.constant 0 : index
    %107 = vector.load %arg17[%c144_79, %c0_80] : memref<200x512xf32, #tpu.memory_space<vmem>>, vector<8x512xf32>
    tpu.vector_store %arg17[%c144_79, %c0_80], %106 {strides = array<i32>} : memref<200x512xf32, #tpu.memory_space<vmem>>, vector<8x512xf32>,
    %c460_i32 = arith.constant 460 : i32
    %108 = tpu.dynamic_rotate %70 by %c460_i32 dim 1 : vector<8x512xf32>, i32 -> vector<8x512xf32>
    %c152_81 = arith.constant 152 : index
    %c0_82 = arith.constant 0 : index
    %109 = vector.load %arg17[%c152_81, %c0_82] : memref<200x512xf32, #tpu.memory_space<vmem>>, vector<8x512xf32>
    tpu.vector_store %arg17[%c152_81, %c0_82], %108 {strides = array<i32>} : memref<200x512xf32, #tpu.memory_space<vmem>>, vector<8x512xf32>,
    %c448_i32 = arith.constant 448 : i32
    %110 = tpu.dynamic_rotate %70 by %c448_i32 dim 1 : vector<8x512xf32>, i32 -> vector<8x512xf32>
    %c160_83 = arith.constant 160 : index
    %c0_84 = arith.constant 0 : index
    %111 = vector.load %arg17[%c160_83, %c0_84] : memref<200x512xf32, #tpu.memory_space<vmem>>, vector<8x512xf32>
    tpu.vector_store %arg17[%c160_83, %c0_84], %110 {strides = array<i32>} : memref<200x512xf32, #tpu.memory_space<vmem>>, vector<8x512xf32>,
    %c447_i32 = arith.constant 447 : i32
    %112 = tpu.dynamic_rotate %70 by %c447_i32 dim 1 : vector<8x512xf32>, i32 -> vector<8x512xf32>
    %c168_85 = arith.constant 168 : index
    %c0_86 = arith.constant 0 : index
    %113 = vector.load %arg17[%c168_85, %c0_86] : memref<200x512xf32, #tpu.memory_space<vmem>>, vector<8x512xf32>
    tpu.vector_store %arg17[%c168_85, %c0_86], %112 {strides = array<i32>} : memref<200x512xf32, #tpu.memory_space<vmem>>, vector<8x512xf32>,
    %c446_i32 = arith.constant 446 : i32
    %114 = tpu.dynamic_rotate %70 by %c446_i32 dim 1 : vector<8x512xf32>, i32 -> vector<8x512xf32>
    %c176_87 = arith.constant 176 : index
    %c0_88 = arith.constant 0 : index
    %115 = vector.load %arg17[%c176_87, %c0_88] : memref<200x512xf32, #tpu.memory_space<vmem>>, vector<8x512xf32>
    tpu.vector_store %arg17[%c176_87, %c0_88], %114 {strides = array<i32>} : memref<200x512xf32, #tpu.memory_space<vmem>>, vector<8x512xf32>,
    %c445_i32 = arith.constant 445 : i32
    %116 = tpu.dynamic_rotate %70 by %c445_i32 dim 1 : vector<8x512xf32>, i32 -> vector<8x512xf32>
    %c184_89 = arith.constant 184 : index
    %c0_90 = arith.constant 0 : index
    %117 = vector.load %arg17[%c184_89, %c0_90] : memref<200x512xf32, #tpu.memory_space<vmem>>, vector<8x512xf32>
    tpu.vector_store %arg17[%c184_89, %c0_90], %116 {strides = array<i32>} : memref<200x512xf32, #tpu.memory_space<vmem>>, vector<8x512xf32>,
    %c444_i32 = arith.constant 444 : i32
    %118 = tpu.dynamic_rotate %70 by %c444_i32 dim 1 : vector<8x512xf32>, i32 -> vector<8x512xf32>
    %c192_91 = arith.constant 192 : index
    %c0_92 = arith.constant 0 : index
    %119 = vector.load %arg17[%c192_91, %c0_92] : memref<200x512xf32, #tpu.memory_space<vmem>>, vector<8x512xf32>
    tpu.vector_store %arg17[%c192_91, %c0_92], %118 {strides = array<i32>} : memref<200x512xf32, #tpu.memory_space<vmem>>, vector<8x512xf32>,
    %c0_93 = arith.constant 0 : index
    %c0_94 = arith.constant 0 : index
    %120 = vector.load %arg3[%c0_93, %c0_94] : memref<16x200xf32, #tpu.memory_space<vmem>>, vector<16x200xf32>
    %c0_95 = arith.constant 0 : index
    %c0_96 = arith.constant 0 : index
    %121 = vector.load %arg17[%c0_95, %c0_96] : memref<200x512xf32, #tpu.memory_space<vmem>>, vector<200x512xf32>
    %cst_97 = arith.constant dense<0.000000e+00> : vector<16x512xf32>
    %122 = tpu.matmul %120, %121, %cst_97 {dimension_numbers = #tpu.dot_dimension_numbers<[1], [0], [0], [1], [0, 0, 1, 1], [], []>} : vector<16x200xf32>, vector<200x512xf32>, vector<16x512xf32> -> vector<16x512xf32>
    %c0_98 = arith.constant 0 : index
    %c0_99 = arith.constant 0 : index
    %123 = vector.load %arg4[%c0_98, %c0_99] : memref<16x1xf32, #tpu.memory_space<vmem>>, vector<16x1xf32>
    %124 = vector.broadcast %123 : vector<16x1xf32> to vector<16x512xf32>
    %125 = arith.addf %122, %124 : vector<16x512xf32>
    %cst_100 = arith.constant 0.000000e+00 : f32
    %126 = vector.broadcast %cst_100 : f32 to vector<16x512xf32>
    %127 = arith.maximumf %125, %126 : vector<16x512xf32>
    %c511_i32_101 = arith.constant 511 : i32
    %128 = tpu.dynamic_rotate %127 by %c511_i32_101 dim 1 : vector<16x512xf32>, i32 -> vector<16x512xf32>
    %129 = arith.maximumf %127, %128 : vector<16x512xf32>
    %c496_i32_102 = arith.constant 496 : i32
    %130 = tpu.dynamic_rotate %127 by %c496_i32_102 dim 1 : vector<16x512xf32>, i32 -> vector<16x512xf32>
    %c495_i32_103 = arith.constant 495 : i32
    %131 = tpu.dynamic_rotate %127 by %c495_i32_103 dim 1 : vector<16x512xf32>, i32 -> vector<16x512xf32>
    %132 = arith.maximumf %130, %131 : vector<16x512xf32>
    %133 = arith.maximumf %129, %132 : vector<16x512xf32>
    %c0_104 = arith.constant 0 : index
    %c0_105 = arith.constant 0 : index
    %134 = vector.load %arg7[%c0_104, %c0_105] : memref<16x400xf32, #tpu.memory_space<vmem>>, vector<16x400xf32>
    %135 = vector.extract_strided_slice %133 {offsets = [0, 0], sizes = [16, 256], strides = [1, 1]} : vector<16x512xf32> to vector<16x256xf32>
    %c0_106 = arith.constant 0 : index
    %c0_107 = arith.constant 0 : index
    %136 = vector.load %arg6[%c0_106, %c0_107] : memref<256x400xf32, #tpu.memory_space<vmem>>, vector<256x400xf32>
    %cst_108 = arith.constant dense<0.000000e+00> : vector<16x400xf32>
    %137 = tpu.matmul %135, %136, %cst_108 {dimension_numbers = #tpu.dot_dimension_numbers<[1], [0], [0], [1], [0, 0, 1, 1], [], []>} : vector<16x256xf32>, vector<256x400xf32>, vector<16x400xf32> -> vector<16x400xf32>
    %138 = arith.mulf %137, %134 : vector<16x400xf32>
    %139 = vector.extract_strided_slice %133 {offsets = [0, 256], sizes = [16, 256], strides = [1, 1]} : vector<16x512xf32> to vector<16x256xf32>
    %c0_109 = arith.constant 0 : index
    %c0_110 = arith.constant 0 : index
    %140 = vector.load %arg6[%c0_109, %c0_110] : memref<256x400xf32, #tpu.memory_space<vmem>>, vector<256x400xf32>
    %cst_111 = arith.constant dense<0.000000e+00> : vector<16x400xf32>
    %141 = tpu.matmul %139, %140, %cst_111 {dimension_numbers = #tpu.dot_dimension_numbers<[1], [0], [0], [1], [0, 0, 1, 1], [], []>} : vector<16x256xf32>, vector<256x400xf32>, vector<16x400xf32> -> vector<16x400xf32>
    %142 = arith.mulf %141, %134 : vector<16x400xf32>
    %143 = tpu.concatenate %138, %142 in 0 : vector<16x400xf32>, vector<16x400xf32> -> vector<32x400xf32>
    %c0_112 = arith.constant 0 : index
    %c0_113 = arith.constant 0 : index
    %144 = vector.load %arg8[%c0_112, %c0_113] : memref<2x32xf32, #tpu.memory_space<vmem>>, vector<2x32xf32>
    %cst_114 = arith.constant dense<0.000000e+00> : vector<2x400xf32>
    %145 = tpu.matmul %144, %143, %cst_114 {dimension_numbers = #tpu.dot_dimension_numbers<[1], [0], [0], [1], [0, 0, 1, 1], [], []>} : vector<2x32xf32>, vector<32x400xf32>, vector<2x400xf32> -> vector<2x400xf32>
    %c0_115 = arith.constant 0 : index
    %c0_116 = arith.constant 0 : index
    %146 = vector.load %arg9[%c0_115, %c0_116] : memref<400x120xf32, #tpu.memory_space<vmem>>, vector<400x120xf32>
    %cst_117 = arith.constant dense<0.000000e+00> : vector<2x120xf32>
    %147 = tpu.matmul %145, %146, %cst_117 {dimension_numbers = #tpu.dot_dimension_numbers<[1], [0], [0], [1], [0, 0, 1, 1], [], []>} : vector<2x400xf32>, vector<400x120xf32>, vector<2x120xf32> -> vector<2x120xf32>
    %c0_118 = arith.constant 0 : index
    %c0_119 = arith.constant 0 : index
    %148 = vector.load %arg10[%c0_118, %c0_119] : memref<1x120xf32, #tpu.memory_space<vmem>>, vector<1x120xf32>
    %149 = vector.broadcast %148 : vector<1x120xf32> to vector<2x120xf32>
    %150 = arith.addf %147, %149 : vector<2x120xf32>
    %cst_120 = arith.constant 0.000000e+00 : f32
    %151 = vector.broadcast %cst_120 : f32 to vector<2x120xf32>
    %152 = arith.maximumf %150, %151 : vector<2x120xf32>
    %c0_121 = arith.constant 0 : index
    %c0_122 = arith.constant 0 : index
    %153 = vector.load %arg11[%c0_121, %c0_122] : memref<120x84xf32, #tpu.memory_space<vmem>>, vector<120x84xf32>
    %cst_123 = arith.constant dense<0.000000e+00> : vector<2x84xf32>
    %154 = tpu.matmul %152, %153, %cst_123 {dimension_numbers = #tpu.dot_dimension_numbers<[1], [0], [0], [1], [0, 0, 1, 1], [], []>} : vector<2x120xf32>, vector<120x84xf32>, vector<2x84xf32> -> vector<2x84xf32>
    %c0_124 = arith.constant 0 : index
    %c0_125 = arith.constant 0 : index
    %155 = vector.load %arg12[%c0_124, %c0_125] : memref<1x84xf32, #tpu.memory_space<vmem>>, vector<1x84xf32>
    %156 = vector.broadcast %155 : vector<1x84xf32> to vector<2x84xf32>
    %157 = arith.addf %154, %156 : vector<2x84xf32>
    %cst_126 = arith.constant 0.000000e+00 : f32
    %158 = vector.broadcast %cst_126 : f32 to vector<2x84xf32>
    %159 = arith.maximumf %157, %158 : vector<2x84xf32>
    %c0_127 = arith.constant 0 : index
    %c0_128 = arith.constant 0 : index
    %160 = vector.load %arg13[%c0_127, %c0_128] : memref<84x10xf32, #tpu.memory_space<vmem>>, vector<84x10xf32>
    %cst_129 = arith.constant dense<0.000000e+00> : vector<2x10xf32>
    %161 = tpu.matmul %159, %160, %cst_129 {dimension_numbers = #tpu.dot_dimension_numbers<[1], [0], [0], [1], [0, 0, 1, 1], [], []>} : vector<2x84xf32>, vector<84x10xf32>, vector<2x10xf32> -> vector<2x10xf32>
    %c0_130 = arith.constant 0 : index
    %c0_131 = arith.constant 0 : index
    %162 = vector.load %arg14[%c0_130, %c0_131] : memref<1x10xf32, #tpu.memory_space<vmem>>, vector<1x10xf32>
    %163 = vector.broadcast %162 : vector<1x10xf32> to vector<2x10xf32>
    %164 = arith.addf %161, %163 : vector<2x10xf32>
    %c0_132 = arith.constant 0 : index
    %c0_133 = arith.constant 0 : index
    %165 = vector.load %arg15[%c0_132, %c0_133] : memref<2x10xf32, #tpu.memory_space<vmem>>, vector<2x10xf32>
    tpu.vector_store %arg15[%c0_132, %c0_133], %164 {strides = array<i32>} : memref<2x10xf32, #tpu.memory_space<vmem>>, vector<2x10xf32>,
    return
  }
}

</mosaic_0001>

<bundles_post_ra>
// kernel: simple_cnn_forward.1
= control target key start
LH: loop header
LB: loop body
LE: loop exit
PB: predicated region body
PF: predicated region fallthrough
CT: control target
= control target key end

     0   :  { %s11445_s0 = inlined_call_operand.vmem [shape: f32[8,2048], index: 0, kind: input, shape index: {}]   ;;  %s11446_s1 = inlined_call_operand.vmem [shape: f32[8,200], index: 1, kind: input, shape index: {}]   ;;  %s11447_s2 = inlined_call_operand.vmem [shape: f32[8,1], index: 2, kind: input, shape index: {}]   ;;  %s11448_s3 = inlined_call_operand.vmem [shape: f32[16,200], index: 3, kind: input, shape index: {}]   ;;  %s11449_s4 = inlined_call_operand.vmem [shape: f32[16,1], index: 4, kind: input, shape index: {}]   ;;  %s11450_s5 = inlined_call_operand.vmem [shape: f32[1024,256], index: 5, kind: input, shape index: {}]   ;;  %s11451_s6 = inlined_call_operand.hbm [shape: f32[256,400], index: 6, kind: input, shape index: {}]   ;;  %s11452_s7 = inlined_call_operand.vmem [shape: f32[16,400], index: 7, kind: input, shape index: {}]   ;;  %s11453_s8 = inlined_call_operand.vmem [shape: f32[2,32], index: 8, kind: input, shape index: {}]   ;;  %s11454_s9 = inlined_call_operand.vmem [shape: f32[400,120], index: 9, kind: input, shape index: {}]   ;;  %s11455_s10 = inlined_call_operand.vmem [shape: f32[1,120], index: 10, kind: input, shape index: {}]   ;;  %s11456_s11 = inlined_call_operand.vmem [shape: f32[120,84], index: 11, kind: input, shape index: {}]   ;;  %s11457_s12 = inlined_call_operand.vmem [shape: f32[1,84], index: 12, kind: input, shape index: {}]   ;;  %s11458_s13 = inlined_call_operand.vmem [shape: f32[84,10], index: 13, kind: input, shape index: {}]   ;;  %s11459_s14 = inlined_call_operand.vmem [shape: f32[1,10], index: 14, kind: input, shape index: {}]   ;;  %s11460_s15 = inlined_call_operand.hbm [shape: f32[2,10], index: 15, kind: output, shape index: {}]  }
   0x1   :  { %11726 = sst [smem:[#allocation105_spill]] %s11454_s9 }
   0x2   :  { %11727 = sst [smem:[#allocation106_spill]] %s11455_s10 }
   0x3   :  { %11728 = sst [smem:[#allocation107_spill]] %s11456_s11 }
   0x4   :  { %11729 = sst [smem:[#allocation108_spill]] %s11457_s12 }
   0x5   :  { %11730 = sst [smem:[#allocation109_spill]] %s11458_s13 }
   0x6   :  { %11731 = sst [smem:[#allocation110_spill]] %s11459_s14 }
   0x7   :  { %11732 = sst [smem:[#allocation111_spill]] %s11460_s15 }
   0x8   :  { %20 = vsyncpa [#allocation5], 0 }
   0x9   :  { %21 = vsyncpa [#allocation6], 0  ;;  %s5742_s18 = smov [#allocation4]  }
   0xa   :  { %s39_s19 = sshll.u32 %s5742_s18, 4  ;;  %s40_s19 = int_to_ptr.vmem [resolvable:$true] %s39_s19 }
   0xb   :  { %s5706_s20 = scalar_lea.vmem %s40_s19, 16384  ;;  %p5711_p1 = scmp.lt.s32.totalorder %s40_s19, %s40_s19 }
   0xc   :  { %p5707_p0 = scmp.ne.s32.totalorder %s40_s19, %s5706_s20  ;;  %p5712_p2 = scmp.lt.s32.totalorder %s5706_s20, %s5706_s20 }
   0xe   :  { %p5713_p3 = por %p5712_p2, %p5711_p1 }
  0x10   :  { %p5714_p4 = pnand %p5713_p3, %p5707_p0 }
  0x12   :  { %5717 = shalt.err (!%p5714_p4)
}
  0x13   :  { %s5743_s21 = smov 512   ;;  %s11507_s22 = smov 32  }
  0x14   :  { %45 = dma.hbm_to_vmem [thread:$0]  %s11451_s6, 16384, %s40_s19, [#allocation5], %s5743_s21, %s5743_s21, %s11507_s22  }
  0x15   :  { %5738 = dma.done.wait [#allocation5], 16384  }
  0x16   :  { %5739 = vsyncadd [#allocation5], 4294950912  ;;  %v5864_v0 = vld [vmem:[%s11445_s0 + $0x8] sm:$0xff]  ;;  %v5869_v1 = vld [vmem:[%s11445_s0] sm:$0xff]  ;;  %s11505_s30 = smov 60   ;;  %s11503_s16 = smov 61   ;;  %v129_v4 = vlaneseq }
  0x17   :  { %1011 = vrot.lane.b32.xlu0 %v5864_v0, %s11507_s22  ;;  %1009 = vrot.lane.b32.xlu1 %v5869_v1, %s11507_s22  ;;  %v5878_v2 = vld [vmem:[%s11445_s0 + $0x10] sm:$0xff]  ;;  %s11501_s17 = smov 62   ;;  %s11497_s18 = smov 63   ;;  %v5967_v3 = vld [vmem:[%s11445_s0 + $0x18] sm:$0xff]  ;;  %vm1822_vm1 = vcmask 588800  }
  0x18   :  { %s11495_s19 = smov 64   ;;  %s11489_s20 = smov 92   ;;  %v6000_v5 = vld [vmem:[%s11445_s0 + $0x20] sm:$0xff]  ;;  %v6002_v6 = vand.u32 127, %v129_v4  ;;  %v6019_v12 = vld [vmem:[%s11446_s1 + $0x8] sm:$0xff]  ;;  %v6065_v22 = vld [vmem:[%s11445_s0 + $0x30] sm:$0xff] }
  0x19   :  { %s11487_s21 = smov 93   ;;  %s11478_s23 = smov 94   ;;  %5223 = vmatprep.mubr.msk.f32.mxu0 %vm1822_vm1, %v6019_v12  ;;  %5224 = vmatprep.mubr.msk.f32.mxu1 %vm1822_vm1, %v6019_v12  ;;  %v6053_v20 = vld [vmem:[%s11445_s0 + $0x28] sm:$0xff] }
  0x1a   :  { %s11463_s24 = smov 95   ;;  %s11461_s25 = smov 96   ;;  %vm1041_vm0 = vcmp.lt.s32.totalorder %v6002_v6, 32  ;;  %vm976_vm2 = vcmp.lt.s32.totalorder %v6002_v6, 60  ;;  %vm911_vm3 = vcmp.lt.s32.totalorder %v6002_v6, 61  ;;  %vm846_vm4 = vcmp.lt.s32.totalorder %v6002_v6, 62 }
  0x1b   :  { %1013 = vrot.lane.b32.xlu0 %v5878_v2, %s11507_s22  ;;  %946 = vrot.lane.b32.xlu1 %v5864_v0, %s11505_s30  ;;  %s11485_s26 = smov 124   ;;  %s11481_s27 = smov 125   ;;  %vm781_vm5 = vcmp.lt.s32.totalorder %v6002_v6, 63  ;;  %vm716_vm6 = vcmp.lt.s32.totalorder %v6002_v6, 64  ;;  %vm651_vm7 = vcmp.lt.s32.totalorder %v6002_v6, 92  ;;  %vm11512_vm8 = vcmp.lt.s32.totalorder %v6002_v6, 93 }
  0x1c   :  { %s11483_s28 = smov 126   ;;  %s11467_s29 = smov 127   ;;  %vm11494_vm9 = vcmp.lt.s32.totalorder %v6002_v6, 94  ;;  %vm11492_vm10 = vcmp.lt.s32.totalorder %v6002_v6, 95  ;;  %vm11493_vm11 = vcmp.lt.s32.totalorder %v6002_v6, 96  ;;  %vm326_vm12 = vcmp.lt.s32.totalorder %v6002_v6, 124 }
  0x1d   :  { %s11469_s6 = smov 30   ;;  %vm11475_vm13 = vcmp.lt.s32.totalorder %v6002_v6, 125  ;;  %vm196_vm14 = vcmp.lt.s32.totalorder %v6002_v6, 126  ;;  %vm11476_vm15 = vcmp.lt.s32.totalorder %v6002_v6, 127  ;;  %s11761_s15 = smov 32  }
  0x1e   :  { %s11764_s14 = smov 62   ;;  %s11770_s12 = smov 64  }
  0x1f   :  { %948 = vrot.lane.b32.xlu0 %v5878_v2, %s11505_s30  ;;  %944 = vrot.lane.b32.xlu1 %v5869_v1, %s11505_s30  ;;  %s5769_s11 = smov 112   ;;  %s5770_s13 = smov 76  }
  0x20   :  { %s5771_s9 = smov 77   ;;  %s5772_s10 = smov 78  }
  0x23   :  { %881 = vrot.lane.b32.xlu0 %v5864_v0, %s11503_s16  ;;  %883 = vrot.lane.b32.xlu1 %v5878_v2, %s11503_s16 }
  0x27   :  { %879 = vrot.lane.b32.xlu0 %v5869_v1, %s11503_s16  ;;  %816 = vrot.lane.b32.xlu1 %v5864_v0, %s11501_s17 }
  0x2b   :  { %818 = vrot.lane.b32.xlu0 %v5878_v2, %s11501_s17  ;;  %814 = vrot.lane.b32.xlu1 %v5869_v1, %s11501_s17 }
  0x2f   :  { %751 = vrot.lane.b32.xlu0 %v5864_v0, %s11497_s18  ;;  %753 = vrot.lane.b32.xlu1 %v5878_v2, %s11497_s18 }
  0x33   :  { %749 = vrot.lane.b32.xlu0 %v5869_v1, %s11497_s18  ;;  %686 = vrot.lane.b32.xlu1 %v5864_v0, %s11495_s19 }
  0x37   :  { %688 = vrot.lane.b32.xlu0 %v5878_v2, %s11495_s19  ;;  %684 = vrot.lane.b32.xlu1 %v5869_v1, %s11495_s19 }
  0x3b   :  { %621 = vrot.lane.b32.xlu0 %v5864_v0, %s11489_s20  ;;  %623 = vrot.lane.b32.xlu1 %v5878_v2, %s11489_s20 }
  0x3f   :  { %619 = vrot.lane.b32.xlu0 %v5869_v1, %s11489_s20  ;;  %556 = vrot.lane.b32.xlu1 %v5864_v0, %s11487_s21 }
  0x43   :  { %558 = vrot.lane.b32.xlu0 %v5878_v2, %s11487_s21  ;;  %554 = vrot.lane.b32.xlu1 %v5869_v1, %s11487_s21 }
  0x47   :  { %491 = vrot.lane.b32.xlu0 %v5864_v0, %s11478_s23  ;;  %493 = vrot.lane.b32.xlu1 %v5878_v2, %s11478_s23 }
  0x4b   :  { %489 = vrot.lane.b32.xlu0 %v5869_v1, %s11478_s23  ;;  %426 = vrot.lane.b32.xlu1 %v5864_v0, %s11463_s24 }
  0x4f   :  { %428 = vrot.lane.b32.xlu0 %v5878_v2, %s11463_s24  ;;  %424 = vrot.lane.b32.xlu1 %v5869_v1, %s11463_s24  ;;  %s11465_s24 = smov 28  }
  0x53   :  { %361 = vrot.lane.b32.xlu0 %v5864_v0, %s11461_s25  ;;  %363 = vrot.lane.b32.xlu1 %v5878_v2, %s11461_s25 }
  0x57   :  { %359 = vrot.lane.b32.xlu0 %v5869_v1, %s11461_s25  ;;  %296 = vrot.lane.b32.xlu1 %v5864_v0, %s11485_s26  ;;  %s11473_s25 = smov 29  }
  0x5b   :  { %298 = vrot.lane.b32.xlu0 %v5878_v2, %s11485_s26  ;;  %294 = vrot.lane.b32.xlu1 %v5869_v1, %s11485_s26 }
  0x5f   :  { %231 = vrot.lane.b32.xlu0 %v5864_v0, %s11481_s27  ;;  %233 = vrot.lane.b32.xlu1 %v5878_v2, %s11481_s27 }
  0x63   :  { %229 = vrot.lane.b32.xlu0 %v5869_v1, %s11481_s27  ;;  %166 = vrot.lane.b32.xlu1 %v5864_v0, %s11483_s28 }
  0x67   :  { %168 = vrot.lane.b32.xlu0 %v5878_v2, %s11483_s28  ;;  %164 = vrot.lane.b32.xlu1 %v5869_v1, %s11483_s28 }
  0x6b   :  { %99 = vrot.lane.b32.xlu0 %v5864_v0, %s11467_s29  ;;  %101 = vrot.lane.b32.xlu1 %v5878_v2, %s11467_s29 }
  0x6f   :  { %97 = vrot.lane.b32.xlu0 %v5869_v1, %s11467_s29  ;;  %300 = vrot.lane.b32.xlu1 %v5967_v3, %s11485_s26 }
  0x73   :  { %235 = vrot.lane.b32.xlu0 %v5967_v3, %s11481_s27  ;;  %170 = vrot.lane.b32.xlu1 %v5967_v3, %s11483_s28 }
  0x77   :  { %103 = vrot.lane.b32.xlu0 %v5967_v3, %s11467_s29  ;;  %1271 = vrot.lane.b32.xlu1 %v5864_v0, %s11465_s24  ;;  %s11741_s29 = smov 30  }
  0x7b   :  { %1273 = vrot.lane.b32.xlu0 %v5878_v2, %s11465_s24  ;;  %1269 = vrot.lane.b32.xlu1 %v5869_v1, %s11465_s24  ;;  %s11736_s24 = smov 127  }
  0x7f   :  { %1206 = vrot.lane.b32.xlu0 %v5864_v0, %s11473_s25  ;;  %1208 = vrot.lane.b32.xlu1 %v5878_v2, %s11473_s25 }
  0x83   :  { %1204 = vrot.lane.b32.xlu0 %v5869_v1, %s11473_s25  ;;  %1141 = vrot.lane.b32.xlu1 %v5864_v0, %s11469_s6  ;;  %s11733_s25 = smov 95  }
  0x87   :  { %1143 = vrot.lane.b32.xlu0 %v5878_v2, %s11469_s6  ;;  %1139 = vrot.lane.b32.xlu1 %v5869_v1, %s11469_s6  ;;  %s11471_s6 = smov 31  }
  0x89   :  { %v1012_v7 = vpop.permute.xlu0 %1011  ;;  %v6004_v8 = vpop.permute.xlu1 %1009 }
  0x8a   :  { %v1056_v13 = vsel %vm1041_vm0, %v6004_v8, %v1012_v7 }
  0x8b   :  { %1015 = vrot.lane.b32.xlu0 %v5967_v3, %s11507_s22  ;;  %1017 = vrot.lane.b32.xlu1 %v6000_v5, %s11507_s22 }
  0x8d   :  { %v6011_v9 = vpop.permute.xlu0 %1013  ;;  %v947_v10 = vpop.permute.xlu1 %946 }
  0x8e   :  { %v1055_v11 = vsel %vm1041_vm0, %v1012_v7, %v6011_v9 }
  0x8f   :  { %1826 = vmatprep.subr.mxu0 %v1055_v11  ;;  %1076 = vrot.lane.b32.xlu0 %v5864_v0, %s11471_s6 }
  0x90   :  { %1078 = vrot.lane.b32.xlu1 %v5878_v2, %s11471_s6  ;;  %1827 = vmatpush1.msra.mxu0 %v1056_v13 }
  0x91   :  { %v6029_v14 = vpop.permute.xlu0 %948  ;;  %v6031_v15 = vpop.permute.xlu1 %944 }
  0x92   :  { %v990_v16 = vsel %vm976_vm2, %v947_v10, %v6029_v14  ;;  %v991_v17 = vsel %vm976_vm2, %v6031_v15, %v947_v10 }
  0x93   :  { %1074 = vrot.lane.b32.xlu0 %v5869_v1, %s11471_s6  ;;  %1828 = vmatprep.subr.mxu0 %v990_v16  ;;  %s11734_s6 = smov 96  }
  0x94   :  { %950 = vrot.lane.b32.xlu1 %v5967_v3, %s11505_s30  ;;  %1829 = vmatpush1.msra.mxu0 %v991_v17 }
  0x95   :  { %v882_v18 = vpop.permute.xlu0 %881  ;;  %v6048_v19 = vpop.permute.xlu1 %883 }
  0x96   :  { %v925_v21 = vsel %vm911_vm3, %v882_v18, %v6048_v19 }
  0x97   :  { %952 = vrot.lane.b32.xlu0 %v6000_v5, %s11505_s30  ;;  %1830 = vmatprep.subr.mxu0 %v925_v21 }
  0x98   :  { %1019 = vrot.lane.b32.xlu1 %v6053_v20, %s11507_s22 }
  0x99   :  { %v6067_v23 = vpop.permute.xlu0 %879  ;;  %v817_v24 = vpop.permute.xlu1 %816 }
  0x9a   :  { %v926_v25 = vsel %vm911_vm3, %v6067_v23, %v882_v18 }
  0x9b   :  { %1021 = vrot.lane.b32.xlu0 %v6065_v22, %s11507_s22  ;;  %1831 = vmatpush1.msra.mxu0 %v926_v25 }
  0x9c   :  { %885 = vrot.lane.b32.xlu1 %v5967_v3, %s11503_s16 }
  0x9d   :  { %v6077_v26 = vpop.permute.xlu0 %818  ;;  %v6079_v27 = vpop.permute.xlu1 %814 }
  0x9e   :  { %v860_v28 = vsel %vm846_vm4, %v817_v24, %v6077_v26  ;;  %v861_v29 = vsel %vm846_vm4, %v6079_v27, %v817_v24 }
  0x9f   :  { %887 = vrot.lane.b32.xlu0 %v6000_v5, %s11503_s16  ;;  %1832 = vmatprep.subr.mxu0 %v860_v28 }
  0xa0   :  { %954 = vrot.lane.b32.xlu1 %v6053_v20, %s11505_s30  ;;  %1833 = vmatpush1.msra.mxu0 %v861_v29 }
  0xa1   :  { %v752_v30 = vpop.permute.xlu0 %751  ;;  %v6092_v31 = vpop.permute.xlu1 %753 }
  0xa2   :  { %v795_v32 = vsel %vm781_vm5, %v752_v30, %v6092_v31 }
  0xa3   :  { %956 = vrot.lane.b32.xlu0 %v6065_v22, %s11505_s30  ;;  %1834 = vmatprep.subr.mxu0 %v795_v32 }
  0xa4   :  { %820 = vrot.lane.b32.xlu1 %v5967_v3, %s11501_s17 }
  0xa5   :  { %v6101_v33 = vpop.permute.xlu0 %749  ;;  %v687_v34 = vpop.permute.xlu1 %686 }
  0xa6   :  { %v796_v35 = vsel %vm781_vm5, %v6101_v33, %v752_v30 }
  0xa7   :  { %822 = vrot.lane.b32.xlu0 %v6000_v5, %s11501_s17  ;;  %1835 = vmatpush1.msra.mxu0 %v796_v35 }
  0xa8   :  { %889 = vrot.lane.b32.xlu1 %v6053_v20, %s11503_s16 }
  0xa9   :  { %v6111_v36 = vpop.permute.xlu0 %688  ;;  %v6113_v37 = vpop.permute.xlu1 %684 }
  0xaa   :  { %v730_v38 = vsel %vm716_vm6, %v687_v34, %v6111_v36  ;;  %v731_v39 = vsel %vm716_vm6, %v6113_v37, %v687_v34 }
  0xab   :  { %891 = vrot.lane.b32.xlu0 %v6065_v22, %s11503_s16  ;;  %1836 = vmatprep.subr.mxu0 %v730_v38 }
  0xac   :  { %755 = vrot.lane.b32.xlu1 %v5967_v3, %s11497_s18  ;;  %1837 = vmatpush1.msra.mxu0 %v731_v39 }
  0xad   :  { %v622_v40 = vpop.permute.xlu0 %621  ;;  %v6126_v41 = vpop.permute.xlu1 %623 }
  0xae   :  { %v665_v42 = vsel %vm651_vm7, %v622_v40, %v6126_v41 }
  0xaf   :  { %757 = vrot.lane.b32.xlu0 %v6000_v5, %s11497_s18  ;;  %1838 = vmatprep.subr.mxu0 %v665_v42 }
  0xb0   :  { %824 = vrot.lane.b32.xlu1 %v6053_v20, %s11501_s17 }
  0xb1   :  { %v6135_v43 = vpop.permute.xlu0 %619  ;;  %v557_v44 = vpop.permute.xlu1 %556 }
  0xb2   :  { %v666_v45 = vsel %vm651_vm7, %v6135_v43, %v622_v40 }
  0xb3   :  { %826 = vrot.lane.b32.xlu0 %v6065_v22, %s11501_s17  ;;  %1839 = vmatpush1.msra.mxu0 %v666_v45 }
  0xb4   :  { %690 = vrot.lane.b32.xlu1 %v5967_v3, %s11495_s19 }
  0xb5   :  { %v6145_v46 = vpop.permute.xlu0 %558  ;;  %v6147_v47 = vpop.permute.xlu1 %554 }
  0xb6   :  { %v600_v48 = vsel %vm11512_vm8, %v557_v44, %v6145_v46  ;;  %v601_v49 = vsel %vm11512_vm8, %v6147_v47, %v557_v44 }
  0xb7   :  { %692 = vrot.lane.b32.xlu0 %v6000_v5, %s11495_s19  ;;  %1840 = vmatprep.subr.mxu0 %v600_v48 }
  0xb8   :  { %759 = vrot.lane.b32.xlu1 %v6053_v20, %s11497_s18  ;;  %1841 = vmatpush1.msra.mxu0 %v601_v49 }
  0xb9   :  { %v492_v50 = vpop.permute.xlu0 %491  ;;  %v6160_v51 = vpop.permute.xlu1 %493 }
  0xba   :  { %v535_v52 = vsel %vm11494_vm9, %v492_v50, %v6160_v51 }
  0xbb   :  { %761 = vrot.lane.b32.xlu0 %v6065_v22, %s11497_s18  ;;  %1842 = vmatprep.subr.mxu0 %v535_v52 }
  0xbc   :  { %625 = vrot.lane.b32.xlu1 %v5967_v3, %s11489_s20 }
  0xbd   :  { %v6169_v53 = vpop.permute.xlu0 %489  ;;  %v427_v54 = vpop.permute.xlu1 %426 }
  0xbe   :  { %v536_v55 = vsel %vm11494_vm9, %v6169_v53, %v492_v50 }
  0xbf   :  { %627 = vrot.lane.b32.xlu0 %v6000_v5, %s11489_s20  ;;  %1843 = vmatpush1.msra.mxu0 %v536_v55 }
  0xc0   :  { %694 = vrot.lane.b32.xlu1 %v6053_v20, %s11495_s19 }
  0xc1   :  { %v6179_v56 = vpop.permute.xlu0 %428  ;;  %v6181_v57 = vpop.permute.xlu1 %424 }
  0xc2   :  { %v470_v58 = vsel %vm11492_vm10, %v427_v54, %v6179_v56  ;;  %v471_v59 = vsel %vm11492_vm10, %v6181_v57, %v427_v54 }
  0xc3   :  { %696 = vrot.lane.b32.xlu0 %v6065_v22, %s11495_s19  ;;  %1844 = vmatprep.subr.mxu0 %v470_v58 }
  0xc4   :  { %560 = vrot.lane.b32.xlu1 %v5967_v3, %s11487_s21  ;;  %1845 = vmatpush1.msra.mxu0 %v471_v59 }
  0xc5   :  { %v362_v60 = vpop.permute.xlu0 %361  ;;  %v6194_v61 = vpop.permute.xlu1 %363 }
  0xc6   :  { %v405_v62 = vsel %vm11493_vm11, %v362_v60, %v6194_v61 }
  0xc7   :  { %562 = vrot.lane.b32.xlu0 %v6000_v5, %s11487_s21  ;;  %1846 = vmatprep.subr.mxu0 %v405_v62 }
  0xc8   :  { %629 = vrot.lane.b32.xlu1 %v6053_v20, %s11489_s20 }
  0xc9   :  { %v6203_v63 = vpop.permute.xlu0 %359  ;;  %v297_v4 = vpop.permute.xlu1 %296 }
  0xca   :  { %v406_v7 = vsel %vm11493_vm11, %v6203_v63, %v362_v60 }
  0xcb   :  { %631 = vrot.lane.b32.xlu0 %v6065_v22, %s11489_s20  ;;  %1847 = vmatpush1.msra.mxu0 %v406_v7  ;;  %s11743_s20 = smov 92  }
  0xcc   :  { %495 = vrot.lane.b32.xlu1 %v5967_v3, %s11478_s23 }
  0xcd   :  { %v299_v10 = vpop.permute.xlu0 %298  ;;  %v6213_v11 = vpop.permute.xlu1 %294 }
  0xce   :  { %v340_v13 = vsel %vm326_vm12, %v297_v4, %v299_v10  ;;  %v6220_v16 = vsel %vm326_vm12, %v6213_v11, %v297_v4 }
  0xcf   :  { %497 = vrot.lane.b32.xlu0 %v6000_v5, %s11478_s23  ;;  %1848 = vmatprep.subr.mxu0 %v340_v13 }
  0xd0   :  { %564 = vrot.lane.b32.xlu1 %v6053_v20, %s11487_s21  ;;  %1849 = vmatpush1.msra.mxu0 %v6220_v16 }
  0xd1   :  { %v232_v17 = vpop.permute.xlu0 %231  ;;  %v234_v18 = vpop.permute.xlu1 %233 }
  0xd2   :  { %v275_v21 = vsel %vm11475_vm13, %v232_v17, %v234_v18 }
  0xd3   :  { %566 = vrot.lane.b32.xlu0 %v6065_v22, %s11487_s21  ;;  %1850 = vmatprep.subr.mxu0 %v275_v21  ;;  %s11746_s21 = smov 94  }
  0xd4   :  { %430 = vrot.lane.b32.xlu1 %v5967_v3, %s11733_s25 }
  0xd5   :  { %v6234_v24 = vpop.permute.xlu0 %229  ;;  %v167_v25 = vpop.permute.xlu1 %166 }
  0xd6   :  { %v6239_v28 = vsel %vm11475_vm13, %v6234_v24, %v232_v17 }
  0xd7   :  { %432 = vrot.lane.b32.xlu0 %v6000_v5, %s11733_s25  ;;  %1851 = vmatpush1.msra.mxu0 %v6239_v28 }
  0xd8   :  { %499 = vrot.lane.b32.xlu1 %v6053_v20, %s11478_s23 }
  0xd9   :  { %v169_v29 = vpop.permute.xlu0 %168  ;;  %v6247_v30 = vpop.permute.xlu1 %164 }
  0xda   :  { %v210_v32 = vsel %vm196_vm14, %v167_v25, %v169_v29  ;;  %v6254_v34 = vsel %vm196_vm14, %v6247_v30, %v167_v25 }
  0xdb   :  { %501 = vrot.lane.b32.xlu0 %v6065_v22, %s11478_s23  ;;  %1852 = vmatprep.subr.mxu0 %v210_v32  ;;  %s11740_s23 = smov 29  }
  0xdc   :  { %365 = vrot.lane.b32.xlu1 %v5967_v3, %s11734_s6  ;;  %1853 = vmatpush1.msra.mxu0 %v6254_v34 }
  0xdd   :  { %v100_v35 = vpop.permute.xlu0 %99  ;;  %v102_v38 = vpop.permute.xlu1 %101 }
  0xde   :  { %v145_v39 = vsel %vm11476_vm15, %v100_v35, %v102_v38 }
  0xdf   :  { %367 = vrot.lane.b32.xlu0 %v6000_v5, %s11734_s6  ;;  %1854 = vmatprep.subr.mxu0 %v145_v39 }
  0xe0   :  { %434 = vrot.lane.b32.xlu1 %v6053_v20, %s11733_s25 }
  0xe1   :  { %v6268_v40 = vpop.permute.xlu0 %97  ;;  %v6270_v42 = vpop.permute.xlu1 %300 }
  0xe2   :  { %v6275_v44 = vsel %vm11476_vm15, %v6268_v40, %v100_v35  ;;  %v6291_v49 = vsel %vm326_vm12, %v299_v10, %v6270_v42  ;;  %v6376_v35 = vld [vmem:[%s11445_s0 + $0x38] sm:$0xff] }
  0xe3   :  { %436 = vrot.lane.b32.xlu0 %v6065_v22, %s11733_s25  ;;  %1855 = vmatpush1.msra.mxu0 %v6275_v44 }
  0xe4   :  { %302 = vrot.lane.b32.xlu1 %v6000_v5, %s11485_s26  ;;  %1856 = vmatprep.subr.mxu0 %v5864_v0 }
  0xe5   :  { %v6283_v45 = vpop.permute.xlu0 %235  ;;  %1857 = vmatpush1.msra.mxu0 %v5869_v1  ;;  %v6286_v48 = vpop.permute.xlu1 %170 }
  0xe6   :  { %1872 = vmatprep.subr.mxu0 %v6291_v49  ;;  %v6297_v50 = vsel %vm11475_vm13, %v234_v18, %v6283_v45  ;;  %v6309_v54 = vsel %vm196_vm14, %v169_v29, %v6286_v48  ;;  %vm11477_vm13 = vcmp.lt.s32.totalorder %v6002_v6, 28 }
  0xe7   :  { %369 = vrot.lane.b32.xlu0 %v6053_v20, %s11734_s6  ;;  %1873 = vmatpush2.msra.mxu0 %v340_v13 }
  0xe8   :  { %371 = vrot.lane.b32.xlu1 %v6065_v22, %s11734_s6  ;;  %1874 = vmatprep.subr.mxu0 %v6297_v50 }
  0xe9   :  { %v6304_v1 = vpop.permute.xlu0 %103  ;;  %1875 = vmatpush2.msra.mxu0 %v275_v21  ;;  %v1272_v52 = vpop.permute.xlu1 %1271 }
  0xea   :  { %1876 = vmatprep.subr.mxu0 %v6309_v54  ;;  %v6315_v55 = vsel %vm11476_vm15, %v102_v38, %v6304_v1  ;;  %vm1236_vm15 = vcmp.lt.s32.totalorder %v6002_v6, 29 }
  0xeb   :  { %237 = vrot.lane.b32.xlu0 %v6000_v5, %s11481_s27  ;;  %1877 = vmatpush2.msra.mxu0 %v210_v32 }
  0xec   :  { %304 = vrot.lane.b32.xlu1 %v6053_v20, %s11485_s26  ;;  %1878 = vmatprep.subr.mxu0 %v6315_v55 }
  0xed   :  { %v6323_v58 = vpop.permute.xlu0 %1273  ;;  %1879 = vmatpush2.msra.mxu0 %v145_v39  ;;  %v6325_v59 = vpop.permute.xlu1 %1269 }
  0xee   :  { %1880 = vmatprep.subr.mxu0 %v5878_v2  ;;  %v1315_v60 = vsel %vm11477_vm13, %v1272_v52, %v6323_v58  ;;  %v1316_v62 = vsel %vm11477_vm13, %v6325_v59, %v1272_v52  ;;  %vm11480_vm13 = vcmp.lt.s32.totalorder %v6002_v6, 30 }
  0xef   :  { %306 = vrot.lane.b32.xlu0 %v6065_v22, %s11485_s26  ;;  %1881 = vmatpush2.msra.mxu0 %v5864_v0 }
  0xf0   :  { %172 = vrot.lane.b32.xlu1 %v6000_v5, %s11483_s28  ;;  %1882 = vmatprep.subr.mxu0 %v1315_v60 }
  0xf1   :  { %v1207_v2 = vpop.permute.xlu0 %1206  ;;  %1883 = vmatpush2.msra.mxu0 %v1316_v62  ;;  %v6340_v4 = vpop.permute.xlu1 %1208 }
  0xf2   :  { %v1250_v7 = vsel %vm1236_vm15, %v1207_v2, %v6340_v4 }
  0xf3   :  { %239 = vrot.lane.b32.xlu0 %v6053_v20, %s11481_s27  ;;  %1884 = vmatprep.subr.mxu0 %v1250_v7 }
  0xf4   :  { %241 = vrot.lane.b32.xlu1 %v6065_v22, %s11481_s27 }
  0xf5   :  { %v6349_v0 = vpop.permute.xlu0 %1204  ;;  %v1142_v10 = vpop.permute.xlu1 %1141 }
  0xf6   :  { %11735 = vst [vmem:[#allocation10_spill] sm:$0xff] %v6349_v0  ;;  %v1251_v13 = vsel %vm1236_vm15, %v6349_v0, %v1207_v2  ;;  %v6402_v2 = vld [vmem:[%s11446_s1] sm:$0xff] }
  0xf7   :  { %105 = vrot.lane.b32.xlu0 %v6000_v5, %s11736_s24  ;;  %1885 = vmatpush2.msra.mxu0 %v1251_v13 }
  0xf8   :  { %174 = vrot.lane.b32.xlu1 %v6053_v20, %s11483_s28 }
  0xf9   :  { %v6359_v17 = vpop.permute.xlu0 %1143  ;;  %v6361_v18 = vpop.permute.xlu1 %1139 }
  0xfa   :  { %11737 = vst [vmem:[#allocation11_spill] sm:$0xff] %v6361_v18  ;;  %v1185_v21 = vsel %vm11480_vm13, %v1142_v10, %v6359_v17  ;;  %v1186_v25 = vsel %vm11480_vm13, %v6361_v18, %v1142_v10  ;;  %vm1106_vm13 = vcmp.lt.s32.totalorder %v6002_v6, 31  ;;  %v5552_v18 = vld [vmem:[%s11445_s0 + $0x10] sm:$0xff] }
  0xfb   :  { %176 = vrot.lane.b32.xlu0 %v6065_v22, %s11483_s28  ;;  %1886 = vmatprep.subr.mxu0 %v1185_v21 }
  0xfc   :  { %107 = vrot.lane.b32.xlu1 %v6053_v20, %s11736_s24  ;;  %1887 = vmatpush2.msra.mxu0 %v1186_v25 }
  0xfd   :  { %v1016_v29 = vpop.permute.xlu0 %1015  ;;  %v1018_v32 = vpop.permute.xlu1 %1017 }
  0xfe   :  { %v1053_v38 = vsel %vm1041_vm0, %v1016_v29, %v1018_v32  ;;  %v1054_v39 = vsel %vm1041_vm0, %v6011_v9, %v1016_v29 }
  0xff   :  { %109 = vrot.lane.b32.xlu0 %v6065_v22, %s11736_s24  ;;  %1897 = vmatprep.subr.mxu1 %v1053_v38 }
 0x100   :  { %308 = vrot.lane.b32.xlu1 %v6376_v35, %s11485_s26  ;;  %1898 = vmatpush1.msra.mxu1 %v1054_v39  ;;  %s11744_s26 = smov 93  }
 0x101   :  { %v1077_v52 = vpop.permute.xlu0 %1076 }
 0x102   :  { %v6388_v60 = vpop.permute.xlu1 %1078 }
 0x103   :  { %243 = vrot.lane.b32.xlu0 %v6376_v35, %s11481_s27  ;;  %v1120_v9 = vsel %vm1106_vm13, %v1077_v52, %v6388_v60  ;;  %s11739_s27 = smov 28  }
 0x104   :  { %178 = vrot.lane.b32.xlu1 %v6376_v35, %s11483_s28  ;;  %1888 = vmatprep.subr.mxu0 %v1120_v9  ;;  %s11742_s28 = smov 31  }
 0x105   :  { %v6397_v62 = vpop.permute.xlu0 %1074 }
 0x106   :  { %11738 = vst [vmem:[#allocation12_spill] sm:$0xff] %v6397_v62  ;;  %v951_v7 = vpop.permute.xlu1 %950  ;;  %v1121_v10 = vsel %vm1106_vm13, %v6397_v62, %v1077_v52 }
 0x107   :  { %111 = vrot.lane.b32.xlu0 %v6376_v35, %s11736_s24  ;;  %1889 = vmatpush2.msra.mxu0 %v1121_v10  ;;  %v989_v29 = vsel %vm976_vm2, %v6029_v14, %v951_v7 }
 0x108   :  { %1275 = vrot.lane.b32.xlu1 %v5967_v3, %s11739_s27  ;;  %1891 = vmatmul.mubr.f32.vlgmr.msra.gmra.mxu0 %v6402_v2 }
 0x109   :  { %v953_v13 = vpop.permute.xlu0 %952  ;;  %5225 = vmatprep.mubr.msk.f32.mxu0 %vm1822_vm1, %v6019_v12 }
 0x10a   :  { %v1020_v21 = vpop.permute.xlu1 %1019  ;;  %v988_v25 = vsel %vm976_vm2, %v951_v7, %v953_v13 }
 0x10b   :  { %1277 = vrot.lane.b32.xlu0 %v6000_v5, %s11739_s27  ;;  %1899 = vmatprep.subr.mxu1 %v988_v25  ;;  %v1052_v52 = vsel %vm1041_vm0, %v1018_v32, %v1020_v21 }
 0x10c   :  { %1210 = vrot.lane.b32.xlu1 %v5967_v3, %s11740_s23  ;;  %1900 = vmatpush1.msra.mxu1 %v989_v29 }
 0x10d   :  { %v6423_v38 = vpop.permute.xlu0 %1021 }
 0x10e   :  { %v886_v39 = vpop.permute.xlu1 %885  ;;  %v1051_v12 = vsel %vm1041_vm0, %v1020_v21, %v6423_v38 }
 0x10f   :  { %1212 = vrot.lane.b32.xlu0 %v6000_v5, %s11740_s23  ;;  %1968 = vmatprep.subr.mxu0 %v1051_v12  ;;  %v924_v10 = vsel %vm911_vm3, %v6048_v19, %v886_v39 }
 0x110   :  { %1279 = vrot.lane.b32.xlu1 %v6053_v20, %s11739_s27  ;;  %1969 = vmatpush1.msra.mxu0 %v1052_v52 }
 0x111   :  { %v888_v14 = vpop.permute.xlu0 %887 }
 0x112   :  { %v955_v9 = vpop.permute.xlu1 %954  ;;  %v923_v7 = vsel %vm911_vm3, %v886_v39, %v888_v14 }
 0x113   :  { %1281 = vrot.lane.b32.xlu0 %v6065_v22, %s11739_s27  ;;  %1901 = vmatprep.subr.mxu1 %v923_v7  ;;  %v987_v29 = vsel %vm976_vm2, %v953_v13, %v955_v9 }
 0x114   :  { %1145 = vrot.lane.b32.xlu1 %v5967_v3, %s11741_s29  ;;  %1902 = vmatpush1.msra.mxu1 %v924_v10 }
 0x115   :  { %v6443_v32 = vpop.permute.xlu0 %956 }
 0x116   :  { %v821_v21 = vpop.permute.xlu1 %820  ;;  %v986_v25 = vsel %vm976_vm2, %v955_v9, %v6443_v32 }
 0x117   :  { %1147 = vrot.lane.b32.xlu0 %v6000_v5, %s11741_s29  ;;  %1970 = vmatprep.subr.mxu0 %v986_v25  ;;  %v859_v52 = vsel %vm846_vm4, %v6077_v26, %v821_v21 }
 0x118   :  { %1214 = vrot.lane.b32.xlu1 %v6053_v20, %s11740_s23  ;;  %1971 = vmatpush1.msra.mxu0 %v987_v29 }
 0x119   :  { %v823_v19 = vpop.permute.xlu0 %822 }
 0x11a   :  { %v890_v39 = vpop.permute.xlu1 %889  ;;  %v858_v12 = vsel %vm846_vm4, %v821_v21, %v823_v19 }
 0x11b   :  { %1216 = vrot.lane.b32.xlu0 %v6065_v22, %s11740_s23  ;;  %1903 = vmatprep.subr.mxu1 %v858_v12  ;;  %v922_v10 = vsel %vm911_vm3, %v888_v14, %v890_v39 }
 0x11c   :  { %1080 = vrot.lane.b32.xlu1 %v5967_v3, %s11742_s28  ;;  %1904 = vmatpush1.msra.mxu1 %v859_v52 }
 0x11d   :  { %v6463_v13 = vpop.permute.xlu0 %891 }
 0x11e   :  { %v756_v9 = vpop.permute.xlu1 %755  ;;  %v921_v7 = vsel %vm911_vm3, %v890_v39, %v6463_v13 }
 0x11f   :  { %1082 = vrot.lane.b32.xlu0 %v6000_v5, %s11742_s28  ;;  %1972 = vmatprep.subr.mxu0 %v921_v7  ;;  %v794_v29 = vsel %vm781_vm5, %v6092_v31, %v756_v9  ;;  %v6497_v31 = vld [vmem:[%s11445_s0 + $0x40] sm:$0xff] }
 0x120   :  { %1149 = vrot.lane.b32.xlu1 %v6053_v20, %s11741_s29  ;;  %1973 = vmatpush1.msra.mxu0 %v922_v10 }
 0x121   :  { %v758_v26 = vpop.permute.xlu0 %757 }
 0x122   :  { %v825_v21 = vpop.permute.xlu1 %824  ;;  %v793_v25 = vsel %vm781_vm5, %v756_v9, %v758_v26 }
 0x123   :  { %1151 = vrot.lane.b32.xlu0 %v6065_v22, %s11741_s29  ;;  %1905 = vmatprep.subr.mxu1 %v793_v25  ;;  %v857_v52 = vsel %vm846_vm4, %v823_v19, %v825_v21  ;;  %v6513_v25 = vld [vmem:[%s11445_s0 + $0x48] sm:$0xff] }
 0x124   :  { %1084 = vrot.lane.b32.xlu1 %v6053_v20, %s11742_s28  ;;  %1906 = vmatpush1.msra.mxu1 %v794_v29 }
 0x125   :  { %v6483_v14 = vpop.permute.xlu0 %826 }
 0x126   :  { %v691_v39 = vpop.permute.xlu1 %690  ;;  %v856_v12 = vsel %vm846_vm4, %v825_v21, %v6483_v14 }
 0x127   :  { %1086 = vrot.lane.b32.xlu0 %v6065_v22, %s11742_s28  ;;  %1974 = vmatprep.subr.mxu0 %v856_v12  ;;  %v729_v19 = vsel %vm716_vm6, %v6111_v36, %v691_v39 }
 0x128   :  { %1023 = vrot.lane.b32.xlu1 %v6376_v35, %s11507_s22  ;;  %1975 = vmatpush1.msra.mxu0 %v857_v52 }
 0x129   :  { %v693_v9 = vpop.permute.xlu0 %692 }
 0x12a   :  { %v760_v7 = vpop.permute.xlu1 %759  ;;  %v728_v10 = vsel %vm716_vm6, %v691_v39, %v693_v9  ;;  %v6527_v39 = vld [vmem:[%s11445_s0 + $0x50] sm:$0xff] }
 0x12b   :  { %1025 = vrot.lane.b32.xlu0 %v6497_v31, %s11507_s22  ;;  %1907 = vmatprep.subr.mxu1 %v728_v10  ;;  %v792_v36 = vsel %vm781_vm5, %v758_v26, %v760_v7 }
 0x12c   :  { %958 = vrot.lane.b32.xlu1 %v6376_v35, %s11505_s30  ;;  %1908 = vmatpush1.msra.mxu1 %v729_v19 }
 0x12d   :  { %v6508_v21 = vpop.permute.xlu0 %761 }
 0x12e   :  { %v626_v29 = vpop.permute.xlu1 %625  ;;  %v791_v12 = vsel %vm781_vm5, %v760_v7, %v6508_v21 }
 0x12f   :  { %960 = vrot.lane.b32.xlu0 %v6497_v31, %s11505_s30  ;;  %1976 = vmatprep.subr.mxu0 %v791_v12  ;;  %v664_v26 = vsel %vm651_vm7, %v6126_v41, %v626_v29 }
 0x130   :  { %1027 = vrot.lane.b32.xlu1 %v6513_v25, %s11507_s22  ;;  %1977 = vmatpush1.msra.mxu0 %v792_v36 }
 0x131   :  { %v628_v52 = vpop.permute.xlu0 %627 }
 0x132   :  { %v695_v10 = vpop.permute.xlu1 %694  ;;  %v663_v19 = vsel %vm651_vm7, %v626_v29, %v628_v52 }
 0x133   :  { %1029 = vrot.lane.b32.xlu0 %v6527_v39, %s11507_s22  ;;  %1909 = vmatprep.subr.mxu1 %v663_v19  ;;  %v727_v19 = vsel %vm716_vm6, %v693_v9, %v695_v10  ;;  %s11767_s22 = smov 63  }
 0x134   :  { %893 = vrot.lane.b32.xlu1 %v6376_v35, %s11503_s16  ;;  %1910 = vmatpush1.msra.mxu1 %v664_v26 }
 0x135   :  { %v6538_v7 = vpop.permute.xlu0 %696 }
 0x136   :  { %v561_v12 = vpop.permute.xlu1 %560  ;;  %v726_v36 = vsel %vm716_vm6, %v695_v10, %v6538_v7 }
 0x137   :  { %895 = vrot.lane.b32.xlu0 %v6497_v31, %s11503_s16  ;;  %1978 = vmatprep.subr.mxu0 %v726_v36  ;;  %v599_v36 = vsel %vm11512_vm8, %v6145_v46, %v561_v12 }
 0x138   :  { %962 = vrot.lane.b32.xlu1 %v6513_v25, %s11505_s30  ;;  %1979 = vmatpush1.msra.mxu0 %v727_v19 }
 0x139   :  { %v563_v41 = vpop.permute.xlu0 %562 }
 0x13a   :  { %v630_v29 = vpop.permute.xlu1 %629  ;;  %v598_v26 = vsel %vm11512_vm8, %v561_v12, %v563_v41 }
 0x13b   :  { %964 = vrot.lane.b32.xlu0 %v6527_v39, %s11505_s30  ;;  %1911 = vmatprep.subr.mxu1 %v598_v26  ;;  %v662_v26 = vsel %vm651_vm7, %v628_v52, %v630_v29  ;;  %s11763_s30 = smov 61  }
 0x13c   :  { %828 = vrot.lane.b32.xlu1 %v6376_v35, %s11501_s17  ;;  %1912 = vmatpush1.msra.mxu1 %v599_v36 }
 0x13d   :  { %v6558_v9 = vpop.permute.xlu0 %631 }
 0x13e   :  { %v496_v10 = vpop.permute.xlu1 %495  ;;  %v661_v19 = vsel %vm651_vm7, %v630_v29, %v6558_v9 }
 0x13f   :  { %830 = vrot.lane.b32.xlu0 %v6497_v31, %s11501_s17  ;;  %1980 = vmatprep.subr.mxu0 %v661_v19  ;;  %v534_v19 = vsel %vm11494_vm9, %v6160_v51, %v496_v10 }
 0x140   :  { %897 = vrot.lane.b32.xlu1 %v6513_v25, %s11503_s16  ;;  %1981 = vmatpush1.msra.mxu0 %v662_v26 }
 0x141   :  { %v498_v46 = vpop.permute.xlu0 %497 }
 0x142   :  { %v565_v12 = vpop.permute.xlu1 %564  ;;  %v533_v36 = vsel %vm11494_vm9, %v496_v10, %v498_v46 }
 0x143   :  { %899 = vrot.lane.b32.xlu0 %v6527_v39, %s11503_s16  ;;  %1913 = vmatprep.subr.mxu1 %v533_v36  ;;  %v597_v36 = vsel %vm11512_vm8, %v563_v41, %v565_v12  ;;  %s11762_s16 = smov 60  }
 0x144   :  { %763 = vrot.lane.b32.xlu1 %v6376_v35, %s11497_s18  ;;  %1914 = vmatpush1.msra.mxu1 %v534_v19 }
 0x145   :  { %v6578_v52 = vpop.permute.xlu0 %566 }
 0x146   :  { %v431_v29 = vpop.permute.xlu1 %430  ;;  %v596_v26 = vsel %vm11512_vm8, %v565_v12, %v6578_v52 }
 0x147   :  { %765 = vrot.lane.b32.xlu0 %v6497_v31, %s11497_s18  ;;  %1982 = vmatprep.subr.mxu0 %v596_v26  ;;  %v469_v26 = vsel %vm11492_vm10, %v6179_v56, %v431_v29 }
 0x148   :  { %832 = vrot.lane.b32.xlu1 %v6513_v25, %s11501_s17  ;;  %1983 = vmatpush1.msra.mxu0 %v597_v36 }
 0x149   :  { %v433_v51 = vpop.permute.xlu0 %432 }
 0x14a   :  { %v500_v10 = vpop.permute.xlu1 %499  ;;  %v468_v19 = vsel %vm11492_vm10, %v431_v29, %v433_v51 }
 0x14b   :  { %834 = vrot.lane.b32.xlu0 %v6527_v39, %s11501_s17  ;;  %1915 = vmatprep.subr.mxu1 %v468_v19  ;;  %v532_v19 = vsel %vm11494_vm9, %v498_v46, %v500_v10  ;;  %s11750_s17 = smov 124  }
 0x14c   :  { %698 = vrot.lane.b32.xlu1 %v6376_v35, %s11495_s19  ;;  %1916 = vmatpush1.msra.mxu1 %v469_v26 }
 0x14d   :  { %v6598_v41 = vpop.permute.xlu0 %501 }
 0x14e   :  { %v366_v12 = vpop.permute.xlu1 %365  ;;  %v531_v36 = vsel %vm11494_vm9, %v500_v10, %v6598_v41  ;;  %vm11748_vm9 = vcmp.lt.s32.totalorder %v6002_v6, 127 }
 0x14f   :  { %700 = vrot.lane.b32.xlu0 %v6497_v31, %s11495_s19  ;;  %1984 = vmatprep.subr.mxu0 %v531_v36  ;;  %v404_v36 = vsel %vm11493_vm11, %v6194_v61, %v366_v12 }
 0x150   :  { %767 = vrot.lane.b32.xlu1 %v6513_v25, %s11497_s18  ;;  %1985 = vmatpush1.msra.mxu0 %v532_v19 }
 0x151   :  { %v368_v56 = vpop.permute.xlu0 %367 }
 0x152   :  { %v435_v29 = vpop.permute.xlu1 %434  ;;  %v403_v26 = vsel %vm11493_vm11, %v366_v12, %v368_v56 }
 0x153   :  { %769 = vrot.lane.b32.xlu0 %v6527_v39, %s11497_s18  ;;  %1917 = vmatprep.subr.mxu1 %v403_v26  ;;  %v467_v61 = vsel %vm11492_vm10, %v433_v51, %v435_v29  ;;  %s11753_s18 = smov 125  }
 0x154   :  { %633 = vrot.lane.b32.xlu1 %v6376_v35, %s11743_s20  ;;  %1918 = vmatpush1.msra.mxu1 %v404_v36 }
 0x155   :  { %v6618_v46 = vpop.permute.xlu0 %436 }
 0x156   :  { %v303_v10 = vpop.permute.xlu1 %302  ;;  %v466_v19 = vsel %vm11492_vm10, %v435_v29, %v6618_v46  ;;  %vm11745_vm10 = vcmp.lt.s32.totalorder %v6002_v6, 125 }
 0x157   :  { %635 = vrot.lane.b32.xlu0 %v6497_v31, %s11743_s20  ;;  %v338_v26 = vsel %vm326_vm12, %v6270_v42, %v303_v10  ;;  %1986 = vmatprep.subr.mxu0 %v466_v19 }
 0x158   :  { %702 = vrot.lane.b32.xlu1 %v6513_v25, %s11495_s19  ;;  %1919 = vmatprep.subr.mxu1 %v338_v26 }
 0x159   :  { %1920 = vmatpush1.msra.mxu1 %v6291_v49  ;;  %1987 = vmatpush1.msra.mxu0 %v467_v61  ;;  %v370_v12 = vpop.permute.xlu0 %369 }
 0x15a   :  { %v6633_v36 = vpop.permute.xlu1 %371  ;;  %v402_v62 = vsel %vm11493_vm11, %v368_v56, %v370_v12 }
 0x15b   :  { %704 = vrot.lane.b32.xlu0 %v6527_v39, %s11495_s19  ;;  %v401_v42 = vsel %vm11493_vm11, %v370_v12, %v6633_v36  ;;  %vm11747_vm11 = vmmov %vm11745_vm10  ;;  %s11756_s19 = smov 126  }
 0x15c   :  { %568 = vrot.lane.b32.xlu1 %v6376_v35, %s11744_s26  ;;  %1988 = vmatprep.subr.mxu0 %v401_v42 }
 0x15d   :  { %1989 = vmatpush1.msra.mxu0 %v402_v62  ;;  %v238_v49 = vpop.permute.xlu0 %237 }
 0x15e   :  { %v305_v51 = vpop.permute.xlu1 %304  ;;  %v273_v29 = vsel %vm11745_vm10, %v6283_v45, %v238_v49 }
 0x15f   :  { %570 = vrot.lane.b32.xlu0 %v6497_v31, %s11744_s26  ;;  %1921 = vmatprep.subr.mxu1 %v273_v29 }
 0x160   :  { %637 = vrot.lane.b32.xlu1 %v6513_v25, %s11743_s20  ;;  %1922 = vmatpush1.msra.mxu1 %v6297_v50  ;;  %v337_v50 = vsel %vm326_vm12, %v303_v10, %v305_v51 }
 0x161   :  { %v307_v56 = vpop.permute.xlu0 %306 }
 0x162   :  { %v173_v19 = vpop.permute.xlu1 %172  ;;  %v336_v62 = vsel %vm326_vm12, %v305_v51, %v307_v56 }
 0x163   :  { %639 = vrot.lane.b32.xlu0 %v6527_v39, %s11743_s20  ;;  %v208_v45 = vsel %vm196_vm14, %v6286_v48, %v173_v19  ;;  %1990 = vmatprep.subr.mxu0 %v336_v62 }
 0x164   :  { %503 = vrot.lane.b32.xlu1 %v6376_v35, %s11746_s21  ;;  %1923 = vmatprep.subr.mxu1 %v208_v45 }
 0x165   :  { %1924 = vmatpush1.msra.mxu1 %v6309_v54  ;;  %1991 = vmatpush1.msra.mxu0 %v337_v50  ;;  %v240_v61 = vpop.permute.xlu0 %239 }
 0x166   :  { %v242_v12 = vpop.permute.xlu1 %241  ;;  %v272_v42 = vsel %vm11745_vm10, %v238_v49, %v240_v61 }
 0x167   :  { %505 = vrot.lane.b32.xlu0 %v6497_v31, %s11746_s21  ;;  %v271_v48 = vsel %vm11747_vm11, %v240_v61, %v242_v12  ;;  %vm11749_vm11 = vmmov %vm11748_vm9 }
 0x168   :  { %572 = vrot.lane.b32.xlu1 %v6513_v25, %s11744_s26  ;;  %1992 = vmatprep.subr.mxu0 %v271_v48 }
 0x169   :  { %1993 = vmatpush1.msra.mxu0 %v272_v42  ;;  %v106_v10 = vpop.permute.xlu0 %105 }
 0x16a   :  { %v175_v51 = vpop.permute.xlu1 %174  ;;  %v143_v54 = vsel %vm11748_vm9, %v6304_v1, %v106_v10 }
 0x16b   :  { %574 = vrot.lane.b32.xlu0 %v6527_v39, %s11744_s26  ;;  %1925 = vmatprep.subr.mxu1 %v143_v54 }
 0x16c   :  { %438 = vrot.lane.b32.xlu1 %v6376_v35, %s11733_s25  ;;  %1926 = vmatpush1.msra.mxu1 %v6315_v55 }
 0x16d   :  { %v177_v49 = vpop.permute.xlu0 %176  ;;  %1927 = vmatprep.subr.mxu1 %v5967_v3  ;;  %v207_v3 = vsel %vm196_vm14, %v173_v19, %v175_v51 }
 0x16e   :  { %v108_v61 = vpop.permute.xlu1 %107  ;;  %1928 = vmatpush1.msra.mxu1 %v5552_v18  ;;  %v206_v1 = vsel %vm196_vm14, %v175_v51, %v177_v49 }
 0x16f   :  { %440 = vrot.lane.b32.xlu0 %v6497_v31, %s11733_s25  ;;  %1943 = vmatprep.subr.mxu1 %v337_v50 }
 0x170   :  { %507 = vrot.lane.b32.xlu1 %v6513_v25, %s11746_s21  ;;  %1994 = vmatprep.subr.mxu0 %v206_v1 }
 0x171   :  { %1944 = vmatpush2.msra.mxu1 %v338_v26  ;;  %1995 = vmatpush1.msra.mxu0 %v207_v3  ;;  %v110_v55 = vpop.permute.xlu0 %109  ;;  %v142_v26 = vsel %vm11749_vm11, %v106_v10, %v108_v61  ;;  %vm11751_vm11 = vcmp.lt.s32.totalorder %v6002_v6, 28 }
 0x172   :  { %1945 = vmatprep.subr.mxu1 %v272_v42  ;;  %v6692_v0 = vpop.permute.xlu1 %308  ;;  %v141_v18 = vsel %vm11748_vm9, %v108_v61, %v110_v55 }
 0x173   :  { %1946 = vmatpush2.msra.mxu1 %v273_v29  ;;  %509 = vrot.lane.b32.xlu0 %v6527_v39, %s11746_s21  ;;  %v6713_v29 = vsel %vm326_vm12, %v307_v56, %v6692_v0  ;;  %v5553_v56 = vld [vmem:[%s11445_s0 + $0x18] sm:$0xff] }
 0x174   :  { %373 = vrot.lane.b32.xlu1 %v6376_v35, %s11734_s6  ;;  %1947 = vmatprep.subr.mxu1 %v207_v3 }
 0x175   :  { %1996 = vmatprep.subr.mxu0 %v141_v18  ;;  %1948 = vmatpush2.msra.mxu1 %v208_v45  ;;  %v6702_v19 = vpop.permute.xlu0 %243 }
 0x176   :  { %1997 = vmatpush1.msra.mxu0 %v142_v26  ;;  %1949 = vmatprep.subr.mxu1 %v142_v26  ;;  %v6704_v50 = vpop.permute.xlu1 %178  ;;  %v6723_v42 = vsel %vm11745_vm10, %v242_v12, %v6702_v19  ;;  %vm11752_vm10 = vmmov %vm11751_vm11 }
 0x177   :  { %1998 = vmatprep.subr.mxu0 %v6053_v20  ;;  %1950 = vmatpush2.msra.mxu1 %v143_v54 }
 0x178   :  { %1999 = vmatpush1.msra.mxu0 %v6000_v5  ;;  %375 = vrot.lane.b32.xlu0 %v6497_v31, %s11734_s6 }
 0x179   :  { %442 = vrot.lane.b32.xlu1 %v6513_v25, %s11733_s25  ;;  %2014 = vmatprep.subr.mxu0 %v6713_v29  ;;  %v6718_v45 = vpop.permute.xlu0 %111 }
 0x17a   :  { %2015 = vmatpush2.msra.mxu0 %v336_v62  ;;  %v1276_v10 = vpop.permute.xlu1 %1275  ;;  %1951 = vmatprep.subr.mxu1 %v6000_v5  ;;  %v6735_v62 = vsel %vm196_vm14, %v177_v49, %v6704_v50  ;;  %v6743_v12 = vsel %vm11748_vm9, %v110_v55, %v6718_v45  ;;  %vm11754_vm9 = vmmov %vm11752_vm10 }
 0x17b   :  { %2016 = vmatprep.subr.mxu0 %v6723_v42  ;;  %1952 = vmatpush2.msra.mxu1 %v5553_v56  ;;  %v1314_v54 = vsel %vm11752_vm10, %v6323_v58, %v1276_v10  ;;  %vm11757_vm10 = vcmp.lt.s32.totalorder %v6002_v6, 30 }
 0x17c   :  { %2017 = vmatpush2.msra.mxu0 %v271_v48  ;;  %444 = vrot.lane.b32.xlu0 %v6527_v39, %s11733_s25 }
 0x17d   :  { %310 = vrot.lane.b32.xlu1 %v6497_v31, %s11750_s17  ;;  %2018 = vmatprep.subr.mxu0 %v6735_v62  ;;  %v1278_v5 = vpop.permute.xlu0 %1277 }
 0x17e   :  { %2019 = vmatpush2.msra.mxu0 %v206_v1  ;;  %v1211_v48 = vpop.permute.xlu1 %1210  ;;  %v1313_v51 = vsel %vm11751_vm11, %v1276_v10, %v1278_v5  ;;  %vm11755_vm11 = vmmov %vm11754_vm9 }
 0x17f   :  { %2020 = vmatprep.subr.mxu0 %v6743_v12  ;;  %1953 = vmatprep.subr.mxu1 %v1313_v51  ;;  %v1249_v3 = vsel %vm1236_vm15, %v6340_v4, %v1211_v48 }
 0x180   :  { %2021 = vmatpush2.msra.mxu0 %v141_v18  ;;  %377 = vrot.lane.b32.xlu0 %v6513_v25, %s11734_s6 }
 0x181   :  { %379 = vrot.lane.b32.xlu1 %v6527_v39, %s11734_s6  ;;  %1954 = vmatpush2.msra.mxu1 %v1314_v54  ;;  %v1213_v49 = vpop.permute.xlu0 %1212 }
 0x182   :  { %v1280_v61 = vpop.permute.xlu1 %1279  ;;  %v1248_v1 = vsel %vm1236_vm15, %v1211_v48, %v1213_v49  ;;  %2022 = vmatprep.subr.mxu0 %v6065_v22 }
 0x183   :  { %1955 = vmatprep.subr.mxu1 %v1248_v1  ;;  %2023 = vmatpush2.msra.mxu0 %v6053_v20  ;;  %v1312_v4 = vsel %vm11755_vm11, %v1278_v5, %v1280_v61 }
 0x184   :  { %245 = vrot.lane.b32.xlu0 %v6497_v31, %s11753_s18  ;;  %1956 = vmatpush2.msra.mxu1 %v1249_v3 }
 0x185   :  { %312 = vrot.lane.b32.xlu1 %v6513_v25, %s11750_s17  ;;  %v6766_v58 = vpop.permute.xlu0 %1281 }
 0x186   :  { %v1146_v55 = vpop.permute.xlu1 %1145  ;;  %v1311_v22 = vsel %vm11754_vm9, %v1280_v61, %v6766_v58  ;;  %vm11758_vm9 = vmmov %vm11757_vm10 }
 0x187   :  { %2024 = vmatprep.subr.mxu0 %v1311_v22  ;;  %v1184_v10 = vsel %vm11758_vm9, %v6359_v17, %v1146_v55  ;;  %vm11759_vm11 = vmmov %vm11758_vm9  ;;  %v6820_v22 = vld [vmem:[%s11446_s1 + $0x8] sm:$0xff] }
 0x188   :  { %314 = vrot.lane.b32.xlu0 %v6527_v39, %s11750_s17  ;;  %2025 = vmatpush2.msra.mxu0 %v1312_v4 }
 0x189   :  { %180 = vrot.lane.b32.xlu1 %v6497_v31, %s11756_s19  ;;  %v1148_v20 = vpop.permute.xlu0 %1147 }
 0x18a   :  { %v1215_v18 = vpop.permute.xlu1 %1214  ;;  %v1183_v26 = vsel %vm11757_vm10, %v1146_v55, %v1148_v20  ;;  %v6812_v55 = vld [vmem:[%s11445_s0 + $0x58] sm:$0xff]  ;;  %vm11760_vm10 = vmmov %vm11758_vm9  ;;  %vm11765_vm9 = vcmp.lt.s32.totalorder %v6002_v6, 94 }
 0x18b   :  { %1957 = vmatprep.subr.mxu1 %v1183_v26  ;;  %v1247_v51 = vsel %vm1236_vm15, %v1213_v49, %v1215_v18 }
 0x18c   :  { %247 = vrot.lane.b32.xlu0 %v6513_v25, %s11753_s18  ;;  %1958 = vmatpush2.msra.mxu1 %v1184_v10 }
 0x18d   :  { %249 = vrot.lane.b32.xlu1 %v6527_v39, %s11753_s18  ;;  %v6786_v56 = vpop.permute.xlu0 %1216 }
 0x18e   :  { %v1081_v5 = vpop.permute.xlu1 %1080  ;;  %v1246_v48 = vsel %vm1236_vm15, %v1215_v18, %v6786_v56 }
 0x18f   :  { %2026 = vmatprep.subr.mxu0 %v1246_v48  ;;  %v1119_v1 = vsel %vm1106_vm13, %v6388_v60, %v1081_v5 }
 0x190   :  { %113 = vrot.lane.b32.xlu0 %v6497_v31, %s11736_s24  ;;  %2027 = vmatpush2.msra.mxu0 %v1247_v51 }
 0x191   :  { %182 = vrot.lane.b32.xlu1 %v6513_v25, %s11756_s19  ;;  %v1083_v17 = vpop.permute.xlu0 %1082 }
 0x192   :  { %v1150_v54 = vpop.permute.xlu1 %1149  ;;  %v1118_v61 = vsel %vm1106_vm13, %v1081_v5, %v1083_v17 }
 0x193   :  { %1959 = vmatprep.subr.mxu1 %v1118_v61  ;;  %v1182_v4 = vsel %vm11760_vm10, %v1148_v20, %v1150_v54  ;;  %vm11768_vm10 = vcmp.lt.s32.totalorder %v6002_v6, 95 }
 0x194   :  { %184 = vrot.lane.b32.xlu0 %v6527_v39, %s11756_s19  ;;  %1960 = vmatpush2.msra.mxu1 %v1119_v1 }
 0x195   :  { %115 = vrot.lane.b32.xlu1 %v6513_v25, %s11736_s24  ;;  %v6806_v49 = vpop.permute.xlu0 %1151  ;;  %1962 = vmatmul.mubr.f32.vlgmr.msra.gmra.mxu1 %v6402_v2 }
 0x196   :  { %v1085_v3 = vpop.permute.xlu1 %1084  ;;  %v1181_v60 = vsel %vm11759_vm11, %v1150_v54, %v6806_v49  ;;  %5226 = vmatprep.mubr.msk.f32.mxu1 %vm1822_vm1, %v6820_v22  ;;  %vm11766_vm11 = vmmov %vm11765_vm9 }
 0x197   :  { %2028 = vmatprep.subr.mxu0 %v1181_v60  ;;  %v1117_v5 = vsel %vm1106_vm13, %v1083_v17, %v1085_v3 }
 0x198   :  { %117 = vrot.lane.b32.xlu0 %v6527_v39, %s11736_s24  ;;  %2029 = vmatpush2.msra.mxu0 %v1182_v4 }
 0x199   :  { %316 = vrot.lane.b32.xlu1 %v6812_v55, %s11750_s17  ;;  %v6830_v18 = vpop.permute.xlu0 %1086 }
 0x19a   :  { %v1024_v26 = vpop.permute.xlu1 %1023  ;;  %v1116_v10 = vsel %vm1106_vm13, %v1085_v3, %v6830_v18 }
 0x19b   :  { %2030 = vmatprep.subr.mxu0 %v1116_v10  ;;  %v1050_v17 = vsel %vm1041_vm0, %v6423_v38, %v1024_v26 }
 0x19c   :  { %251 = vrot.lane.b32.xlu0 %v6812_v55, %s11753_s18  ;;  %2031 = vmatpush2.msra.mxu0 %v1117_v5 }
 0x19d   :  { %186 = vrot.lane.b32.xlu1 %v6812_v55, %s11756_s19  ;;  %v1026_v20 = vpop.permute.xlu0 %1025  ;;  %2033 = vmatmul.mubr.f32.vlgmr.msra.gmra.mxu0 %v6402_v2 }
 0x19e   :  { %v959_v48 = vpop.permute.xlu1 %958  ;;  %v1049_v51 = vsel %vm1041_vm0, %v1024_v26, %v1026_v20  ;;  %5227 = vmatprep.mubr.msk.f32.mxu0 %vm1822_vm1, %v6820_v22 }
 0x19f   :  { %2039 = vmatprep.subr.mxu1 %v1049_v51  ;;  %v985_v1 = vsel %vm976_vm2, %v6443_v32, %v959_v48 }
 0x1a0   :  { %119 = vrot.lane.b32.xlu0 %v6812_v55, %s11736_s24  ;;  %2040 = vmatpush1.msra.mxu1 %v1050_v17 }
 0x1a1   :  { %1283 = vrot.lane.b32.xlu1 %v6376_v35, %s11739_s27  ;;  %v961_v2 = vpop.permute.xlu0 %960 }
 0x1a2   :  { %v1028_v54 = vpop.permute.xlu1 %1027  ;;  %v984_v61 = vsel %vm976_vm2, %v959_v48, %v961_v2 }
 0x1a3   :  { %2041 = vmatprep.subr.mxu1 %v984_v61  ;;  %v1048_v4 = vsel %vm1041_vm0, %v1026_v20, %v1028_v54 }
 0x1a4   :  { %1285 = vrot.lane.b32.xlu0 %v6497_v31, %s11739_s27  ;;  %2042 = vmatpush1.msra.mxu1 %v985_v1 }
 0x1a5   :  { %1218 = vrot.lane.b32.xlu1 %v6376_v35, %s11740_s23  ;;  %v6862_v38 = vpop.permute.xlu0 %1029 }
 0x1a6   :  { %v894_v3 = vpop.permute.xlu1 %893  ;;  %v1047_v60 = vsel %vm1041_vm0, %v1028_v54, %v6862_v38 }
 0x1a7   :  { %2110 = vmatprep.subr.mxu0 %v1047_v60  ;;  %v920_v5 = vsel %vm911_vm3, %v6463_v13, %v894_v3 }
 0x1a8   :  { %1220 = vrot.lane.b32.xlu0 %v6497_v31, %s11740_s23  ;;  %2111 = vmatpush1.msra.mxu0 %v1048_v4 }
 0x1a9   :  { %1287 = vrot.lane.b32.xlu1 %v6513_v25, %s11739_s27  ;;  %v896_v32 = vpop.permute.xlu0 %895 }
 0x1aa   :  { %v963_v26 = vpop.permute.xlu1 %962  ;;  %v919_v10 = vsel %vm911_vm3, %v894_v3, %v896_v32 }
 0x1ab   :  { %2043 = vmatprep.subr.mxu1 %v919_v10  ;;  %v983_v17 = vsel %vm976_vm2, %v961_v2, %v963_v26 }
 0x1ac   :  { %1289 = vrot.lane.b32.xlu0 %v6527_v39, %s11739_s27  ;;  %2044 = vmatpush1.msra.mxu1 %v920_v5 }
 0x1ad   :  { %1153 = vrot.lane.b32.xlu1 %v6376_v35, %s11741_s29  ;;  %v6882_v20 = vpop.permute.xlu0 %964 }
 0x1ae   :  { %v829_v48 = vpop.permute.xlu1 %828  ;;  %v982_v51 = vsel %vm976_vm2, %v963_v26, %v6882_v20 }
 0x1af   :  { %2112 = vmatprep.subr.mxu0 %v982_v51  ;;  %v855_v1 = vsel %vm846_vm4, %v6483_v14, %v829_v48 }
 0x1b0   :  { %1155 = vrot.lane.b32.xlu0 %v6497_v31, %s11741_s29  ;;  %2113 = vmatpush1.msra.mxu0 %v983_v17  ;;  %v6936_v17 = vld [vmem:[%s11445_s0 + $0x60] sm:$0xff] }
 0x1b1   :  { %1222 = vrot.lane.b32.xlu1 %v6513_v25, %s11740_s23  ;;  %v831_v13 = vpop.permute.xlu0 %830 }
 0x1b2   :  { %v898_v54 = vpop.permute.xlu1 %897  ;;  %v854_v61 = vsel %vm846_vm4, %v829_v48, %v831_v13 }
 0x1b3   :  { %2045 = vmatprep.subr.mxu1 %v854_v61  ;;  %v918_v4 = vsel %vm911_vm3, %v896_v32, %v898_v54 }
 0x1b4   :  { %1224 = vrot.lane.b32.xlu0 %v6527_v39, %s11740_s23  ;;  %2046 = vmatpush1.msra.mxu1 %v855_v1 }
 0x1b5   :  { %1088 = vrot.lane.b32.xlu1 %v6376_v35, %s11742_s28  ;;  %v6902_v2 = vpop.permute.xlu0 %899 }
 0x1b6   :  { %v764_v3 = vpop.permute.xlu1 %763  ;;  %v917_v60 = vsel %vm911_vm3, %v898_v54, %v6902_v2 }
 0x1b7   :  { %2114 = vmatprep.subr.mxu0 %v917_v60  ;;  %v790_v10 = vsel %vm781_vm5, %v6508_v21, %v764_v3 }
 0x1b8   :  { %1090 = vrot.lane.b32.xlu0 %v6497_v31, %s11742_s28  ;;  %2115 = vmatpush1.msra.mxu0 %v918_v4 }
 0x1b9   :  { %1157 = vrot.lane.b32.xlu1 %v6513_v25, %s11741_s29  ;;  %v766_v14 = vpop.permute.xlu0 %765 }
 0x1ba   :  { %v833_v35 = vpop.permute.xlu1 %832  ;;  %v789_v26 = vsel %vm781_vm5, %v764_v3, %v766_v14  ;;  %v6952_v3 = vld [vmem:[%s11445_s0 + $0x68] sm:$0xff] }
 0x1bb   :  { %2047 = vmatprep.subr.mxu1 %v789_v26  ;;  %v853_v51 = vsel %vm846_vm4, %v831_v13, %v833_v35 }
 0x1bc   :  { %1159 = vrot.lane.b32.xlu0 %v6527_v39, %s11741_s29  ;;  %2048 = vmatpush1.msra.mxu1 %v790_v10 }
 0x1bd   :  { %1092 = vrot.lane.b32.xlu1 %v6513_v25, %s11742_s28  ;;  %v6922_v32 = vpop.permute.xlu0 %834 }
 0x1be   :  { %v699_v5 = vpop.permute.xlu1 %698  ;;  %v852_v48 = vsel %vm846_vm4, %v833_v35, %v6922_v32  ;;  %v6966_v35 = vld [vmem:[%s11445_s0 + $0x70] sm:$0xff] }
 0x1bf   :  { %2116 = vmatprep.subr.mxu0 %v852_v48  ;;  %v725_v13 = vsel %vm716_vm6, %v6538_v7, %v699_v5 }
 0x1c0   :  { %1094 = vrot.lane.b32.xlu0 %v6527_v39, %s11742_s28  ;;  %2117 = vmatpush1.msra.mxu0 %v853_v51 }
 0x1c1   :  { %1031 = vrot.lane.b32.xlu1 %v6812_v55, %s11761_s15  ;;  %v701_v21 = vpop.permute.xlu0 %700 }
 0x1c2   :  { %v768_v54 = vpop.permute.xlu1 %767  ;;  %v724_v61 = vsel %vm716_vm6, %v699_v5, %v701_v21 }
 0x1c3   :  { %2049 = vmatprep.subr.mxu1 %v724_v61  ;;  %v788_v7 = vsel %vm781_vm5, %v766_v14, %v768_v54 }
 0x1c4   :  { %1033 = vrot.lane.b32.xlu0 %v6936_v17, %s11761_s15  ;;  %2050 = vmatpush1.msra.mxu1 %v725_v13 }
 0x1c5   :  { %966 = vrot.lane.b32.xlu1 %v6812_v55, %s11762_s16  ;;  %v6947_v39 = vpop.permute.xlu0 %769 }
 0x1c6   :  { %v634_v1 = vpop.permute.xlu1 %633  ;;  %v787_v60 = vsel %vm781_vm5, %v768_v54, %v6947_v39 }
 0x1c7   :  { %2118 = vmatprep.subr.mxu0 %v787_v60  ;;  %v660_v14 = vsel %vm651_vm7, %v6558_v9, %v634_v1 }
 0x1c8   :  { %968 = vrot.lane.b32.xlu0 %v6936_v17, %s11762_s16  ;;  %2119 = vmatpush1.msra.mxu0 %v788_v7 }
 0x1c9   :  { %1035 = vrot.lane.b32.xlu1 %v6952_v3, %s11761_s15  ;;  %v636_v4 = vpop.permute.xlu0 %635 }
 0x1ca   :  { %v703_v26 = vpop.permute.xlu1 %702  ;;  %v659_v10 = vsel %vm651_vm7, %v634_v1, %v636_v4 }
 0x1cb   :  { %2051 = vmatprep.subr.mxu1 %v659_v10  ;;  %v723_v54 = vsel %vm716_vm6, %v701_v21, %v703_v26 }
 0x1cc   :  { %1037 = vrot.lane.b32.xlu0 %v6966_v35, %s11761_s15  ;;  %2052 = vmatpush1.msra.mxu1 %v660_v14 }
 0x1cd   :  { %901 = vrot.lane.b32.xlu1 %v6812_v55, %s11763_s30  ;;  %v6977_v5 = vpop.permute.xlu0 %704 }
 0x1ce   :  { %v569_v48 = vpop.permute.xlu1 %568  ;;  %v722_v51 = vsel %vm716_vm6, %v703_v26, %v6977_v5 }
 0x1cf   :  { %2120 = vmatprep.subr.mxu0 %v722_v51  ;;  %v595_v1 = vsel %vm11512_vm8, %v6578_v52, %v569_v48 }
 0x1d0   :  { %903 = vrot.lane.b32.xlu0 %v6936_v17, %s11763_s30  ;;  %2121 = vmatpush1.msra.mxu0 %v723_v54 }
 0x1d1   :  { %970 = vrot.lane.b32.xlu1 %v6952_v3, %s11762_s16  ;;  %v571_v9 = vpop.permute.xlu0 %570 }
 0x1d2   :  { %v638_v61 = vpop.permute.xlu1 %637  ;;  %v594_v13 = vsel %vm11512_vm8, %v569_v48, %v571_v9 }
 0x1d3   :  { %2053 = vmatprep.subr.mxu1 %v594_v13  ;;  %v658_v26 = vsel %vm651_vm7, %v636_v4, %v638_v61 }
 0x1d4   :  { %972 = vrot.lane.b32.xlu0 %v6966_v35, %s11762_s16  ;;  %2054 = vmatpush1.msra.mxu1 %v595_v1 }
 0x1d5   :  { %836 = vrot.lane.b32.xlu1 %v6812_v55, %s11764_s14  ;;  %v6997_v21 = vpop.permute.xlu0 %639 }
 0x1d6   :  { %v504_v60 = vpop.permute.xlu1 %503  ;;  %v657_v7 = vsel %vm651_vm7, %v638_v61, %v6997_v21 }
 0x1d7   :  { %2122 = vmatprep.subr.mxu0 %v657_v7  ;;  %v530_v48 = vsel %vm11766_vm11, %v6598_v41, %v504_v60 }
 0x1d8   :  { %838 = vrot.lane.b32.xlu0 %v6936_v17, %s11764_s14  ;;  %2123 = vmatpush1.msra.mxu0 %v658_v26 }
 0x1d9   :  { %905 = vrot.lane.b32.xlu1 %v6952_v3, %s11763_s30  ;;  %v506_v52 = vpop.permute.xlu0 %505 }
 0x1da   :  { %v573_v10 = vpop.permute.xlu1 %572  ;;  %v529_v14 = vsel %vm11765_vm9, %v504_v60, %v506_v52  ;;  %vm11769_vm9 = vmmov %vm11768_vm10 }
 0x1db   :  { %2055 = vmatprep.subr.mxu1 %v529_v14  ;;  %v593_v61 = vsel %vm11512_vm8, %v571_v9, %v573_v10 }
 0x1dc   :  { %907 = vrot.lane.b32.xlu0 %v6966_v35, %s11763_s30  ;;  %2056 = vmatpush1.msra.mxu1 %v530_v48 }
 0x1dd   :  { %771 = vrot.lane.b32.xlu1 %v6812_v55, %s11767_s22  ;;  %v7017_v4 = vpop.permute.xlu0 %574 }
 0x1de   :  { %v439_v51 = vpop.permute.xlu1 %438  ;;  %v592_v54 = vsel %vm11512_vm8, %v573_v10, %v7017_v4 }
 0x1df   :  { %2124 = vmatprep.subr.mxu0 %v592_v54  ;;  %v465_v60 = vsel %vm11769_vm9, %v6618_v46, %v439_v51  ;;  %vm11772_vm9 = vcmp.lt.s32.totalorder %v6002_v6, 96 }
 0x1e0   :  { %773 = vrot.lane.b32.xlu0 %v6936_v17, %s11767_s22  ;;  %2125 = vmatpush1.msra.mxu0 %v593_v61 }
 0x1e1   :  { %840 = vrot.lane.b32.xlu1 %v6952_v3, %s11764_s14  ;;  %v441_v41 = vpop.permute.xlu0 %440 }
 0x1e2   :  { %v508_v13 = vpop.permute.xlu1 %507  ;;  %v464_v1 = vsel %vm11768_vm10, %v439_v51, %v441_v41  ;;  %vm11771_vm10 = vmmov %vm11766_vm11 }
 0x1e3   :  { %2057 = vmatprep.subr.mxu1 %v464_v1  ;;  %v528_v10 = vsel %vm11771_vm10, %v506_v52, %v508_v13  ;;  %vm11774_vm10 = vcmp.lt.s32.totalorder %v6002_v6, 95 }
 0x1e4   :  { %842 = vrot.lane.b32.xlu0 %v6966_v35, %s11764_s14  ;;  %2058 = vmatpush1.msra.mxu1 %v465_v60 }
 0x1e5   :  { %706 = vrot.lane.b32.xlu1 %v6812_v55, %s11770_s12  ;;  %v7037_v9 = vpop.permute.xlu0 %509 }
 0x1e6   :  { %v374_v7 = vpop.permute.xlu1 %373  ;;  %v527_v26 = vsel %vm11766_vm11, %v508_v13, %v7037_v9  ;;  %vm11773_vm11 = vmmov %vm11772_vm9 }
 0x1e7   :  { %2126 = vmatprep.subr.mxu0 %v527_v26  ;;  %v400_v52 = vsel %vm11773_vm11, %v6633_v36, %v374_v7 }
 0x1e8   :  { %708 = vrot.lane.b32.xlu0 %v6936_v17, %s11770_s12  ;;  %2127 = vmatpush1.msra.mxu0 %v528_v10 }
 0x1e9   :  { %775 = vrot.lane.b32.xlu1 %v6952_v3, %s11767_s22 }
 0x1ea   :  { %v376_v46 = vpop.permute.xlu0 %375 }
 0x1eb   :  { %v443_v14 = vpop.permute.xlu1 %442  ;;  %v399_v48 = vsel %vm11772_vm9, %v374_v7, %v376_v46  ;;  %vm11775_vm9 = vmmov %vm11774_vm10 }
 0x1ec   :  { %777 = vrot.lane.b32.xlu0 %v6966_v35, %s11767_s22  ;;  %2059 = vmatprep.subr.mxu1 %v399_v48  ;;  %v463_v36 = vsel %vm11775_vm9, %v441_v41, %v443_v14  ;;  %vm11777_vm9 = vcmp.lt.s32.totalorder %v6002_v6, 125 }
 0x1ed   :  { %641 = vrot.lane.b32.xlu1 %v6812_v55, %s11743_s20  ;;  %2060 = vmatpush1.msra.mxu1 %v400_v52 }
 0x1ee   :  { %v7057_v51 = vpop.permute.xlu0 %444 }
 0x1ef   :  { %v311_v54 = vpop.permute.xlu1 %310  ;;  %v462_v61 = vsel %vm11774_vm10, %v443_v14, %v7057_v51  ;;  %vm11776_vm10 = vmmov %vm11773_vm11 }
 0x1f0   :  { %643 = vrot.lane.b32.xlu0 %v6936_v17, %s11743_s20  ;;  %v7067_v13 = vsel %vm326_vm12, %v6692_v0, %v311_v54  ;;  %2128 = vmatprep.subr.mxu0 %v462_v61 }
 0x1f1   :  { %710 = vrot.lane.b32.xlu1 %v6952_v3, %s11770_s12  ;;  %2061 = vmatprep.subr.mxu1 %v7067_v13 }
 0x1f2   :  { %2062 = vmatpush1.msra.mxu1 %v6713_v29  ;;  %2129 = vmatpush1.msra.mxu0 %v463_v36  ;;  %v378_v1 = vpop.permute.xlu0 %377 }
 0x1f3   :  { %v7075_v60 = vpop.permute.xlu1 %379  ;;  %v398_v7 = vsel %vm11773_vm11, %v376_v46, %v378_v1  ;;  %v5763_v46 = vmov 0   ;;  %vm11778_vm11 = vmmov %vm11777_vm9 }
 0x1f4   :  { %712 = vrot.lane.b32.xlu0 %v6966_v35, %s11770_s12  ;;  %v397_v0 = vsel %vm11776_vm10, %v378_v1, %v7075_v60  ;;  %5506 = vset.pattern.permute.xlu1 %v5763_v46  ;;  %vm11779_vm10 = vmmov %vm11777_vm9 }
 0x1f5   :  { %576 = vrot.lane.b32.xlu1 %v6812_v55, %s11744_s26  ;;  %2130 = vmatprep.subr.mxu0 %v397_v0  ;;  %v5555_v0 = vld [vmem:[%s11445_s0 + $0x38] sm:$0xff] }
 0x1f6   :  { %2131 = vmatpush1.msra.mxu0 %v398_v7  ;;  %v246_v29 = vpop.permute.xlu0 %245  ;;  %5400 = vset.pattern.permute.xlu0 %v5763_v46 }
 0x1f7   :  { %v313_v41 = vpop.permute.xlu1 %312  ;;  %v269_v26 = vsel %vm11777_vm9, %v6702_v19, %v246_v29  ;;  %vm11780_vm9 = vcmp.lt.s32.totalorder %v6002_v6, 127 }
 0x1f8   :  { %578 = vrot.lane.b32.xlu0 %v6936_v17, %s11744_s26  ;;  %2063 = vmatprep.subr.mxu1 %v269_v26 }
 0x1f9   :  { %645 = vrot.lane.b32.xlu1 %v6952_v3, %s11743_s20  ;;  %2064 = vmatpush1.msra.mxu1 %v6723_v42  ;;  %v333_v42 = vsel %vm326_vm12, %v311_v54, %v313_v41 }
 0x1fa   :  { %v7094_v10 = vpop.permute.xlu0 %314 }
 0x1fb   :  { %v181_v14 = vpop.permute.xlu1 %180  ;;  %v332_v48 = vsel %vm326_vm12, %v313_v41, %v7094_v10 }
 0x1fc   :  { %647 = vrot.lane.b32.xlu0 %v6966_v35, %s11743_s20  ;;  %v204_v19 = vsel %vm196_vm14, %v6704_v50, %v181_v14  ;;  %2132 = vmatprep.subr.mxu0 %v332_v48 }
 0x1fd   :  { %511 = vrot.lane.b32.xlu1 %v6812_v55, %s11746_s21  ;;  %2065 = vmatprep.subr.mxu1 %v204_v19 }
 0x1fe   :  { %2066 = vmatpush1.msra.mxu1 %v6735_v62  ;;  %2133 = vmatpush1.msra.mxu0 %v333_v42  ;;  %v248_v52 = vpop.permute.xlu0 %247 }
 0x1ff   :  { %v250_v61 = vpop.permute.xlu1 %249  ;;  %v268_v36 = vsel %vm11778_vm11, %v246_v29, %v248_v52  ;;  %vm11781_vm11 = vmmov %vm11780_vm9 }
 0x200   :  { %513 = vrot.lane.b32.xlu0 %v6936_v17, %s11746_s21  ;;  %v267_v50 = vsel %vm11779_vm10, %v248_v52, %v250_v61  ;;  %vm11782_vm10 = vmmov %vm11780_vm9 }
 0x201   :  { %580 = vrot.lane.b32.xlu1 %v6952_v3, %s11744_s26  ;;  %2134 = vmatprep.subr.mxu0 %v267_v50 }
 0x202   :  { %2135 = vmatpush1.msra.mxu0 %v268_v36  ;;  %v114_v54 = vpop.permute.xlu0 %113 }
 0x203   :  { %v183_v1 = vpop.permute.xlu1 %182  ;;  %v139_v62 = vsel %vm11780_vm9, %v6718_v45, %v114_v54  ;;  %v5556_v45 = vld [vmem:[%s11445_s0 + $0x30] sm:$0xff]  ;;  %vm11783_vm9 = vcmp.lt.s32.totalorder %v6002_v6, 125 }
 0x204   :  { %582 = vrot.lane.b32.xlu0 %v6966_v35, %s11744_s26  ;;  %2067 = vmatprep.subr.mxu1 %v139_v62 }
 0x205   :  { %446 = vrot.lane.b32.xlu1 %v6812_v55, %s11733_s25  ;;  %2068 = vmatpush1.msra.mxu1 %v6743_v12  ;;  %v203_v12 = vsel %vm196_vm14, %v181_v14, %v183_v1 }
 0x206   :  { %v185_v7 = vpop.permute.xlu0 %184  ;;  %2069 = vmatprep.subr.mxu1 %v5555_v0 }
 0x207   :  { %v116_v29 = vpop.permute.xlu1 %115  ;;  %2070 = vmatpush1.msra.mxu1 %v5556_v45  ;;  %v202_v41 = vsel %vm196_vm14, %v183_v1, %v185_v7 }
 0x208   :  { %448 = vrot.lane.b32.xlu0 %v6936_v17, %s11733_s25  ;;  %2085 = vmatprep.subr.mxu1 %v333_v42 }
 0x209   :  { %515 = vrot.lane.b32.xlu1 %v6952_v3, %s11746_s21  ;;  %2136 = vmatprep.subr.mxu0 %v202_v41 }
 0x20a   :  { %2086 = vmatpush2.msra.mxu1 %v7067_v13  ;;  %2137 = vmatpush1.msra.mxu0 %v203_v12  ;;  %v118_v46 = vpop.permute.xlu0 %117  ;;  %v138_v13 = vsel %vm11782_vm10, %v114_v54, %v116_v29 }
 0x20b   :  { %2087 = vmatprep.subr.mxu1 %v268_v36  ;;  %v7140_v52 = vpop.permute.xlu1 %316  ;;  %v137_v45 = vsel %vm11781_vm11, %v116_v29, %v118_v46  ;;  %v5557_v36 = vld [vmem:[%s11445_s0 + $0x40] sm:$0xff]  ;;  %vm11784_vm11 = vmmov %vm11782_vm10  ;;  %vm11785_vm10 = vcmp.lt.s32.totalorder %v6002_v6, 28  ;;  %v7208_v29 = vld [vmem:[%s11445_s0 + $0x50] sm:$0xff] }
 0x20c   :  { %2088 = vmatpush2.msra.mxu1 %v269_v26  ;;  %517 = vrot.lane.b32.xlu0 %v6966_v35, %s11746_s21  ;;  %v7162_v26 = vsel %vm326_vm12, %v7094_v10, %v7140_v52 }
 0x20d   :  { %381 = vrot.lane.b32.xlu1 %v6812_v55, %s11734_s6  ;;  %2089 = vmatprep.subr.mxu1 %v203_v12 }
 0x20e   :  { %2138 = vmatprep.subr.mxu0 %v137_v45  ;;  %2090 = vmatpush2.msra.mxu1 %v204_v19  ;;  %v7150_v14 = vpop.permute.xlu0 %251 }
 0x20f   :  { %2139 = vmatpush1.msra.mxu0 %v138_v13  ;;  %2091 = vmatprep.subr.mxu1 %v138_v13  ;;  %v7152_v42 = vpop.permute.xlu1 %186 }
 0x210   :  { %2140 = vmatprep.subr.mxu0 %v6513_v25  ;;  %2092 = vmatpush2.msra.mxu1 %v139_v62  ;;  %v7183_v10 = vsel %vm196_vm14, %v185_v7, %v7152_v42 }
 0x211   :  { %2141 = vmatpush1.msra.mxu0 %v6497_v31  ;;  %383 = vrot.lane.b32.xlu0 %v6936_v17, %s11734_s6  ;;  %v7172_v31 = vsel %vm11783_vm9, %v250_v61, %v7150_v14  ;;  %vm11786_vm9 = vmmov %vm11785_vm10 }
 0x212   :  { %450 = vrot.lane.b32.xlu1 %v6952_v3, %s11733_s25  ;;  %2156 = vmatprep.subr.mxu0 %v7162_v26  ;;  %v7167_v19 = vpop.permute.xlu0 %119 }
 0x213   :  { %2157 = vmatpush2.msra.mxu0 %v332_v48  ;;  %v1284_v25 = vpop.permute.xlu1 %1283  ;;  %2093 = vmatprep.subr.mxu1 %v5557_v36  ;;  %v7191_v61 = vsel %vm11784_vm11, %v118_v46, %v7167_v19  ;;  %vm11787_vm11 = vmmov %vm11786_vm9 }
 0x214   :  { %2158 = vmatprep.subr.mxu0 %v7172_v31  ;;  %2094 = vmatpush2.msra.mxu1 %v5555_v0  ;;  %v1310_v1 = vsel %vm11786_vm9, %v6766_v58, %v1284_v25 }
 0x215   :  { %2159 = vmatpush2.msra.mxu0 %v267_v50  ;;  %452 = vrot.lane.b32.xlu0 %v6966_v35, %s11733_s25 }
 0x216   :  { %318 = vrot.lane.b32.xlu1 %v6936_v17, %s11750_s17  ;;  %2160 = vmatprep.subr.mxu0 %v7183_v10  ;;  %v1286_v48 = vpop.permute.xlu0 %1285 }
 0x217   :  { %2161 = vmatpush2.msra.mxu0 %v202_v41  ;;  %v1219_v50 = vpop.permute.xlu1 %1218  ;;  %v1309_v54 = vsel %vm11785_vm10, %v1284_v25, %v1286_v48  ;;  %v5559_v41 = vld [vmem:[%s11445_s0 + $0x48] sm:$0xff]  ;;  %vm11788_vm10 = vmmov %vm11786_vm9  ;;  %vm11789_vm9 = vcmp.lt.s32.totalorder %v6002_v6, 30 }
 0x218   :  { %2162 = vmatprep.subr.mxu0 %v7191_v61  ;;  %2095 = vmatprep.subr.mxu1 %v1309_v54  ;;  %v1245_v58 = vsel %vm1236_vm15, %v6786_v56, %v1219_v50 }
 0x219   :  { %2163 = vmatpush2.msra.mxu0 %v137_v45  ;;  %385 = vrot.lane.b32.xlu0 %v6952_v3, %s11734_s6 }
 0x21a   :  { %387 = vrot.lane.b32.xlu1 %v6966_v35, %s11734_s6  ;;  %2096 = vmatpush2.msra.mxu1 %v1310_v1  ;;  %v1221_v62 = vpop.permute.xlu0 %1220 }
 0x21b   :  { %v1288_v7 = vpop.permute.xlu1 %1287  ;;  %v1244_v0 = vsel %vm1236_vm15, %v1219_v50, %v1221_v62  ;;  %2164 = vmatprep.subr.mxu0 %v7208_v29 }
 0x21c   :  { %2097 = vmatprep.subr.mxu1 %v1244_v0  ;;  %2165 = vmatpush2.msra.mxu0 %v5559_v41  ;;  %v1308_v56 = vsel %vm11788_vm10, %v1286_v48, %v1288_v7  ;;  %vm11791_vm10 = vmmov %vm11789_vm9 }
 0x21d   :  { %253 = vrot.lane.b32.xlu0 %v6936_v17, %s11753_s18  ;;  %2098 = vmatpush2.msra.mxu1 %v1245_v58 }
 0x21e   :  { %320 = vrot.lane.b32.xlu1 %v6952_v3, %s11750_s17  ;;  %v7221_v12 = vpop.permute.xlu0 %1289 }
 0x21f   :  { %v1154_v46 = vpop.permute.xlu1 %1153  ;;  %v1307_v45 = vsel %vm11787_vm11, %v1288_v7, %v7221_v12  ;;  %vm11790_vm11 = vmmov %vm11789_vm9 }
 0x220   :  { %2166 = vmatprep.subr.mxu0 %v1307_v45  ;;  %v1180_v50 = vsel %vm11790_vm11, %v6806_v49, %v1154_v46  ;;  %vm11792_vm11 = vcmp.lt.s32.totalorder %v6002_v6, 94 }
 0x221   :  { %322 = vrot.lane.b32.xlu0 %v6966_v35, %s11750_s17  ;;  %2167 = vmatpush2.msra.mxu0 %v1308_v56 }
 0x222   :  { %188 = vrot.lane.b32.xlu1 %v6936_v17, %s11756_s19  ;;  %v1156_v13 = vpop.permute.xlu0 %1155 }
 0x223   :  { %v1223_v25 = vpop.permute.xlu1 %1222  ;;  %v1179_v36 = vsel %vm11789_vm9, %v1154_v46, %v1156_v13  ;;  %v7266_v46 = vld [vmem:[%s11446_s1] sm:$0xff] }
 0x224   :  { %2099 = vmatprep.subr.mxu1 %v1179_v36  ;;  %v1243_v7 = vsel %vm1236_vm15, %v1221_v62, %v1223_v25 }
 0x225   :  { %255 = vrot.lane.b32.xlu0 %v6952_v3, %s11753_s18  ;;  %2100 = vmatpush2.msra.mxu1 %v1180_v50 }
 0x226   :  { %257 = vrot.lane.b32.xlu1 %v6966_v35, %s11753_s18  ;;  %v7241_v48 = vpop.permute.xlu0 %1224 }
 0x227   :  { %v1089_v54 = vpop.permute.xlu1 %1088  ;;  %v1242_v1 = vsel %vm1236_vm15, %v1223_v25, %v7241_v48 }
 0x228   :  { %2168 = vmatprep.subr.mxu0 %v1242_v1  ;;  %v1115_v41 = vsel %vm1106_vm13, %v6830_v18, %v1089_v54  ;;  %v7272_v18 = vld [vmem:[%s11445_s0 + $0x78] sm:$0xff] }
 0x229   :  { %121 = vrot.lane.b32.xlu0 %v6936_v17, %s11736_s24  ;;  %2169 = vmatpush2.msra.mxu0 %v1243_v7 }
 0x22a   :  { %190 = vrot.lane.b32.xlu1 %v6952_v3, %s11756_s19  ;;  %v1091_v49 = vpop.permute.xlu0 %1090 }
 0x22b   :  { %v1158_v0 = vpop.permute.xlu1 %1157  ;;  %v1114_v58 = vsel %vm1106_vm13, %v1089_v54, %v1091_v49 }
 0x22c   :  { %2101 = vmatprep.subr.mxu1 %v1114_v58  ;;  %v1178_v25 = vsel %vm11789_vm9, %v1156_v13, %v1158_v0  ;;  %vm11794_vm9 = vcmp.lt.s32.totalorder %v6002_v6, 95 }
 0x22d   :  { %192 = vrot.lane.b32.xlu0 %v6966_v35, %s11756_s19  ;;  %2102 = vmatpush2.msra.mxu1 %v1115_v41 }
 0x22e   :  { %123 = vrot.lane.b32.xlu1 %v6952_v3, %s11736_s24  ;;  %v7261_v62 = vpop.permute.xlu0 %1159  ;;  %2104 = vmatmul.mubr.f32.vlgmr.msra.gmra.mxu1 %v7266_v46 }
 0x22f   :  { %v1093_v45 = vpop.permute.xlu1 %1092  ;;  %v1177_v56 = vsel %vm11791_vm10, %v1158_v0, %v7261_v62  ;;  %5228 = vmatprep.mubr.msk.f32.mxu1 %vm1822_vm1, %v6820_v22  ;;  %vm11793_vm10 = vmmov %vm11792_vm11 }
 0x230   :  { %2170 = vmatprep.subr.mxu0 %v1177_v56  ;;  %v1113_v1 = vsel %vm1106_vm13, %v1091_v49, %v1093_v45 }
 0x231   :  { %125 = vrot.lane.b32.xlu0 %v6966_v35, %s11736_s24  ;;  %2171 = vmatpush2.msra.mxu0 %v1178_v25 }
 0x232   :  { %324 = vrot.lane.b32.xlu1 %v7272_v18, %s11750_s17  ;;  %v7285_v36 = vpop.permute.xlu0 %1094 }
 0x233   :  { %v1032_v50 = vpop.permute.xlu1 %1031  ;;  %v1112_v54 = vsel %vm1106_vm13, %v1093_v45, %v7285_v36 }
 0x234   :  { %2172 = vmatprep.subr.mxu0 %v1112_v54  ;;  %v1046_v49 = vsel %vm1041_vm0, %v6862_v38, %v1032_v50 }
 0x235   :  { %259 = vrot.lane.b32.xlu0 %v7272_v18, %s11753_s18  ;;  %2173 = vmatpush2.msra.mxu0 %v1113_v1 }
 0x236   :  { %194 = vrot.lane.b32.xlu1 %v7272_v18, %s11756_s19  ;;  %v1034_v13 = vpop.permute.xlu0 %1033  ;;  %2175 = vmatmul.mubr.f32.vlgmr.msra.gmra.mxu0 %v7266_v46 }
 0x237   :  { %v967_v7 = vpop.permute.xlu1 %966  ;;  %v1045_v0 = vsel %vm1041_vm0, %v1032_v50, %v1034_v13  ;;  %5229 = vmatprep.mubr.msk.f32.mxu0 %vm1822_vm1, %v6820_v22 }
 0x238   :  { %2181 = vmatprep.subr.mxu1 %v1045_v0  ;;  %v981_v22 = vsel %vm976_vm2, %v6882_v20, %v967_v7 }
 0x239   :  { %127 = vrot.lane.b32.xlu0 %v7272_v18, %s11736_s24  ;;  %2182 = vmatpush1.msra.mxu1 %v1046_v49 }
 0x23a   :  { %1291 = vrot.lane.b32.xlu1 %v6812_v55, %s11739_s27  ;;  %v969_v58 = vpop.permute.xlu0 %968 }
 0x23b   :  { %v1036_v41 = vpop.permute.xlu1 %1035  ;;  %v980_v45 = vsel %vm976_vm2, %v967_v7, %v969_v58 }
 0x23c   :  { %2183 = vmatprep.subr.mxu1 %v980_v45  ;;  %v1044_v50 = vsel %vm1041_vm0, %v1034_v13, %v1036_v41 }
 0x23d   :  { %1293 = vrot.lane.b32.xlu0 %v6936_v17, %s11739_s27  ;;  %2184 = vmatpush1.msra.mxu1 %v981_v22 }
 0x23e   :  { %1226 = vrot.lane.b32.xlu1 %v6812_v55, %s11740_s23  ;;  %v7317_v38 = vpop.permute.xlu0 %1037 }
 0x23f   :  { %v902_v56 = vpop.permute.xlu1 %901  ;;  %v1043_v25 = vsel %vm1041_vm0, %v1036_v41, %v7317_v38 }
 0x240   :  { %2252 = vmatprep.subr.mxu0 %v1043_v25  ;;  %v916_v7 = vsel %vm911_vm3, %v6902_v2, %v902_v56 }
 0x241   :  { %1228 = vrot.lane.b32.xlu0 %v6936_v17, %s11740_s23  ;;  %2253 = vmatpush1.msra.mxu0 %v1044_v50 }
 0x242   :  { %1295 = vrot.lane.b32.xlu1 %v6952_v3, %s11739_s27  ;;  %v904_v20 = vpop.permute.xlu0 %903 }
 0x243   :  { %v971_v54 = vpop.permute.xlu1 %970  ;;  %v915_v1 = vsel %vm911_vm3, %v902_v56, %v904_v20 }
 0x244   :  { %2185 = vmatprep.subr.mxu1 %v915_v1  ;;  %v979_v41 = vsel %vm976_vm2, %v969_v58, %v971_v54 }
 0x245   :  { %1297 = vrot.lane.b32.xlu0 %v6966_v35, %s11739_s27  ;;  %2186 = vmatpush1.msra.mxu1 %v916_v7 }
 0x246   :  { %1161 = vrot.lane.b32.xlu1 %v6812_v55, %s11741_s29  ;;  %v7337_v13 = vpop.permute.xlu0 %972 }
 0x247   :  { %v837_v0 = vpop.permute.xlu1 %836  ;;  %v978_v49 = vsel %vm976_vm2, %v971_v54, %v7337_v13 }
 0x248   :  { %2254 = vmatprep.subr.mxu0 %v978_v49  ;;  %v851_v56 = vsel %vm846_vm4, %v6922_v32, %v837_v0 }
 0x249   :  { %1163 = vrot.lane.b32.xlu0 %v6936_v17, %s11741_s29  ;;  %2255 = vmatpush1.msra.mxu0 %v979_v41 }
 0x24a   :  { %1230 = vrot.lane.b32.xlu1 %v6952_v3, %s11740_s23  ;;  %v839_v2 = vpop.permute.xlu0 %838 }
 0x24b   :  { %v906_v45 = vpop.permute.xlu1 %905  ;;  %v850_v22 = vsel %vm846_vm4, %v837_v0, %v839_v2 }
 0x24c   :  { %2187 = vmatprep.subr.mxu1 %v850_v22  ;;  %v914_v54 = vsel %vm911_vm3, %v904_v20, %v906_v45 }
 0x24d   :  { %1232 = vrot.lane.b32.xlu0 %v6966_v35, %s11740_s23  ;;  %2188 = vmatpush1.msra.mxu1 %v851_v56 }
 0x24e   :  { %1096 = vrot.lane.b32.xlu1 %v6812_v55, %s11742_s28  ;;  %v7357_v58 = vpop.permute.xlu0 %907 }
 0x24f   :  { %v772_v25 = vpop.permute.xlu1 %771  ;;  %v913_v50 = vsel %vm911_vm3, %v906_v45, %v7357_v58 }
 0x250   :  { %2256 = vmatprep.subr.mxu0 %v913_v50  ;;  %v786_v7 = vsel %vm781_vm5, %v6947_v39, %v772_v25 }
 0x251   :  { %1098 = vrot.lane.b32.xlu0 %v6936_v17, %s11742_s28  ;;  %2257 = vmatpush1.msra.mxu0 %v914_v54 }
 0x252   :  { %1165 = vrot.lane.b32.xlu1 %v6952_v3, %s11741_s29  ;;  %v774_v32 = vpop.permute.xlu0 %773 }
 0x253   :  { %v841_v55 = vpop.permute.xlu1 %840  ;;  %v785_v1 = vsel %vm781_vm5, %v772_v25, %v774_v32 }
 0x254   :  { %2189 = vmatprep.subr.mxu1 %v785_v1  ;;  %v849_v41 = vsel %vm846_vm4, %v839_v2, %v841_v55 }
 0x255   :  { %1167 = vrot.lane.b32.xlu0 %v6966_v35, %s11741_s29  ;;  %2190 = vmatpush1.msra.mxu1 %v786_v7 }
 0x256   :  { %1100 = vrot.lane.b32.xlu1 %v6952_v3, %s11742_s28  ;;  %v7377_v20 = vpop.permute.xlu0 %842 }
 0x257   :  { %v707_v0 = vpop.permute.xlu1 %706  ;;  %v848_v49 = vsel %vm846_vm4, %v841_v55, %v7377_v20 }
 0x258   :  { %2258 = vmatprep.subr.mxu0 %v848_v49  ;;  %v721_v56 = vsel %vm716_vm6, %v6977_v5, %v707_v0 }
 0x259   :  { %1102 = vrot.lane.b32.xlu0 %v6966_v35, %s11742_s28  ;;  %2259 = vmatpush1.msra.mxu0 %v849_v41 }
 0x25a   :  { %1039 = vrot.lane.b32.xlu1 %v7272_v18, %s11761_s15  ;;  %v709_v39 = vpop.permute.xlu0 %708  ;;  %s5768_s15 = smov 111  }
 0x25b   :  { %v776_v45 = vpop.permute.xlu1 %775  ;;  %v720_v22 = vsel %vm716_vm6, %v707_v0, %v709_v39 }
 0x25c   :  { %2191 = vmatprep.subr.mxu1 %v720_v22  ;;  %v784_v54 = vsel %vm781_vm5, %v774_v32, %v776_v45 }
 0x25d   :  { %974 = vrot.lane.b32.xlu0 %v7272_v18, %s11762_s16  ;;  %2192 = vmatpush1.msra.mxu1 %v721_v56 }
 0x25e   :  { %909 = vrot.lane.b32.xlu1 %v7272_v18, %s11763_s30  ;;  %v7397_v2 = vpop.permute.xlu0 %777 }
 0x25f   :  { %v642_v25 = vpop.permute.xlu1 %641  ;;  %v783_v50 = vsel %vm781_vm5, %v776_v45, %v7397_v2 }
 0x260   :  { %2260 = vmatprep.subr.mxu0 %v783_v50  ;;  %v656_v7 = vsel %vm651_vm7, %v6997_v21, %v642_v25 }
 0x261   :  { %844 = vrot.lane.b32.xlu0 %v7272_v18, %s11764_s14  ;;  %2261 = vmatpush1.msra.mxu0 %v784_v54 }
 0x262   :  { %779 = vrot.lane.b32.xlu1 %v7272_v18, %s11767_s22  ;;  %v644_v5 = vpop.permute.xlu0 %643 }
 0x263   :  { %v711_v55 = vpop.permute.xlu1 %710  ;;  %v655_v1 = vsel %vm651_vm7, %v642_v25, %v644_v5 }
 0x264   :  { %2193 = vmatprep.subr.mxu1 %v655_v1  ;;  %v719_v41 = vsel %vm716_vm6, %v709_v39, %v711_v55 }
 0x265   :  { %714 = vrot.lane.b32.xlu0 %v7272_v18, %s11770_s12  ;;  %2194 = vmatpush1.msra.mxu1 %v656_v7 }
 0x266   :  { %649 = vrot.lane.b32.xlu1 %v7272_v18, %s11743_s20  ;;  %v7417_v32 = vpop.permute.xlu0 %712 }
 0x267   :  { %v577_v0 = vpop.permute.xlu1 %576  ;;  %v718_v49 = vsel %vm716_vm6, %v711_v55, %v7417_v32 }
 0x268   :  { %2262 = vmatprep.subr.mxu0 %v718_v49  ;;  %v591_v56 = vsel %vm11512_vm8, %v7017_v4, %v577_v0 }
 0x269   :  { %584 = vrot.lane.b32.xlu0 %v7272_v18, %s11744_s26  ;;  %2263 = vmatpush1.msra.mxu0 %v719_v41 }
 0x26a   :  { %519 = vrot.lane.b32.xlu1 %v7272_v18, %s11746_s21  ;;  %v579_v21 = vpop.permute.xlu0 %578 }
 0x26b   :  { %v646_v45 = vpop.permute.xlu1 %645  ;;  %v590_v22 = vsel %vm11512_vm8, %v577_v0, %v579_v21  ;;  %v1816_v0 = vld [vmem:[%s11447_s2] sm:$0xff]  ;;  %s5765_s2 = smov 108  }
 0x26c   :  { %2195 = vmatprep.subr.mxu1 %v590_v22  ;;  %v654_v54 = vsel %vm651_vm7, %v644_v5, %v646_v45 }
 0x26d   :  { %454 = vrot.lane.b32.xlu0 %v7272_v18, %s11733_s25  ;;  %2196 = vmatpush1.msra.mxu1 %v591_v56 }
 0x26e   :  { %389 = vrot.lane.b32.xlu1 %v7272_v18, %s11734_s6  ;;  %v7437_v39 = vpop.permute.xlu0 %647 }
 0x26f   :  { %v512_v25 = vpop.permute.xlu1 %511  ;;  %v653_v50 = vsel %vm651_vm7, %v646_v45, %v7437_v39 }
 0x270   :  { %2264 = vmatprep.subr.mxu0 %v653_v50  ;;  %v526_v7 = vsel %vm11793_vm10, %v7037_v9, %v512_v25 }
 0x271   :  { %1299 = vrot.lane.b32.xlu0 %v7272_v18, %s11739_s27  ;;  %2265 = vmatpush1.msra.mxu0 %v654_v54 }
 0x272   :  { %1234 = vrot.lane.b32.xlu1 %v7272_v18, %s11740_s23  ;;  %v514_v4 = vpop.permute.xlu0 %513 }
 0x273   :  { %v581_v55 = vpop.permute.xlu1 %580  ;;  %v525_v1 = vsel %vm11792_vm11, %v512_v25, %v514_v4  ;;  %vm11795_vm11 = vmmov %vm11794_vm9 }
 0x274   :  { %2197 = vmatprep.subr.mxu1 %v525_v1  ;;  %v589_v9 = vsel %vm11512_vm8, %v579_v21, %v581_v55 }
 0x275   :  { %1169 = vrot.lane.b32.xlu0 %v7272_v18, %s11741_s29  ;;  %2198 = vmatpush1.msra.mxu1 %v526_v7  ;;  %s5767_s29 = smov 110  }
 0x276   :  { %1104 = vrot.lane.b32.xlu1 %v7272_v18, %s11742_s28  ;;  %v7457_v5 = vpop.permute.xlu0 %582  ;;  %s5766_s28 = smov 109  }
 0x277   :  { %v447_v49 = vpop.permute.xlu1 %446  ;;  %v588_v41 = vsel %vm11512_vm8, %v581_v55, %v7457_v5  ;;  %vm11796_vm8 = vmmov %vm11793_vm10 }
 0x278   :  { %2266 = vmatprep.subr.mxu0 %v588_v41  ;;  %v461_v25 = vsel %vm11795_vm11, %v7057_v51, %v447_v49 }
 0x279   :  { %1819 = vperm.xlu0 %5400, %v1816_v0   ;;  %2267 = vmatpush1.msra.mxu0 %v589_v9 }
 0x27a   :  { %v449_v45 = vpop.permute.xlu0 %448 }
 0x27b   :  { %v516_v22 = vpop.permute.xlu1 %515  ;;  %v460_v56 = vsel %vm11794_vm9, %v447_v49, %v449_v45  ;;  %vm11797_vm9 = vcmp.lt.s32.totalorder %v6002_v6, 96 }
 0x27c   :  { %2199 = vmatprep.subr.mxu1 %v460_v56  ;;  %v524_v55 = vsel %vm11796_vm8, %v514_v4, %v516_v22  ;;  %vm11798_vm11 = vmmov %vm11797_vm9 }
 0x27d   :  { %2200 = vmatpush1.msra.mxu1 %v461_v25 }
 0x27e   :  { %v7472_v50 = vpop.permute.xlu0 %517 }
 0x27f   :  { %v382_v54 = vpop.permute.xlu1 %381  ;;  %v523_v21 = vsel %vm11793_vm10, %v516_v22, %v7472_v50  ;;  %vm11799_vm10 = vcmp.lt.s32.totalorder %v6002_v6, 95 }
 0x280   :  { %2268 = vmatprep.subr.mxu0 %v523_v21  ;;  %v396_v51 = vsel %vm11798_vm11, %v7075_v60, %v382_v54  ;;  %vm11800_vm8 = vmmov %vm11799_vm10 }
 0x281   :  { %2269 = vmatpush1.msra.mxu0 %v524_v55  ;;  %vm11801_vm11 = vmmov %vm11797_vm9 }
 0x283   :  { %v384_v1 = vpop.permute.xlu0 %383 }
 0x284   :  { %v451_v7 = vpop.permute.xlu1 %450  ;;  %v395_v0 = vsel %vm11797_vm9, %v382_v54, %v384_v1 }
 0x285   :  { %2201 = vmatprep.subr.mxu1 %v395_v0  ;;  %v459_v22 = vsel %vm11800_vm8, %v449_v45, %v451_v7 }
 0x286   :  { %2202 = vmatpush1.msra.mxu1 %v396_v51 }
 0x287   :  { %v7484_v49 = vpop.permute.xlu0 %452 }
 0x288   :  { %v319_v41 = vpop.permute.xlu1 %318  ;;  %v458_v9 = vsel %vm11799_vm10, %v451_v7, %v7484_v49  ;;  %vm11802_vm10 = vcmp.lt.s32.totalorder %v6002_v6, 125 }
 0x289   :  { %v330_v4 = vsel %vm326_vm12, %v7140_v52, %v319_v41  ;;  %2270 = vmatprep.subr.mxu0 %v458_v9  ;;  %vm11803_vm8 = vmmov %vm11802_vm10 }
 0x28a   :  { %2203 = vmatprep.subr.mxu1 %v330_v4  ;;  %2271 = vmatpush1.msra.mxu0 %v459_v22 }
 0x28b   :  { %2204 = vmatpush1.msra.mxu1 %v7162_v26  ;;  %v386_v60 = vpop.permute.xlu0 %385 }
 0x28c   :  { %v7495_v56 = vpop.permute.xlu1 %387  ;;  %v394_v25 = vsel %vm11797_vm9, %v384_v1, %v386_v60  ;;  %vm11804_vm9 = vmmov %vm11803_vm8 }
 0x28d   :  { %v393_v54 = vsel %vm11801_vm11, %v386_v60, %v7495_v56  ;;  %vm11805_vm11 = vcmp.lt.s32.totalorder %v6002_v6, 127  ;;  %v5561_v60 = vld [vmem:[%s11445_s0 + $0x58] sm:$0xff] }
 0x28e   :  { %2272 = vmatprep.subr.mxu0 %v393_v54 }
 0x28f   :  { %2273 = vmatpush1.msra.mxu0 %v394_v25  ;;  %v254_v52 = vpop.permute.xlu0 %253 }
 0x290   :  { %v321_v21 = vpop.permute.xlu1 %320  ;;  %v265_v45 = vsel %vm11802_vm10, %v7150_v14, %v254_v52  ;;  %vm11806_vm10 = vmmov %vm11805_vm11 }
 0x291   :  { %2205 = vmatprep.subr.mxu1 %v265_v45  ;;  %v329_v0 = vsel %vm326_vm12, %v319_v41, %v321_v21 }
 0x292   :  { %2206 = vmatpush1.msra.mxu1 %v7172_v31 }
 0x293   :  { %v323_v26 = vpop.permute.xlu0 %322 }
 0x294   :  { %v189_v55 = vpop.permute.xlu1 %188  ;;  %v328_v1 = vsel %vm326_vm12, %v321_v21, %v323_v26 }
 0x295   :  { %v200_v7 = vsel %vm196_vm14, %v7152_v42, %v189_v55  ;;  %2274 = vmatprep.subr.mxu0 %v328_v1 }
 0x296   :  { %2207 = vmatprep.subr.mxu1 %v200_v7  ;;  %2275 = vmatpush1.msra.mxu0 %v329_v0 }
 0x297   :  { %2208 = vmatpush1.msra.mxu1 %v7183_v10  ;;  %v256_v14 = vpop.permute.xlu0 %255 }
 0x298   :  { %v258_v51 = vpop.permute.xlu1 %257  ;;  %v264_v31 = vsel %vm11803_vm8, %v254_v52, %v256_v14  ;;  %vm11807_vm8 = vmmov %vm11806_vm10 }
 0x299   :  { %v263_v9 = vsel %vm11804_vm9, %v256_v14, %v258_v51 }
 0x29a   :  { %2276 = vmatprep.subr.mxu0 %v263_v9 }
 0x29b   :  { %2277 = vmatpush1.msra.mxu0 %v264_v31  ;;  %v122_v22 = vpop.permute.xlu0 %121 }
 0x29c   :  { %v191_v42 = vpop.permute.xlu1 %190  ;;  %v135_v41 = vsel %vm11805_vm11, %v7167_v19, %v122_v22  ;;  %vm11808_vm11 = vmmov %vm11807_vm8 }
 0x29d   :  { %2209 = vmatprep.subr.mxu1 %v135_v41  ;;  %v199_v19 = vsel %vm196_vm14, %v189_v55, %v191_v42 }
 0x29e   :  { %2210 = vmatpush1.msra.mxu1 %v7191_v61 }
 0x29f   :  { %v193_v10 = vpop.permute.xlu0 %192  ;;  %2211 = vmatprep.subr.mxu1 %v5561_v60 }
 0x2a0   :  { %v124_v25 = vpop.permute.xlu1 %123  ;;  %2212 = vmatpush1.msra.mxu1 %v7208_v29  ;;  %v198_v54 = vsel %vm196_vm14, %v191_v42, %v193_v10 }
 0x2a1   :  { %2227 = vmatprep.subr.mxu1 %v329_v0  ;;  %2278 = vmatprep.subr.mxu0 %v198_v54  ;;  %v134_v29 = vsel %vm11807_vm8, %v122_v22, %v124_v25 }
 0x2a2   :  { %2228 = vmatpush2.msra.mxu1 %v330_v4  ;;  %2279 = vmatpush1.msra.mxu0 %v199_v19 }
 0x2a3   :  { %v126_v61 = vpop.permute.xlu0 %125  ;;  %2229 = vmatprep.subr.mxu1 %v264_v31 }
 0x2a4   :  { %v7530_v52 = vpop.permute.xlu1 %324  ;;  %2230 = vmatpush2.msra.mxu1 %v265_v45  ;;  %v133_v21 = vsel %vm11806_vm10, %v124_v25, %v126_v61  ;;  %vm11809_vm10 = vcmp.lt.s32.totalorder %v6002_v6, 28 }
 0x2a5   :  { %2231 = vmatprep.subr.mxu1 %v199_v19  ;;  %2280 = vmatprep.subr.mxu0 %v133_v21  ;;  %v7545_v45 = vsel %vm326_vm12, %v323_v26, %v7530_v52  ;;  %vm11810_vm8 = vmmov %vm11809_vm10 }
 0x2a6   :  { %2232 = vmatpush2.msra.mxu1 %v200_v7  ;;  %2281 = vmatpush1.msra.mxu0 %v134_v29 }
 0x2a7   :  { %v7536_v0 = vpop.permute.xlu0 %259  ;;  %2233 = vmatprep.subr.mxu1 %v134_v29  ;;  %2282 = vmatprep.subr.mxu0 %v6952_v3 }
 0x2a8   :  { %v7539_v4 = vpop.permute.xlu1 %194  ;;  %2234 = vmatpush2.msra.mxu1 %v135_v41  ;;  %2283 = vmatpush1.msra.mxu0 %v6936_v17  ;;  %v7552_v55 = vsel %vm11804_vm9, %v258_v51, %v7536_v0  ;;  %vm11811_vm9 = vmmov %vm11810_vm8 }
 0x2a9   :  { %2298 = vmatprep.subr.mxu0 %v7545_v45  ;;  %2235 = vmatprep.subr.mxu1 %v6936_v17  ;;  %v7560_v26 = vsel %vm196_vm14, %v193_v10, %v7539_v4 }
 0x2aa   :  { %2299 = vmatpush2.msra.mxu0 %v328_v1  ;;  %2236 = vmatpush2.msra.mxu1 %v5561_v60 }
 0x2ab   :  { %v7554_v7 = vpop.permute.xlu0 %127  ;;  %2300 = vmatprep.subr.mxu0 %v7552_v55 }
 0x2ac   :  { %v1292_v14 = vpop.permute.xlu1 %1291  ;;  %2301 = vmatpush2.msra.mxu0 %v263_v9  ;;  %v7566_v17 = vsel %vm11808_vm11, %v126_v61, %v7554_v7  ;;  %vm11812_vm11 = vmmov %vm11810_vm8 }
 0x2ad   :  { %2302 = vmatprep.subr.mxu0 %v7560_v26  ;;  %v1306_v9 = vsel %vm11810_vm8, %v7221_v12, %v1292_v14 }
 0x2ae   :  { %2303 = vmatpush2.msra.mxu0 %v198_v54 }
 0x2af   :  { %v1294_v1 = vpop.permute.xlu0 %1293  ;;  %2304 = vmatprep.subr.mxu0 %v7566_v17 }
 0x2b0   :  { %v1227_v51 = vpop.permute.xlu1 %1226  ;;  %2305 = vmatpush2.msra.mxu0 %v133_v21  ;;  %v1305_v31 = vsel %vm11809_vm10, %v1292_v14, %v1294_v1  ;;  %vm11813_vm10 = vcmp.lt.s32.totalorder %v6002_v6, 30 }
 0x2b1   :  { %2237 = vmatprep.subr.mxu1 %v1305_v31  ;;  %2306 = vmatprep.subr.mxu0 %v6966_v35  ;;  %v1241_v10 = vsel %vm1236_vm15, %v7241_v48, %v1227_v51  ;;  %vm11814_vm8 = vmmov %vm11813_vm10 }
 0x2b2   :  { %2238 = vmatpush2.msra.mxu1 %v1306_v9  ;;  %2307 = vmatpush2.msra.mxu0 %v6952_v3 }
 0x2b3   :  { %v1229_v22 = vpop.permute.xlu0 %1228 }
 0x2b4   :  { %v1296_v42 = vpop.permute.xlu1 %1295  ;;  %v1240_v41 = vsel %vm1236_vm15, %v1227_v51, %v1229_v22 }
 0x2b5   :  { %2239 = vmatprep.subr.mxu1 %v1240_v41  ;;  %v1304_v3 = vsel %vm11812_vm11, %v1294_v1, %v1296_v42  ;;  %v5562_v41 = vld [vmem:[%s11446_s1 + $0x8] sm:$0xff]  ;;  %vm11816_vm11 = vmmov %vm11814_vm8 }
 0x2b6   :  { %2240 = vmatpush2.msra.mxu1 %v1241_v10 }
 0x2b7   :  { %v7581_v60 = vpop.permute.xlu0 %1297 }
 0x2b8   :  { %v1162_v25 = vpop.permute.xlu1 %1161  ;;  %v1303_v35 = vsel %vm11811_vm9, %v1296_v42, %v7581_v60  ;;  %vm11815_vm9 = vmmov %vm11814_vm8 }
 0x2b9   :  { %2308 = vmatprep.subr.mxu0 %v1303_v35  ;;  %v1176_v48 = vsel %vm11814_vm8, %v7261_v62, %v1162_v25  ;;  %vm11819_vm8 = vcmp.lt.s32.totalorder %v6002_v6, 94 }
 0x2ba   :  { %2309 = vmatpush2.msra.mxu0 %v1304_v3 }
 0x2bb   :  { %v1164_v12 = vpop.permute.xlu0 %1163 }
 0x2bc   :  { %v1231_v54 = vpop.permute.xlu1 %1230  ;;  %v1175_v19 = vsel %vm11813_vm10, %v1162_v25, %v1164_v12 }
 0x2bd   :  { %2241 = vmatprep.subr.mxu1 %v1175_v19  ;;  %v1239_v14 = vsel %vm1236_vm15, %v1229_v22, %v1231_v54  ;;  %v2633_v19 = vld [vmem:[%s11450_s5 + $0xf8] sm:$0xff] }
 0x2be   :  { %2242 = vmatpush2.msra.mxu1 %v1176_v48  ;;  %v2632_v48 = vld [vmem:[%s11450_s5 + $0xf0] sm:$0xff] }
 0x2bf   :  { %v7593_v61 = vpop.permute.xlu0 %1232 }
 0x2c0   :  { %v1097_v21 = vpop.permute.xlu1 %1096  ;;  %v1238_v29 = vsel %vm1236_vm15, %v1231_v54, %v7593_v61 }
 0x2c1   :  { %2310 = vmatprep.subr.mxu0 %v1238_v29  ;;  %v1111_v62 = vsel %vm1106_vm13, %v7285_v36, %v1097_v21 }
 0x2c2   :  { %2311 = vmatpush2.msra.mxu0 %v1239_v14 }
 0x2c3   :  { %v1099_v1 = vpop.permute.xlu0 %1098 }
 0x2c4   :  { %v1166_v51 = vpop.permute.xlu1 %1165  ;;  %v1110_v31 = vsel %vm1106_vm13, %v1097_v21, %v1099_v1 }
 0x2c5   :  { %2243 = vmatprep.subr.mxu1 %v1110_v31  ;;  %v1174_v36 = vsel %vm11816_vm11, %v1164_v12, %v1166_v51  ;;  %vm11821_vm11 = vcmp.lt.s32.totalorder %v6002_v6, 95 }
 0x2c6   :  { %2244 = vmatpush2.msra.mxu1 %v1111_v62  ;;  %v2627_v62 = vld [vmem:[%s11450_s5 + $0xc8] sm:$0xff] }
 0x2c7   :  { %v7605_v9 = vpop.permute.xlu0 %1167  ;;  %2246 = vmatmul.mubr.f32.vlgmr.msra.gmra.mxu1 %v7266_v46 }
 0x2c8   :  { %v1101_v42 = vpop.permute.xlu1 %1100  ;;  %v1173_v22 = vsel %vm11815_vm9, %v1166_v51, %v7605_v9  ;;  %5230 = vmatprep.mubr.msk.f32.mxu1 %vm1822_vm1, %v5562_v41  ;;  %v2625_v41 = vld [vmem:[%s11450_s5 + $0xb8] sm:$0xff]  ;;  %vm11820_vm9 = vmmov %vm11819_vm8 }
 0x2c9   :  { %2312 = vmatprep.subr.mxu0 %v1173_v22  ;;  %v1109_v54 = vsel %vm1106_vm13, %v1099_v1, %v1101_v42  ;;  %v2630_v1 = vld [vmem:[%s11450_s5 + $0xe0] sm:$0xff] }
 0x2ca   :  { %2313 = vmatpush2.msra.mxu0 %v1174_v36 }
 0x2cb   :  { %v7617_v10 = vpop.permute.xlu0 %1102 }
 0x2cc   :  { %v1040_v25 = vpop.permute.xlu1 %1039  ;;  %v1108_v35 = vsel %vm1106_vm13, %v1101_v42, %v7617_v10 }
 0x2cd   :  { %2314 = vmatprep.subr.mxu0 %v1108_v35  ;;  %v1057_v3 = vsel %vm1041_vm0, %v1040_v25, %v6004_v8  ;;  %v1042_v12 = vsel %vm1041_vm0, %v7317_v38, %v1040_v25  ;;  %v2631_v8 = vld [vmem:[%s11450_s5 + $0xe8] sm:$0xff]  ;;  %vm11817_vm0 = vcmp.lt.s32.totalorder %v6002_v6, 93 }
 0x2ce   :  { %2323 = vmatprep.subr.mxu1 %v1057_v3  ;;  %2315 = vmatpush2.msra.mxu0 %v1109_v54  ;;  %v2623_v35 = vld [vmem:[%s11450_s5 + $0xa8] sm:$0xff]  ;;  %vm11818_vm10 = vmmov %vm11817_vm0 }
 0x2cf   :  { %2324 = vmatpush1.msra.mxu1 %v1042_v12  ;;  %v975_v21 = vpop.permute.xlu0 %974  ;;  %2317 = vmatmul.mubr.f32.vlgmr.msra.gmra.mxu0 %v7266_v46  ;;  %v2629_v46 = vld [vmem:[%s11450_s5 + $0xd8] sm:$0xff] }
 0x2d0   :  { %v910_v29 = vpop.permute.xlu1 %909  ;;  %v992_v38 = vsel %vm976_vm2, %v975_v21, %v6031_v15  ;;  %v977_v14 = vsel %vm976_vm2, %v7337_v13, %v975_v21  ;;  %2858 = vmatprep.subr.mxu0 %v2633_v19  ;;  %v2628_v13 = vld [vmem:[%s11450_s5 + $0xd0] sm:$0xff]  ;;  %v2621_v12 = vld [vmem:[%s11450_s5 + $0x98] sm:$0xff]  ;;  %v2619_v21 = vld [vmem:[%s11450_s5 + $0x88] sm:$0xff] }
 0x2d1   :  { %2325 = vmatprep.subr.mxu1 %v992_v38  ;;  %2859 = vmatpush1.msra.mxu0 %v2632_v48  ;;  %v927_v15 = vsel %vm911_vm3, %v910_v29, %v6067_v23  ;;  %v912_v31 = vsel %vm911_vm3, %v7357_v58, %v910_v29  ;;  %v2626_v58 = vld [vmem:[%s11450_s5 + $0xc0] sm:$0xff]  ;;  %v2617_v38 = vld [vmem:[%s11450_s5 + $0x78] sm:$0xff] }
 0x2d2   :  { %2326 = vmatpush1.msra.mxu1 %v977_v14  ;;  %2860 = vmatprep.subr.mxu0 %v2631_v8 }
 0x2d3   :  { %v845_v51 = vpop.permute.xlu0 %844  ;;  %2327 = vmatprep.subr.mxu1 %v927_v15  ;;  %2861 = vmatpush1.msra.mxu0 %v2630_v1 }
 0x2d4   :  { %v780_v42 = vpop.permute.xlu1 %779  ;;  %2328 = vmatpush1.msra.mxu1 %v912_v31  ;;  %v862_v23 = vsel %vm846_vm4, %v845_v51, %v6079_v27  ;;  %v847_v22 = vsel %vm846_vm4, %v7377_v20, %v845_v51  ;;  %2862 = vmatprep.subr.mxu0 %v2629_v46  ;;  %v2624_v20 = vld [vmem:[%s11450_s5 + $0xb0] sm:$0xff]  ;;  %v2615_v46 = vld [vmem:[%s11450_s5 + $0x68] sm:$0xff]  ;;  %v2613_v51 = vld [vmem:[%s11450_s5 + $0x58] sm:$0xff] }
 0x2d5   :  { %2329 = vmatprep.subr.mxu1 %v862_v23  ;;  %2863 = vmatpush1.msra.mxu0 %v2628_v13  ;;  %v797_v27 = vsel %vm781_vm5, %v780_v42, %v6101_v33  ;;  %v782_v25 = vsel %vm781_vm5, %v7397_v2, %v780_v42  ;;  %v2622_v2 = vld [vmem:[%s11450_s5 + $0xa0] sm:$0xff] }
 0x2d6   :  { %2330 = vmatpush1.msra.mxu1 %v847_v22  ;;  %2864 = vmatprep.subr.mxu0 %v2627_v62  ;;  %v2611_v62 = vld [vmem:[%s11450_s5 + $0x48] sm:$0xff]  ;;  %v2610_v42 = vld [vmem:[%s11450_s5 + $0x40] sm:$0xff] }
 0x2d7   :  { %v715_v36 = vpop.permute.xlu0 %714  ;;  %2331 = vmatprep.subr.mxu1 %v797_v27  ;;  %2865 = vmatpush1.msra.mxu0 %v2626_v58  ;;  %v1963_v58 = vpop.f32.mrf.mxu1 }
 0x2d8   :  { %v650_v3 = vpop.permute.xlu1 %649  ;;  %2332 = vmatpush1.msra.mxu1 %v782_v25  ;;  %v732_v33 = vsel %vm716_vm6, %v715_v36, %v6113_v37  ;;  %v717_v54 = vsel %vm716_vm6, %v7417_v32, %v715_v36  ;;  %2866 = vmatprep.subr.mxu0 %v2625_v41  ;;  %v2620_v32 = vld [vmem:[%s11450_s5 + $0x90] sm:$0xff]  ;;  %v2663_v41 = vld [vmem:[%s11450_s5 + $0x1e8] sm:$0xff]  ;;  %v1892_v27 = vpop.f32.mrf.mxu0  ;;  %v2662_v36 = vld [vmem:[%s11450_s5 + $0x1e0] sm:$0xff] }
 0x2d9   :  { %2333 = vmatprep.subr.mxu1 %v732_v33  ;;  %2867 = vmatpush1.msra.mxu0 %v2624_v20  ;;  %v667_v37 = vsel %vm651_vm7, %v650_v3, %v6135_v43  ;;  %v652_v48 = vsel %vm651_vm7, %v7437_v39, %v650_v3  ;;  %v2618_v39 = vld [vmem:[%s11450_s5 + $0x80] sm:$0xff]  ;;  %v1965_v25 = vpop.f32.mrf.mxu1 }
 0x2da   :  { %2334 = vmatpush1.msra.mxu1 %v717_v54  ;;  %2868 = vmatprep.subr.mxu0 %v2623_v35  ;;  %v1894_v35 = vpop.f32.mrf.mxu0 }
 0x2db   :  { %v585_v19 = vpop.permute.xlu0 %584  ;;  %2335 = vmatprep.subr.mxu1 %v667_v37  ;;  %2869 = vmatpush1.msra.mxu0 %v2622_v2  ;;  %v2659_v2 = vld [vmem:[%s11450_s5 + $0x1c8] sm:$0xff] }
 0x2dc   :  { %v520_v8 = vpop.permute.xlu1 %519  ;;  %2336 = vmatpush1.msra.mxu1 %v652_v48  ;;  %v602_v43 = vsel %vm11817_vm0, %v585_v19, %v6147_v47  ;;  %v587_v29 = vsel %vm11818_vm10, %v7457_v5, %v585_v19  ;;  %2870 = vmatprep.subr.mxu0 %v2621_v12  ;;  %v2616_v5 = vld [vmem:[%s11450_s5 + $0x70] sm:$0xff]  ;;  %vm11822_vm0 = vmmov %vm11821_vm11  ;;  %vm11823_vm10 = vcmp.lt.s32.totalorder %v6002_v6, 96 }
 0x2dd   :  { %2337 = vmatprep.subr.mxu1 %v602_v43  ;;  %2871 = vmatpush1.msra.mxu0 %v2620_v32  ;;  %v537_v47 = vsel %vm11819_vm8, %v520_v8, %v6169_v53  ;;  %v522_v1 = vsel %vm11820_vm9, %v7472_v50, %v520_v8  ;;  %v2614_v50 = vld [vmem:[%s11450_s5 + $0x60] sm:$0xff]  ;;  %vm11824_vm8 = vmmov %vm11823_vm10  ;;  %vm11825_vm9 = vcmp.lt.s32.totalorder %v6002_v6, 125 }
 0x2de   :  { %2338 = vmatpush1.msra.mxu1 %v587_v29  ;;  %2872 = vmatprep.subr.mxu0 %v2619_v21  ;;  %v277_v23 = vsel %vm11825_vm9, %v7536_v0, %v6234_v24  ;;  %v2606_v24 = vld [vmem:[%s11450_s5 + $0x20] sm:$0xff]  ;;  %v2605_v0 = vld [vmem:[%s11450_s5 + $0x18] sm:$0xff]  ;;  %v2034_v29 = vpop.f32.mrf.mxu0 }
 0x2df   :  { %v455_v14 = vpop.permute.xlu0 %454  ;;  %2339 = vmatprep.subr.mxu1 %v537_v47  ;;  %2873 = vmatpush1.msra.mxu0 %v2618_v39  ;;  %v2658_v32 = vld [vmem:[%s11450_s5 + $0x1c0] sm:$0xff]  ;;  %v2657_v21 = vld [vmem:[%s11450_s5 + $0x1b8] sm:$0xff] }
 0x2e0   :  { %v390_v15 = vpop.permute.xlu1 %389  ;;  %2340 = vmatpush1.msra.mxu1 %v522_v1  ;;  %v472_v53 = vsel %vm11821_vm11, %v455_v14, %v6181_v57  ;;  %v457_v13 = vsel %vm11822_vm0, %v7484_v49, %v455_v14  ;;  %2874 = vmatprep.subr.mxu0 %v2617_v38  ;;  %v2612_v49 = vld [vmem:[%s11450_s5 + $0x50] sm:$0xff]  ;;  %vm11826_vm11 = vcmp.lt.s32.totalorder %v6002_v6, 127  ;;  %vm11827_vm0 = vcmp.lt.s32.totalorder %v6002_v6, 28  ;;  %v11829_v47 = vld [vmem:[#allocation10_spill] sm:$0xff] }
 0x2e1   :  { %2341 = vmatprep.subr.mxu1 %v472_v53  ;;  %2875 = vmatpush1.msra.mxu0 %v2616_v5  ;;  %v407_v57 = vsel %vm11823_vm10, %v390_v15, %v6203_v63  ;;  %v392_v31 = vsel %vm11824_vm8, %v7495_v56, %v390_v15  ;;  %v342_v63 = vsel %vm326_vm12, %v7530_v52, %v6213_v11  ;;  %v2609_v56 = vld [vmem:[%s11450_s5 + $0x38] sm:$0xff]  ;;  %v2608_v11 = vld [vmem:[%s11450_s5 + $0x30] sm:$0xff]  ;;  %v2607_v52 = vld [vmem:[%s11450_s5 + $0x28] sm:$0xff]  ;;  %vm11831_vm8 = vcmp.lt.s32.totalorder %v6002_v6, 30 }
 0x2e2   :  { %2342 = vmatpush1.msra.mxu1 %v457_v13  ;;  %2876 = vmatprep.subr.mxu0 %v2615_v46  ;;  %vm11828_vm10 = vmmov %vm11827_vm0  ;;  %v2654_v1 = vld [vmem:[%s11450_s5 + $0x1a0] sm:$0xff]  ;;  %v11830_v13 = vld [vmem:[#allocation11_spill] sm:$0xff] }
 0x2e3   :  { %2343 = vmatprep.subr.mxu1 %v407_v57  ;;  %2877 = vmatpush1.msra.mxu0 %v2614_v50  ;;  %v1300_v22 = vpop.permute.xlu0 %1299  ;;  %vm11832_vm9 = vmmov %vm11831_vm8 }
 0x2e4   :  { %2344 = vmatpush1.msra.mxu1 %v392_v31  ;;  %2878 = vmatprep.subr.mxu0 %v2613_v51  ;;  %v1235_v12 = vpop.permute.xlu1 %1234  ;;  %v1317_v8 = vsel %vm11827_vm0, %v1300_v22, %v6325_v59  ;;  %v1302_v43 = vsel %vm11828_vm10, %v7581_v60, %v1300_v22  ;;  %v2656_v59 = vld [vmem:[%s11450_s5 + $0x1b0] sm:$0xff]  ;;  %v2655_v60 = vld [vmem:[%s11450_s5 + $0x1a8] sm:$0xff] }
 0x2e5   :  { %2345 = vmatprep.subr.mxu1 %v342_v63  ;;  %2879 = vmatpush1.msra.mxu0 %v2612_v49  ;;  %v1252_v5 = vsel %vm1236_vm15, %v1235_v12, %v11829_v47  ;;  %v1237_v15 = vsel %vm1236_vm15, %v7593_v61, %v1235_v12  ;;  %v2036_v49 = vpop.f32.mrf.mxu0  ;;  %v2653_v61 = vld [vmem:[%s11450_s5 + $0x198] sm:$0xff]  ;;  %v2686_v12 = vld [vmem:[%s11450_s5 + $0x2a0] sm:$0xff]  ;;  %vm11836_vm15 = vcmp.lt.s32.totalorder %v6002_v6, 96 }
 0x2e6   :  { %2346 = vmatpush1.msra.mxu1 %v7545_v45  ;;  %2880 = vmatprep.subr.mxu0 %v2611_v62  ;;  %v212_v45 = vsel %vm196_vm14, %v7539_v4, %v6247_v30  ;;  %v2604_v30 = vld [vmem:[%s11450_s5 + $0x10] sm:$0xff]  ;;  %v2603_v4 = vld [vmem:[%s11450_s5 + $0x8] sm:$0xff]  ;;  %v2645_v47 = vld [vmem:[%s11450_s5 + $0x158] sm:$0xff] }
 0x2e7   :  { %2347 = vmatprep.subr.mxu1 %v277_v23  ;;  %2881 = vmatpush1.msra.mxu0 %v2610_v42  ;;  %v1170_v20 = vpop.permute.xlu0 %1169  ;;  %v11833_v62 = vld [vmem:[#allocation12_spill] sm:$0xff]  ;;  %vm11841_vm10 = vmmov %vm11836_vm15 }
 0x2e8   :  { %2348 = vmatpush1.msra.mxu1 %v7552_v55  ;;  %2882 = vmatprep.subr.mxu0 %v2609_v56  ;;  %v147_v55 = vsel %vm11826_vm11, %v7554_v7, %v6268_v40  ;;  %v2665_v40 = vld [vmem:[%s11450_s5 + $0x1f8] sm:$0xff]  ;;  %v5563_v7 = vld [vmem:[%s11445_s0 + $0x70] sm:$0xff]  ;;  %v1105_v46 = vpop.permute.xlu1 %1104  ;;  %v1187_v50 = vsel %vm11831_vm8, %v1170_v20, %v11830_v13  ;;  %v1172_v57 = vsel %vm11832_vm9, %v7605_v9, %v1170_v20 }
 0x2e9   :  { %2349 = vmatprep.subr.mxu1 %v212_v45  ;;  %2883 = vmatpush1.msra.mxu0 %v2608_v11  ;;  %v2697_v56 = vld [vmem:[%s11450_s5 + $0x2f8] sm:$0xff]  ;;  %v2696_v11 = vld [vmem:[%s11450_s5 + $0x2f0] sm:$0xff] }
 0x2ea   :  { %2350 = vmatpush1.msra.mxu1 %v7560_v26  ;;  %2884 = vmatprep.subr.mxu0 %v2607_v52  ;;  %v2602_v26 = vld [vmem:[%s11450_s5] sm:$0xff]  ;;  %v2695_v52 = vld [vmem:[%s11450_s5 + $0x2e8] sm:$0xff]  ;;  %v2676_v13 = vld [vmem:[%s11450_s5 + $0x250] sm:$0xff] }
 0x2eb   :  { %2351 = vmatprep.subr.mxu1 %v147_v55  ;;  %2885 = vmatpush1.msra.mxu0 %v2606_v24 }
 0x2ec   :  { %2352 = vmatpush1.msra.mxu1 %v7566_v17  ;;  %2886 = vmatprep.subr.mxu0 %v2605_v0  ;;  %v2664_v17 = vld [vmem:[%s11450_s5 + $0x1f0] sm:$0xff] }
 0x2ed   :  { %2353 = vmatprep.subr.mxu1 %v7272_v18  ;;  %2887 = vmatpush1.msra.mxu0 %v2604_v30  ;;  %v2652_v0 = vld [vmem:[%s11450_s5 + $0x190] sm:$0xff]  ;;  %v2693_v30 = vld [vmem:[%s11450_s5 + $0x2d8] sm:$0xff] }
 0x2ee   :  { %2354 = vmatpush1.msra.mxu1 %v5563_v7  ;;  %2888 = vmatprep.subr.mxu0 %v2603_v4  ;;  %v2105_v53 = vpop.f32.mrf.mxu1  ;;  %v2651_v4 = vld [vmem:[%s11450_s5 + $0x188] sm:$0xff] }
 0x2ef   :  { %2369 = vmatprep.subr.mxu1 %v6220_v16  ;;  %2889 = vmatpush1.msra.mxu0 %v2602_v26  ;;  %v2661_v16 = vld [vmem:[%s11450_s5 + $0x1d8] sm:$0xff] }
 0x2f0   :  { %2370 = vmatpush2.msra.mxu1 %v342_v63  ;;  %2890 = vmatprep.subr.mxu0 %v2665_v40  ;;  %v1122_v63 = vsel %vm1106_vm13, %v1105_v46, %v11833_v62  ;;  %v2107_v24 = vpop.f32.mrf.mxu1  ;;  %v2692_v40 = vld [vmem:[%s11450_s5 + $0x2d0] sm:$0xff] }
 0x2f1   :  { %2371 = vmatprep.subr.mxu1 %v6239_v28  ;;  %2891 = vmatpush2.msra.mxu0 %v2664_v17  ;;  %v2660_v28 = vld [vmem:[%s11450_s5 + $0x1d0] sm:$0xff]  ;;  %v2691_v17 = vld [vmem:[%s11450_s5 + $0x2c8] sm:$0xff] }
 0x2f2   :  { %2372 = vmatpush2.msra.mxu1 %v277_v23  ;;  %2892 = vmatprep.subr.mxu0 %v2663_v41  ;;  %v1107_v23 = vsel %vm1106_vm13, %v7617_v10, %v1105_v46  ;;  %v2694_v10 = vld [vmem:[%s11450_s5 + $0x2e0] sm:$0xff]  ;;  %v2644_v46 = vld [vmem:[%s11450_s5 + $0x150] sm:$0xff]  ;;  %vm11835_vm13 = vmmov %vm11826_vm11  ;;  %vm11837_vm11 = vcmp.lt.s32.totalorder %v6002_v6, 95 }
 0x2f3   :  { %2373 = vmatprep.subr.mxu1 %v6254_v34  ;;  %2893 = vmatpush2.msra.mxu0 %v2662_v36  ;;  %v2690_v41 = vld [vmem:[%s11450_s5 + $0x2c0] sm:$0xff]  ;;  %v2689_v36 = vld [vmem:[%s11450_s5 + $0x2b8] sm:$0xff]  ;;  %v2640_v62 = vld [vmem:[%s11450_s5 + $0x130] sm:$0xff] }
 0x2f4   :  { %v7829_v3 = vpop.permute.xlu0 %1819  ;;  %2374 = vmatpush2.msra.mxu1 %v212_v45  ;;  %2894 = vmatprep.subr.mxu0 %v2661_v16  ;;  %v5565_v45 = vld [vmem:[%s11446_s1] sm:$0xff]  ;;  %v2649_v16 = vld [vmem:[%s11450_s5 + $0x178] sm:$0xff]  ;;  %vm11840_vm0 = vmmov %vm11835_vm13  ;;  %s5773_s1 = smov 79  }
 0x2f5   :  { %v7835_v33 = vadd.f32 %v1965_v25, %v7829_v3  ;;  %2375 = vmatprep.subr.mxu1 %v6275_v44  ;;  %v7839_v54 = vadd.f32 %v1894_v35, %v7829_v3  ;;  %v7842_v34 = vadd.f32 %v1963_v58, %v7829_v3  ;;  %v7848_v37 = vadd.f32 %v1892_v27, %v7829_v3  ;;  %v5564_v44 = vld [vmem:[%s11445_s0] sm:$0xff]  ;;  %v2688_v25 = vld [vmem:[%s11450_s5 + $0x2b0] sm:$0xff]  ;;  %vm11842_vm8 = vmmov %vm11837_vm11 }
 0x2f6   :  { %2376 = vmatpush2.msra.mxu1 %v147_v55  ;;  %2895 = vmatpush2.msra.mxu0 %v2660_v28  ;;  %v2035_v14 = vadd.f32 %v2034_v29, %v7829_v3  ;;  %v7912_v42 = vadd.f32 %v2036_v49, %v7829_v3  ;;  %v7915_v9 = vadd.f32 %v2105_v53, %v7829_v3  ;;  %v2176_v26 = vpop.f32.mrf.mxu0  ;;  %v2650_v27 = vld [vmem:[%s11450_s5 + $0x180] sm:$0xff]  ;;  %v2683_v29 = vld [vmem:[%s11450_s5 + $0x288] sm:$0xff]  ;;  %v2641_v49 = vld [vmem:[%s11450_s5 + $0x138] sm:$0xff] }
 0x2f7   :  { %2377 = vmatprep.subr.mxu1 %v5564_v44  ;;  %v2395_v19 = vmax.f32 %v7839_v54, 0.0  ;;  %v2396_v48 = vmax.f32 %v7842_v34, 0.0  ;;  %2896 = vmatprep.subr.mxu0 %v2659_v2  ;;  %v2397_v39 = vmax.f32 %v7835_v33, 0.0  ;;  %v7954_v7 = vadd.f32 %v2176_v26, %v7829_v3  ;;  %v2687_v2 = vld [vmem:[%s11450_s5 + $0x2a8] sm:$0xff]  ;;  %v2685_v44 = vld [vmem:[%s11450_s5 + $0x298] sm:$0xff]  ;;  %v2634_v26 = vld [vmem:[%s11450_s5 + $0x100] sm:$0xff] }
 0x2f8   :  { %2378 = vmatpush2.msra.mxu1 %v7272_v18  ;;  %v2394_v18 = vmax.f32 %v7848_v37, 0.0  ;;  %2897 = vmatpush2.msra.mxu0 %v2658_v32  ;;  %v7905_v31 = vmax.f32 %v2035_v14, 0.0  ;;  %v2399_v22 = vmax.f32 %v7912_v42, 0.0  ;;  %v11522_v55 = vmax.f32 %v7915_v9, 0.0  ;;  %v2648_v32 = vld [vmem:[%s11450_s5 + $0x170] sm:$0xff]  ;;  %v2679_v14 = vld [vmem:[%s11450_s5 + $0x268] sm:$0xff]  ;;  %vm11843_vm9 = vmmov %vm11842_vm8  ;;  %v2178_v33 = vpop.f32.mrf.mxu0 }
 0x2f9   :  { %2379 = vmatprep.subr.mxu1 %v1317_v8  ;;  %v5411_v38 = vpack.i.bf16 %v2396_v48, %v2395_v19  ;;  %2898 = vmatprep.subr.mxu0 %v2657_v21  ;;  %v7957_v58 = vadd.f32 %v2107_v24, %v7829_v3  ;;  %v11518_v35 = vmax.f32 %v7954_v7, 0.0  ;;  %v2647_v21 = vld [vmem:[%s11450_s5 + $0x168] sm:$0xff]  ;;  %v2684_v8 = vld [vmem:[%s11450_s5 + $0x290] sm:$0xff]  ;;  %v2669_v24 = vld [vmem:[%s11450_s5 + $0x218] sm:$0xff] }
 0x2fa   :  { %2380 = vmatpush2.msra.mxu1 %v1302_v43  ;;  %2899 = vmatpush2.msra.mxu0 %v2656_v59  ;;  %v5421_v51 = vpack.i.bf16 %v2397_v39, %v2394_v18  ;;  %v5436_v20 = vpack.i.bf16 %v11522_v55, %v2399_v22  ;;  %v2646_v59 = vld [vmem:[%s11450_s5 + $0x160] sm:$0xff]  ;;  %v2643_v53 = vld [vmem:[%s11450_s5 + $0x148] sm:$0xff]  ;;  %v8441_v42 = vld [vmem:[%s11450_s5 + $0x490] sm:$0xff] }
 0x2fb   :  { %5412 = vrot.lane.b32.xlu0 %v5411_v38, %s11733_s25  ;;  %5402 = vrot.lane.b32.xlu1 %v5411_v38, %s11736_s24  ;;  %v2401_v28 = vmax.f32 %v7957_v58, 0.0  ;;  %v8508_v58 = vld [vmem:[%s11450_s5 + $0x478] sm:$0xff] }
 0x2fc   :  { %2381 = vmatprep.subr.mxu1 %v1252_v5  ;;  %2900 = vmatprep.subr.mxu0 %v2655_v60  ;;  %v2681_v60 = vld [vmem:[%s11450_s5 + $0x278] sm:$0xff]  ;;  %v2680_v5 = vld [vmem:[%s11450_s5 + $0x270] sm:$0xff] }
 0x2fd   :  { %2382 = vmatpush2.msra.mxu1 %v1237_v15  ;;  %2901 = vmatpush2.msra.mxu0 %v2654_v1  ;;  %v5446_v43 = vpack.i.bf16 %v11518_v35, %v2401_v28  ;;  %v2678_v1 = vld [vmem:[%s11450_s5 + $0x260] sm:$0xff]  ;;  %v2677_v15 = vld [vmem:[%s11450_s5 + $0x258] sm:$0xff] }
 0x2fe   :  { %2383 = vmatprep.subr.mxu1 %v1187_v50  ;;  %2902 = vmatprep.subr.mxu0 %v2653_v61  ;;  %v2642_v50 = vld [vmem:[%s11450_s5 + $0x140] sm:$0xff]  ;;  %v2673_v61 = vld [vmem:[%s11450_s5 + $0x238] sm:$0xff] }
 0x2ff   :  { %2384 = vmatpush2.msra.mxu1 %v1172_v57  ;;  %5422 = vrot.lane.b32.xlu0 %v5421_v51, %s11734_s6  ;;  %v2674_v57 = vld [vmem:[%s11450_s5 + $0x240] sm:$0xff] }
 0x300   :  { %5407 = vrot.lane.b32.xlu1 %v5411_v38, %s11734_s6  ;;  %2385 = vmatprep.subr.mxu1 %v1122_v63  ;;  %v2682_v38 = vld [vmem:[%s11450_s5 + $0x280] sm:$0xff]  ;;  %v2672_v63 = vld [vmem:[%s11450_s5 + $0x230] sm:$0xff] }
 0x301   :  { %2386 = vmatpush2.msra.mxu1 %v1107_v23  ;;  %2903 = vmatpush2.msra.mxu0 %v2652_v0  ;;  %v2671_v23 = vld [vmem:[%s11450_s5 + $0x228] sm:$0xff]  ;;  %v2668_v0 = vld [vmem:[%s11450_s5 + $0x210] sm:$0xff]  ;;  %v8483_v35 = vld [vmem:[%s11450_s5 + $0x6a0] sm:$0xff] }
 0x302   :  { %2388 = vmatmul.mubr.f32.vlgmr.msra.gmra.mxu1 %v5565_v45  ;;  %2929 = vmatprep.subr.mxu1 %v2697_v56  ;;  %v2639_v56 = vld [vmem:[%s11450_s5 + $0x128] sm:$0xff]  ;;  %v2637_v45 = vld [vmem:[%s11450_s5 + $0x118] sm:$0xff] }
 0x303   :  { %2418 = vrot.lane.b32.xlu0 %v7905_v31, %s11736_s24  ;;  %2930 = vmatpush1.msra.mxu1 %v2696_v11  ;;  %v2638_v11 = vld [vmem:[%s11450_s5 + $0x120] sm:$0xff] }
 0x304   :  { %5417 = vrot.lane.b32.xlu1 %v5421_v51, %s11736_s24  ;;  %2931 = vmatprep.subr.mxu1 %v2695_v52  ;;  %v2670_v52 = vld [vmem:[%s11450_s5 + $0x220] sm:$0xff] }
 0x305   :  { %2932 = vmatpush1.msra.mxu1 %v2694_v10  ;;  %2904 = vmatprep.subr.mxu0 %v2651_v4  ;;  %v2636_v10 = vld [vmem:[%s11450_s5 + $0x110] sm:$0xff]  ;;  %v2667_v4 = vld [vmem:[%s11450_s5 + $0x208] sm:$0xff] }
 0x306   :  { %2933 = vmatprep.subr.mxu1 %v2693_v30  ;;  %2905 = vmatpush2.msra.mxu0 %v2650_v27  ;;  %v2635_v30 = vld [vmem:[%s11450_s5 + $0x108] sm:$0xff]  ;;  %v2728_v27 = vld [vmem:[%s11450_s5 + $0x3f0] sm:$0xff] }
 0x307   :  { %2530 = vrot.lane.b32.xlu0 %v7905_v31, %s11733_s25  ;;  %2934 = vmatpush1.msra.mxu1 %v2692_v40  ;;  %v2666_v40 = vld [vmem:[%s11450_s5 + $0x200] sm:$0xff] }
 0x308   :  { %5427 = vrot.lane.b32.xlu1 %v5421_v51, %s11733_s25  ;;  %2935 = vmatprep.subr.mxu1 %v2691_v17  ;;  %v2675_v51 = vld [vmem:[%s11450_s5 + $0x248] sm:$0xff]  ;;  %v2761_v17 = vld [vmem:[%s11450_s5 + $0x4f8] sm:$0xff] }
 0x309   :  { %2936 = vmatpush1.msra.mxu1 %v2690_v41  ;;  %2906 = vmatprep.subr.mxu0 %v2649_v16  ;;  %v2729_v41 = vld [vmem:[%s11450_s5 + $0x3f8] sm:$0xff] }
 0x30a   :  { %2937 = vmatprep.subr.mxu1 %v2689_v36  ;;  %2907 = vmatpush2.msra.mxu0 %v2648_v32  ;;  %v2726_v36 = vld [vmem:[%s11450_s5 + $0x3e0] sm:$0xff]  ;;  %v2725_v16 = vld [vmem:[%s11450_s5 + $0x3d8] sm:$0xff] }
 0x30b   :  { %5437 = vrot.lane.b32.xlu0 %v5436_v20, %s11734_s6  ;;  %2938 = vmatpush1.msra.mxu1 %v2688_v25  ;;  %v2724_v25 = vld [vmem:[%s11450_s5 + $0x3d0] sm:$0xff]  ;;  %v2721_v32 = vld [vmem:[%s11450_s5 + $0x3b8] sm:$0xff] }
 0x30c   :  { %2482 = vrot.lane.b32.xlu1 %v7905_v31, %s11734_s6  ;;  %2939 = vmatprep.subr.mxu1 %v2687_v2  ;;  %v2723_v2 = vld [vmem:[%s11450_s5 + $0x3c8] sm:$0xff] }
 0x30d   :  { %2940 = vmatpush1.msra.mxu1 %v2686_v12  ;;  %2908 = vmatprep.subr.mxu0 %v2647_v21  ;;  %v2722_v12 = vld [vmem:[%s11450_s5 + $0x3c0] sm:$0xff]  ;;  %v2719_v21 = vld [vmem:[%s11450_s5 + $0x3a8] sm:$0xff] }
 0x30e   :  { %2941 = vmatprep.subr.mxu1 %v2685_v44  ;;  %2909 = vmatpush2.msra.mxu0 %v2646_v59  ;;  %v2720_v44 = vld [vmem:[%s11450_s5 + $0x3b0] sm:$0xff]  ;;  %v2714_v59 = vld [vmem:[%s11450_s5 + $0x380] sm:$0xff] }
 0x30f   :  { %5447 = vrot.lane.b32.xlu0 %v5446_v43, %s11736_s24  ;;  %2942 = vmatpush1.msra.mxu1 %v2684_v8  ;;  %v2718_v8 = vld [vmem:[%s11450_s5 + $0x3a0] sm:$0xff] }
 0x310   :  { %5432 = vrot.lane.b32.xlu1 %v5436_v20, %s11736_s24  ;;  %2943 = vmatprep.subr.mxu1 %v2683_v29  ;;  %v2716_v29 = vld [vmem:[%s11450_s5 + $0x390] sm:$0xff] }
 0x311   :  { %2944 = vmatpush1.msra.mxu1 %v2682_v38  ;;  %2910 = vmatprep.subr.mxu0 %v2645_v47  ;;  %v2715_v38 = vld [vmem:[%s11450_s5 + $0x388] sm:$0xff]  ;;  %v2712_v47 = vld [vmem:[%s11450_s5 + $0x370] sm:$0xff] }
 0x312   :  { %2945 = vmatprep.subr.mxu1 %v2681_v60  ;;  %2911 = vmatpush2.msra.mxu0 %v2644_v46  ;;  %v2713_v60 = vld [vmem:[%s11450_s5 + $0x378] sm:$0xff]  ;;  %v2708_v46 = vld [vmem:[%s11450_s5 + $0x350] sm:$0xff] }
 0x313   :  { %5457 = vrot.lane.b32.xlu0 %v5446_v43, %s11733_s25  ;;  %2946 = vmatpush1.msra.mxu1 %v2680_v5  ;;  %v2711_v5 = vld [vmem:[%s11450_s5 + $0x368] sm:$0xff] }
 0x314   :  { %5442 = vrot.lane.b32.xlu1 %v5436_v20, %s11733_s25  ;;  %2947 = vmatprep.subr.mxu1 %v2679_v14  ;;  %v2727_v20 = vld [vmem:[%s11450_s5 + $0x3e8] sm:$0xff]  ;;  %v2710_v14 = vld [vmem:[%s11450_s5 + $0x360] sm:$0xff] }
 0x315   :  { %2948 = vmatpush1.msra.mxu1 %v2678_v1  ;;  %2912 = vmatprep.subr.mxu0 %v2643_v53  ;;  %v2709_v1 = vld [vmem:[%s11450_s5 + $0x358] sm:$0xff]  ;;  %v2706_v53 = vld [vmem:[%s11450_s5 + $0x340] sm:$0xff] }
 0x316   :  { %2949 = vmatprep.subr.mxu1 %v2677_v15  ;;  %2913 = vmatpush2.msra.mxu0 %v2642_v50  ;;  %v2707_v15 = vld [vmem:[%s11450_s5 + $0x348] sm:$0xff]  ;;  %v2704_v50 = vld [vmem:[%s11450_s5 + $0x330] sm:$0xff] }
 0x317   :  { %2950 = vmatpush1.msra.mxu1 %v2676_v13  ;;  %2914 = vmatprep.subr.mxu0 %v2641_v49  ;;  %v2705_v13 = vld [vmem:[%s11450_s5 + $0x338] sm:$0xff] }
 0x318   :  { %5452 = vrot.lane.b32.xlu1 %v5446_v43, %s11734_s6  ;;  %2951 = vmatprep.subr.mxu1 %v2675_v51  ;;  %v2717_v43 = vld [vmem:[%s11450_s5 + $0x398] sm:$0xff]  ;;  %v2703_v51 = vld [vmem:[%s11450_s5 + $0x328] sm:$0xff] }
 0x319   :  { %2952 = vmatpush1.msra.mxu1 %v2674_v57  ;;  %2915 = vmatpush2.msra.mxu0 %v2640_v62  ;;  %v2702_v57 = vld [vmem:[%s11450_s5 + $0x320] sm:$0xff]  ;;  %v2701_v49 = vld [vmem:[%s11450_s5 + $0x318] sm:$0xff]  ;;  %v2699_v62 = vld [vmem:[%s11450_s5 + $0x308] sm:$0xff] }
 0x31a   :  { %2953 = vmatprep.subr.mxu1 %v2673_v61  ;;  %2916 = vmatprep.subr.mxu0 %v2639_v56  ;;  %v2700_v61 = vld [vmem:[%s11450_s5 + $0x310] sm:$0xff]  ;;  %v2825_v56 = vld [vmem:[%s11450_s5 + $0x6f8] sm:$0xff] }
 0x31b   :  { %2954 = vmatpush1.msra.mxu1 %v2672_v63  ;;  %2917 = vmatpush2.msra.mxu0 %v2638_v11  ;;  %v2698_v63 = vld [vmem:[%s11450_s5 + $0x300] sm:$0xff] }
 0x31c   :  { %2955 = vmatprep.subr.mxu1 %v2671_v23  ;;  %2918 = vmatprep.subr.mxu0 %v2637_v45 }
 0x31d   :  { %2956 = vmatpush1.msra.mxu1 %v2670_v52  ;;  %2919 = vmatpush2.msra.mxu0 %v2636_v10 }
 0x31e   :  { %2957 = vmatprep.subr.mxu1 %v2669_v24  ;;  %2920 = vmatprep.subr.mxu0 %v2635_v30 }
 0x31f   :  { %2958 = vmatpush1.msra.mxu1 %v2668_v0  ;;  %2921 = vmatpush2.msra.mxu0 %v2634_v26 }
 0x320   :  { %2959 = vmatprep.subr.mxu1 %v2667_v4  ;;  %3000 = vmatprep.subr.mxu0 %v2761_v17 }
 0x321   :  { %2960 = vmatpush1.msra.mxu1 %v2666_v40 }
 0x322   :  { %2961 = vmatprep.subr.mxu1 %v2729_v41 }
 0x323   :  { %2962 = vmatpush2.msra.mxu1 %v2728_v27 }
 0x324   :  { %2963 = vmatprep.subr.mxu1 %v2727_v20 }
 0x325   :  { %2964 = vmatpush2.msra.mxu1 %v2726_v36 }
 0x326   :  { %2965 = vmatprep.subr.mxu1 %v2725_v16 }
 0x327   :  { %2966 = vmatpush2.msra.mxu1 %v2724_v25 }
 0x328   :  { %2967 = vmatprep.subr.mxu1 %v2723_v2 }
 0x329   :  { %2968 = vmatpush2.msra.mxu1 %v2722_v12 }
 0x32a   :  { %2969 = vmatprep.subr.mxu1 %v2721_v32 }
 0x32b   :  { %2970 = vmatpush2.msra.mxu1 %v2720_v44 }
 0x32c   :  { %2971 = vmatprep.subr.mxu1 %v2719_v21 }
 0x32d   :  { %2972 = vmatpush2.msra.mxu1 %v2718_v8 }
 0x32e   :  { %2973 = vmatprep.subr.mxu1 %v2717_v43 }
 0x32f   :  { %2974 = vmatpush2.msra.mxu1 %v2716_v29 }
 0x330   :  { %2975 = vmatprep.subr.mxu1 %v2715_v38 }
 0x331   :  { %2976 = vmatpush2.msra.mxu1 %v2714_v59 }
 0x332   :  { %2977 = vmatprep.subr.mxu1 %v2713_v60 }
 0x333   :  { %2978 = vmatpush2.msra.mxu1 %v2712_v47 }
 0x334   :  { %2979 = vmatprep.subr.mxu1 %v2711_v5 }
 0x335   :  { %2980 = vmatpush2.msra.mxu1 %v2710_v14 }
 0x336   :  { %2981 = vmatprep.subr.mxu1 %v2709_v1 }
 0x337   :  { %2982 = vmatpush2.msra.mxu1 %v2708_v46 }
 0x338   :  { %2983 = vmatprep.subr.mxu1 %v2707_v15 }
 0x339   :  { %2984 = vmatpush2.msra.mxu1 %v2706_v53 }
 0x33a   :  { %2985 = vmatprep.subr.mxu1 %v2705_v13 }
 0x33b   :  { %2986 = vmatpush2.msra.mxu1 %v2704_v50 }
 0x33c   :  { %2987 = vmatprep.subr.mxu1 %v2703_v51 }
 0x33d   :  { %2988 = vmatpush2.msra.mxu1 %v2702_v57 }
 0x33e   :  { %2989 = vmatprep.subr.mxu1 %v2701_v49  ;;  %v8271_v49 = vld [vmem:[%s11450_s5 + $0x4f0] sm:$0xff] }
 0x33f   :  { %2990 = vmatpush2.msra.mxu1 %v2700_v61 }
 0x340   :  { %2991 = vmatprep.subr.mxu1 %v2699_v62  ;;  %v8282_v62 = vld [vmem:[%s11450_s5 + $0x4e8] sm:$0xff] }
 0x341   :  { %2992 = vmatpush2.msra.mxu1 %v2698_v63 }
 0x342   :  { %3071 = vmatprep.subr.mxu1 %v2825_v56 }
 0x36d   :  { %v5413_v23 = vpop.permute.xlu0 %5412  ;;  %v5403_v11 = vpop.permute.xlu1 %5402 }
 0x36e   :  { %v5405_v52 = vunpack.i.h.bf16 %v5403_v11  ;;  %v5404_v45 = vunpack.i.l.bf16 %v5403_v11  ;;  %v5415_v24 = vunpack.i.h.bf16 %v5413_v23  ;;  %v5414_v10 = vunpack.i.l.bf16 %v5413_v23  ;;  %v8289_v23 = vld [vmem:[%s11450_s5 + $0x4e0] sm:$0xff]  ;;  %v8297_v11 = vld [vmem:[%s11450_s5 + $0x4d8] sm:$0xff] }
 0x370   :  { %v2455_v40 = vsel %vm11835_vm13, %v5404_v45, %v5405_v52  ;;  %v2567_v27 = vsel %vm11837_vm11, %v5414_v10, %v5415_v24  ;;  %vm11844_vm13 = vmmov %vm11840_vm0 }
 0x371   :  { %v8211_v0 = vpop.permute.xlu0 %5422  ;;  %v2459_v36 = vmax.f32 %v2395_v19, %v2455_v40  ;;  %vm11846_vm11 = vmmov %vm11840_vm0  ;;  %v8325_v40 = vadd.f32 %v2178_v33, %v7829_v3  ;;  %v8418_v33 = vld [vmem:[%s11450_s5 + $0x6b8] sm:$0xff] }
 0x372   :  { %11834 = vst [vmem:[#allocation10_spill] sm:$0xff] %v8211_v0  ;;  %v5408_v30 = vpop.permute.xlu1 %5407  ;;  %v11514_v12 = vunpack.i.l.bf16 %v8211_v0  ;;  %v5425_v21 = vunpack.i.h.bf16 %v8211_v0  ;;  %v8632_v0 = vld [vmem:[%s11450_s5 + $0x648] sm:$0xff] }
 0x373   :  { %v5410_v4 = vunpack.i.h.bf16 %v5408_v30  ;;  %v5409_v26 = vunpack.i.l.bf16 %v5408_v30  ;;  %11867 = vst [vmem:[#allocation25_spill] sm:$0xff] %v8632_v0 }
 0x375   :  { %v8215_v17 = vpop.permute.xlu0 %2418  ;;  %v2519_v41 = vsel %vm11836_vm15, %v5409_v26, %v5410_v4  ;;  %v2520_v29 = vsel %vm11841_vm10, %v11514_v12, %v5409_v26  ;;  %vm11845_vm15 = vmmov %vm11841_vm10  ;;  %v8322_v26 = vld [vmem:[%s11450_s5 + $0x6e0] sm:$0xff]  ;;  %v8434_v12 = vld [vmem:[%s11450_s5 + $0x6b0] sm:$0xff] }
 0x376   :  { %v8221_v20 = vpop.permute.xlu1 %5417  ;;  %v2571_v16 = vmax.f32 %v2519_v41, %v2567_v27  ;;  %v2518_v5 = vsel %vm11845_vm15, %v5410_v4, %v5425_v21  ;;  %v8317_v4 = vld [vmem:[%s11450_s5 + $0x4c8] sm:$0xff] }
 0x377   :  { %11838 = vst [vmem:[#allocation11_spill] sm:$0xff] %v8221_v20  ;;  %v11513_v25 = vunpack.i.l.bf16 %v8221_v20  ;;  %v5420_v32 = vunpack.i.h.bf16 %v8221_v20  ;;  %v8625_v20 = vld [vmem:[%s11450_s5 + $0x430] sm:$0xff] }
 0x378   :  { %v2587_v2 = vmax.f32 %v2459_v36, %v2571_v16  ;;  %v8335_v36 = vld [vmem:[%s11450_s5 + $0x4c0] sm:$0xff]  ;;  %v8340_v16 = vld [vmem:[%s11450_s5 + $0x6d8] sm:$0xff]  ;;  %11866 = vst [vmem:[#allocation24_spill] sm:$0xff] %v8625_v20 }
 0x379   :  { %v8228_v44 = vpop.permute.xlu0 %2530  ;;  %v2456_v54 = vsel %vm11840_vm0, %v11513_v25, %v5404_v45  ;;  %v2453_v47 = vsel %vm11844_vm13, %v5420_v32, %v8215_v17  ;;  %v2454_v14 = vsel %vm11846_vm11, %v5405_v52, %v5420_v32  ;;  %vm11847_vm0 = vmmov %vm11841_vm10  ;;  %v2824_v52 = vld [vmem:[%s11450_s5 + $0x6f0] sm:$0xff]  ;;  %v8429_v25 = vld [vmem:[%s11450_s5 + $0x498] sm:$0xff] }
 0x37a   :  { %v8231_v8 = vpop.permute.xlu1 %5427  ;;  %2922 = vmatprep.mubr.f32.mxu0 %v2587_v2  ;;  %v2458_v1 = vmax.f32 %v2394_v18, %v2456_v54  ;;  %vm11848_vm10 = vmmov %vm11842_vm8  ;;  %v2461_v37 = vmax.f32 %v2397_v39, %v2453_v47  ;;  %v2460_v18 = vmax.f32 %v2396_v48, %v2454_v14  ;;  %v8306_v45 = vld [vmem:[%s11450_s5 + $0x4d0] sm:$0xff]  ;;  %v8348_v54 = vld [vmem:[%s11450_s5 + $0x4b8] sm:$0xff] }
 0x37b   :  { %11839 = vst [vmem:[#allocation12_spill] sm:$0xff] %v8231_v8  ;;  %v5430_v19 = vunpack.i.h.bf16 %v8231_v8  ;;  %v11515_v43 = vunpack.i.l.bf16 %v8231_v8  ;;  %v8376_v14 = vld [vmem:[%s11450_s5 + $0x6c8] sm:$0xff]  ;;  %vm11851_vm13 = vmmov %vm11848_vm10 }
 0x37c   :  { %v8639_v8 = vld [vmem:[%s11450_s5 + $0x428] sm:$0xff] }
 0x37d   :  { %v2566_v38 = vsel %vm11842_vm8, %v5415_v24, %v5430_v19  ;;  %v2568_v59 = vsel %vm11843_vm9, %v11515_v43, %v5414_v10  ;;  %v8249_v60 = vpop.permute.xlu0 %5437  ;;  %v2565_v50 = vsel %vm11848_vm10, %v5430_v19, %v8228_v44  ;;  %v2823_v24 = vld [vmem:[%s11450_s5 + $0x6e8] sm:$0xff]  ;;  %v8353_v19 = vld [vmem:[%s11450_s5 + $0x6d0] sm:$0xff]  ;;  %vm11849_vm8 = vmmov %vm11846_vm11  ;;  %11868 = vst [vmem:[#allocation26_spill] sm:$0xff] %v8639_v8 }
 0x37e   :  { %v2570_v46 = vmax.f32 %v2520_v29, %v2568_v59  ;;  %v8260_v15 = vpop.permute.xlu1 %2482  ;;  %v2572_v53 = vmax.f32 %v2518_v5, %v2566_v38  ;;  %v11527_v10 = vunpack.i.h.bf16 %v8249_v60  ;;  %v11532_v30 = vunpack.i.l.bf16 %v8249_v60  ;;  %v8371_v5 = vld [vmem:[%s11450_s5 + $0x4b0] sm:$0xff]  ;;  %vm11850_vm9 = vmmov %vm11847_vm0 }
 0x37f   :  { %v2517_v13 = vsel %vm11847_vm0, %v5425_v21, %v8260_v15  ;;  %vm11852_vm15 = vmmov %vm11849_vm8 }
 0x380   :  { %v2573_v51 = vmax.f32 %v2517_v13, %v2565_v50  ;;  %v2586_v57 = vmax.f32 %v2458_v1, %v2570_v46  ;;  %v2588_v39 = vmax.f32 %v2460_v18, %v2572_v53  ;;  %v8385_v53 = vld [vmem:[%s11450_s5 + $0x4a8] sm:$0xff]  ;;  %v8390_v13 = vld [vmem:[%s11450_s5 + $0x6c0] sm:$0xff]  ;;  %v2515_v50 = vsel %vm11850_vm9, %v11532_v30, %v11527_v10  ;;  %vm11853_vm11 = vmmov %vm11847_vm0 }
 0x381   :  { %v8277_v61 = vpop.permute.xlu0 %5447  ;;  %vm11854_vm0 = vmmov %vm11848_vm10  ;;  %v8566_v10 = vld [vmem:[%s11450_s5 + $0x670] sm:$0xff]  ;;  %v8608_v30 = vld [vmem:[%s11450_s5 + $0x658] sm:$0xff] }
 0x382   :  { %v8284_v63 = vpop.permute.xlu1 %5432  ;;  %2923 = vmatmul.mubr.f32.vlgmr.msra.gmra.mxu0 %v2586_v57  ;;  %v2589_v56 = vmax.f32 %v2461_v37, %v2573_v51  ;;  %v11521_v38 = vunpack.i.h.bf16 %v8277_v61  ;;  %v11526_v59 = vunpack.i.l.bf16 %v8277_v61  ;;  %v11517_v57 = vmax.f32 %v8325_v40, 0.0  ;;  %11859 = vst [vmem:[#allocation17_spill] sm:$0xff] %v8566_v10  ;;  %11863 = vst [vmem:[#allocation21_spill] sm:$0xff] %v8608_v30 }
 0x383   :  { %v11525_v34 = vunpack.i.h.bf16 %v8284_v63  ;;  %v11529_v48 = vunpack.i.l.bf16 %v8284_v63  ;;  %3001 = vmatpush1.msra.mxu0 %v8271_v49  ;;  %vm11932_vm10 = vmmov %vm11854_vm0 }
 0x384   :  { %3002 = vmatprep.subr.mxu0 %v8282_v62  ;;  %2993 = vmatprep.mubr.f32.mxu1 %v2589_v56  ;;  %v8413_v56 = vld [vmem:[%s11450_s5 + $0x4a0] sm:$0xff] }
 0x385   :  { %3003 = vmatpush1.msra.mxu0 %v8289_v23  ;;  %2994 = vmatmul.mubr.f32.vlgmr.msra.gmra.mxu1 %v2588_v39  ;;  %v8328_v41 = vpop.permute.xlu0 %5457  ;;  %v2451_v29 = vsel %vm11849_vm8, %v11529_v48, %v11525_v34  ;;  %v8554_v34 = vld [vmem:[%s11450_s5 + $0x678] sm:$0xff]  ;;  %v8589_v48 = vld [vmem:[%s11450_s5 + $0x448] sm:$0xff]  ;;  %vm11937_vm8 = vmmov %vm11850_vm9 }
 0x386   :  { %3004 = vmatprep.subr.mxu0 %v8297_v11  ;;  %3072 = vmatpush1.msra.mxu1 %v2824_v52  ;;  %v8330_v27 = vpop.permute.xlu1 %5442  ;;  %v11520_v1 = vunpack.i.h.bf16 %v8328_v41  ;;  %v11524_v46 = vunpack.i.l.bf16 %v8328_v41  ;;  %v2463_v39 = vmax.f32 %v2399_v22, %v2451_v29  ;;  %11858 = vst [vmem:[#allocation16_spill] sm:$0xff] %v8554_v34  ;;  %vm11939_vm9 = vmmov %vm11852_vm15 }
 0x387   :  { %v11523_v2 = vunpack.i.h.bf16 %v8330_v27  ;;  %v11533_v32 = vunpack.i.l.bf16 %v8330_v27  ;;  %3005 = vmatpush1.msra.mxu0 %v8306_v45  ;;  %3073 = vmatprep.subr.mxu1 %v2823_v24  ;;  %v2247_v21 = vpop.f32.mrf.mxu1 }
 0x388   :  { %3006 = vmatprep.subr.mxu0 %v8317_v4  ;;  %3074 = vmatpush1.msra.mxu1 %v8322_v26  ;;  %v8366_v47 = vadd.f32 %v2247_v21, %v7829_v3  ;;  %v2561_v43 = vsel %vm11854_vm0, %v11524_v46, %v11520_v1  ;;  %v8488_v1 = vld [vmem:[%s11450_s5 + $0x480] sm:$0xff] }
 0x389   :  { %3007 = vmatpush1.msra.mxu0 %v8335_v36  ;;  %3075 = vmatprep.subr.mxu1 %v8340_v16  ;;  %v2563_v51 = vsel %vm11851_vm13, %v11533_v32, %v11523_v2  ;;  %v8535_v2 = vld [vmem:[%s11450_s5 + $0x468] sm:$0xff]  ;;  %v8548_v46 = vld [vmem:[%s11450_s5 + $0x460] sm:$0xff]  ;;  %v8613_v32 = vld [vmem:[%s11450_s5 + $0x438] sm:$0xff] }
 0x38a   :  { %v11516_v37 = vmax.f32 %v8366_v47, 0.0  ;;  %3008 = vmatprep.subr.mxu0 %v8348_v54  ;;  %3076 = vmatpush1.msra.mxu1 %v8353_v19  ;;  %v8408_v18 = vpop.permute.xlu1 %5452  ;;  %v2575_v52 = vmax.f32 %v2515_v50, %v2563_v51  ;;  %v2449_v50 = vsel %vm11852_vm15, %v11526_v59, %v11521_v38  ;;  %v2249_v51 = vpop.f32.mrf.mxu1  ;;  %v8559_v59 = vld [vmem:[%s11450_s5 + $0x458] sm:$0xff]  ;;  %11864 = vst [vmem:[#allocation22_spill] sm:$0xff] %v8613_v32  ;;  %vm11942_vm13 = vmmov %vm11937_vm8 }
 0x38b   :  { %v11519_v24 = vunpack.i.h.bf16 %v8408_v18  ;;  %v11528_v21 = vunpack.i.l.bf16 %v8408_v18  ;;  %3009 = vmatpush1.msra.mxu0 %v8371_v5  ;;  %3077 = vmatprep.subr.mxu1 %v8376_v14  ;;  %v2465_v38 = vmax.f32 %v2401_v28, %v2449_v50  ;;  %v8493_v55 = vadd.f32 %v2249_v51, %v7829_v3  ;;  %v8515_v28 = vld [vmem:[%s11450_s5 + $0x690] sm:$0xff]  ;;  %vm11948_vm15 = vmmov %vm11939_vm9 }
 0x38c   :  { %3010 = vmatprep.subr.mxu0 %v8385_v53  ;;  %3078 = vmatpush1.msra.mxu1 %v8390_v13  ;;  %v2591_v22 = vmax.f32 %v2463_v39, %v2575_v52  ;;  %v5466_v29 = vpack.i.bf16 %v11516_v37, %v11517_v57  ;;  %v8458_v39 = vld [vmem:[%s11450_s5 + $0x6a8] sm:$0xff] }
 0x38d   :  { %3011 = vmatpush1.msra.mxu0 %v8413_v56  ;;  %3079 = vmatprep.subr.mxu1 %v8418_v33  ;;  %v2513_v52 = vsel %vm11853_vm11, %v11528_v21, %v11519_v24  ;;  %v8477_v37 = vld [vmem:[%s11450_s5 + $0x488] sm:$0xff]  ;;  %vm11951_vm11 = vmmov %vm11854_vm0 }
 0x38e   :  { %3012 = vmatprep.subr.mxu0 %v8429_v25  ;;  %3080 = vmatpush1.msra.mxu1 %v8434_v12  ;;  %v2577_v57 = vmax.f32 %v2513_v52, %v2561_v43  ;;  %v8528_v52 = vld [vmem:[%s11450_s5 + $0x688] sm:$0xff]  ;;  %vm11960_vm0 = vmmov %vm11939_vm9 }
 0x38f   :  { %3013 = vmatpush1.msra.mxu0 %v8441_v42  ;;  %3064 = vmatprep.mubr.f32.mxu0 %v2591_v22  ;;  %v2318_v24 = vpop.f32.mrf.mxu0  ;;  %v8503_v22 = vld [vmem:[%s11450_s5 + $0x698] sm:$0xff]  ;;  %11856 = vst [vmem:[#allocation14_spill] sm:$0xff] %v8528_v52 }
 0x390   :  { %3081 = vmatprep.subr.mxu1 %v8458_v39  ;;  %5467 = vrot.lane.b32.xlu0 %v5466_v29, %s11734_s6  ;;  %v8498_v43 = vadd.f32 %v2318_v24, %v7829_v3  ;;  %v8520_v24 = vld [vmem:[%s11450_s5 + $0x470] sm:$0xff]  ;;  %v2593_v50 = vmax.f32 %v2465_v38, %v2577_v57  ;;  %v11531_v38 = vmax.f32 %v8493_v55, 0.0  ;;  %v8543_v57 = vld [vmem:[%s11450_s5 + $0x680] sm:$0xff] }
 0x391   :  { %5462 = vrot.lane.b32.xlu1 %v5466_v29, %s11736_s24  ;;  %3014 = vmatprep.subr.mxu0 %v8477_v37  ;;  %11857 = vst [vmem:[#allocation15_spill] sm:$0xff] %v8543_v57 }
 0x392   :  { %11855 = vst [vmem:[#allocation13_spill] sm:$0xff] %v8498_v43  ;;  %3082 = vmatpush1.msra.mxu1 %v8483_v35  ;;  %v11530_v51 = vmax.f32 %v8498_v43, 0.0  ;;  %3015 = vmatpush1.msra.mxu0 %v8488_v1  ;;  %v8620_v43 = vld [vmem:[%s11450_s5 + $0x650] sm:$0xff] }
 0x393   :  { %3083 = vmatprep.subr.mxu1 %v8503_v22  ;;  %3016 = vmatprep.subr.mxu0 %v8508_v58  ;;  %11865 = vst [vmem:[#allocation23_spill] sm:$0xff] %v8620_v43 }
 0x394   :  { %3084 = vmatpush1.msra.mxu1 %v8515_v28  ;;  %3017 = vmatpush1.msra.mxu0 %v8520_v24  ;;  %v5481_v21 = vpack.i.bf16 %v11530_v51, %v11531_v38  ;;  %v8596_v51 = vld [vmem:[%s11450_s5 + $0x660] sm:$0xff] }
 0x395   :  { %3085 = vmatprep.subr.mxu1 %v8528_v52  ;;  %3135 = vmatprep.mubr.f32.mxu1 %v2593_v50  ;;  %v8571_v50 = vld [vmem:[%s11450_s5 + $0x450] sm:$0xff]  ;;  %11861 = vst [vmem:[#allocation19_spill] sm:$0xff] %v8596_v51  ;;  %v8601_v38 = vld [vmem:[%s11450_s5 + $0x440] sm:$0xff] }
 0x396   :  { %5472 = vrot.lane.b32.xlu1 %v5466_v29, %s11733_s25  ;;  %3018 = vmatprep.subr.mxu0 %v8535_v2  ;;  %v8582_v29 = vld [vmem:[%s11450_s5 + $0x668] sm:$0xff]  ;;  %11862 = vst [vmem:[#allocation20_spill] sm:$0xff] %v8601_v38 }
 0x397   :  { %3086 = vmatpush1.msra.mxu1 %v8543_v57  ;;  %3019 = vmatpush1.msra.mxu0 %v8548_v46  ;;  %11860 = vst [vmem:[#allocation18_spill] sm:$0xff] %v8582_v29  ;;  %v11940_v57 = vunpack.i.l.bf16 %v8408_v18 }
 0x398   :  { %3087 = vmatprep.subr.mxu1 %v8554_v34  ;;  %3020 = vmatprep.subr.mxu0 %v8559_v59 }
 0x399   :  { %3088 = vmatpush1.msra.mxu1 %v8566_v10  ;;  %3021 = vmatpush1.msra.mxu0 %v8571_v50  ;;  %v8668_v10 = vld [vmem:[%s11450_s5 + $0x630] sm:$0xff] }
 0x39a   :  { %3089 = vmatprep.subr.mxu1 %v8582_v29  ;;  %5482 = vrot.lane.b32.xlu1 %v5481_v21, %s11734_s6  ;;  %v8656_v29 = vld [vmem:[%s11450_s5 + $0x638] sm:$0xff]  ;;  %11873 = vst [vmem:[#allocation31_spill] sm:$0xff] %v8668_v10 }
 0x39b   :  { %5477 = vrot.lane.b32.xlu0 %v5481_v21, %s11736_s24  ;;  %3022 = vmatprep.subr.mxu0 %v8589_v48  ;;  %11871 = vst [vmem:[#allocation29_spill] sm:$0xff] %v8656_v29 }
 0x39c   :  { %3090 = vmatpush1.msra.mxu1 %v8596_v51  ;;  %3023 = vmatpush1.msra.mxu0 %v8601_v38  ;;  %v8644_v51 = vld [vmem:[%s11450_s5 + $0x640] sm:$0xff]  ;;  %v11941_v38 = vunpack.i.h.bf16 %v8249_v60 }
 0x39d   :  { %3091 = vmatprep.subr.mxu1 %v8608_v30  ;;  %3024 = vmatprep.subr.mxu0 %v8613_v32  ;;  %11869 = vst [vmem:[#allocation27_spill] sm:$0xff] %v8644_v51  ;;  %v8651_v30 = vld [vmem:[%s11450_s5 + $0x420] sm:$0xff]  ;;  %v2320_v32 = vpop.f32.mrf.mxu0 }
 0x39e   :  { %3092 = vmatpush1.msra.mxu1 %v8620_v43  ;;  %3025 = vmatpush1.msra.mxu0 %v8625_v20  ;;  %11870 = vst [vmem:[#allocation28_spill] sm:$0xff] %v8651_v30  ;;  %v8663_v43 = vld [vmem:[%s11450_s5 + $0x418] sm:$0xff]  ;;  %v11931_v20 = vunpack.i.l.bf16 %v8330_v27  ;;  %v2514_v52 = vsel %vm11942_vm13, %v11941_v38, %v11940_v57  ;;  %v9085_v38 = vld [vmem:[%s11450_s5 + $0x728] sm:$0xff]  ;;  %v11946_v57 = vunpack.i.l.bf16 %v8277_v61  ;;  %vm11965_vm13 = vmmov %vm11937_vm8 }
 0x39f   :  { %3093 = vmatprep.subr.mxu1 %v8632_v0  ;;  %5487 = vrot.lane.b32.xlu0 %v5481_v21, %s11733_s25  ;;  %11872 = vst [vmem:[#allocation30_spill] sm:$0xff] %v8663_v43  ;;  %v8675_v0 = vld [vmem:[%s11450_s5 + $0x410] sm:$0xff]  ;;  %v8680_v21 = vld [vmem:[%s11450_s5 + $0x628] sm:$0xff]  ;;  %11945 = vst [vmem:[#allocation94_spill] sm:$0xff] %v9085_v38 }
 0x3a0   :  { %3026 = vmatprep.subr.mxu0 %v8639_v8  ;;  %3094 = vmatpush1.msra.mxu1 %v8644_v51  ;;  %11874 = vst [vmem:[#allocation32_spill] sm:$0xff] %v8675_v0  ;;  %11875 = vst [vmem:[#allocation33_spill] sm:$0xff] %v8680_v21  ;;  %v8687_v8 = vld [vmem:[%s11450_s5 + $0x408] sm:$0xff]  ;;  %v8692_v51 = vld [vmem:[%s11450_s5 + $0x620] sm:$0xff]  ;;  %v2564_v34 = vsel %vm11932_vm10, %v8228_v44, %v11931_v20 }
 0x3a1   :  { %3027 = vmatpush1.msra.mxu0 %v8651_v30  ;;  %3095 = vmatprep.subr.mxu1 %v8656_v29  ;;  %11876 = vst [vmem:[#allocation34_spill] sm:$0xff] %v8687_v8  ;;  %11877 = vst [vmem:[#allocation35_spill] sm:$0xff] %v8692_v51  ;;  %v8699_v30 = vld [vmem:[%s11450_s5 + $0x400] sm:$0xff]  ;;  %v8704_v29 = vld [vmem:[%s11450_s5 + $0x618] sm:$0xff] }
 0x3a2   :  { %3028 = vmatprep.subr.mxu0 %v8663_v43  ;;  %3096 = vmatpush1.msra.mxu1 %v8668_v10  ;;  %11878 = vst [vmem:[#allocation36_spill] sm:$0xff] %v8699_v30  ;;  %11879 = vst [vmem:[#allocation37_spill] sm:$0xff] %v8704_v29  ;;  %v8711_v43 = vld [vmem:[%s11450_s5 + $0x5f8] sm:$0xff]  ;;  %v8716_v10 = vld [vmem:[%s11450_s5 + $0x610] sm:$0xff] }
 0x3a3   :  { %3029 = vmatpush1.msra.mxu0 %v8675_v0  ;;  %3097 = vmatprep.subr.mxu1 %v8680_v21  ;;  %11880 = vst [vmem:[#allocation38_spill] sm:$0xff] %v8711_v43  ;;  %11881 = vst [vmem:[#allocation39_spill] sm:$0xff] %v8716_v10  ;;  %v8723_v0 = vld [vmem:[%s11450_s5 + $0x5f0] sm:$0xff]  ;;  %v8728_v21 = vld [vmem:[%s11450_s5 + $0x608] sm:$0xff] }
 0x3a4   :  { %3030 = vmatprep.subr.mxu0 %v8687_v8  ;;  %3098 = vmatpush1.msra.mxu1 %v8692_v51  ;;  %11882 = vst [vmem:[#allocation40_spill] sm:$0xff] %v8723_v0  ;;  %11883 = vst [vmem:[#allocation41_spill] sm:$0xff] %v8728_v21  ;;  %v8735_v8 = vld [vmem:[%s11450_s5 + $0x5e8] sm:$0xff]  ;;  %v8740_v51 = vld [vmem:[%s11450_s5 + $0x600] sm:$0xff] }
 0x3a5   :  { %3031 = vmatpush1.msra.mxu0 %v8699_v30  ;;  %3099 = vmatprep.subr.mxu1 %v8704_v29  ;;  %11884 = vst [vmem:[#allocation42_spill] sm:$0xff] %v8735_v8  ;;  %11885 = vst [vmem:[#allocation43_spill] sm:$0xff] %v8740_v51  ;;  %v8747_v30 = vld [vmem:[%s11450_s5 + $0x5e0] sm:$0xff]  ;;  %v8752_v29 = vld [vmem:[%s11450_s5 + $0x7f8] sm:$0xff] }
 0x3a6   :  { %3032 = vmatprep.subr.mxu0 %v8711_v43  ;;  %3100 = vmatpush1.msra.mxu1 %v8716_v10  ;;  %11886 = vst [vmem:[#allocation44_spill] sm:$0xff] %v8747_v30  ;;  %11887 = vst [vmem:[#allocation45_spill] sm:$0xff] %v8752_v29  ;;  %v8759_v43 = vld [vmem:[%s11450_s5 + $0x5d8] sm:$0xff]  ;;  %v8764_v10 = vld [vmem:[%s11450_s5 + $0x7f0] sm:$0xff] }
 0x3a7   :  { %3033 = vmatpush2.msra.mxu0 %v8723_v0  ;;  %3101 = vmatprep.subr.mxu1 %v8728_v21  ;;  %11888 = vst [vmem:[#allocation46_spill] sm:$0xff] %v8759_v43  ;;  %11889 = vst [vmem:[#allocation47_spill] sm:$0xff] %v8764_v10  ;;  %v8771_v0 = vld [vmem:[%s11450_s5 + $0x5d0] sm:$0xff]  ;;  %v8776_v21 = vld [vmem:[%s11450_s5 + $0x7e8] sm:$0xff] }
 0x3a8   :  { %3034 = vmatprep.subr.mxu0 %v8735_v8  ;;  %3102 = vmatpush1.msra.mxu1 %v8740_v51  ;;  %11890 = vst [vmem:[#allocation48_spill] sm:$0xff] %v8771_v0  ;;  %11891 = vst [vmem:[#allocation49_spill] sm:$0xff] %v8776_v21  ;;  %v8783_v8 = vld [vmem:[%s11450_s5 + $0x5c8] sm:$0xff]  ;;  %v8788_v51 = vld [vmem:[%s11450_s5 + $0x7e0] sm:$0xff] }
 0x3a9   :  { %3035 = vmatpush2.msra.mxu0 %v8747_v30  ;;  %3103 = vmatprep.subr.mxu1 %v8752_v29  ;;  %11892 = vst [vmem:[#allocation50_spill] sm:$0xff] %v8783_v8  ;;  %11893 = vst [vmem:[#allocation51_spill] sm:$0xff] %v8788_v51  ;;  %v8795_v30 = vld [vmem:[%s11450_s5 + $0x5c0] sm:$0xff]  ;;  %v8800_v29 = vld [vmem:[%s11450_s5 + $0x7d8] sm:$0xff] }
 0x3aa   :  { %3036 = vmatprep.subr.mxu0 %v8759_v43  ;;  %3104 = vmatpush2.msra.mxu1 %v8764_v10  ;;  %11894 = vst [vmem:[#allocation52_spill] sm:$0xff] %v8795_v30  ;;  %11895 = vst [vmem:[#allocation53_spill] sm:$0xff] %v8800_v29  ;;  %v8807_v43 = vld [vmem:[%s11450_s5 + $0x5b8] sm:$0xff]  ;;  %v8812_v10 = vld [vmem:[%s11450_s5 + $0x7d0] sm:$0xff] }
 0x3ab   :  { %3037 = vmatpush2.msra.mxu0 %v8771_v0  ;;  %3105 = vmatprep.subr.mxu1 %v8776_v21  ;;  %11896 = vst [vmem:[#allocation54_spill] sm:$0xff] %v8807_v43  ;;  %11897 = vst [vmem:[#allocation55_spill] sm:$0xff] %v8812_v10  ;;  %v8819_v0 = vld [vmem:[%s11450_s5 + $0x5b0] sm:$0xff]  ;;  %v8824_v21 = vld [vmem:[%s11450_s5 + $0x7c8] sm:$0xff] }
 0x3ac   :  { %3038 = vmatprep.subr.mxu0 %v8783_v8  ;;  %3106 = vmatpush2.msra.mxu1 %v8788_v51  ;;  %11898 = vst [vmem:[#allocation56_spill] sm:$0xff] %v8819_v0  ;;  %11899 = vst [vmem:[#allocation57_spill] sm:$0xff] %v8824_v21  ;;  %v8831_v8 = vld [vmem:[%s11450_s5 + $0x5a8] sm:$0xff]  ;;  %v8836_v51 = vld [vmem:[%s11450_s5 + $0x7c0] sm:$0xff] }
 0x3ad   :  { %3039 = vmatpush2.msra.mxu0 %v8795_v30  ;;  %3107 = vmatprep.subr.mxu1 %v8800_v29  ;;  %11900 = vst [vmem:[#allocation58_spill] sm:$0xff] %v8831_v8  ;;  %11901 = vst [vmem:[#allocation59_spill] sm:$0xff] %v8836_v51  ;;  %v8843_v30 = vld [vmem:[%s11450_s5 + $0x5a0] sm:$0xff]  ;;  %v8848_v29 = vld [vmem:[%s11450_s5 + $0x7b8] sm:$0xff] }
 0x3ae   :  { %3040 = vmatprep.subr.mxu0 %v8807_v43  ;;  %3108 = vmatpush2.msra.mxu1 %v8812_v10  ;;  %11902 = vst [vmem:[#allocation60_spill] sm:$0xff] %v8843_v30  ;;  %11903 = vst [vmem:[#allocation61_spill] sm:$0xff] %v8848_v29  ;;  %v8855_v43 = vld [vmem:[%s11450_s5 + $0x598] sm:$0xff]  ;;  %v8860_v10 = vld [vmem:[%s11450_s5 + $0x7b0] sm:$0xff] }
 0x3af   :  { %3041 = vmatpush2.msra.mxu0 %v8819_v0  ;;  %3109 = vmatprep.subr.mxu1 %v8824_v21  ;;  %11904 = vst [vmem:[#allocation62_spill] sm:$0xff] %v8855_v43  ;;  %11905 = vst [vmem:[#allocation63_spill] sm:$0xff] %v8860_v10  ;;  %v8867_v0 = vld [vmem:[%s11450_s5 + $0x590] sm:$0xff]  ;;  %v8872_v21 = vld [vmem:[%s11450_s5 + $0x7a8] sm:$0xff] }
 0x3b0   :  { %3042 = vmatprep.subr.mxu0 %v8831_v8  ;;  %3110 = vmatpush2.msra.mxu1 %v8836_v51  ;;  %11906 = vst [vmem:[#allocation64_spill] sm:$0xff] %v8867_v0  ;;  %11907 = vst [vmem:[#allocation65_spill] sm:$0xff] %v8872_v21  ;;  %v8879_v8 = vld [vmem:[%s11450_s5 + $0x588] sm:$0xff]  ;;  %v8884_v51 = vld [vmem:[%s11450_s5 + $0x7a0] sm:$0xff] }
 0x3b1   :  { %3043 = vmatpush2.msra.mxu0 %v8843_v30  ;;  %3111 = vmatprep.subr.mxu1 %v8848_v29  ;;  %11908 = vst [vmem:[#allocation66_spill] sm:$0xff] %v8879_v8  ;;  %11909 = vst [vmem:[#allocation67_spill] sm:$0xff] %v8884_v51  ;;  %v8891_v30 = vld [vmem:[%s11450_s5 + $0x580] sm:$0xff]  ;;  %v8896_v29 = vld [vmem:[%s11450_s5 + $0x798] sm:$0xff] }
 0x3b2   :  { %3044 = vmatprep.subr.mxu0 %v8855_v43  ;;  %3112 = vmatpush2.msra.mxu1 %v8860_v10  ;;  %11910 = vst [vmem:[#allocation68_spill] sm:$0xff] %v8891_v30  ;;  %11911 = vst [vmem:[#allocation69_spill] sm:$0xff] %v8896_v29  ;;  %v8903_v43 = vld [vmem:[%s11450_s5 + $0x578] sm:$0xff]  ;;  %v8908_v10 = vld [vmem:[%s11450_s5 + $0x790] sm:$0xff] }
 0x3b3   :  { %3045 = vmatpush2.msra.mxu0 %v8867_v0  ;;  %3113 = vmatprep.subr.mxu1 %v8872_v21  ;;  %11912 = vst [vmem:[#allocation70_spill] sm:$0xff] %v8903_v43  ;;  %11913 = vst [vmem:[#allocation71_spill] sm:$0xff] %v8908_v10  ;;  %v8915_v0 = vld [vmem:[%s11450_s5 + $0x570] sm:$0xff]  ;;  %v8920_v21 = vld [vmem:[%s11450_s5 + $0x788] sm:$0xff] }
 0x3b4   :  { %3046 = vmatprep.subr.mxu0 %v8879_v8  ;;  %3114 = vmatpush2.msra.mxu1 %v8884_v51  ;;  %11914 = vst [vmem:[#allocation72_spill] sm:$0xff] %v8915_v0  ;;  %11915 = vst [vmem:[#allocation73_spill] sm:$0xff] %v8920_v21  ;;  %v8927_v8 = vld [vmem:[%s11450_s5 + $0x568] sm:$0xff]  ;;  %v8932_v51 = vld [vmem:[%s11450_s5 + $0x780] sm:$0xff] }
 0x3b5   :  { %3047 = vmatpush2.msra.mxu0 %v8891_v30  ;;  %3115 = vmatprep.subr.mxu1 %v8896_v29  ;;  %11916 = vst [vmem:[#allocation74_spill] sm:$0xff] %v8927_v8  ;;  %11917 = vst [vmem:[#allocation75_spill] sm:$0xff] %v8932_v51  ;;  %v8939_v30 = vld [vmem:[%s11450_s5 + $0x560] sm:$0xff]  ;;  %v8944_v29 = vld [vmem:[%s11450_s5 + $0x778] sm:$0xff] }
 0x3b6   :  { %3048 = vmatprep.subr.mxu0 %v8903_v43  ;;  %3116 = vmatpush2.msra.mxu1 %v8908_v10  ;;  %11918 = vst [vmem:[#allocation76_spill] sm:$0xff] %v8939_v30  ;;  %11919 = vst [vmem:[#allocation77_spill] sm:$0xff] %v8944_v29  ;;  %v8951_v43 = vld [vmem:[%s11450_s5 + $0x558] sm:$0xff]  ;;  %v8956_v10 = vld [vmem:[%s11450_s5 + $0x770] sm:$0xff] }
 0x3b7   :  { %3049 = vmatpush2.msra.mxu0 %v8915_v0  ;;  %3117 = vmatprep.subr.mxu1 %v8920_v21  ;;  %11920 = vst [vmem:[#allocation78_spill] sm:$0xff] %v8951_v43  ;;  %11921 = vst [vmem:[#allocation79_spill] sm:$0xff] %v8956_v10  ;;  %v8963_v0 = vld [vmem:[%s11450_s5 + $0x550] sm:$0xff]  ;;  %v8968_v21 = vld [vmem:[%s11450_s5 + $0x768] sm:$0xff] }
 0x3b8   :  { %3050 = vmatprep.subr.mxu0 %v8927_v8  ;;  %3118 = vmatpush2.msra.mxu1 %v8932_v51  ;;  %11922 = vst [vmem:[#allocation80_spill] sm:$0xff] %v8963_v0  ;;  %11923 = vst [vmem:[#allocation81_spill] sm:$0xff] %v8968_v21  ;;  %v8975_v8 = vld [vmem:[%s11450_s5 + $0x548] sm:$0xff]  ;;  %v8980_v51 = vld [vmem:[%s11450_s5 + $0x760] sm:$0xff] }
 0x3b9   :  { %3051 = vmatpush2.msra.mxu0 %v8939_v30  ;;  %3119 = vmatprep.subr.mxu1 %v8944_v29  ;;  %11924 = vst [vmem:[#allocation82_spill] sm:$0xff] %v8975_v8  ;;  %11925 = vst [vmem:[#allocation83_spill] sm:$0xff] %v8980_v51  ;;  %v8987_v30 = vld [vmem:[%s11450_s5 + $0x540] sm:$0xff]  ;;  %v8992_v29 = vld [vmem:[%s11450_s5 + $0x758] sm:$0xff] }
 0x3ba   :  { %3052 = vmatprep.subr.mxu0 %v8951_v43  ;;  %3120 = vmatpush2.msra.mxu1 %v8956_v10  ;;  %11926 = vst [vmem:[#allocation84_spill] sm:$0xff] %v8987_v30  ;;  %11927 = vst [vmem:[#allocation85_spill] sm:$0xff] %v8992_v29  ;;  %v8999_v43 = vld [vmem:[%s11450_s5 + $0x538] sm:$0xff]  ;;  %v9004_v10 = vld [vmem:[%s11450_s5 + $0x750] sm:$0xff] }
 0x3bb   :  { %3053 = vmatpush2.msra.mxu0 %v8963_v0  ;;  %3121 = vmatprep.subr.mxu1 %v8968_v21  ;;  %11928 = vst [vmem:[#allocation86_spill] sm:$0xff] %v8999_v43  ;;  %11929 = vst [vmem:[#allocation87_spill] sm:$0xff] %v9004_v10  ;;  %v9011_v0 = vld [vmem:[%s11450_s5 + $0x530] sm:$0xff]  ;;  %v9016_v21 = vld [vmem:[%s11450_s5 + $0x748] sm:$0xff] }
 0x3bc   :  { %3054 = vmatprep.subr.mxu0 %v8975_v8  ;;  %3122 = vmatpush2.msra.mxu1 %v8980_v51  ;;  %11930 = vst [vmem:[#allocation88_spill] sm:$0xff] %v9016_v21  ;;  %v9028_v51 = vld [vmem:[%s11450_s5 + $0x528] sm:$0xff]  ;;  %v9033_v8 = vld [vmem:[%s11450_s5 + $0x740] sm:$0xff]  ;;  %v9045_v44 = vld [vmem:[%s11450_s5 + $0x738] sm:$0xff] }
 0x3bd   :  { %3055 = vmatpush2.msra.mxu0 %v8987_v30  ;;  %3123 = vmatprep.subr.mxu1 %v8992_v29  ;;  %11933 = vst [vmem:[#allocation89_spill] sm:$0xff] %v9028_v51  ;;  %11934 = vst [vmem:[#allocation90_spill] sm:$0xff] %v9033_v8  ;;  %v9040_v20 = vld [vmem:[%s11450_s5 + $0x520] sm:$0xff]  ;;  %v11936_v29 = vunpack.i.l.bf16 %v8249_v60  ;;  %v9080_v60 = vld [vmem:[%s11450_s5 + $0x510] sm:$0xff] }
 0x3be   :  { %3056 = vmatprep.subr.mxu0 %v8999_v43  ;;  %3124 = vmatpush2.msra.mxu1 %v9004_v10  ;;  %11935 = vst [vmem:[#allocation91_spill] sm:$0xff] %v9045_v44  ;;  %v11938_v43 = vunpack.i.l.bf16 %v8284_v63  ;;  %11944 = vst [vmem:[#allocation93_spill] sm:$0xff] %v9080_v60 }
 0x3bf   :  { %v2516_v30 = vsel %vm11937_vm8, %v8260_v15, %v11936_v29  ;;  %3057 = vmatpush2.msra.mxu0 %v9011_v0  ;;  %3125 = vmatprep.subr.mxu1 %v9016_v21  ;;  %v9068_v15 = vld [vmem:[%s11450_s5 + $0x518] sm:$0xff]  ;;  %v11947_v29 = vunpack.i.h.bf16 %v8284_v63  ;;  %v9107_v63 = vld [vmem:[%s11450_s5 + $0x508] sm:$0xff]  ;;  %vm11961_vm10 = vmmov %vm11960_vm0 }
 0x3c0   :  { %v2452_v10 = vsel %vm11939_vm9, %v8215_v17, %v11938_v43  ;;  %v9073_v17 = vld [vmem:[%s11450_s5 + $0x730] sm:$0xff]  ;;  %v2574_v43 = vmax.f32 %v2516_v30, %v2564_v34  ;;  %3058 = vmatprep.subr.mxu0 %v9028_v51  ;;  %3126 = vmatpush2.msra.mxu1 %v9033_v8  ;;  %v11949_v30 = vunpack.i.l.bf16 %v8328_v41  ;;  %v11950_v8 = vunpack.i.h.bf16 %v8330_v27  ;;  %vm11964_vm9 = vmmov %vm11951_vm11 }
 0x3c1   :  { %11943 = vst [vmem:[#allocation92_spill] sm:$0xff] %v9073_v17  ;;  %v2450_v34 = vsel %vm11948_vm15, %v11947_v29, %v11946_v57  ;;  %v9100_v51 = vadd.f32 %v2320_v32, %v7829_v3  ;;  %3059 = vmatpush2.msra.mxu0 %v9040_v20  ;;  %3127 = vmatprep.subr.mxu1 %v9045_v44  ;;  %v9112_v57 = vld [vmem:[%s11450_s5 + $0x720] sm:$0xff]  ;;  %v9125_v29 = vld [vmem:[%s11450_s5 + $0x718] sm:$0xff]  ;;  %vm11966_vm15 = vmmov %vm11964_vm9 }
 0x3c2   :  { %v2562_v21 = vsel %vm11951_vm11, %v11950_v8, %v11949_v30  ;;  %11952 = vst [vmem:[#allocation95_spill] sm:$0xff] %v9112_v57  ;;  %v2462_v27 = vmax.f32 %v7905_v31, %v2452_v10  ;;  %3060 = vmatprep.subr.mxu0 %v9068_v15  ;;  %3128 = vmatpush2.msra.mxu1 %v9073_v17  ;;  %v9120_v32 = vld [vmem:[%s11450_s5 + $0x500] sm:$0xff]  ;;  %11953 = vst [vmem:[#allocation96_spill] sm:$0xff] %v9125_v29  ;;  %v2389_v30 = vpop.f32.mrf.mxu1  ;;  %v9132_v31 = vld [vmem:[%s11450_s5 + $0x710] sm:$0xff] }
 0x3c3   :  { %v2576_v8 = vmax.f32 %v2514_v52, %v2562_v21  ;;  %3061 = vmatpush2.msra.mxu0 %v9080_v60  ;;  %3129 = vmatprep.subr.mxu1 %v9085_v38  ;;  %11954 = vst [vmem:[#allocation97_spill] sm:$0xff] %v9132_v31  ;;  %v9135_v10 = vadd.f32 %v2389_v30, %v7829_v3  ;;  %v11956_v52 = vmax.f32 %v7915_v9, 0.0  ;;  %v9144_v38 = vld [vmem:[%s11450_s5 + $0x708] sm:$0xff]  ;;  %v11620_v60 = vmax.f32 %v9100_v51, 0.0  ;;  %vm11969_vm11 = vmmov %vm11960_vm0 }
 0x3c4   :  { %3062 = vmatprep.subr.mxu0 %v9107_v63  ;;  %3130 = vmatpush2.msra.mxu1 %v9112_v57  ;;  %v2590_v17 = vmax.f32 %v2462_v27, %v2574_v43  ;;  %11957 = vst [vmem:[#allocation99_spill] sm:$0xff] %v9144_v38  ;;  %v2391_v44 = vpop.f32.mrf.mxu1 }
 0x3c5   :  { %11955 = vst [vmem:[#allocation98_spill] sm:$0xff] %v9135_v10  ;;  %v2464_v21 = vmax.f32 %v11956_v52, %v2450_v34  ;;  %3063 = vmatpush2.msra.mxu0 %v9120_v32  ;;  %3131 = vmatprep.subr.mxu1 %v9125_v29  ;;  %v11619_v9 = vmax.f32 %v9135_v10, 0.0  ;;  %v9153_v34 = vld [vmem:[%s11450_s5 + $0x700] sm:$0xff]  ;;  %v2392_v27 = vadd.f32 %v2391_v44, %v7829_v3  ;;  %v5566_v52 = vld [vmem:[%s11450_s5 + $0xf8] sm:$0xff]  ;;  %v5568_v3 = vld [vmem:[%s11450_s5 + $0xe8] sm:$0xff] }
 0x3c6   :  { %11958 = vst [vmem:[#allocation100_spill] sm:$0xff] %v9153_v34  ;;  %3065 = vmatmul.mubr.f32.vlgmr.msra.gmra.mxu0 %v2590_v17  ;;  %3132 = vmatpush2.msra.mxu1 %v9132_v31  ;;  %v5567_v17 = vld [vmem:[%s11450_s5 + $0xf0] sm:$0xff]  ;;  %v5689_v31 = vld [vmem:[%s11450_s5 + $0x328] sm:$0xff] }
 0x3c7   :  { %v2592_v43 = vmax.f32 %v2464_v21, %v2576_v8  ;;  %3133 = vmatprep.subr.mxu1 %v9144_v38  ;;  %v5496_v30 = vpack.i.bf16 %v11619_v9, %v11620_v60  ;;  %3142 = vmatprep.subr.mxu0 %v5566_v52  ;;  %v9174_v44 = vmax.f32 %v2392_v27, 0.0  ;;  %v5569_v8 = vld [vmem:[%s11450_s5 + $0xe0] sm:$0xff]  ;;  %v5570_v21 = vld [vmem:[%s11450_s5 + $0x2f8] sm:$0xff]  ;;  %v5572_v27 = vld [vmem:[%s11450_s5 + $0x2f0] sm:$0xff] }
 0x3c8   :  { %3134 = vmatpush2.msra.mxu1 %v9153_v34  ;;  %3143 = vmatpush1.msra.mxu0 %v5567_v17  ;;  %v5573_v52 = vld [vmem:[%s11450_s5 + $0xd0] sm:$0xff]  ;;  %v5574_v17 = vld [vmem:[%s11450_s5 + $0xc8] sm:$0xff]  ;;  %v5687_v60 = vld [vmem:[%s11450_s5 + $0x4f8] sm:$0xff] }
 0x3c9   :  { %3136 = vmatmul.mubr.f32.vlgmr.msra.gmra.mxu1 %v2592_v43  ;;  %5497 = vrot.lane.b32.xlu0 %v5496_v30, %s11734_s6  ;;  %v5571_v43 = vld [vmem:[%s11450_s5 + $0xd8] sm:$0xff] }
 0x3ca   :  { %5492 = vrot.lane.b32.xlu1 %v5496_v30, %s11736_s24  ;;  %3144 = vmatprep.subr.mxu0 %v5568_v3  ;;  %v5575_v3 = vld [vmem:[%s11450_s5 + $0xc0] sm:$0xff] }
 0x3cb   :  { %3145 = vmatpush1.msra.mxu0 %v5569_v8  ;;  %3213 = vmatprep.subr.mxu1 %v5570_v21  ;;  %v5576_v8 = vld [vmem:[%s11450_s5 + $0x2e8] sm:$0xff]  ;;  %v5577_v21 = vld [vmem:[%s11450_s5 + $0xb8] sm:$0xff] }
 0x3cc   :  { %3146 = vmatprep.subr.mxu0 %v5571_v43  ;;  %3214 = vmatpush1.msra.mxu1 %v5572_v27  ;;  %v5579_v43 = vld [vmem:[%s11450_s5 + $0xb0] sm:$0xff]  ;;  %v5580_v27 = vld [vmem:[%s11450_s5 + $0xa8] sm:$0xff] }
 0x3cd   :  { %2440 = vrot.lane.b32.xlu0 %v9174_v44, %s11736_s24  ;;  %3147 = vmatpush1.msra.mxu0 %v5573_v52  ;;  %v5581_v52 = vld [vmem:[%s11450_s5 + $0xa0] sm:$0xff] }
 0x3ce   :  { %5502 = vrot.lane.b32.xlu1 %v5496_v30, %s11733_s25  ;;  %3148 = vmatprep.subr.mxu0 %v5574_v17  ;;  %v5578_v30 = vld [vmem:[%s11450_s5 + $0x2e0] sm:$0xff]  ;;  %v5582_v17 = vld [vmem:[%s11450_s5 + $0x2d8] sm:$0xff] }
 0x3cf   :  { %3149 = vmatpush1.msra.mxu0 %v5575_v3  ;;  %3215 = vmatprep.subr.mxu1 %v5576_v8  ;;  %v5583_v3 = vld [vmem:[%s11450_s5 + $0x98] sm:$0xff]  ;;  %v5584_v8 = vld [vmem:[%s11450_s5 + $0x2d0] sm:$0xff] }
 0x3d0   :  { %3150 = vmatprep.subr.mxu0 %v5577_v21  ;;  %3216 = vmatpush1.msra.mxu1 %v5578_v30  ;;  %v5585_v21 = vld [vmem:[%s11450_s5 + $0x90] sm:$0xff]  ;;  %v5586_v30 = vld [vmem:[%s11450_s5 + $0x2c8] sm:$0xff] }
 0x3d1   :  { %2552 = vrot.lane.b32.xlu0 %v9174_v44, %s11733_s25  ;;  %3151 = vmatpush1.msra.mxu0 %v5579_v43  ;;  %v5587_v43 = vld [vmem:[%s11450_s5 + $0x88] sm:$0xff] }
 0x3d2   :  { %2504 = vrot.lane.b32.xlu1 %v9174_v44, %s11734_s6  ;;  %3152 = vmatprep.subr.mxu0 %v5580_v27  ;;  %v5588_v27 = vld [vmem:[%s11450_s5 + $0x2c0] sm:$0xff] }
 0x3d3   :  { %3153 = vmatpush1.msra.mxu0 %v5581_v52  ;;  %3217 = vmatprep.subr.mxu1 %v5582_v17  ;;  %v5589_v52 = vld [vmem:[%s11450_s5 + $0x80] sm:$0xff]  ;;  %v5590_v17 = vld [vmem:[%s11450_s5 + $0x2b8] sm:$0xff] }
 0x3d4   :  { %3154 = vmatprep.subr.mxu0 %v5583_v3  ;;  %3218 = vmatpush1.msra.mxu1 %v5584_v8  ;;  %v5591_v3 = vld [vmem:[%s11450_s5 + $0x78] sm:$0xff]  ;;  %v5592_v8 = vld [vmem:[%s11450_s5 + $0x2b0] sm:$0xff] }
 0x3d5   :  { %3155 = vmatpush1.msra.mxu0 %v5585_v21  ;;  %3219 = vmatprep.subr.mxu1 %v5586_v30  ;;  %v5593_v21 = vld [vmem:[%s11450_s5 + $0x70] sm:$0xff]  ;;  %v5594_v30 = vld [vmem:[%s11450_s5 + $0x2a8] sm:$0xff] }
 0x3d6   :  { %3156 = vmatprep.subr.mxu0 %v5587_v43  ;;  %3220 = vmatpush1.msra.mxu1 %v5588_v27  ;;  %v5595_v43 = vld [vmem:[%s11450_s5 + $0x68] sm:$0xff]  ;;  %v5596_v27 = vld [vmem:[%s11450_s5 + $0x2a0] sm:$0xff] }
 0x3d7   :  { %3157 = vmatpush1.msra.mxu0 %v5589_v52  ;;  %3221 = vmatprep.subr.mxu1 %v5590_v17  ;;  %v5597_v52 = vld [vmem:[%s11450_s5 + $0x60] sm:$0xff]  ;;  %v5598_v17 = vld [vmem:[%s11450_s5 + $0x298] sm:$0xff] }
 0x3d8   :  { %3158 = vmatprep.subr.mxu0 %v5591_v3  ;;  %3222 = vmatpush1.msra.mxu1 %v5592_v8  ;;  %v5599_v3 = vld [vmem:[%s11450_s5 + $0x58] sm:$0xff]  ;;  %v5600_v8 = vld [vmem:[%s11450_s5 + $0x290] sm:$0xff] }
 0x3d9   :  { %3159 = vmatpush1.msra.mxu0 %v5593_v21  ;;  %3223 = vmatprep.subr.mxu1 %v5594_v30  ;;  %v5601_v21 = vld [vmem:[%s11450_s5 + $0x50] sm:$0xff]  ;;  %v5602_v30 = vld [vmem:[%s11450_s5 + $0x288] sm:$0xff] }
 0x3da   :  { %3160 = vmatprep.subr.mxu0 %v5595_v43  ;;  %3224 = vmatpush1.msra.mxu1 %v5596_v27  ;;  %v5603_v43 = vld [vmem:[%s11450_s5 + $0x48] sm:$0xff]  ;;  %v5604_v27 = vld [vmem:[%s11450_s5 + $0x280] sm:$0xff] }
 0x3db   :  { %3161 = vmatpush1.msra.mxu0 %v5597_v52  ;;  %3225 = vmatprep.subr.mxu1 %v5598_v17  ;;  %v5605_v52 = vld [vmem:[%s11450_s5 + $0x40] sm:$0xff]  ;;  %v5606_v17 = vld [vmem:[%s11450_s5 + $0x278] sm:$0xff] }
 0x3dc   :  { %3162 = vmatprep.subr.mxu0 %v5599_v3  ;;  %3226 = vmatpush1.msra.mxu1 %v5600_v8  ;;  %v5607_v3 = vld [vmem:[%s11450_s5 + $0x38] sm:$0xff]  ;;  %v5608_v8 = vld [vmem:[%s11450_s5 + $0x270] sm:$0xff] }
 0x3dd   :  { %3163 = vmatpush1.msra.mxu0 %v5601_v21  ;;  %3227 = vmatprep.subr.mxu1 %v5602_v30  ;;  %v5609_v21 = vld [vmem:[%s11450_s5 + $0x30] sm:$0xff]  ;;  %v5610_v30 = vld [vmem:[%s11450_s5 + $0x268] sm:$0xff] }
 0x3de   :  { %3164 = vmatprep.subr.mxu0 %v5603_v43  ;;  %3228 = vmatpush1.msra.mxu1 %v5604_v27  ;;  %v5611_v43 = vld [vmem:[%s11450_s5 + $0x28] sm:$0xff]  ;;  %v5612_v27 = vld [vmem:[%s11450_s5 + $0x260] sm:$0xff] }
 0x3df   :  { %3165 = vmatpush1.msra.mxu0 %v5605_v52  ;;  %3229 = vmatprep.subr.mxu1 %v5606_v17  ;;  %v5613_v52 = vld [vmem:[%s11450_s5 + $0x20] sm:$0xff]  ;;  %v5614_v17 = vld [vmem:[%s11450_s5 + $0x258] sm:$0xff] }
 0x3e0   :  { %3166 = vmatprep.subr.mxu0 %v5607_v3  ;;  %3230 = vmatpush1.msra.mxu1 %v5608_v8  ;;  %v5615_v3 = vld [vmem:[%s11450_s5 + $0x18] sm:$0xff]  ;;  %v5616_v8 = vld [vmem:[%s11450_s5 + $0x250] sm:$0xff] }
 0x3e1   :  { %3167 = vmatpush1.msra.mxu0 %v5609_v21  ;;  %3231 = vmatprep.subr.mxu1 %v5610_v30  ;;  %v5617_v21 = vld [vmem:[%s11450_s5 + $0x10] sm:$0xff]  ;;  %v5618_v30 = vld [vmem:[%s11450_s5 + $0x248] sm:$0xff] }
 0x3e2   :  { %3168 = vmatprep.subr.mxu0 %v5611_v43  ;;  %3232 = vmatpush1.msra.mxu1 %v5612_v27  ;;  %v5619_v43 = vld [vmem:[%s11450_s5 + $0x8] sm:$0xff]  ;;  %v5620_v27 = vld [vmem:[%s11450_s5 + $0x240] sm:$0xff] }
 0x3e3   :  { %3169 = vmatpush1.msra.mxu0 %v5613_v52  ;;  %3233 = vmatprep.subr.mxu1 %v5614_v17  ;;  %v5621_v52 = vld [vmem:[%s11450_s5] sm:$0xff]  ;;  %v5622_v17 = vld [vmem:[%s11450_s5 + $0x238] sm:$0xff] }
 0x3e4   :  { %3170 = vmatprep.subr.mxu0 %v5615_v3  ;;  %3234 = vmatpush1.msra.mxu1 %v5616_v8  ;;  %v5623_v3 = vld [vmem:[%s11450_s5 + $0x1f8] sm:$0xff]  ;;  %v5624_v8 = vld [vmem:[%s11450_s5 + $0x230] sm:$0xff] }
 0x3e5   :  { %3171 = vmatpush1.msra.mxu0 %v5617_v21  ;;  %3235 = vmatprep.subr.mxu1 %v5618_v30  ;;  %v5625_v21 = vld [vmem:[%s11450_s5 + $0x1f0] sm:$0xff]  ;;  %v5626_v30 = vld [vmem:[%s11450_s5 + $0x228] sm:$0xff] }
 0x3e6   :  { %3172 = vmatprep.subr.mxu0 %v5619_v43  ;;  %3236 = vmatpush1.msra.mxu1 %v5620_v27  ;;  %v5627_v43 = vld [vmem:[%s11450_s5 + $0x1e8] sm:$0xff]  ;;  %v5628_v27 = vld [vmem:[%s11450_s5 + $0x220] sm:$0xff] }
 0x3e7   :  { %3173 = vmatpush1.msra.mxu0 %v5621_v52  ;;  %3237 = vmatprep.subr.mxu1 %v5622_v17  ;;  %v5629_v52 = vld [vmem:[%s11450_s5 + $0x1e0] sm:$0xff]  ;;  %v5630_v17 = vld [vmem:[%s11450_s5 + $0x218] sm:$0xff] }
 0x3e8   :  { %3174 = vmatprep.subr.mxu0 %v5623_v3  ;;  %3238 = vmatpush1.msra.mxu1 %v5624_v8  ;;  %v5631_v3 = vld [vmem:[%s11450_s5 + $0x1d8] sm:$0xff]  ;;  %v5632_v8 = vld [vmem:[%s11450_s5 + $0x210] sm:$0xff] }
 0x3e9   :  { %3175 = vmatpush2.msra.mxu0 %v5625_v21  ;;  %3239 = vmatprep.subr.mxu1 %v5626_v30  ;;  %v5633_v21 = vld [vmem:[%s11450_s5 + $0x1d0] sm:$0xff]  ;;  %v5634_v30 = vld [vmem:[%s11450_s5 + $0x208] sm:$0xff] }
 0x3ea   :  { %3176 = vmatprep.subr.mxu0 %v5627_v43  ;;  %3240 = vmatpush1.msra.mxu1 %v5628_v27  ;;  %v5635_v43 = vld [vmem:[%s11450_s5 + $0x1c8] sm:$0xff]  ;;  %v5636_v27 = vld [vmem:[%s11450_s5 + $0x200] sm:$0xff] }
 0x3eb   :  { %3177 = vmatpush2.msra.mxu0 %v5629_v52  ;;  %3241 = vmatprep.subr.mxu1 %v5630_v17  ;;  %v5637_v52 = vld [vmem:[%s11450_s5 + $0x1c0] sm:$0xff]  ;;  %v5638_v17 = vld [vmem:[%s11450_s5 + $0x3f8] sm:$0xff] }
 0x3ec   :  { %3178 = vmatprep.subr.mxu0 %v5631_v3  ;;  %3242 = vmatpush1.msra.mxu1 %v5632_v8  ;;  %v5639_v3 = vld [vmem:[%s11450_s5 + $0x1b8] sm:$0xff]  ;;  %v5640_v8 = vld [vmem:[%s11450_s5 + $0x3f0] sm:$0xff] }
 0x3ed   :  { %3179 = vmatpush2.msra.mxu0 %v5633_v21  ;;  %3243 = vmatprep.subr.mxu1 %v5634_v30  ;;  %v5641_v21 = vld [vmem:[%s11450_s5 + $0x1b0] sm:$0xff]  ;;  %v5642_v30 = vld [vmem:[%s11450_s5 + $0x3e8] sm:$0xff] }
 0x3ee   :  { %3180 = vmatprep.subr.mxu0 %v5635_v43  ;;  %3244 = vmatpush1.msra.mxu1 %v5636_v27  ;;  %v5643_v43 = vld [vmem:[%s11450_s5 + $0x1a8] sm:$0xff]  ;;  %v5644_v27 = vld [vmem:[%s11450_s5 + $0x3e0] sm:$0xff] }
 0x3ef   :  { %3181 = vmatpush2.msra.mxu0 %v5637_v52  ;;  %3245 = vmatprep.subr.mxu1 %v5638_v17  ;;  %v5645_v52 = vld [vmem:[%s11450_s5 + $0x1a0] sm:$0xff]  ;;  %v5646_v17 = vld [vmem:[%s11450_s5 + $0x3d8] sm:$0xff] }
 0x3f0   :  { %3182 = vmatprep.subr.mxu0 %v5639_v3  ;;  %3246 = vmatpush2.msra.mxu1 %v5640_v8  ;;  %v5647_v3 = vld [vmem:[%s11450_s5 + $0x198] sm:$0xff]  ;;  %v5648_v8 = vld [vmem:[%s11450_s5 + $0x3d0] sm:$0xff] }
 0x3f1   :  { %3183 = vmatpush2.msra.mxu0 %v5641_v21  ;;  %3247 = vmatprep.subr.mxu1 %v5642_v30  ;;  %v5649_v21 = vld [vmem:[%s11450_s5 + $0x190] sm:$0xff]  ;;  %v5650_v30 = vld [vmem:[%s11450_s5 + $0x3c8] sm:$0xff] }
 0x3f2   :  { %3184 = vmatprep.subr.mxu0 %v5643_v43  ;;  %3248 = vmatpush2.msra.mxu1 %v5644_v27  ;;  %v5651_v43 = vld [vmem:[%s11450_s5 + $0x188] sm:$0xff]  ;;  %v5652_v27 = vld [vmem:[%s11450_s5 + $0x3c0] sm:$0xff] }
 0x3f3   :  { %3185 = vmatpush2.msra.mxu0 %v5645_v52  ;;  %3249 = vmatprep.subr.mxu1 %v5646_v17  ;;  %v5653_v52 = vld [vmem:[%s11450_s5 + $0x180] sm:$0xff]  ;;  %v5654_v17 = vld [vmem:[%s11450_s5 + $0x3b8] sm:$0xff] }
 0x3f4   :  { %3186 = vmatprep.subr.mxu0 %v5647_v3  ;;  %3250 = vmatpush2.msra.mxu1 %v5648_v8  ;;  %v5655_v3 = vld [vmem:[%s11450_s5 + $0x178] sm:$0xff]  ;;  %v5656_v8 = vld [vmem:[%s11450_s5 + $0x3b0] sm:$0xff] }
 0x3f5   :  { %3187 = vmatpush2.msra.mxu0 %v5649_v21  ;;  %3251 = vmatprep.subr.mxu1 %v5650_v30  ;;  %v5657_v21 = vld [vmem:[%s11450_s5 + $0x170] sm:$0xff]  ;;  %v5658_v30 = vld [vmem:[%s11450_s5 + $0x3a8] sm:$0xff] }
 0x3f6   :  { %3188 = vmatprep.subr.mxu0 %v5651_v43  ;;  %3252 = vmatpush2.msra.mxu1 %v5652_v27  ;;  %v5659_v43 = vld [vmem:[%s11450_s5 + $0x168] sm:$0xff]  ;;  %v5660_v27 = vld [vmem:[%s11450_s5 + $0x3a0] sm:$0xff] }
 0x3f7   :  { %3189 = vmatpush2.msra.mxu0 %v5653_v52  ;;  %3253 = vmatprep.subr.mxu1 %v5654_v17  ;;  %v5661_v52 = vld [vmem:[%s11450_s5 + $0x160] sm:$0xff]  ;;  %v5662_v17 = vld [vmem:[%s11450_s5 + $0x398] sm:$0xff] }
 0x3f8   :  { %3190 = vmatprep.subr.mxu0 %v5655_v3  ;;  %3254 = vmatpush2.msra.mxu1 %v5656_v8  ;;  %v5663_v3 = vld [vmem:[%s11450_s5 + $0x158] sm:$0xff]  ;;  %v5664_v8 = vld [vmem:[%s11450_s5 + $0x390] sm:$0xff] }
 0x3f9   :  { %3191 = vmatpush2.msra.mxu0 %v5657_v21  ;;  %3255 = vmatprep.subr.mxu1 %v5658_v30  ;;  %v5665_v21 = vld [vmem:[%s11450_s5 + $0x150] sm:$0xff]  ;;  %v5666_v30 = vld [vmem:[%s11450_s5 + $0x388] sm:$0xff] }
 0x3fa   :  { %3192 = vmatprep.subr.mxu0 %v5659_v43  ;;  %3256 = vmatpush2.msra.mxu1 %v5660_v27  ;;  %v5667_v43 = vld [vmem:[%s11450_s5 + $0x148] sm:$0xff]  ;;  %v5668_v27 = vld [vmem:[%s11450_s5 + $0x380] sm:$0xff] }
 0x3fb   :  { %3193 = vmatpush2.msra.mxu0 %v5661_v52  ;;  %3257 = vmatprep.subr.mxu1 %v5662_v17  ;;  %v5669_v52 = vld [vmem:[%s11450_s5 + $0x140] sm:$0xff]  ;;  %v5670_v17 = vld [vmem:[%s11450_s5 + $0x378] sm:$0xff] }
 0x3fc   :  { %3194 = vmatprep.subr.mxu0 %v5663_v3  ;;  %3258 = vmatpush2.msra.mxu1 %v5664_v8  ;;  %v5671_v3 = vld [vmem:[%s11450_s5 + $0x138] sm:$0xff]  ;;  %v5672_v8 = vld [vmem:[%s11450_s5 + $0x370] sm:$0xff] }
 0x3fd   :  { %3195 = vmatpush2.msra.mxu0 %v5665_v21  ;;  %3259 = vmatprep.subr.mxu1 %v5666_v30  ;;  %v5673_v21 = vld [vmem:[%s11450_s5 + $0x130] sm:$0xff]  ;;  %v5674_v30 = vld [vmem:[%s11450_s5 + $0x368] sm:$0xff] }
 0x3fe   :  { %3196 = vmatprep.subr.mxu0 %v5667_v43  ;;  %3260 = vmatpush2.msra.mxu1 %v5668_v27  ;;  %v5675_v43 = vld [vmem:[%s11450_s5 + $0x128] sm:$0xff]  ;;  %v5676_v27 = vld [vmem:[%s11450_s5 + $0x360] sm:$0xff] }
 0x3ff   :  { %3197 = vmatpush2.msra.mxu0 %v5669_v52  ;;  %3261 = vmatprep.subr.mxu1 %v5670_v17  ;;  %v5677_v17 = vld [vmem:[%s11450_s5 + $0x120] sm:$0xff] }
 0x400   :  { %3198 = vmatprep.subr.mxu0 %v5671_v3  ;;  %3262 = vmatpush2.msra.mxu1 %v5672_v8  ;;  %v5678_v3 = vld [vmem:[%s11450_s5 + $0x358] sm:$0xff] }
 0x401   :  { %3199 = vmatpush2.msra.mxu0 %v5673_v21  ;;  %3263 = vmatprep.subr.mxu1 %v5674_v30  ;;  %v5679_v21 = vld [vmem:[%s11450_s5 + $0x118] sm:$0xff]  ;;  %v5680_v30 = vld [vmem:[%s11450_s5 + $0x350] sm:$0xff] }
 0x402   :  { %3200 = vmatprep.subr.mxu0 %v5675_v43  ;;  %3264 = vmatpush2.msra.mxu1 %v5676_v27  ;;  %v9515_v8 = vpop.permute.xlu0 %5467 }
 0x403   :  { %v9507_v52 = vpop.permute.xlu1 %5462  ;;  %3201 = vmatpush2.msra.mxu0 %v5677_v17  ;;  %3265 = vmatprep.subr.mxu1 %v5678_v3  ;;  %v5681_v17 = vld [vmem:[%s11450_s5 + $0x110] sm:$0xff]  ;;  %v5682_v3 = vld [vmem:[%s11450_s5 + $0x348] sm:$0xff]  ;;  %v5469_v9 = vunpack.i.l.bf16 %v9515_v8 }
 0x404   :  { %3202 = vmatprep.subr.mxu0 %v5679_v21  ;;  %3266 = vmatpush2.msra.mxu1 %v5680_v30  ;;  %v5465_v43 = vunpack.i.h.bf16 %v9507_v52  ;;  %v5464_v27 = vunpack.i.l.bf16 %v9507_v52  ;;  %v5683_v21 = vld [vmem:[%s11450_s5 + $0x108] sm:$0xff]  ;;  %v5684_v30 = vld [vmem:[%s11450_s5 + $0x340] sm:$0xff]  ;;  %v5470_v52 = vunpack.i.h.bf16 %v9515_v8  ;;  %v5688_v8 = vld [vmem:[%s11450_s5 + $0x330] sm:$0xff] }
 0x405   :  { %3203 = vmatpush2.msra.mxu0 %v5681_v17  ;;  %3267 = vmatprep.subr.mxu1 %v5682_v3  ;;  %v5685_v17 = vld [vmem:[%s11450_s5 + $0x100] sm:$0xff]  ;;  %v5686_v3 = vld [vmem:[%s11450_s5 + $0x338] sm:$0xff] }
 0x406   :  { %3204 = vmatprep.subr.mxu0 %v5683_v21  ;;  %3268 = vmatpush2.msra.mxu1 %v5684_v30  ;;  %v11959_v30 = vunpack.i.h.bf16 %v8277_v61  ;;  %v11962_v61 = vunpack.i.h.bf16 %v8408_v18  ;;  %v11967_v18 = vmax.f32 %v7954_v7, 0.0 }
 0x407   :  { %3205 = vmatpush2.msra.mxu0 %v5685_v17  ;;  %3269 = vmatprep.subr.mxu1 %v5686_v3  ;;  %v2447_v3 = vsel %vm11961_vm10, %v5464_v27, %v5465_v43  ;;  %vm11970_vm10 = vmmov %vm11937_vm8 }
 0x408   :  { %v5473_v21 = vpop.permute.xlu1 %5472  ;;  %3284 = vmatprep.subr.mxu0 %v5687_v60  ;;  %3270 = vmatpush2.msra.mxu1 %v5688_v8  ;;  %v2448_v17 = vsel %vm11960_vm0, %v11959_v30, %v5464_v27  ;;  %v5690_v60 = vld [vmem:[%s11450_s5 + $0x320] sm:$0xff]  ;;  %v2512_v8 = vsel %vm11937_vm8, %v11962_v61, %v5469_v9  ;;  %v2511_v30 = vsel %vm11965_vm13, %v5469_v9, %v5470_v52  ;;  %v5692_v9 = vld [vmem:[%s11450_s5 + $0x310] sm:$0xff]  ;;  %vm11971_vm8 = vmmov %vm11964_vm9 }
 0x409   :  { %v5475_v34 = vunpack.i.h.bf16 %v5473_v21  ;;  %v5474_v38 = vunpack.i.l.bf16 %v5473_v21  ;;  %3271 = vmatprep.subr.mxu1 %v5689_v31  ;;  %v11963_v21 = vunpack.i.h.bf16 %v8328_v41  ;;  %v2466_v29 = vmax.f32 %v11967_v18, %v2448_v17  ;;  %vm11973_vm13 = vmmov %vm11971_vm8 }
 0x40a   :  { %3272 = vmatpush2.msra.mxu1 %v5690_v60  ;;  %v5691_v60 = vld [vmem:[%s11450_s5 + $0x318] sm:$0xff]  ;;  %v11968_v41 = vmax.f32 %v8325_v40, 0.0 }
 0x40b   :  { %v2560_v27 = vsel %vm11964_vm9, %v11963_v21, %v5474_v38  ;;  %v2559_v31 = vsel %vm11966_vm15, %v5474_v38, %v5475_v34  ;;  %3273 = vmatprep.subr.mxu1 %v5691_v60  ;;  %v5693_v60 = vld [vmem:[%s11450_s5 + $0x308] sm:$0xff]  ;;  %vm11972_vm9 = vmmov %vm11970_vm10 }
 0x40c   :  { %v2578_v61 = vmax.f32 %v2512_v8, %v2560_v27  ;;  %v2467_v10 = vmax.f32 %v11968_v41, %v2447_v3  ;;  %v2579_v57 = vmax.f32 %v2511_v30, %v2559_v31  ;;  %3274 = vmatpush2.msra.mxu1 %v5692_v9  ;;  %v9587_v38 = vpop.permute.xlu1 %5482  ;;  %v5694_v8 = vld [vmem:[%s11450_s5 + $0x300] sm:$0xff]  ;;  %v5695_v27 = vld [vmem:[%s11450_s5 + $0x6f8] sm:$0xff]  ;;  %vm12032_vm15 = vmmov %vm11960_vm0 }
 0x40d   :  { %v9585_v21 = vpop.permute.xlu0 %5477  ;;  %3275 = vmatprep.subr.mxu1 %v5693_v60  ;;  %v5485_v30 = vunpack.i.h.bf16 %v9587_v38  ;;  %v5484_v31 = vunpack.i.l.bf16 %v9587_v38  ;;  %v12065_v38 = vld [vmem:[#allocation13_spill] sm:$0xff] }
 0x40e   :  { %v5480_v7 = vunpack.i.h.bf16 %v9585_v21  ;;  %v5479_v40 = vunpack.i.l.bf16 %v9585_v21  ;;  %v2595_v17 = vmax.f32 %v2467_v10, %v2579_v57  ;;  %v2594_v3 = vmax.f32 %v2466_v29, %v2578_v61  ;;  %3276 = vmatpush2.msra.mxu1 %v5694_v8  ;;  %v12006_v8 = vld [vmem:[#allocation39_spill] sm:$0xff]  ;;  %v12067_v21 = vld [vmem:[#allocation85_spill] sm:$0xff] }
 0x40f   :  { %3355 = vmatprep.subr.mxu1 %v5695_v27  ;;  %v2510_v41 = vsel %vm11970_vm10, %v5470_v52, %v5484_v31  ;;  %v12007_v27 = vld [vmem:[#allocation50_spill] sm:$0xff]  ;;  %vm12039_vm10 = vmmov %vm11972_vm9 }
 0x410   :  { %3206 = vmatprep.mubr.f32.mxu0 %v2595_v17  ;;  %v2446_v57 = vsel %vm11969_vm11, %v5465_v43, %v5479_v40  ;;  %v2445_v61 = vsel %vm11960_vm0, %v5479_v40, %v5480_v7  ;;  %vm12033_vm11 = vmmov %vm11971_vm8 }
 0x411   :  { %v9602_v18 = vpop.permute.xlu0 %5487  ;;  %3207 = vmatmul.mubr.f32.vlgmr.msra.gmra.mxu0 %v2594_v3  ;;  %vm12038_vm0 = vmmov %vm11971_vm8 }
 0x412   :  { %v5490_v29 = vunpack.i.h.bf16 %v9602_v18  ;;  %v5489_v10 = vunpack.i.l.bf16 %v9602_v18  ;;  %3285 = vmatpush1.msra.mxu0 %v8271_v49  ;;  %v2509_v49 = vsel %vm11972_vm9, %v5484_v31, %v5485_v30  ;;  %v12008_v31 = vld [vmem:[#allocation41_spill] sm:$0xff]  ;;  %v12061_v18 = vld [vmem:[#allocation79_spill] sm:$0xff] }
 0x413   :  { %3286 = vmatprep.subr.mxu0 %v8282_v62  ;;  %v11974_v62 = vmax.f32 %v8366_v47, 0.0  ;;  %v11989_v47 = vld [vmem:[#allocation32_spill] sm:$0xff] }
 0x414   :  { %v2558_v9 = vsel %vm11971_vm8, %v5475_v34, %v5489_v10  ;;  %3287 = vmatpush1.msra.mxu0 %v8289_v23  ;;  %v2557_v43 = vsel %vm11973_vm13, %v5489_v10, %v5490_v29  ;;  %v11975_v34 = vmax.f32 %v8493_v55, 0.0  ;;  %v5696_v55 = vld [vmem:[%s11450_s5 + $0x6f0] sm:$0xff]  ;;  %vm12044_vm8 = vmmov %vm11972_vm9 }
 0x415   :  { %v2468_v60 = vmax.f32 %v11974_v62, %v2446_v57  ;;  %v2580_v40 = vmax.f32 %v2510_v41, %v2558_v9  ;;  %3288 = vmatprep.subr.mxu0 %v8297_v11  ;;  %v2581_v23 = vmax.f32 %v2509_v49, %v2557_v43  ;;  %v5697_v11 = vld [vmem:[%s11450_s5 + $0x6e8] sm:$0xff]  ;;  %v12009_v57 = vld [vmem:[#allocation52_spill] sm:$0xff]  ;;  %v12012_v41 = vld [vmem:[#allocation45_spill] sm:$0xff]  ;;  %s5764_s5 = smov 80  }
 0x416   :  { %v2469_v52 = vmax.f32 %v11975_v34, %v2445_v61  ;;  %3289 = vmatpush1.msra.mxu0 %v8306_v45  ;;  %v11978_v45 = vld [vmem:[#allocation15_spill] sm:$0xff]  ;;  %v12011_v61 = vld [vmem:[#allocation54_spill] sm:$0xff]  ;;  %v12013_v9 = vld [vmem:[#allocation56_spill] sm:$0xff] }
 0x417   :  { %3290 = vmatprep.subr.mxu0 %v8317_v4  ;;  %v2596_v3 = vmax.f32 %v2468_v60, %v2580_v40  ;;  %v11979_v4 = vld [vmem:[#allocation22_spill] sm:$0xff]  ;;  %v12010_v10 = vld [vmem:[#allocation43_spill] sm:$0xff]  ;;  %v12016_v60 = vld [vmem:[#allocation49_spill] sm:$0xff] }
 0x418   :  { %v2597_v17 = vmax.f32 %v2469_v52, %v2581_v23  ;;  %3291 = vmatpush1.msra.mxu0 %v8335_v36  ;;  %v11982_v36 = vld [vmem:[#allocation17_spill] sm:$0xff]  ;;  %v12014_v49 = vld [vmem:[#allocation47_spill] sm:$0xff]  ;;  %v12015_v43 = vld [vmem:[#allocation58_spill] sm:$0xff] }
 0x419   :  { %3292 = vmatprep.subr.mxu0 %v8348_v54  ;;  %v11985_v54 = vld [vmem:[#allocation28_spill] sm:$0xff]  ;;  %v12018_v52 = vld [vmem:[#allocation51_spill] sm:$0xff]  ;;  %v12019_v23 = vld [vmem:[#allocation62_spill] sm:$0xff] }
 0x41a   :  { %3277 = vmatprep.mubr.f32.mxu1 %v2597_v17  ;;  %3293 = vmatpush1.msra.mxu0 %v8371_v5  ;;  %v11990_v5 = vld [vmem:[#allocation23_spill] sm:$0xff]  ;;  %v12017_v40 = vld [vmem:[#allocation60_spill] sm:$0xff]  ;;  %v12020_v17 = vld [vmem:[#allocation53_spill] sm:$0xff] }
 0x41b   :  { %3278 = vmatmul.mubr.f32.vlgmr.msra.gmra.mxu1 %v2596_v3  ;;  %3294 = vmatprep.subr.mxu0 %v8385_v53  ;;  %v11994_v53 = vld [vmem:[#allocation27_spill] sm:$0xff]  ;;  %v12021_v3 = vld [vmem:[#allocation64_spill] sm:$0xff]  ;;  %vm12047_vm9 = vmmov %vm12032_vm15 }
 0x41c   :  { %3356 = vmatpush1.msra.mxu1 %v5696_v55  ;;  %3295 = vmatpush1.msra.mxu0 %v8413_v56  ;;  %v11997_v56 = vld [vmem:[#allocation40_spill] sm:$0xff]  ;;  %v12022_v55 = vld [vmem:[#allocation55_spill] sm:$0xff]  ;;  %vm12055_vm13 = vmmov %vm12038_vm0 }
 0x41d   :  { %3357 = vmatprep.subr.mxu1 %v5697_v11  ;;  %3296 = vmatprep.subr.mxu0 %v8429_v25  ;;  %v11976_v25 = vld [vmem:[#allocation14_spill] sm:$0xff] }
 0x41e   :  { %3358 = vmatpush1.msra.mxu1 %v8322_v26  ;;  %3297 = vmatpush1.msra.mxu0 %v8441_v42  ;;  %v11980_v26 = vld [vmem:[#allocation16_spill] sm:$0xff]  ;;  %v11999_v42 = vld [vmem:[#allocation42_spill] sm:$0xff] }
 0x41f   :  { %3359 = vmatprep.subr.mxu1 %v8340_v16  ;;  %3298 = vmatprep.subr.mxu0 %v8477_v37  ;;  %v11983_v16 = vld [vmem:[#allocation26_spill] sm:$0xff]  ;;  %v11996_v37 = vld [vmem:[#allocation29_spill] sm:$0xff] }
 0x420   :  { %3360 = vmatpush1.msra.mxu1 %v8353_v19  ;;  %3299 = vmatpush1.msra.mxu0 %v8488_v1  ;;  %v11987_v19 = vld [vmem:[#allocation30_spill] sm:$0xff]  ;;  %v11992_v1 = vld [vmem:[#allocation25_spill] sm:$0xff] }
 0x421   :  { %3361 = vmatprep.subr.mxu1 %v8376_v14  ;;  %3300 = vmatprep.subr.mxu0 %v8508_v58  ;;  %v11991_v14 = vld [vmem:[#allocation34_spill] sm:$0xff]  ;;  %v12002_v58 = vld [vmem:[#allocation35_spill] sm:$0xff] }
 0x422   :  { %3362 = vmatpush1.msra.mxu1 %v8390_v13  ;;  %3301 = vmatpush1.msra.mxu0 %v8520_v24  ;;  %v11995_v13 = vld [vmem:[#allocation38_spill] sm:$0xff]  ;;  %v12004_v24 = vld [vmem:[#allocation37_spill] sm:$0xff] }
 0x423   :  { %3363 = vmatprep.subr.mxu1 %v8418_v33  ;;  %3302 = vmatprep.subr.mxu0 %v8535_v2  ;;  %v11984_v2 = vld [vmem:[#allocation18_spill] sm:$0xff]  ;;  %v11998_v33 = vld [vmem:[#allocation31_spill] sm:$0xff] }
 0x424   :  { %3364 = vmatpush1.msra.mxu1 %v8434_v12  ;;  %3303 = vmatpush1.msra.mxu0 %v8548_v46  ;;  %v11977_v12 = vld [vmem:[#allocation20_spill] sm:$0xff] }
 0x425   :  { %3365 = vmatprep.subr.mxu1 %v8458_v39  ;;  %3304 = vmatprep.subr.mxu0 %v8559_v59  ;;  %v11988_v59 = vld [vmem:[#allocation21_spill] sm:$0xff]  ;;  %v11993_v46 = vld [vmem:[#allocation36_spill] sm:$0xff] }
 0x426   :  { %3366 = vmatpush1.msra.mxu1 %v8483_v35  ;;  %3305 = vmatpush1.msra.mxu0 %v8571_v50  ;;  %v11981_v35 = vld [vmem:[#allocation24_spill] sm:$0xff]  ;;  %v12000_v39 = vld [vmem:[#allocation33_spill] sm:$0xff] }
 0x427   :  { %3367 = vmatprep.subr.mxu1 %v8503_v22  ;;  %3306 = vmatprep.subr.mxu0 %v8589_v48  ;;  %v11986_v48 = vld [vmem:[#allocation19_spill] sm:$0xff]  ;;  %v12001_v22 = vld [vmem:[#allocation44_spill] sm:$0xff] }
 0x428   :  { %3368 = vmatpush1.msra.mxu1 %v8515_v28  ;;  %3307 = vmatpush1.msra.mxu0 %v11977_v12  ;;  %v12003_v28 = vld [vmem:[#allocation46_spill] sm:$0xff]  ;;  %v12005_v50 = vld [vmem:[#allocation48_spill] sm:$0xff] }
 0x429   :  { %3369 = vmatprep.subr.mxu1 %v11976_v25  ;;  %3308 = vmatprep.subr.mxu0 %v11979_v4  ;;  %v12023_v12 = vld [vmem:[#allocation66_spill] sm:$0xff] }
 0x42a   :  { %3370 = vmatpush1.msra.mxu1 %v11978_v45  ;;  %3309 = vmatpush1.msra.mxu0 %v11981_v35  ;;  %v12024_v35 = vld [vmem:[#allocation57_spill] sm:$0xff] }
 0x42b   :  { %3371 = vmatprep.subr.mxu1 %v11980_v26  ;;  %3310 = vmatprep.subr.mxu0 %v11983_v16 }
 0x42c   :  { %3372 = vmatpush1.msra.mxu1 %v11982_v36  ;;  %3311 = vmatpush1.msra.mxu0 %v11985_v54  ;;  %v12025_v36 = vld [vmem:[#allocation68_spill] sm:$0xff]  ;;  %v12027_v54 = vld [vmem:[#allocation70_spill] sm:$0xff] }
 0x42d   :  { %3373 = vmatprep.subr.mxu1 %v11984_v2  ;;  %3312 = vmatprep.subr.mxu0 %v11987_v19  ;;  %v12026_v2 = vld [vmem:[#allocation59_spill] sm:$0xff] }
 0x42e   :  { %3374 = vmatpush1.msra.mxu1 %v11986_v48  ;;  %3313 = vmatpush1.msra.mxu0 %v11989_v47  ;;  %v12029_v47 = vld [vmem:[#allocation72_spill] sm:$0xff] }
 0x42f   :  { %3375 = vmatprep.subr.mxu1 %v11988_v59  ;;  %3314 = vmatprep.subr.mxu0 %v11991_v14  ;;  %v12028_v59 = vld [vmem:[#allocation61_spill] sm:$0xff]  ;;  %v12031_v14 = vld [vmem:[#allocation74_spill] sm:$0xff] }
 0x430   :  { %3376 = vmatpush1.msra.mxu1 %v11990_v5  ;;  %3315 = vmatpush1.msra.mxu0 %v11993_v46  ;;  %v12030_v5 = vld [vmem:[#allocation63_spill] sm:$0xff] }
 0x431   :  { %3377 = vmatprep.subr.mxu1 %v11992_v1  ;;  %3316 = vmatprep.subr.mxu0 %v11995_v13  ;;  %v12034_v13 = vld [vmem:[#allocation65_spill] sm:$0xff] }
 0x432   :  { %3378 = vmatpush1.msra.mxu1 %v11994_v53  ;;  %3317 = vmatpush2.msra.mxu0 %v11997_v56  ;;  %v12036_v56 = vld [vmem:[#allocation12_spill] sm:$0xff] }
 0x433   :  { %3379 = vmatprep.subr.mxu1 %v11996_v37  ;;  %3318 = vmatprep.subr.mxu0 %v11999_v42  ;;  %v12035_v37 = vld [vmem:[#allocation76_spill] sm:$0xff] }
 0x434   :  { %3380 = vmatpush1.msra.mxu1 %v11998_v33  ;;  %3319 = vmatpush2.msra.mxu0 %v12001_v22  ;;  %v12037_v33 = vunpack.i.l.bf16 %v12036_v56  ;;  %v12082_v56 = vld [vmem:[#allocation99_spill] sm:$0xff] }
 0x435   :  { %3381 = vmatprep.subr.mxu1 %v12000_v39  ;;  %3320 = vmatprep.subr.mxu0 %v12003_v28  ;;  %v12041_v28 = vld [vmem:[#allocation78_spill] sm:$0xff] }
 0x436   :  { %3382 = vmatpush1.msra.mxu1 %v12002_v58  ;;  %3321 = vmatpush2.msra.mxu0 %v12005_v50  ;;  %v12040_v58 = vld [vmem:[#allocation67_spill] sm:$0xff] }
 0x437   :  { %3383 = vmatprep.subr.mxu1 %v12004_v24  ;;  %3322 = vmatprep.subr.mxu0 %v12007_v27  ;;  %v12042_v24 = vld [vmem:[#allocation10_spill] sm:$0xff] }
 0x438   :  { %3384 = vmatpush1.msra.mxu1 %v12006_v8  ;;  %3323 = vmatpush2.msra.mxu0 %v12009_v57  ;;  %v12043_v50 = vunpack.i.l.bf16 %v12042_v24 }
 0x439   :  { %3385 = vmatprep.subr.mxu1 %v12008_v31  ;;  %3324 = vmatprep.subr.mxu0 %v12011_v61  ;;  %v12045_v31 = vld [vmem:[#allocation11_spill] sm:$0xff]  ;;  %v12048_v61 = vld [vmem:[#allocation69_spill] sm:$0xff] }
 0x43a   :  { %3386 = vmatpush1.msra.mxu1 %v12010_v10  ;;  %3325 = vmatpush2.msra.mxu0 %v12013_v9  ;;  %v12046_v57 = vunpack.i.l.bf16 %v12045_v31  ;;  %v12050_v9 = vmax.f32 %v9100_v51, 0.0  ;;  %v12057_v51 = vld [vmem:[#allocation86_spill] sm:$0xff] }
 0x43b   :  { %3387 = vmatprep.subr.mxu1 %v12012_v41  ;;  %3326 = vmatprep.subr.mxu0 %v12015_v43  ;;  %v9707_v62 = vpop.permute.xlu0 %5497  ;;  %v12049_v41 = vld [vmem:[#allocation80_spill] sm:$0xff]  ;;  %v12051_v43 = vld [vmem:[#allocation71_spill] sm:$0xff] }
 0x43c   :  { %3388 = vmatpush2.msra.mxu1 %v12014_v49  ;;  %3327 = vmatpush2.msra.mxu0 %v12017_v40  ;;  %v9711_v34 = vpop.permute.xlu1 %5492  ;;  %v5500_v4 = vunpack.i.h.bf16 %v9707_v62  ;;  %v5499_v26 = vunpack.i.l.bf16 %v9707_v62  ;;  %v12052_v40 = vld [vmem:[#allocation82_spill] sm:$0xff]  ;;  %v12077_v62 = vld [vmem:[#allocation95_spill] sm:$0xff] }
 0x43d   :  { %3389 = vmatprep.subr.mxu1 %v12016_v60  ;;  %3328 = vmatprep.subr.mxu0 %v12019_v23  ;;  %v5495_v11 = vunpack.i.h.bf16 %v9711_v34  ;;  %v5494_v25 = vunpack.i.l.bf16 %v9711_v34  ;;  %v12054_v23 = vld [vmem:[#allocation84_spill] sm:$0xff] }
 0x43e   :  { %3390 = vmatpush2.msra.mxu1 %v12018_v52  ;;  %3329 = vmatpush2.msra.mxu0 %v12021_v3  ;;  %v2507_v22 = vsel %vm12039_vm10, %v5499_v26, %v5500_v4  ;;  %v12053_v52 = vld [vmem:[#allocation73_spill] sm:$0xff]  ;;  %vm12071_vm10 = vmmov %vm12044_vm8  ;;  %v12083_v34 = vld [vmem:[#allocation100_spill] sm:$0xff] }
 0x43f   :  { %3391 = vmatprep.subr.mxu1 %v12020_v17  ;;  %3330 = vmatprep.subr.mxu0 %v12023_v12  ;;  %v9721_v45 = vpop.permute.xlu0 %2440  ;;  %v2443_v46 = vsel %vm12032_vm15, %v5494_v25, %v5495_v11  ;;  %v12056_v12 = vld [vmem:[#allocation75_spill] sm:$0xff]  ;;  %vm12059_vm15 = vmmov %vm12044_vm8 }
 0x440   :  { %3392 = vmatpush2.msra.mxu1 %v12022_v55  ;;  %3331 = vmatpush2.msra.mxu0 %v12025_v36  ;;  %v5503_v16 = vpop.permute.xlu1 %5502  ;;  %v2457_v10 = vsel %vm12047_vm9, %v9721_v45, %v12046_v57  ;;  %v2471_v49 = vmax.f32 %v12050_v9, %v2443_v46  ;;  %v2508_v36 = vsel %vm12059_vm15, %v5485_v30, %v5499_v26  ;;  %v12066_v30 = vmax.f32 %v12065_v38, 0.0 }
 0x441   :  { %3393 = vmatprep.subr.mxu1 %v12024_v35  ;;  %3332 = vmatprep.subr.mxu0 %v12027_v54  ;;  %v5505_v48 = vunpack.i.h.bf16 %v5503_v16  ;;  %v5504_v19 = vunpack.i.l.bf16 %v5503_v16  ;;  %v2473_v3 = vmax.f32 %v9174_v44, %v2457_v10  ;;  %v12058_v35 = vld [vmem:[#allocation77_spill] sm:$0xff] }
 0x442   :  { %3394 = vmatpush2.msra.mxu1 %v12026_v2  ;;  %3333 = vmatpush2.msra.mxu0 %v12029_v47  ;;  %v12063_v54 = vld [vmem:[#allocation81_spill] sm:$0xff]  ;;  %v12072_v47 = vld [vmem:[#allocation90_spill] sm:$0xff] }
 0x443   :  { %3395 = vmatprep.subr.mxu1 %v12028_v59  ;;  %3334 = vmatprep.subr.mxu0 %v12031_v14  ;;  %v2553_v1 = vpop.permute.xlu0 %2552  ;;  %v2555_v53 = vsel %vm12033_vm11, %v5504_v19, %v5505_v48  ;;  %v2556_v55 = vsel %vm12055_vm13, %v5490_v29, %v5504_v19  ;;  %vm12060_vm11 = vmmov %vm12047_vm9  ;;  %v12062_v29 = vld [vmem:[#allocation89_spill] sm:$0xff]  ;;  %v12070_v59 = vld [vmem:[#allocation88_spill] sm:$0xff]  ;;  %vm12084_vm13 = vcmp.lt.s32.totalorder %v6002_v6, 93 }
 0x444   :  { %3396 = vmatpush2.msra.mxu1 %v12030_v5  ;;  %3335 = vmatpush2.msra.mxu0 %v12035_v37  ;;  %v2569_v42 = vsel %vm12038_vm0, %v2553_v1, %v12037_v33  ;;  %v2505_v39 = vpop.permute.xlu1 %2504  ;;  %v2583_v27 = vmax.f32 %v2507_v22, %v2555_v53  ;;  %v2444_v44 = vsel %vm12060_vm11, %v5480_v7, %v5494_v25  ;;  %v12068_v7 = vld [vmem:[#allocation93_spill] sm:$0xff]  ;;  %v12069_v25 = vld [vmem:[#allocation87_spill] sm:$0xff]  ;;  %v12080_v53 = vld [vmem:[#allocation96_spill] sm:$0xff]  ;;  %vm12086_vm11 = vcmp.lt.s32.totalorder %v6002_v6, 94 }
 0x445   :  { %3397 = vmatprep.subr.mxu1 %v12034_v13  ;;  %3336 = vmatprep.subr.mxu0 %v12041_v28  ;;  %v2521_v8 = vsel %vm12044_vm8, %v2505_v39, %v12043_v50  ;;  %v2582_v2 = vmax.f32 %v2508_v36, %v2556_v55  ;;  %v2470_v26 = vmax.f32 %v12066_v30, %v2444_v44  ;;  %v12073_v5 = vld [vmem:[#allocation91_spill] sm:$0xff]  ;;  %vm12074_vm8 = vmmov %vm12047_vm9  ;;  %v12081_v13 = vld [vmem:[#allocation97_spill] sm:$0xff]  ;;  %vm3667_vm9 = vcmp.lt.s32.totalorder %v6002_v6, 80 }
 0x446   :  { %3398 = vmatpush2.msra.mxu1 %v12040_v58  ;;  %3337 = vmatpush2.msra.mxu0 %v12049_v41  ;;  %v2585_v60 = vmax.f32 %v2521_v8, %v2569_v42  ;;  %v2599_v17 = vmax.f32 %v2471_v49, %v2583_v27  ;;  %vm12085_vm15 = vmmov %vm12084_vm13 }
 0x447   :  { %3399 = vmatprep.subr.mxu1 %v12048_v61  ;;  %3338 = vmatprep.subr.mxu0 %v12052_v40  ;;  %v2598_v19 = vmax.f32 %v2470_v26, %v2582_v2 }
 0x448   :  { %3400 = vmatpush2.msra.mxu1 %v12051_v43  ;;  %3339 = vmatpush2.msra.mxu0 %v12054_v23  ;;  %v2601_v16 = vmax.f32 %v2473_v3, %v2585_v60 }
 0x449   :  { %3401 = vmatprep.subr.mxu1 %v12053_v52  ;;  %3340 = vmatprep.subr.mxu0 %v12057_v51 }
 0x44a   :  { %3402 = vmatpush2.msra.mxu1 %v12056_v12  ;;  %3341 = vmatpush2.msra.mxu0 %v9011_v0  ;;  %v12064_v0 = vld [vmem:[#allocation83_spill] sm:$0xff] }
 0x44b   :  { %3403 = vmatprep.subr.mxu1 %v12058_v35  ;;  %3342 = vmatprep.subr.mxu0 %v12062_v29 }
 0x44c   :  { %3404 = vmatpush2.msra.mxu1 %v12061_v18  ;;  %3348 = vmatprep.mubr.f32.mxu0 %v2599_v17 }
 0x44d   :  { %3405 = vmatprep.subr.mxu1 %v12063_v54  ;;  %3343 = vmatpush2.msra.mxu0 %v9040_v20  ;;  %v2554_v20 = vsel %vm12038_vm0, %v5505_v48, %v2553_v1  ;;  %v12076_v48 = vld [vmem:[#allocation94_spill] sm:$0xff]  ;;  %vm12087_vm0 = vmmov %vm12086_vm11 }
 0x44e   :  { %3406 = vmatpush2.msra.mxu1 %v12064_v0  ;;  %3344 = vmatprep.subr.mxu0 %v9068_v15  ;;  %v2506_v15 = vsel %vm12071_vm10, %v5500_v4, %v2505_v39  ;;  %v12078_v1 = vld [vmem:[#allocation98_spill] sm:$0xff]  ;;  %vm12088_vm10 = vcmp.lt.s32.totalorder %v6002_v6, 95 }
 0x44f   :  { %3407 = vmatprep.subr.mxu1 %v12067_v21  ;;  %3419 = vmatprep.mubr.f32.mxu1 %v2601_v16  ;;  %v2584_v14 = vmax.f32 %v2506_v15, %v2554_v20  ;;  %v12079_v4 = vmax.f32 %v12078_v1, 0.0 }
 0x450   :  { %3345 = vmatpush2.msra.mxu0 %v12068_v7  ;;  %3408 = vmatpush2.msra.mxu1 %v12069_v25 }
 0x451   :  { %3346 = vmatprep.subr.mxu0 %v9107_v63  ;;  %3409 = vmatprep.subr.mxu1 %v12070_v59  ;;  %v2442_v63 = vsel %vm12074_vm8, %v5495_v11, %v9721_v45  ;;  %v2924_v11 = vpop.f32.mrf.mxu0  ;;  %v2995_v45 = vpop.f32.mrf.mxu1  ;;  %vm12089_vm8 = vmmov %vm12088_vm10 }
 0x452   :  { %3347 = vmatpush2.msra.mxu0 %v9120_v32  ;;  %3410 = vmatpush2.msra.mxu1 %v12072_v47  ;;  %v12075_v32 = vld [vmem:[#allocation92_spill] sm:$0xff]  ;;  %v2472_v46 = vmax.f32 %v12079_v4, %v2442_v63  ;;  %v2996_v39 = vadd.f32 %v2995_v45, %v2924_v11  ;;  %v3825_v11 = vld [vmem:[%s11448_s3 + $0x8] sm:$0xff] }
 0x453   :  { %3349 = vmatmul.mubr.f32.vlgmr.msra.gmra.mxu0 %v2598_v19  ;;  %3411 = vmatprep.subr.mxu1 %v12073_v5  ;;  %v2926_v33 = vpop.f32.mrf.mxu0  ;;  %v2997_v42 = vpop.f32.mrf.mxu1 }
 0x454   :  { %3412 = vmatpush2.msra.mxu1 %v12075_v32  ;;  %v2600_v37 = vmax.f32 %v2472_v46, %v2584_v14  ;;  %v2998_v58 = vadd.f32 %v2997_v42, %v2926_v33  ;;  %5231 = vmatprep.mubr.msk.f32.mxu0 %vm1822_vm1, %v3825_v11 }
 0x455   :  { %3413 = vmatprep.subr.mxu1 %v12076_v48 }
 0x456   :  { %3414 = vmatpush2.msra.mxu1 %v12077_v62 }
 0x457   :  { %3415 = vmatprep.subr.mxu1 %v12080_v53 }
 0x458   :  { %3416 = vmatpush2.msra.mxu1 %v12081_v13 }
 0x459   :  { %3417 = vmatprep.subr.mxu1 %v12082_v56 }
 0x45a   :  { %3418 = vmatpush2.msra.mxu1 %v12083_v34 }
 0x45b   :  { %3420 = vmatmul.mubr.f32.vlgmr.msra.gmra.mxu1 %v2600_v37 }
 0x45c   :  { %5233 = vmatprep.mubr.msk.f32.mxu1 %vm1822_vm1, %v3825_v11 }
 0x486   :  { %v3066_v22 = vpop.f32.mrf.mxu0 }
 0x487   :  { %v3067_v28 = vadd.f32 %v3066_v22, %v2996_v39 }
 0x488   :  { %v3068_v24 = vpop.f32.mrf.mxu0 }
 0x489   :  { %v3069_v50 = vadd.f32 %v3068_v24, %v2998_v58  ;;  %v3137_v8 = vpop.f32.mrf.mxu1 }
 0x48a   :  { %v9821_v27 = vadd.f32 %v3137_v8, %v3067_v28  ;;  %v3929_v8 = vld [vmem:[%s11449_s4 + $0x8] sm:$0xff] }
 0x48b   :  { %v3139_v31 = vpop.f32.mrf.mxu1 }
 0x48c   :  { %v9823_v57 = vadd.f32 %v3139_v31, %v3069_v50  ;;  %3659 = vrot.lane.b32.xlu1 %v9821_v27, %s5764_s5  ;;  %v3928_v50 = vld [vmem:[%s11449_s4] sm:$0xff] }
 0x48e   :  { %3645 = vrot.lane.b32.xlu0 %v9823_v57, %s11743_s20 }
 0x490   :  { %3643 = vrot.lane.b32.xlu1 %v9821_v27, %s11743_s20 }
 0x492   :  { %3629 = vrot.lane.b32.xlu0 %v9823_v57, %s11744_s26 }
 0x494   :  { %3627 = vrot.lane.b32.xlu1 %v9821_v27, %s11744_s26 }
 0x496   :  { %3613 = vrot.lane.b32.xlu0 %v9823_v57, %s11746_s21 }
 0x498   :  { %3611 = vrot.lane.b32.xlu1 %v9821_v27, %s11746_s21 }
 0x49a   :  { %3597 = vrot.lane.b32.xlu0 %v9823_v57, %s11733_s25 }
 0x49c   :  { %3595 = vrot.lane.b32.xlu1 %v9821_v27, %s11733_s25 }
 0x49e   :  { %3581 = vrot.lane.b32.xlu0 %v9823_v57, %s11734_s6 }
 0x4a0   :  { %3579 = vrot.lane.b32.xlu1 %v9821_v27, %s11734_s6 }
 0x4a2   :  { %3564 = vrot.lane.b32.xlu0 %v9823_v57, %s5765_s2 }
 0x4a4   :  { %3562 = vrot.lane.b32.xlu1 %v9821_v27, %s5765_s2 }
 0x4a6   :  { %3547 = vrot.lane.b32.xlu0 %v9823_v57, %s5766_s28 }
 0x4a8   :  { %3545 = vrot.lane.b32.xlu1 %v9821_v27, %s5766_s28 }
 0x4aa   :  { %3530 = vrot.lane.b32.xlu0 %v9823_v57, %s5767_s29 }
 0x4ac   :  { %3528 = vrot.lane.b32.xlu1 %v9821_v27, %s5767_s29 }
 0x4ae   :  { %3513 = vrot.lane.b32.xlu0 %v9823_v57, %s5768_s15 }
 0x4b0   :  { %3511 = vrot.lane.b32.xlu1 %v9821_v27, %s5768_s15 }
 0x4b2   :  { %3496 = vrot.lane.b32.xlu0 %v9823_v57, %s5769_s11 }
 0x4b4   :  { %3494 = vrot.lane.b32.xlu1 %v9821_v27, %s5769_s11 }
 0x4b6   :  { %3480 = vrot.lane.b32.xlu0 %v9823_v57, %s11750_s17 }
 0x4b8   :  { %3478 = vrot.lane.b32.xlu1 %v9821_v27, %s11750_s17 }
 0x4ba   :  { %3464 = vrot.lane.b32.xlu0 %v9823_v57, %s11753_s18 }
 0x4bc   :  { %3462 = vrot.lane.b32.xlu1 %v9821_v27, %s11753_s18 }
 0x4be   :  { %3448 = vrot.lane.b32.xlu0 %v9823_v57, %s11756_s19 }
 0x4c0   :  { %3446 = vrot.lane.b32.xlu1 %v9821_v27, %s11756_s19 }
 0x4c2   :  { %3432 = vrot.lane.b32.xlu0 %v9823_v57, %s11736_s24 }
 0x4c4   :  { %3430 = vrot.lane.b32.xlu1 %v9821_v27, %s11736_s24 }
 0x4c6   :  { %3794 = vrot.lane.b32.xlu0 %v9823_v57, %s11763_s30 }
 0x4c8   :  { %3808 = vrot.lane.b32.xlu1 %v9821_v27, %s11762_s16 }
 0x4ca   :  { %3778 = vrot.lane.b32.xlu0 %v9823_v57, %s11764_s14 }
 0x4cc   :  { %3792 = vrot.lane.b32.xlu1 %v9821_v27, %s11763_s30 }
 0x4ce   :  { %3762 = vrot.lane.b32.xlu0 %v9823_v57, %s11767_s22 }
 0x4d0   :  { %3776 = vrot.lane.b32.xlu1 %v9821_v27, %s11764_s14 }
 0x4d1   :  { %v3208_v43 = vpop.f32.mrf.mxu0 }
 0x4d2   :  { %3746 = vrot.lane.b32.xlu0 %v9823_v57, %s11770_s12 }
 0x4d3   :  { %v3210_v52 = vpop.f32.mrf.mxu0 }
 0x4d4   :  { %3760 = vrot.lane.b32.xlu1 %v9821_v27, %s11767_s22 }
 0x4d6   :  { %3729 = vrot.lane.b32.xlu0 %v9823_v57, %s5770_s13 }
 0x4d8   :  { %3744 = vrot.lane.b32.xlu1 %v9821_v27, %s11770_s12 }
 0x4da   :  { %3712 = vrot.lane.b32.xlu0 %v9823_v57, %s5771_s9 }
 0x4db   :  { %v3279_v23 = vpop.f32.mrf.mxu1 }
 0x4dc   :  { %3727 = vrot.lane.b32.xlu1 %v9821_v27, %s5770_s13  ;;  %v3280_v3 = vadd.f32 %v3279_v23, %v3208_v43 }
 0x4dd   :  { %v3281_v55 = vpop.f32.mrf.mxu1 }
 0x4de   :  { %3695 = vrot.lane.b32.xlu0 %v9823_v57, %s5772_s10  ;;  %v3282_v29 = vadd.f32 %v3281_v55, %v3210_v52 }
 0x4e0   :  { %3710 = vrot.lane.b32.xlu1 %v9821_v27, %s5771_s9 }
 0x4e2   :  { %3678 = vrot.lane.b32.xlu0 %v9823_v57, %s5773_s1 }
 0x4e4   :  { %3693 = vrot.lane.b32.xlu1 %v9821_v27, %s5772_s10 }
 0x4e8   :  { %3661 = vrot.lane.b32.xlu1 %v9823_v57, %s5764_s5 }
 0x4ec   :  { %3810 = vrot.lane.b32.xlu1 %v9823_v57, %s11762_s16 }
 0x4fe   :  { %v9919_v10 = vpop.permute.xlu1 %3659 }
 0x500   :  { %v9925_v9 = vpop.permute.xlu0 %3645 }
 0x502   :  { %v9921_v61 = vpop.permute.xlu1 %3643 }
 0x504   :  { %v9929_v60 = vpop.permute.xlu0 %3629 }
 0x506   :  { %v9923_v41 = vpop.permute.xlu1 %3627 }
 0x507   :  { %v3637_v11 = vsel %vm12085_vm15, %v9923_v41, %v9929_v60 }
 0x508   :  { %v9933_v12 = vpop.permute.xlu0 %3613 }
 0x50a   :  { %v9927_v49 = vpop.permute.xlu1 %3611 }
 0x50c   :  { %v9943_v16 = vpop.permute.xlu0 %3597 }
 0x50e   :  { %v9931_v40 = vpop.permute.xlu1 %3595 }
 0x510   :  { %v9953_v30 = vpop.permute.xlu0 %3581 }
 0x512   :  { %v9935_v35 = vpop.permute.xlu1 %3579 }
 0x513   :  { %v3350_v17 = vpop.f32.mrf.mxu0 }
 0x514   :  { %v3351_v51 = vadd.f32 %v3350_v17, %v3280_v3  ;;  %v9965_v21 = vpop.permute.xlu0 %3564 }
 0x515   :  { %v3352_v18 = vpop.f32.mrf.mxu0 }
 0x516   :  { %v9945_v2 = vpop.permute.xlu1 %3562  ;;  %v3353_v0 = vadd.f32 %v3352_v18, %v3282_v29 }
 0x518   :  { %v9973_v25 = vpop.permute.xlu0 %3547 }
 0x51a   :  { %v9955_v26 = vpop.permute.xlu1 %3545 }
 0x51b   :  { %v3421_v36 = vpop.f32.mrf.mxu1 }
 0x51c   :  { %v9937_v44 = vadd.f32 %v3421_v36, %v3351_v51  ;;  %v9985_v59 = vpop.permute.xlu0 %3530 }
 0x51d   :  { %v3423_v54 = vpop.f32.mrf.mxu1 }
 0x51e   :  { %3663 = vrot.lane.b32.xlu0 %v9937_v44, %s5764_s5  ;;  %3647 = vrot.lane.b32.xlu1 %v9937_v44, %s11743_s20  ;;  %v9951_v38 = vadd.f32 %v3423_v54, %v3353_v0  ;;  %v9967_v7 = vpop.permute.xlu1 %3528  ;;  %v3653_v54 = vsel %vm651_vm7, %v9921_v61, %v9925_v9 }
 0x520   :  { %v9993_v15 = vpop.permute.xlu0 %3513 }
 0x522   :  { %3812 = vrot.lane.b32.xlu0 %v9937_v44, %s11762_s16  ;;  %3631 = vrot.lane.b32.xlu1 %v9937_v44, %s11744_s26  ;;  %v9975_v19 = vpop.permute.xlu1 %3511 }
 0x524   :  { %v10005_v5 = vpop.permute.xlu0 %3496 }
 0x526   :  { %3665 = vrot.lane.b32.xlu0 %v9951_v38, %s5764_s5  ;;  %3615 = vrot.lane.b32.xlu1 %v9937_v44, %s11746_s21  ;;  %v9987_v20 = vpop.permute.xlu1 %3494 }
 0x528   :  { %v10013_v32 = vpop.permute.xlu0 %3480 }
 0x52a   :  { %3649 = vrot.lane.b32.xlu0 %v9951_v38, %s11743_s20  ;;  %3599 = vrot.lane.b32.xlu1 %v9937_v44, %s11733_s25  ;;  %v9995_v47 = vpop.permute.xlu1 %3478 }
 0x52c   :  { %v10025_v48 = vpop.permute.xlu0 %3464 }
 0x52e   :  { %3633 = vrot.lane.b32.xlu0 %v9951_v38, %s11744_s26  ;;  %3583 = vrot.lane.b32.xlu1 %v9937_v44, %s11734_s6  ;;  %v10007_v63 = vpop.permute.xlu1 %3462 }
 0x530   :  { %v10033_v1 = vpop.permute.xlu0 %3448 }
 0x532   :  { %3617 = vrot.lane.b32.xlu0 %v9951_v38, %s11746_s21  ;;  %3566 = vrot.lane.b32.xlu1 %v9937_v44, %s5765_s2  ;;  %v10015_v14 = vpop.permute.xlu1 %3446  ;;  %s12316_s21 = sld [smem:[#allocation108_spill]] }
 0x534   :  { %v10045_v46 = vpop.permute.xlu0 %3432 }
 0x536   :  { %3601 = vrot.lane.b32.xlu0 %v9951_v38, %s11733_s25  ;;  %3549 = vrot.lane.b32.xlu1 %v9937_v44, %s5766_s28  ;;  %v10027_v62 = vpop.permute.xlu1 %3430 }
 0x538   :  { %v10053_v13 = vpop.permute.xlu0 %3794 }
 0x53a   :  { %3585 = vrot.lane.b32.xlu0 %v9951_v38, %s11734_s6  ;;  %3532 = vrot.lane.b32.xlu1 %v9937_v44, %s5767_s29  ;;  %v10035_v4 = vpop.permute.xlu1 %3808 }
 0x53c   :  { %v10065_v56 = vpop.permute.xlu0 %3778 }
 0x53e   :  { %3568 = vrot.lane.b32.xlu0 %v9951_v38, %s5765_s2  ;;  %3515 = vrot.lane.b32.xlu1 %v9937_v44, %s5768_s15  ;;  %v10047_v53 = vpop.permute.xlu1 %3792 }
 0x540   :  { %v10078_v45 = vpop.permute.xlu0 %3762 }
 0x542   :  { %3551 = vrot.lane.b32.xlu0 %v9951_v38, %s5766_s28  ;;  %3498 = vrot.lane.b32.xlu1 %v9937_v44, %s5769_s11  ;;  %v10055_v37 = vpop.permute.xlu1 %3776 }
 0x544   :  { %v10090_v42 = vpop.permute.xlu0 %3746 }
 0x546   :  { %3534 = vrot.lane.b32.xlu0 %v9951_v38, %s5767_s29  ;;  %3482 = vrot.lane.b32.xlu1 %v9937_v44, %s11750_s17  ;;  %v10067_v34 = vpop.permute.xlu1 %3760 }
 0x548   :  { %v10098_v22 = vpop.permute.xlu0 %3729 }
 0x54a   :  { %3517 = vrot.lane.b32.xlu0 %v9951_v38, %s5768_s15  ;;  %3466 = vrot.lane.b32.xlu1 %v9937_v44, %s11753_s18  ;;  %v10080_v33 = vpop.permute.xlu1 %3744 }
 0x54c   :  { %v10106_v28 = vpop.permute.xlu0 %3712 }
 0x54e   :  { %3500 = vrot.lane.b32.xlu0 %v9951_v38, %s5769_s11  ;;  %3450 = vrot.lane.b32.xlu1 %v9937_v44, %s11756_s19  ;;  %v10092_v39 = vpop.permute.xlu1 %3727 }
 0x550   :  { %v10118_v31 = vpop.permute.xlu0 %3695 }
 0x552   :  { %3484 = vrot.lane.b32.xlu0 %v9951_v38, %s11750_s17  ;;  %3434 = vrot.lane.b32.xlu1 %v9937_v44, %s11736_s24  ;;  %v10100_v58 = vpop.permute.xlu1 %3710 }
 0x554   :  { %v10120_v52 = vpop.permute.xlu0 %3678 }
 0x556   :  { %3468 = vrot.lane.b32.xlu0 %v9951_v38, %s11753_s18  ;;  %3796 = vrot.lane.b32.xlu1 %v9937_v44, %s11763_s30  ;;  %v10108_v24 = vpop.permute.xlu1 %3693 }
 0x55a   :  { %3452 = vrot.lane.b32.xlu0 %v9951_v38, %s11756_s19  ;;  %3780 = vrot.lane.b32.xlu1 %v9937_v44, %s11764_s14  ;;  %v3662_v43 = vpop.permute.xlu1 %3661 }
 0x55b   :  { %v3670_v51 = vsel %vm3667_vm9, %v9919_v10, %v3662_v43 }
 0x55e   :  { %3436 = vrot.lane.b32.xlu0 %v9951_v38, %s11736_s24  ;;  %3764 = vrot.lane.b32.xlu1 %v9937_v44, %s11767_s22  ;;  %v10122_v23 = vpop.permute.xlu1 %3810 }
 0x562   :  { %3814 = vrot.lane.b32.xlu0 %v9951_v38, %s11762_s16  ;;  %3748 = vrot.lane.b32.xlu1 %v9937_v44, %s11770_s12  ;;  %s12317_s16 = sld [smem:[#allocation110_spill]] }
 0x566   :  { %3798 = vrot.lane.b32.xlu0 %v9951_v38, %s11763_s30  ;;  %3731 = vrot.lane.b32.xlu1 %v9937_v44, %s5770_s13  ;;  %s5776_s30 = smov [#allocation7]  }
 0x56a   :  { %3782 = vrot.lane.b32.xlu0 %v9951_v38, %s11764_s14  ;;  %3714 = vrot.lane.b32.xlu1 %v9937_v44, %s5771_s9 }
 0x56e   :  { %3766 = vrot.lane.b32.xlu0 %v9951_v38, %s11767_s22  ;;  %3697 = vrot.lane.b32.xlu1 %v9937_v44, %s5772_s10 }
 0x572   :  { %3750 = vrot.lane.b32.xlu0 %v9951_v38, %s11770_s12  ;;  %3680 = vrot.lane.b32.xlu1 %v9937_v44, %s5773_s1  ;;  %s12312_s12 = sld [smem:[#allocation105_spill]] }
 0x576   :  { %3733 = vrot.lane.b32.xlu0 %v9951_v38, %s5770_s13  ;;  %3676 = vrot.lane.b32.xlu1 %v9821_v27, %s5773_s1 }
 0x57a   :  { %3716 = vrot.lane.b32.xlu0 %v9951_v38, %s5771_s9  ;;  %3932 = vperm.xlu1 %5506, %v3928_v50  }
 0x57e   :  { %3699 = vrot.lane.b32.xlu0 %v9951_v38, %s5772_s10 }
 0x582   :  { %3682 = vrot.lane.b32.xlu0 %v9951_v38, %s5773_s1 }
 0x586   :  { %3937 = vperm.xlu0 %5400, %v3929_v8  }
 0x590   :  { %v3664_v17 = vpop.permute.xlu0 %3663  ;;  %v3648_v3 = vpop.permute.xlu1 %3647 }
 0x591   :  { %v3669_v55 = vsel %vm3667_vm9, %v3662_v43, %v3664_v17  ;;  %v3652_v36 = vsel %vm651_vm7, %v9925_v9, %v3648_v3 }
 0x592   :  { %3946 = vmatprep.subr.mxu0 %v3669_v55 }
 0x593   :  { %3947 = vmatpush1.msra.mxu0 %v3670_v51 }
 0x594   :  { %v10133_v18 = vpop.permute.xlu0 %3812  ;;  %3948 = vmatprep.subr.mxu0 %v3652_v36  ;;  %v3632_v29 = vpop.permute.xlu1 %3631 }
 0x595   :  { %3949 = vmatpush1.msra.mxu0 %v3653_v54  ;;  %v3636_v0 = vsel %vm12084_vm13, %v9929_v60, %v3632_v29  ;;  %v3621_v60 = vsel %vm12087_vm0, %v9927_v49, %v9933_v12 }
 0x596   :  { %3950 = vmatprep.subr.mxu0 %v3636_v0 }
 0x597   :  { %3951 = vmatpush1.msra.mxu0 %v3637_v11 }
 0x598   :  { %v3666_v50 = vpop.permute.xlu0 %3665  ;;  %v3616_v8 = vpop.permute.xlu1 %3615 }
 0x599   :  { %v3668_v43 = vsel %vm3667_vm9, %v3664_v17, %v3666_v50  ;;  %v3620_v9 = vsel %vm12086_vm11, %v9933_v12, %v3616_v8  ;;  %v3671_v55 = vsel %vm3667_vm9, %v3666_v50, %v9919_v10  ;;  %v3605_v12 = vsel %vm12089_vm8, %v9931_v40, %v9943_v16  ;;  %vm12090_vm9 = vmmov %vm12084_vm13 }
 0x59a   :  { %3952 = vmatprep.subr.mxu0 %v3620_v9  ;;  %4023 = vmatprep.subr.mxu1 %v3671_v55  ;;  %vm12091_vm13 = vcmp.lt.s32.totalorder %v6002_v6, 96  ;;  %vm3570_vm11 = vcmp.lt.s32.totalorder %v6002_v6, 108  ;;  %vm3553_vm8 = vcmp.lt.s32.totalorder %v6002_v6, 109 }
 0x59b   :  { %3953 = vmatpush1.msra.mxu0 %v3621_v60  ;;  %4024 = vmatpush1.msra.mxu1 %v3668_v43  ;;  %vm12093_vm15 = vmmov %vm12091_vm13 }
 0x59c   :  { %v3650_v51 = vpop.permute.xlu0 %3649  ;;  %v3600_v36 = vpop.permute.xlu1 %3599 }
 0x59d   :  { %v3651_v17 = vsel %vm651_vm7, %v3648_v3, %v3650_v51  ;;  %v3604_v54 = vsel %vm12088_vm10, %v9943_v16, %v3600_v36  ;;  %v3654_v10 = vsel %vm651_vm7, %v3650_v51, %v9921_v61  ;;  %vm12092_vm7 = vmmov %vm12090_vm9  ;;  %v3589_v16 = vsel %vm12093_vm15, %v9935_v35, %v9953_v30 }
 0x59e   :  { %3954 = vmatprep.subr.mxu0 %v3604_v54  ;;  %4025 = vmatprep.subr.mxu1 %v3654_v10  ;;  %vm12094_vm10 = vmmov %vm12087_vm0 }
 0x59f   :  { %3955 = vmatpush1.msra.mxu0 %v3605_v12  ;;  %4026 = vmatpush1.msra.mxu1 %v3651_v17 }
 0x5a0   :  { %v3634_v0 = vpop.permute.xlu0 %3633  ;;  %v3584_v11 = vpop.permute.xlu1 %3583 }
 0x5a1   :  { %v3635_v3 = vsel %vm12090_vm9, %v3632_v29, %v3634_v0  ;;  %v3588_v50 = vsel %vm12091_vm13, %v9953_v30, %v3584_v11  ;;  %v3638_v61 = vsel %vm12092_vm7, %v3634_v0, %v9923_v41  ;;  %v3573_v30 = vsel %vm3570_vm11, %v9945_v2, %v9965_v21 }
 0x5a2   :  { %3956 = vmatprep.subr.mxu0 %v3588_v50  ;;  %4027 = vmatprep.subr.mxu1 %v3638_v61  ;;  %vm12095_vm9 = vcmp.lt.s32.totalorder %v6002_v6, 95  ;;  %vm3536_vm7 = vcmp.lt.s32.totalorder %v6002_v6, 110 }
 0x5a3   :  { %3957 = vmatpush1.msra.mxu0 %v3589_v16  ;;  %4028 = vmatpush1.msra.mxu1 %v3635_v3  ;;  %vm12096_vm13 = vmmov %vm12095_vm9 }
 0x5a4   :  { %v3618_v29 = vpop.permute.xlu0 %3617  ;;  %v3567_v43 = vpop.permute.xlu1 %3566 }
 0x5a5   :  { %v3619_v9 = vsel %vm12087_vm0, %v3616_v8, %v3618_v29  ;;  %v3572_v41 = vsel %vm3570_vm11, %v9965_v21, %v3567_v43  ;;  %v3622_v55 = vsel %vm12094_vm10, %v3618_v29, %v9927_v49  ;;  %v3556_v21 = vsel %vm3553_vm8, %v9955_v26, %v9973_v25  ;;  %vm12097_vm0 = vmmov %vm12093_vm15 }
 0x5a6   :  { %3958 = vmatprep.subr.mxu0 %v3572_v41  ;;  %4029 = vmatprep.subr.mxu1 %v3622_v55  ;;  %vm3519_vm10 = vcmp.lt.s32.totalorder %v6002_v6, 111 }
 0x5a7   :  { %3959 = vmatpush1.msra.mxu0 %v3573_v30  ;;  %4030 = vmatpush1.msra.mxu1 %v3619_v9 }
 0x5a8   :  { %v3602_v8 = vpop.permute.xlu0 %3601  ;;  %v3550_v60 = vpop.permute.xlu1 %3549 }
 0x5a9   :  { %v3603_v51 = vsel %vm12095_vm9, %v3600_v36, %v3602_v8  ;;  %v3555_v49 = vsel %vm3553_vm8, %v9973_v25, %v3550_v60  ;;  %v3606_v17 = vsel %vm12096_vm13, %v3602_v8, %v9931_v40  ;;  %v3539_v25 = vsel %vm3536_vm7, %v9967_v7, %v9985_v59 }
 0x5aa   :  { %3960 = vmatprep.subr.mxu0 %v3555_v49  ;;  %4031 = vmatprep.subr.mxu1 %v3606_v17  ;;  %vm3502_vm9 = vcmp.lt.s32.totalorder %v6002_v6, 112  ;;  %vm12100_vm13 = vcmp.lt.s32.totalorder %v6002_v6, 127 }
 0x5ab   :  { %3961 = vmatpush1.msra.mxu0 %v3556_v21  ;;  %4032 = vmatpush1.msra.mxu1 %v3603_v51 }
 0x5ac   :  { %v3586_v36 = vpop.permute.xlu0 %3585  ;;  %v3533_v54 = vpop.permute.xlu1 %3532 }
 0x5ad   :  { %v3587_v10 = vsel %vm12093_vm15, %v3584_v11, %v3586_v36  ;;  %v3538_v40 = vsel %vm3536_vm7, %v9985_v59, %v3533_v54  ;;  %v3590_v12 = vsel %vm12097_vm0, %v3586_v36, %v9935_v35  ;;  %v3522_v59 = vsel %vm3519_vm10, %v9975_v19, %v9993_v15 }
 0x5ae   :  { %3962 = vmatprep.subr.mxu0 %v3538_v40  ;;  %4033 = vmatprep.subr.mxu1 %v3590_v12 }
 0x5af   :  { %3963 = vmatpush1.msra.mxu0 %v3539_v25  ;;  %4034 = vmatpush1.msra.mxu1 %v3587_v10 }
 0x5b0   :  { %v3569_v0 = vpop.permute.xlu0 %3568  ;;  %v3516_v11 = vpop.permute.xlu1 %3515 }
 0x5b1   :  { %v3571_v3 = vsel %vm3570_vm11, %v3567_v43, %v3569_v0  ;;  %v3521_v35 = vsel %vm3519_vm10, %v9993_v15, %v3516_v11  ;;  %v3574_v50 = vsel %vm3570_vm11, %v3569_v0, %v9945_v2  ;;  %v3505_v15 = vsel %vm3502_vm9, %v9987_v20, %v10005_v5 }
 0x5b2   :  { %3964 = vmatprep.subr.mxu0 %v3521_v35  ;;  %4035 = vmatprep.subr.mxu1 %v3574_v50  ;;  %vm12098_vm11 = vcmp.lt.s32.totalorder %v6002_v6, 125  ;;  %v3802_v35 = vsel %vm911_vm3, %v10047_v53, %v10053_v13 }
 0x5b3   :  { %3965 = vmatpush1.msra.mxu0 %v3522_v59  ;;  %4036 = vmatpush1.msra.mxu1 %v3571_v3 }
 0x5b4   :  { %v3552_v61 = vpop.permute.xlu0 %3551  ;;  %v3499_v16 = vpop.permute.xlu1 %3498 }
 0x5b5   :  { %v3554_v29 = vsel %vm3553_vm8, %v3550_v60, %v3552_v61  ;;  %v3504_v2 = vsel %vm3502_vm9, %v10005_v5, %v3499_v16  ;;  %v3557_v43 = vsel %vm3553_vm8, %v3552_v61, %v9955_v26  ;;  %v3488_v5 = vsel %vm326_vm12, %v9995_v47, %v10013_v32  ;;  %vm12099_vm8 = vmmov %vm12098_vm11 }
 0x5b6   :  { %3966 = vmatprep.subr.mxu0 %v3504_v2  ;;  %4037 = vmatprep.subr.mxu1 %v3557_v43  ;;  %vm12102_vm15 = vmmov %vm12099_vm8 }
 0x5b7   :  { %3967 = vmatpush1.msra.mxu0 %v3505_v15  ;;  %4038 = vmatpush1.msra.mxu1 %v3554_v29 }
 0x5b8   :  { %v3535_v9 = vpop.permute.xlu0 %3534  ;;  %v3483_v41 = vpop.permute.xlu1 %3482 }
 0x5b9   :  { %v3537_v55 = vsel %vm3536_vm7, %v3533_v54, %v3535_v9  ;;  %v3487_v30 = vsel %vm326_vm12, %v10013_v32, %v3483_v41  ;;  %v3540_v26 = vsel %vm3536_vm7, %v3535_v9, %v9967_v7  ;;  %v3472_v32 = vsel %vm12099_vm8, %v10007_v63, %v10025_v48  ;;  %vm12101_vm7 = vmmov %vm12100_vm13 }
 0x5ba   :  { %3968 = vmatprep.subr.mxu0 %v3487_v30  ;;  %4039 = vmatprep.subr.mxu1 %v3540_v26  ;;  %vm12104_vm0 = vmmov %vm12101_vm7 }
 0x5bb   :  { %3969 = vmatpush1.msra.mxu0 %v3488_v5  ;;  %4040 = vmatpush1.msra.mxu1 %v3537_v55 }
 0x5bc   :  { %v3518_v8 = vpop.permute.xlu0 %3517  ;;  %v3467_v60 = vpop.permute.xlu1 %3466 }
 0x5bd   :  { %v3520_v51 = vsel %vm3519_vm10, %v3516_v11, %v3518_v8  ;;  %v3471_v49 = vsel %vm12098_vm11, %v10025_v48, %v3467_v60  ;;  %v3523_v7 = vsel %vm3519_vm10, %v3518_v8, %v9975_v19  ;;  %v3456_v48 = vsel %vm196_vm14, %v10015_v14, %v10033_v1 }
 0x5be   :  { %3970 = vmatprep.subr.mxu0 %v3471_v49  ;;  %4041 = vmatprep.subr.mxu1 %v3523_v7  ;;  %vm3735_vm11 = vcmp.lt.s32.totalorder %v6002_v6, 76 }
 0x5bf   :  { %3971 = vmatpush1.msra.mxu0 %v3472_v32  ;;  %4042 = vmatpush1.msra.mxu1 %v3520_v51 }
 0x5c0   :  { %v3501_v17 = vpop.permute.xlu0 %3500  ;;  %v3451_v21 = vpop.permute.xlu1 %3450 }
 0x5c1   :  { %v3503_v36 = vsel %vm3502_vm9, %v3499_v16, %v3501_v17  ;;  %v3455_v54 = vsel %vm196_vm14, %v10033_v1, %v3451_v21  ;;  %v3506_v19 = vsel %vm3502_vm9, %v3501_v17, %v9987_v20  ;;  %v3440_v1 = vsel %vm12101_vm7, %v10027_v62, %v10045_v46  ;;  %vm12212_vm7 = vmmov %vm12104_vm0 }
 0x5c2   :  { %3972 = vmatprep.subr.mxu0 %v3455_v54  ;;  %4043 = vmatprep.subr.mxu1 %v3506_v19 }
 0x5c3   :  { %3973 = vmatpush1.msra.mxu0 %v3456_v48  ;;  %4044 = vmatpush1.msra.mxu1 %v3503_v36  ;;  %v3824_v48 = vld [vmem:[%s11448_s3] sm:$0xff] }
 0x5c4   :  { %v3485_v10 = vpop.permute.xlu0 %3484  ;;  %v3435_v40 = vpop.permute.xlu1 %3434 }
 0x5c5   :  { %v3486_v12 = vsel %vm326_vm12, %v3483_v41, %v3485_v10  ;;  %v3439_v25 = vsel %vm12100_vm13, %v10045_v46, %v3435_v40  ;;  %v3489_v20 = vsel %vm326_vm12, %v3485_v10, %v9995_v47  ;;  %v3817_v47 = vsel %vm976_vm2, %v10122_v23, %v10133_v18  ;;  %vm12103_vm12 = vmmov %vm12099_vm8 }
 0x5c6   :  { %3974 = vmatprep.subr.mxu0 %v3439_v25  ;;  %4045 = vmatprep.subr.mxu1 %v3489_v20  ;;  %v3826_v20 = vld [vmem:[%s11448_s3 + $0x10] sm:$0xff]  ;;  %vm12208_vm8 = vmmov %vm12104_vm0 }
 0x5c7   :  { %3975 = vmatpush1.msra.mxu0 %v3440_v1  ;;  %4046 = vmatpush1.msra.mxu1 %v3486_v12  ;;  %v3827_v12 = vld [vmem:[%s11448_s3 + $0x18] sm:$0xff]  ;;  %vm12209_vm13 = vmmov %vm12104_vm0  ;;  %s12313_s3 = sld [smem:[#allocation107_spill]] }
 0x5c8   :  { %v3469_v0 = vpop.permute.xlu0 %3468  ;;  %3976 = vmatprep.subr.mxu0 %v9823_v57  ;;  %v3797_v11 = vpop.permute.xlu1 %3796  ;;  %v3818_v57 = vsel %vm976_vm2, %v10035_v4, %v10122_v23 }
 0x5c9   :  { %v3470_v3 = vsel %vm12102_vm15, %v3467_v60, %v3469_v0  ;;  %3977 = vmatpush1.msra.mxu0 %v9821_v27  ;;  %v3473_v46 = vsel %vm12103_vm12, %v3469_v0, %v10007_v63  ;;  %v3801_v27 = vsel %vm911_vm3, %v10053_v13, %v3797_v11  ;;  %v3786_v13 = vsel %vm846_vm4, %v10055_v37, %v10065_v56  ;;  %vm12295_vm15 = vmmov %vm12104_vm0 }
 0x5ca   :  { %3992 = vmatprep.subr.mxu0 %v3817_v47  ;;  %4047 = vmatprep.subr.mxu1 %v3473_v46  ;;  %v10437_v46 = vld [vmem:[#allocation4 + $0x1e8] sm:$0xff]  ;;  %vm12302_vm12 = vmmov %vm12104_vm0 }
 0x5cb   :  { %3993 = vmatpush2.msra.mxu0 %v3818_v57  ;;  %4048 = vmatpush1.msra.mxu1 %v3470_v3  ;;  %v10439_v57 = vld [vmem:[#allocation4 + $0x1f8] sm:$0xff] }
 0x5cc   :  { %v3453_v50 = vpop.permute.xlu0 %3452  ;;  %3994 = vmatprep.subr.mxu0 %v3801_v27  ;;  %v3781_v63 = vpop.permute.xlu1 %3780  ;;  %v10445_v27 = vld [vmem:[#allocation4 + $0x1f0] sm:$0xff] }
 0x5cd   :  { %v3454_v59 = vsel %vm196_vm14, %v3451_v21, %v3453_v50  ;;  %3995 = vmatpush2.msra.mxu0 %v3802_v35  ;;  %v3785_v23 = vsel %vm846_vm4, %v10065_v56, %v3781_v63  ;;  %v3457_v61 = vsel %vm196_vm14, %v3453_v50, %v10015_v14  ;;  %vm12105_vm14 = vmmov %vm12104_vm0  ;;  %v3770_v56 = vsel %vm781_vm5, %v10067_v34, %v10078_v45  ;;  %v10447_v35 = vld [vmem:[#allocation4 + $0x1c8] sm:$0xff]  ;;  %v10449_v50 = vld [vmem:[#allocation4 + $0x1d8] sm:$0xff] }
 0x5ce   :  { %3996 = vmatprep.subr.mxu0 %v3785_v23  ;;  %4049 = vmatprep.subr.mxu1 %v3457_v61  ;;  %v10457_v23 = vld [vmem:[#allocation4 + $0x1a8] sm:$0xff]  ;;  %v10461_v61 = vld [vmem:[#allocation4 + $0x1b8] sm:$0xff] }
 0x5cf   :  { %3997 = vmatpush2.msra.mxu0 %v3786_v13  ;;  %4050 = vmatpush1.msra.mxu1 %v3454_v59  ;;  %v10455_v59 = vld [vmem:[#allocation4 + $0x1d0] sm:$0xff]  ;;  %v10463_v13 = vld [vmem:[#allocation4 + $0x1a0] sm:$0xff] }
 0x5d0   :  { %v3437_v16 = vpop.permute.xlu0 %3436  ;;  %v3765_v29 = vpop.permute.xlu1 %3764 }
 0x5d1   :  { %v3438_v2 = vsel %vm12104_vm0, %v3435_v40, %v3437_v16  ;;  %v3769_v43 = vsel %vm781_vm5, %v10078_v45, %v3765_v29  ;;  %v3441_v14 = vsel %vm12105_vm14, %v3437_v16, %v10027_v62  ;;  %v10465_v16 = vld [vmem:[#allocation4 + $0x1b0] sm:$0xff]  ;;  %vm5132_vm14 = vcmask 1043456  }
 0x5d2   :  { %3998 = vmatprep.subr.mxu0 %v3769_v43  ;;  %4051 = vmatprep.subr.mxu1 %v3441_v14  ;;  %v10475_v43 = vld [vmem:[#allocation4 + $0x180] sm:$0xff]  ;;  %v10477_v14 = vld [vmem:[#allocation4 + $0x190] sm:$0xff] }
 0x5d3   :  { %3999 = vmatpush2.msra.mxu0 %v3770_v56  ;;  %4052 = vmatpush1.msra.mxu1 %v3438_v2  ;;  %v10471_v2 = vld [vmem:[#allocation4 + $0x198] sm:$0xff]  ;;  %v10481_v56 = vld [vmem:[#allocation4 + $0x168] sm:$0xff] }
 0x5d4   :  { %v3815_v15 = vpop.permute.xlu0 %3814  ;;  %4053 = vmatprep.subr.mxu1 %v9951_v38  ;;  %v3749_v9 = vpop.permute.xlu1 %3748  ;;  %v3754_v38 = vsel %vm716_vm6, %v10080_v33, %v10090_v42 }
 0x5d5   :  { %v3816_v41 = vsel %vm976_vm2, %v10133_v18, %v3815_v15  ;;  %4054 = vmatpush1.msra.mxu1 %v9937_v44  ;;  %v3753_v62 = vsel %vm716_vm6, %v10090_v42, %v3749_v9  ;;  %v3819_v45 = vsel %vm976_vm2, %v3815_v15, %v10035_v4  ;;  %v3738_v42 = vsel %vm3735_vm11, %v10092_v39, %v10098_v22  ;;  %v10483_v15 = vld [vmem:[#allocation4 + $0x178] sm:$0xff] }
 0x5d6   :  { %4000 = vmatprep.subr.mxu0 %v3753_v62  ;;  %4069 = vmatprep.subr.mxu1 %v3819_v45  ;;  %vm3718_vm2 = vcmp.lt.s32.totalorder %v6002_v6, 77  ;;  %v10493_v62 = vld [vmem:[#allocation4 + $0x148] sm:$0xff]  ;;  %v10495_v45 = vld [vmem:[#allocation4 + $0x158] sm:$0xff] }
 0x5d7   :  { %4001 = vmatpush2.msra.mxu0 %v3754_v38  ;;  %4070 = vmatpush2.msra.mxu1 %v3816_v41  ;;  %v10489_v41 = vld [vmem:[#allocation4 + $0x170] sm:$0xff]  ;;  %v10499_v38 = vld [vmem:[#allocation4 + $0x140] sm:$0xff] }
 0x5d8   :  { %v3799_v44 = vpop.permute.xlu0 %3798  ;;  %v3732_v18 = vpop.permute.xlu1 %3731 }
 0x5d9   :  { %v3800_v55 = vsel %vm911_vm3, %v3797_v11, %v3799_v44  ;;  %v3737_v4 = vsel %vm3735_vm11, %v10098_v22, %v3732_v18  ;;  %v3803_v30 = vsel %vm911_vm3, %v3799_v44, %v10047_v53  ;;  %v3721_v22 = vsel %vm3718_vm2, %v10100_v58, %v10106_v28  ;;  %v10501_v44 = vld [vmem:[#allocation4 + $0x150] sm:$0xff] }
 0x5da   :  { %4002 = vmatprep.subr.mxu0 %v3737_v4  ;;  %4071 = vmatprep.subr.mxu1 %v3803_v30  ;;  %vm3701_vm3 = vcmp.lt.s32.totalorder %v6002_v6, 78  ;;  %v10511_v4 = vld [vmem:[#allocation4 + $0x120] sm:$0xff]  ;;  %v10513_v30 = vld [vmem:[#allocation4 + $0x130] sm:$0xff] }
 0x5db   :  { %4003 = vmatpush2.msra.mxu0 %v3738_v42  ;;  %4072 = vmatpush2.msra.mxu1 %v3800_v55  ;;  %v10507_v55 = vld [vmem:[#allocation4 + $0x138] sm:$0xff]  ;;  %v10517_v42 = vld [vmem:[#allocation4 + $0x108] sm:$0xff] }
 0x5dc   :  { %v3783_v26 = vpop.permute.xlu0 %3782  ;;  %v3715_v5 = vpop.permute.xlu1 %3714 }
 0x5dd   :  { %v3784_v8 = vsel %vm846_vm4, %v3781_v63, %v3783_v26  ;;  %v3720_v53 = vsel %vm3718_vm2, %v10106_v28, %v3715_v5  ;;  %v3787_v60 = vsel %vm846_vm4, %v3783_v26, %v10055_v37  ;;  %v3704_v28 = vsel %vm3701_vm3, %v10108_v24, %v10118_v31  ;;  %v10453_v63 = vld [vmem:[#allocation4 + $0x1c0] sm:$0xff]  ;;  %v10519_v26 = vld [vmem:[#allocation4 + $0x118] sm:$0xff] }
 0x5de   :  { %4004 = vmatprep.subr.mxu0 %v3720_v53  ;;  %4073 = vmatprep.subr.mxu1 %v3787_v60  ;;  %vm3684_vm4 = vcmp.lt.s32.totalorder %v6002_v6, 79  ;;  %v10529_v53 = vld [vmem:[#allocation4 + $0xe8] sm:$0xff]  ;;  %v10531_v60 = vld [vmem:[#allocation4 + $0xf8] sm:$0xff] }
 0x5df   :  { %4005 = vmatpush2.msra.mxu0 %v3721_v22  ;;  %4074 = vmatpush2.msra.mxu1 %v3784_v8  ;;  %v10525_v8 = vld [vmem:[#allocation4 + $0x110] sm:$0xff]  ;;  %v10535_v22 = vld [vmem:[#allocation4 + $0xe0] sm:$0xff] }
 0x5e0   :  { %v3767_v51 = vpop.permute.xlu0 %3766  ;;  %v3698_v49 = vpop.permute.xlu1 %3697 }
 0x5e1   :  { %v3768_v7 = vsel %vm781_vm5, %v3765_v29, %v3767_v51  ;;  %v3703_v37 = vsel %vm3701_vm3, %v10118_v31, %v3698_v49  ;;  %v3771_v32 = vsel %vm781_vm5, %v3767_v51, %v10067_v34  ;;  %v10469_v29 = vld [vmem:[#allocation4 + $0x188] sm:$0xff]  ;;  %v10537_v51 = vld [vmem:[#allocation4 + $0xf0] sm:$0xff]  ;;  %vm12204_vm5 = vmmov %vm12104_vm0 }
 0x5e2   :  { %4006 = vmatprep.subr.mxu0 %v3703_v37  ;;  %4075 = vmatprep.subr.mxu1 %v3771_v32  ;;  %12106 = vst [vmem:[#allocation14_spill] sm:$0xff] %v10537_v51  ;;  %v10547_v37 = vld [vmem:[#allocation4 + $0xc0] sm:$0xff]  ;;  %v10549_v32 = vld [vmem:[#allocation4 + $0xd0] sm:$0xff] }
 0x5e3   :  { %4007 = vmatpush2.msra.mxu0 %v3704_v28  ;;  %4076 = vmatpush2.msra.mxu1 %v3768_v7  ;;  %v10543_v7 = vld [vmem:[#allocation4 + $0xd8] sm:$0xff]  ;;  %12109 = vst [vmem:[#allocation22_spill] sm:$0xff] %v10547_v37  ;;  %12110 = vst [vmem:[#allocation16_spill] sm:$0xff] %v10549_v32  ;;  %v10553_v28 = vld [vmem:[#allocation4 + $0xa8] sm:$0xff] }
 0x5e4   :  { %v3751_v17 = vpop.permute.xlu0 %3750  ;;  %v3681_v21 = vpop.permute.xlu1 %3680  ;;  %12108 = vst [vmem:[#allocation15_spill] sm:$0xff] %v10543_v7  ;;  %12111 = vst [vmem:[#allocation24_spill] sm:$0xff] %v10553_v28 }
 0x5e5   :  { %v3752_v36 = vsel %vm716_vm6, %v3749_v9, %v3751_v17  ;;  %v3686_v34 = vsel %vm3684_vm4, %v10120_v52, %v3681_v21  ;;  %v3755_v54 = vsel %vm716_vm6, %v3751_v17, %v10080_v33  ;;  %v10487_v9 = vld [vmem:[#allocation4 + $0x160] sm:$0xff]  ;;  %v10555_v17 = vld [vmem:[#allocation4 + $0xb8] sm:$0xff]  ;;  %vm12206_vm6 = vmmov %vm12104_vm0 }
 0x5e6   :  { %4008 = vmatprep.subr.mxu0 %v3686_v34  ;;  %4077 = vmatprep.subr.mxu1 %v3755_v54  ;;  %12112 = vst [vmem:[#allocation17_spill] sm:$0xff] %v10555_v17  ;;  %v10565_v34 = vld [vmem:[#allocation4 + $0x88] sm:$0xff]  ;;  %v10567_v54 = vld [vmem:[#allocation4 + $0x98] sm:$0xff] }
 0x5e7   :  { %4078 = vmatpush2.msra.mxu1 %v3752_v36  ;;  %v10561_v36 = vld [vmem:[#allocation4 + $0xb0] sm:$0xff]  ;;  %12115 = vst [vmem:[#allocation28_spill] sm:$0xff] %v10565_v34  ;;  %12116 = vst [vmem:[#allocation19_spill] sm:$0xff] %v10567_v54 }
 0x5e8   :  { %v3734_v31 = vpop.permute.xlu0 %3733  ;;  %v3677_v19 = vpop.permute.xlu1 %3676  ;;  %12114 = vst [vmem:[#allocation18_spill] sm:$0xff] %v10561_v36 }
 0x5e9   :  { %v3736_v10 = vsel %vm3735_vm11, %v3732_v18, %v3734_v31  ;;  %v3687_v40 = vsel %vm3684_vm4, %v3677_v19, %v10120_v52  ;;  %v3739_v33 = vsel %vm3735_vm11, %v3734_v31, %v10092_v39  ;;  %v10505_v18 = vld [vmem:[#allocation4 + $0x128] sm:$0xff]  ;;  %v10571_v31 = vld [vmem:[#allocation4 + $0x80] sm:$0xff]  ;;  %vm5035_vm11 = vcmask 982016  }
 0x5ea   :  { %4009 = vmatpush2.msra.mxu0 %v3687_v40  ;;  %4079 = vmatprep.subr.mxu1 %v3739_v33  ;;  %12117 = vst [vmem:[#allocation30_spill] sm:$0xff] %v10571_v31  ;;  %v10583_v40 = vld [vmem:[#allocation4 + $0x60] sm:$0xff]  ;;  %v10585_v33 = vld [vmem:[#allocation4 + $0x70] sm:$0xff] }
 0x5eb   :  { %4011 = vmatmul.mubr.f32.vlgmr.msra.gmra.mxu0 %v3824_v48  ;;  %4080 = vmatpush2.msra.mxu1 %v3736_v10  ;;  %v10579_v10 = vld [vmem:[#allocation4 + $0x78] sm:$0xff]  ;;  %12121 = vst [vmem:[#allocation34_spill] sm:$0xff] %v10583_v40  ;;  %12122 = vst [vmem:[#allocation25_spill] sm:$0xff] %v10585_v33 }
 0x5ec   :  { %v3717_v25 = vpop.permute.xlu0 %3716  ;;  %5232 = vmatprep.mubr.msk.f32.mxu0 %vm1822_vm1, %v3827_v12  ;;  %4340 = vmatprep.subr.mxu0 %v10437_v46  ;;  %12120 = vst [vmem:[#allocation23_spill] sm:$0xff] %v10579_v10 }
 0x5ed   :  { %v3719_v52 = vsel %vm3718_vm2, %v3715_v5, %v3717_v25  ;;  %v3722_v39 = vsel %vm3718_vm2, %v3717_v25, %v10100_v58  ;;  %v10523_v5 = vld [vmem:[#allocation4 + $0x100] sm:$0xff]  ;;  %v10591_v25 = vld [vmem:[#allocation4 + $0x58] sm:$0xff]  ;;  %vm5128_vm2 = vcmask 687104  }
 0x5ee   :  { %4081 = vmatprep.subr.mxu1 %v3722_v39  ;;  %12124 = vst [vmem:[#allocation27_spill] sm:$0xff] %v10591_v25  ;;  %v10601_v39 = vld [vmem:[#allocation4 + $0x28] sm:$0xff] }
 0x5ef   :  { %4017 = vmatmul.mubr.f32.gmra.mxu0 %v3826_v20  ;;  %4082 = vmatpush2.msra.mxu1 %v3719_v52  ;;  %v10597_v52 = vld [vmem:[#allocation4 + $0x50] sm:$0xff]  ;;  %12127 = vst [vmem:[#allocation40_spill] sm:$0xff] %v10601_v39 }
 0x5f0   :  { %v3700_v1 = vpop.permute.xlu0 %3699  ;;  %12126 = vst [vmem:[#allocation29_spill] sm:$0xff] %v10597_v52 }
 0x5f1   :  { %v3702_v0 = vsel %vm3701_vm3, %v3698_v49, %v3700_v1  ;;  %v3705_v11 = vsel %vm3701_vm3, %v3700_v1, %v10108_v24  ;;  %v10441_v24 = vld [vmem:[#allocation4 + $0x1e0] sm:$0xff]  ;;  %v10541_v49 = vld [vmem:[#allocation4 + $0xc8] sm:$0xff]  ;;  %v10603_v1 = vld [vmem:[#allocation4 + $0x38] sm:$0xff]  ;;  %vm5206_vm3 = vcmask 74752  }
 0x5f2   :  { %4083 = vmatprep.subr.mxu1 %v3705_v11  ;;  %4341 = vmatpush1.msra.mxu0 %v10441_v24  ;;  %12107 = vst [vmem:[#allocation20_spill] sm:$0xff] %v10541_v49  ;;  %12128 = vst [vmem:[#allocation31_spill] sm:$0xff] %v10603_v1  ;;  %v10609_v11 = vld [vmem:[#allocation4 + $0x30] sm:$0xff] }
 0x5f3   :  { %4084 = vmatpush2.msra.mxu1 %v3702_v0  ;;  %4342 = vmatprep.subr.mxu0 %v10447_v35  ;;  %v10607_v0 = vld [vmem:[#allocation4 + $0x20] sm:$0xff]  ;;  %12130 = vst [vmem:[#allocation33_spill] sm:$0xff] %v10609_v11 }
 0x5f4   :  { %v3683_v3 = vpop.permute.xlu0 %3682  ;;  %4343 = vmatpush1.msra.mxu0 %v10453_v63  ;;  %12129 = vst [vmem:[#allocation42_spill] sm:$0xff] %v10607_v0 }
 0x5f5   :  { %v3685_v47 = vsel %vm3684_vm4, %v3681_v21, %v3683_v3  ;;  %v3688_v58 = vsel %vm3684_vm4, %v3683_v3, %v3677_v19  ;;  %4344 = vmatprep.subr.mxu0 %v10457_v23  ;;  %v10559_v21 = vld [vmem:[#allocation4 + $0xa0] sm:$0xff]  ;;  %v10573_v19 = vld [vmem:[#allocation4 + $0x90] sm:$0xff]  ;;  %v10613_v3 = vld [vmem:[#allocation4 + $0x8] sm:$0xff] }
 0x5f6   :  { %4085 = vmatprep.subr.mxu1 %v3688_v58  ;;  %4345 = vmatpush1.msra.mxu0 %v10463_v13  ;;  %12113 = vst [vmem:[#allocation26_spill] sm:$0xff] %v10559_v21  ;;  %12118 = vst [vmem:[#allocation21_spill] sm:$0xff] %v10573_v19  ;;  %v10619_v58 = vld [vmem:[#allocation4] sm:$0xff] }
 0x5f7   :  { %4086 = vmatpush2.msra.mxu1 %v3685_v47  ;;  %4346 = vmatprep.subr.mxu0 %v10469_v29  ;;  %12131 = vst [vmem:[#allocation44_spill] sm:$0xff] %v10613_v3  ;;  %v10615_v47 = vld [vmem:[#allocation4 + $0x18] sm:$0xff]  ;;  %12133 = vst [vmem:[#allocation46_spill] sm:$0xff] %v10619_v58 }
 0x5f8   :  { %4088 = vmatmul.mubr.f32.vlgmr.msra.gmra.mxu1 %v3824_v48  ;;  %4417 = vmatprep.subr.mxu1 %v10439_v57  ;;  %v10577_v48 = vld [vmem:[#allocation4 + $0x68] sm:$0xff]  ;;  %12132 = vst [vmem:[#allocation35_spill] sm:$0xff] %v10615_v47 }
 0x5f9   :  { %5234 = vmatprep.mubr.msk.f32.mxu1 %vm1822_vm1, %v3827_v12  ;;  %4418 = vmatpush1.msra.mxu1 %v10445_v27  ;;  %12119 = vst [vmem:[#allocation32_spill] sm:$0xff] %v10577_v48  ;;  %v10589_v12 = vld [vmem:[#allocation4 + $0x48] sm:$0xff]  ;;  %vm12203_vm1 = vmmov %vm12104_vm0  ;;  %vm5775_vm0 = vmmov 0  }
 0x5fa   :  { %4419 = vmatprep.subr.mxu1 %v10449_v50  ;;  %4347 = vmatpush1.msra.mxu0 %v10475_v43  ;;  %12123 = vst [vmem:[#allocation36_spill] sm:$0xff] %v10589_v12 }
 0x5fb   :  { %4420 = vmatpush1.msra.mxu1 %v10455_v59  ;;  %4348 = vmatprep.subr.mxu0 %v10481_v56 }
 0x5fc   :  { %4094 = vmatmul.mubr.f32.gmra.mxu1 %v3826_v20  ;;  %4421 = vmatprep.subr.mxu1 %v10461_v61  ;;  %v10595_v20 = vld [vmem:[#allocation4 + $0x40] sm:$0xff] }
 0x5fd   :  { %4422 = vmatpush1.msra.mxu1 %v10465_v16  ;;  %4349 = vmatpush1.msra.mxu0 %v10487_v9  ;;  %12125 = vst [vmem:[#allocation38_spill] sm:$0xff] %v10595_v20 }
 0x5fe   :  { %4423 = vmatprep.subr.mxu1 %v10471_v2  ;;  %4350 = vmatprep.subr.mxu0 %v10493_v62 }
 0x5ff   :  { %4424 = vmatpush1.msra.mxu1 %v10477_v14  ;;  %4351 = vmatpush1.msra.mxu0 %v10499_v38 }
 0x600   :  { %4425 = vmatprep.subr.mxu1 %v10483_v15  ;;  %4352 = vmatprep.subr.mxu0 %v10505_v18 }
 0x601   :  { %4426 = vmatpush1.msra.mxu1 %v10489_v41  ;;  %4353 = vmatpush1.msra.mxu0 %v10511_v4 }
 0x602   :  { %4427 = vmatprep.subr.mxu1 %v10495_v45  ;;  %4354 = vmatprep.subr.mxu0 %v10517_v42 }
 0x603   :  { %4428 = vmatpush1.msra.mxu1 %v10501_v44  ;;  %4355 = vmatpush1.msra.mxu0 %v10523_v5 }
 0x604   :  { %4429 = vmatprep.subr.mxu1 %v10507_v55  ;;  %4356 = vmatprep.subr.mxu0 %v10529_v53 }
 0x605   :  { %4430 = vmatpush1.msra.mxu1 %v10513_v30  ;;  %4357 = vmatpush1.msra.mxu0 %v10535_v22 }
 0x606   :  { %4431 = vmatprep.subr.mxu1 %v10519_v26  ;;  %4358 = vmatprep.subr.mxu0 %v10541_v49 }
 0x607   :  { %4432 = vmatpush1.msra.mxu1 %v10525_v8  ;;  %4359 = vmatpush1.msra.mxu0 %v10547_v37 }
 0x608   :  { %4433 = vmatprep.subr.mxu1 %v10531_v60  ;;  %4360 = vmatprep.subr.mxu0 %v10553_v28 }
 0x609   :  { %4434 = vmatpush1.msra.mxu1 %v10537_v51  ;;  %4361 = vmatpush1.msra.mxu0 %v10559_v21 }
 0x60a   :  { %4435 = vmatprep.subr.mxu1 %v10543_v7  ;;  %4362 = vmatprep.subr.mxu0 %v10565_v34 }
 0x60b   :  { %4436 = vmatpush1.msra.mxu1 %v10549_v32  ;;  %4363 = vmatpush1.msra.mxu0 %v10571_v31 }
 0x60c   :  { %4437 = vmatprep.subr.mxu1 %v10555_v17  ;;  %4364 = vmatprep.subr.mxu0 %v10577_v48  ;;  %v10831_v48 = vld [vmem:[#allocation4 + $0x200] sm:$0xff] }
 0x60d   :  { %4438 = vmatpush1.msra.mxu1 %v10561_v36  ;;  %4365 = vmatpush1.msra.mxu0 %v10583_v40  ;;  %12199 = vst [vmem:[#allocation101_spill] sm:$0xff] %v10831_v48 }
 0x60e   :  { %4439 = vmatprep.subr.mxu1 %v10567_v54  ;;  %4366 = vmatprep.subr.mxu0 %v10589_v12  ;;  %v10621_v12 = vld [vmem:[#allocation4 + $0x10] sm:$0xff] }
 0x60f   :  { %4440 = vmatpush1.msra.mxu1 %v10573_v19  ;;  %4367 = vmatpush1.msra.mxu0 %v10595_v20  ;;  %12134 = vst [vmem:[#allocation37_spill] sm:$0xff] %v10621_v12  ;;  %v10627_v20 = vld [vmem:[#allocation4 + $0x3f8] sm:$0xff] }
 0x610   :  { %4441 = vmatprep.subr.mxu1 %v10579_v10  ;;  %4368 = vmatprep.subr.mxu0 %v10601_v39  ;;  %12136 = vst [vmem:[#allocation39_spill] sm:$0xff] %v10627_v20  ;;  %v10633_v39 = vld [vmem:[#allocation4 + $0x3f0] sm:$0xff] }
 0x611   :  { %4442 = vmatpush1.msra.mxu1 %v10585_v33  ;;  %4369 = vmatpush1.msra.mxu0 %v10607_v0  ;;  %12138 = vst [vmem:[#allocation41_spill] sm:$0xff] %v10633_v39  ;;  %v10639_v0 = vld [vmem:[#allocation4 + $0x3d8] sm:$0xff]  ;;  %v10795_v33 = vld [vmem:[#allocation4 + $0x240] sm:$0xff] }
 0x612   :  { %4443 = vmatprep.subr.mxu1 %v10591_v25  ;;  %v10625_v25 = vld [vmem:[#allocation4 + $0x3e8] sm:$0xff]  ;;  %4370 = vmatprep.subr.mxu0 %v10613_v3  ;;  %12140 = vst [vmem:[#allocation43_spill] sm:$0xff] %v10639_v0  ;;  %v10645_v3 = vld [vmem:[#allocation4 + $0x3d0] sm:$0xff]  ;;  %12189 = vst [vmem:[#allocation92_spill] sm:$0xff] %v10795_v33 }
 0x613   :  { %4444 = vmatpush1.msra.mxu1 %v10597_v52  ;;  %12135 = vst [vmem:[#allocation48_spill] sm:$0xff] %v10625_v25  ;;  %v10631_v52 = vld [vmem:[#allocation4 + $0x3e0] sm:$0xff]  ;;  %4371 = vmatpush1.msra.mxu0 %v10619_v58  ;;  %12142 = vst [vmem:[#allocation45_spill] sm:$0xff] %v10645_v3  ;;  %v10651_v58 = vld [vmem:[#allocation4 + $0x3b8] sm:$0xff] }
 0x614   :  { %4445 = vmatprep.subr.mxu1 %v10603_v1  ;;  %12137 = vst [vmem:[#allocation50_spill] sm:$0xff] %v10631_v52  ;;  %v10637_v1 = vld [vmem:[#allocation4 + $0x3c8] sm:$0xff]  ;;  %4372 = vmatprep.subr.mxu0 %v10625_v25  ;;  %12144 = vst [vmem:[#allocation47_spill] sm:$0xff] %v10651_v58  ;;  %v10657_v25 = vld [vmem:[#allocation4 + $0x3b0] sm:$0xff] }
 0x615   :  { %4446 = vmatpush1.msra.mxu1 %v10609_v11  ;;  %12139 = vst [vmem:[#allocation52_spill] sm:$0xff] %v10637_v1  ;;  %v10643_v11 = vld [vmem:[#allocation4 + $0x3c0] sm:$0xff]  ;;  %4373 = vmatpush2.msra.mxu0 %v10631_v52  ;;  %12146 = vst [vmem:[#allocation49_spill] sm:$0xff] %v10657_v25  ;;  %v10663_v52 = vld [vmem:[#allocation4 + $0x398] sm:$0xff] }
 0x616   :  { %4447 = vmatprep.subr.mxu1 %v10615_v47  ;;  %12141 = vst [vmem:[#allocation54_spill] sm:$0xff] %v10643_v11  ;;  %v10649_v47 = vld [vmem:[#allocation4 + $0x3a8] sm:$0xff]  ;;  %4374 = vmatprep.subr.mxu0 %v10637_v1  ;;  %12148 = vst [vmem:[#allocation51_spill] sm:$0xff] %v10663_v52  ;;  %v10669_v1 = vld [vmem:[#allocation4 + $0x390] sm:$0xff] }
 0x617   :  { %4448 = vmatpush1.msra.mxu1 %v10621_v12  ;;  %12143 = vst [vmem:[#allocation56_spill] sm:$0xff] %v10649_v47  ;;  %v10655_v12 = vld [vmem:[#allocation4 + $0x3a0] sm:$0xff]  ;;  %4375 = vmatpush2.msra.mxu0 %v10643_v11  ;;  %12150 = vst [vmem:[#allocation53_spill] sm:$0xff] %v10669_v1  ;;  %v10675_v11 = vld [vmem:[#allocation4 + $0x378] sm:$0xff] }
 0x618   :  { %4449 = vmatprep.subr.mxu1 %v10627_v20  ;;  %12145 = vst [vmem:[#allocation58_spill] sm:$0xff] %v10655_v12  ;;  %v10661_v20 = vld [vmem:[#allocation4 + $0x388] sm:$0xff]  ;;  %4376 = vmatprep.subr.mxu0 %v10649_v47  ;;  %12152 = vst [vmem:[#allocation55_spill] sm:$0xff] %v10675_v11  ;;  %v10681_v47 = vld [vmem:[#allocation4 + $0x370] sm:$0xff] }
 0x619   :  { %4450 = vmatpush2.msra.mxu1 %v10633_v39  ;;  %12147 = vst [vmem:[#allocation60_spill] sm:$0xff] %v10661_v20  ;;  %v10667_v39 = vld [vmem:[#allocation4 + $0x380] sm:$0xff]  ;;  %4377 = vmatpush2.msra.mxu0 %v10655_v12  ;;  %12154 = vst [vmem:[#allocation57_spill] sm:$0xff] %v10681_v47  ;;  %v10687_v12 = vld [vmem:[#allocation4 + $0x358] sm:$0xff] }
 0x61a   :  { %4451 = vmatprep.subr.mxu1 %v10639_v0  ;;  %12149 = vst [vmem:[#allocation62_spill] sm:$0xff] %v10667_v39  ;;  %v10673_v0 = vld [vmem:[#allocation4 + $0x368] sm:$0xff]  ;;  %4378 = vmatprep.subr.mxu0 %v10661_v20  ;;  %12156 = vst [vmem:[#allocation59_spill] sm:$0xff] %v10687_v12  ;;  %v10693_v20 = vld [vmem:[#allocation4 + $0x350] sm:$0xff] }
 0x61b   :  { %4452 = vmatpush2.msra.mxu1 %v10645_v3  ;;  %12151 = vst [vmem:[#allocation64_spill] sm:$0xff] %v10673_v0  ;;  %v10679_v3 = vld [vmem:[#allocation4 + $0x360] sm:$0xff]  ;;  %4379 = vmatpush2.msra.mxu0 %v10667_v39  ;;  %12158 = vst [vmem:[#allocation61_spill] sm:$0xff] %v10693_v20  ;;  %v10699_v39 = vld [vmem:[#allocation4 + $0x338] sm:$0xff] }
 0x61c   :  { %4453 = vmatprep.subr.mxu1 %v10651_v58  ;;  %12153 = vst [vmem:[#allocation66_spill] sm:$0xff] %v10679_v3  ;;  %v10685_v58 = vld [vmem:[#allocation4 + $0x348] sm:$0xff]  ;;  %4380 = vmatprep.subr.mxu0 %v10673_v0  ;;  %12160 = vst [vmem:[#allocation63_spill] sm:$0xff] %v10699_v39  ;;  %v10705_v0 = vld [vmem:[#allocation4 + $0x330] sm:$0xff] }
 0x61d   :  { %4454 = vmatpush2.msra.mxu1 %v10657_v25  ;;  %12155 = vst [vmem:[#allocation68_spill] sm:$0xff] %v10685_v58  ;;  %v10691_v25 = vld [vmem:[#allocation4 + $0x340] sm:$0xff]  ;;  %4381 = vmatpush2.msra.mxu0 %v10679_v3  ;;  %12162 = vst [vmem:[#allocation65_spill] sm:$0xff] %v10705_v0  ;;  %v10711_v3 = vld [vmem:[#allocation4 + $0x318] sm:$0xff] }
 0x61e   :  { %4455 = vmatprep.subr.mxu1 %v10663_v52  ;;  %12157 = vst [vmem:[#allocation70_spill] sm:$0xff] %v10691_v25  ;;  %v10697_v52 = vld [vmem:[#allocation4 + $0x328] sm:$0xff]  ;;  %4382 = vmatprep.subr.mxu0 %v10685_v58  ;;  %12164 = vst [vmem:[#allocation12_spill] sm:$0xff] %v10711_v3  ;;  %v10717_v58 = vld [vmem:[#allocation4 + $0x310] sm:$0xff] }
 0x61f   :  { %4456 = vmatpush2.msra.mxu1 %v10669_v1  ;;  %12159 = vst [vmem:[#allocation72_spill] sm:$0xff] %v10697_v52  ;;  %v10703_v1 = vld [vmem:[#allocation4 + $0x320] sm:$0xff]  ;;  %4383 = vmatpush2.msra.mxu0 %v10691_v25  ;;  %12166 = vst [vmem:[#allocation78_spill] sm:$0xff] %v10717_v58 }
 0x620   :  { %4457 = vmatprep.subr.mxu1 %v10675_v11  ;;  %12161 = vst [vmem:[#allocation74_spill] sm:$0xff] %v10703_v1  ;;  %v10709_v11 = vld [vmem:[#allocation4 + $0x308] sm:$0xff]  ;;  %4384 = vmatprep.subr.mxu0 %v10697_v52  ;;  %v10727_v52 = vld [vmem:[#allocation4 + $0x2f8] sm:$0xff] }
 0x621   :  { %4458 = vmatpush2.msra.mxu1 %v10681_v47  ;;  %12163 = vst [vmem:[#allocation76_spill] sm:$0xff] %v10709_v11  ;;  %v10715_v47 = vld [vmem:[#allocation4 + $0x300] sm:$0xff]  ;;  %4385 = vmatpush2.msra.mxu0 %v10703_v1  ;;  %12168 = vst [vmem:[#allocation11_spill] sm:$0xff] %v10727_v52  ;;  %v10733_v1 = vld [vmem:[#allocation4 + $0x2f0] sm:$0xff] }
 0x622   :  { %4459 = vmatprep.subr.mxu1 %v10687_v12  ;;  %12165 = vst [vmem:[#allocation67_spill] sm:$0xff] %v10715_v47  ;;  %4386 = vmatprep.subr.mxu0 %v10709_v11  ;;  %12170 = vst [vmem:[#allocation80_spill] sm:$0xff] %v10733_v1  ;;  %v10737_v11 = vld [vmem:[#allocation4 + $0x2d8] sm:$0xff] }
 0x623   :  { %4460 = vmatpush2.msra.mxu1 %v10693_v20  ;;  %4387 = vmatpush2.msra.mxu0 %v10715_v47  ;;  %v10725_v20 = vld [vmem:[#allocation4 + $0x2e8] sm:$0xff]  ;;  %12172 = vst [vmem:[#allocation82_spill] sm:$0xff] %v10737_v11  ;;  %v10743_v47 = vld [vmem:[#allocation4 + $0x2d0] sm:$0xff] }
 0x624   :  { %4461 = vmatprep.subr.mxu1 %v10699_v39  ;;  %12167 = vst [vmem:[#allocation10_spill] sm:$0xff] %v10725_v20  ;;  %v10729_v39 = vld [vmem:[#allocation4 + $0x2e0] sm:$0xff]  ;;  %4388 = vmatprep.subr.mxu0 %v10725_v20  ;;  %12174 = vst [vmem:[#allocation84_spill] sm:$0xff] %v10743_v47 }
 0x625   :  { %4462 = vmatpush2.msra.mxu1 %v10705_v0  ;;  %12169 = vst [vmem:[#allocation69_spill] sm:$0xff] %v10729_v39  ;;  %v10735_v0 = vld [vmem:[#allocation4 + $0x2c8] sm:$0xff]  ;;  %4389 = vmatpush2.msra.mxu0 %v10729_v39  ;;  %v10755_v39 = vld [vmem:[#allocation4 + $0x2b8] sm:$0xff] }
 0x626   :  { %4463 = vmatprep.subr.mxu1 %v10711_v3  ;;  %12171 = vst [vmem:[#allocation71_spill] sm:$0xff] %v10735_v0  ;;  %4390 = vmatprep.subr.mxu0 %v10735_v0  ;;  %12176 = vst [vmem:[#allocation86_spill] sm:$0xff] %v10755_v39 }
 0x627   :  { %4464 = vmatpush2.msra.mxu1 %v10717_v58  ;;  %v10741_v58 = vld [vmem:[#allocation4 + $0x2c0] sm:$0xff] }
 0x628   :  { %4465 = vmatprep.subr.mxu1 %v10727_v52  ;;  %12173 = vst [vmem:[#allocation73_spill] sm:$0xff] %v10741_v58  ;;  %4391 = vmatpush2.msra.mxu0 %v10741_v58  ;;  %v3933_v52 = vpop.permute.xlu1 %3932  ;;  %v10761_v58 = vld [vmem:[#allocation4 + $0x2b0] sm:$0xff] }
 0x629   :  { %4466 = vmatpush2.msra.mxu1 %v10733_v1  ;;  %v10753_v1 = vld [vmem:[#allocation4 + $0x2a8] sm:$0xff]  ;;  %12178 = vst [vmem:[#allocation79_spill] sm:$0xff] %v10761_v58 }
 0x62a   :  { %4467 = vmatprep.subr.mxu1 %v10737_v11  ;;  %12175 = vst [vmem:[#allocation75_spill] sm:$0xff] %v10753_v1  ;;  %4392 = vmatprep.subr.mxu0 %v10753_v1  ;;  %v10759_v11 = vld [vmem:[#allocation4 + $0x2a0] sm:$0xff]  ;;  %v10773_v1 = vld [vmem:[#allocation4 + $0x290] sm:$0xff] }
 0x62b   :  { %4468 = vmatpush2.msra.mxu1 %v10743_v47  ;;  %12177 = vst [vmem:[#allocation77_spill] sm:$0xff] %v10759_v11  ;;  %4393 = vmatpush2.msra.mxu0 %v10759_v11  ;;  %v10769_v47 = vld [vmem:[#allocation4 + $0x280] sm:$0xff]  ;;  %12182 = vst [vmem:[#allocation13_spill] sm:$0xff] %v10773_v1  ;;  %v10777_v11 = vld [vmem:[#allocation4 + $0x268] sm:$0xff] }
 0x62c   :  { %4469 = vmatprep.subr.mxu1 %v10755_v39  ;;  %12181 = vst [vmem:[#allocation83_spill] sm:$0xff] %v10769_v47  ;;  %12183 = vst [vmem:[#allocation85_spill] sm:$0xff] %v10777_v11 }
 0x62d   :  { %4470 = vmatpush2.msra.mxu1 %v10761_v58  ;;  %v10779_v58 = vld [vmem:[#allocation4 + $0x278] sm:$0xff] }
 0x62e   :  { %12184 = vst [vmem:[#allocation93_spill] sm:$0xff] %v10779_v58 }
 0x6ab   :  { %v4012_v20 = vpop.f32.mrf.mxu0 }
 0x6ac   :  { %v4013_v3 = vadd.f32 %v4012_v20, %v3933_v52  ;;  %v10765_v20 = vld [vmem:[#allocation4 + $0x288] sm:$0xff] }
 0x6ad   :  { %12179 = vst [vmem:[#allocation89_spill] sm:$0xff] %v10765_v20  ;;  %4394 = vmatprep.subr.mxu0 %v10765_v20  ;;  %v4014_v39 = vpop.f32.mrf.mxu0  ;;  %v10785_v20 = vld [vmem:[#allocation4 + $0x260] sm:$0xff] }
 0x6ae   :  { %v10749_v25 = vmax.f32 %v4013_v3, 0.0  ;;  %v10767_v3 = vld [vmem:[#allocation4 + $0x298] sm:$0xff]  ;;  %4395 = vmatpush2.msra.mxu0 %v10769_v47  ;;  %v10781_v0 = vadd.f32 %v4014_v39, %v3933_v52  ;;  %12185 = vst [vmem:[#allocation87_spill] sm:$0xff] %v10785_v20 }
 0x6af   :  { %12180 = vst [vmem:[#allocation81_spill] sm:$0xff] %v10767_v3  ;;  %4471 = vmatprep.subr.mxu1 %v10767_v3  ;;  %4396 = vmatprep.subr.mxu0 %v10777_v11  ;;  %v10787_v3 = vld [vmem:[#allocation4 + $0x270] sm:$0xff]  ;;  %v10793_v47 = vld [vmem:[#allocation4 + $0x258] sm:$0xff]  ;;  %v4018_v10 = vpop.f32.mrf.mxu0 }
 0x6b0   :  { %4108 = vrot.lane.b32.xlu0 %v10749_v25, %s11736_s24  ;;  %4472 = vmatpush2.msra.mxu1 %v10773_v1  ;;  %12186 = vst [vmem:[#allocation88_spill] sm:$0xff] %v10787_v3  ;;  %v10791_v1 = vld [vmem:[#allocation4 + $0x248] sm:$0xff]  ;;  %12188 = vst [vmem:[#allocation91_spill] sm:$0xff] %v10793_v47  ;;  %v12205_v36 = vmax.f32 %v10781_v0, 0.0 }
 0x6b1   :  { %4473 = vmatprep.subr.mxu1 %v10779_v58  ;;  %4397 = vmatpush2.msra.mxu0 %v10785_v20  ;;  %12187 = vst [vmem:[#allocation90_spill] sm:$0xff] %v10791_v1  ;;  %v10801_v58 = vld [vmem:[#allocation4 + $0x250] sm:$0xff]  ;;  %v10807_v20 = vld [vmem:[#allocation4 + $0x238] sm:$0xff] }
 0x6b2   :  { %4474 = vmatpush2.msra.mxu1 %v10787_v3  ;;  %4398 = vmatprep.subr.mxu0 %v10791_v1  ;;  %12190 = vst [vmem:[#allocation94_spill] sm:$0xff] %v10801_v58  ;;  %v10805_v3 = vld [vmem:[#allocation4 + $0x228] sm:$0xff]  ;;  %12192 = vst [vmem:[#allocation98_spill] sm:$0xff] %v10807_v20  ;;  %v10815_v1 = vld [vmem:[#allocation4 + $0x230] sm:$0xff] }
 0x6b3   :  { %4475 = vmatprep.subr.mxu1 %v10793_v47  ;;  %4399 = vmatpush2.msra.mxu0 %v10795_v33  ;;  %12191 = vst [vmem:[#allocation95_spill] sm:$0xff] %v10805_v3  ;;  %v10813_v47 = vld [vmem:[#allocation4 + $0x220] sm:$0xff]  ;;  %12194 = vst [vmem:[#allocation97_spill] sm:$0xff] %v10815_v1  ;;  %v10821_v33 = vld [vmem:[#allocation4 + $0x218] sm:$0xff] }
 0x6b4   :  { %4476 = vmatpush2.msra.mxu1 %v10801_v58  ;;  %4400 = vmatprep.subr.mxu0 %v10805_v3  ;;  %12193 = vst [vmem:[#allocation96_spill] sm:$0xff] %v10813_v47  ;;  %v10819_v58 = vld [vmem:[#allocation4 + $0x208] sm:$0xff]  ;;  %12196 = vst [vmem:[#allocation100_spill] sm:$0xff] %v10821_v33 }
 0x6b5   :  { %4477 = vmatprep.subr.mxu1 %v10807_v20  ;;  %4401 = vmatpush2.msra.mxu0 %v10813_v47  ;;  %12195 = vst [vmem:[#allocation99_spill] sm:$0xff] %v10819_v58  ;;  %v10833_v47 = vld [vmem:[#allocation4 + $0x210] sm:$0xff] }
 0x6b6   :  { %4478 = vmatpush2.msra.mxu1 %v10815_v1  ;;  %4402 = vmatprep.subr.mxu0 %v10819_v58  ;;  %12200 = vst [vmem:[#allocation102_spill] sm:$0xff] %v10833_v47  ;;  %v3938_v1 = vpop.permute.xlu0 %3937 }
 0x6b7   :  { %4479 = vmatprep.subr.mxu1 %v10821_v33  ;;  %4403 = vmatpush2.msra.mxu0 %v10831_v48 }
 0x6b8   :  { %v4089_v12 = vpop.f32.mrf.mxu1  ;;  %4480 = vmatpush2.msra.mxu1 %v10833_v47  ;;  %4502 = vmatprep.subr.mxu0 %v10437_v46 }
 0x6b9   :  { %v10797_v39 = vadd.f32 %v4089_v12, %v3933_v52  ;;  %v12197_v12 = vmax.f32 %v10781_v0, 0.0  ;;  %4579 = vmatprep.subr.mxu1 %v10439_v57 }
 0x6ba   :  { %v4091_v11 = vpop.f32.mrf.mxu1 }
 0x6bb   :  { %v10823_v40 = vadd.f32 %v4091_v11, %v3933_v52  ;;  %v12198_v3 = vmax.f32 %v10797_v39, 0.0  ;;  %v10837_v52 = vadd.f32 %v4018_v10, %v3938_v1  ;;  %v4020_v11 = vpop.f32.mrf.mxu0 }
 0x6bc   :  { %v4095_v19 = vpop.f32.mrf.mxu1  ;;  %v10847_v48 = vadd.f32 %v4020_v11, %v3938_v1 }
 0x6bd   :  { %v5507_v20 = vpack.i.bf16 %v12198_v3, %v12197_v12  ;;  %v11706_v3 = vmax.f32 %v10823_v40, 0.0  ;;  %v10844_v12 = vadd.f32 %v4095_v19, %v3938_v1  ;;  %v11708_v33 = vmax.f32 %v10837_v52, 0.0 }
 0x6be   :  { %v11709_v57 = vmax.f32 %v10847_v48, 0.0 }
 0x6bf   :  { %5508 = vrot.lane.b32.xlu1 %v5507_v20, %s11736_s24  ;;  %5513 = vrot.lane.b32.xlu0 %v5507_v20, %s5769_s11  ;;  %12201 = vst [vmem:[#allocation103_spill] sm:$0xff] %v10844_v12  ;;  %v11707_v10 = vmax.f32 %v10844_v12, 0.0  ;;  %v5522_v46 = vpack.i.bf16 %v11706_v3, %v11708_v33 }
 0x6c1   :  { %v5537_v19 = vpack.i.bf16 %v11707_v10, %v11709_v57 }
 0x6c3   :  { %5518 = vrot.lane.b32.xlu1 %v5507_v20, %s5768_s15  ;;  %4164 = vrot.lane.b32.xlu0 %v10749_v25, %s5768_s15  ;;  %v4097_v20 = vpop.f32.mrf.mxu1 }
 0x6c4   :  { %v4098_v11 = vadd.f32 %v4097_v20, %v3938_v1 }
 0x6c6   :  { %v10869_v3 = vmax.f32 %v4098_v11, 0.0 }
 0x6c7   :  { %4140 = vrot.lane.b32.xlu1 %v10749_v25, %s5769_s11  ;;  %5523 = vrot.lane.b32.xlu0 %v5522_v46, %s11736_s24 }
 0x6c8   :  { %12202 = vst [vmem:[#allocation104_spill] sm:$0xff] %v10869_v3 }
 0x6cb   :  { %5528 = vrot.lane.b32.xlu1 %v5522_v46, %s5769_s11  ;;  %5538 = vrot.lane.b32.xlu0 %v5537_v19, %s5769_s11 }
 0x6cf   :  { %5533 = vrot.lane.b32.xlu1 %v5537_v19, %s11736_s24  ;;  %5543 = vrot.lane.b32.xlu0 %v5522_v46, %s5768_s15 }
 0x6d3   :  { %5548 = vrot.lane.b32.xlu1 %v5537_v19, %s5768_s15  ;;  %4154 = vrot.lane.b32.xlu0 %v10869_v3, %s5769_s11 }
 0x6d7   :  { %4122 = vrot.lane.b32.xlu1 %v10869_v3, %s11736_s24  ;;  %s12314_s24 = sld [smem:[#allocation109_spill]] }
 0x6db   :  { %4178 = vrot.lane.b32.xlu1 %v10869_v3, %s5768_s15 }
 0x722   :  { %v10878_v10 = vpop.permute.xlu0 %4108 }
 0x731   :  { %v5509_v1 = vpop.permute.xlu1 %5508  ;;  %v5514_v20 = vpop.permute.xlu0 %5513 }
 0x732   :  { %v5511_v33 = vunpack.i.h.bf16 %v5509_v1  ;;  %v5510_v57 = vunpack.i.l.bf16 %v5509_v1  ;;  %v5516_v46 = vunpack.i.h.bf16 %v5514_v20  ;;  %v5515_v11 = vunpack.i.l.bf16 %v5514_v20 }
 0x734   :  { %v4126_v19 = vsel %vm12203_vm1, %v5510_v57, %v5511_v33  ;;  %v4128_v3 = vsel %vm12204_vm5, %v10878_v10, %v5510_v57  ;;  %v4158_v54 = vsel %vm3502_vm9, %v5515_v11, %v5516_v46 }
 0x735   :  { %v5519_v12 = vpop.permute.xlu1 %5518  ;;  %v10880_v47 = vpop.permute.xlu0 %4164  ;;  %v4133_v21 = vmax.f32 %v12205_v36, %v4126_v19  ;;  %v4132_v28 = vmax.f32 %v10749_v25, %v4128_v3 }
 0x736   :  { %v5521_v58 = vunpack.i.h.bf16 %v5519_v12  ;;  %v5520_v31 = vunpack.i.l.bf16 %v5519_v12 }
 0x738   :  { %v4182_v1 = vsel %vm3519_vm10, %v5520_v31, %v5521_v58  ;;  %v4184_v12 = vsel %vm3519_vm10, %v10880_v47, %v5520_v31 }
 0x739   :  { %v10891_v34 = vpop.permute.xlu1 %4140  ;;  %v10893_v20 = vpop.permute.xlu0 %5523  ;;  %v4189_v17 = vmax.f32 %v4158_v54, %v4182_v1 }
 0x73a   :  { %v4160_v57 = vsel %vm3502_vm9, %v10891_v34, %v5515_v11  ;;  %v5526_v36 = vunpack.i.h.bf16 %v10893_v20  ;;  %v5525_v25 = vunpack.i.l.bf16 %v10893_v20  ;;  %v12301_v20 = vld [vmem:[#allocation98_spill] sm:$0xff] }
 0x73b   :  { %v4188_v32 = vmax.f32 %v4160_v57, %v4184_v12  ;;  %v4197_v37 = vmax.f32 %v4133_v21, %v4189_v17  ;;  %v12229_v12 = vld [vmem:[#allocation34_spill] sm:$0xff]  ;;  %v12230_v57 = vld [vmem:[#allocation25_spill] sm:$0xff] }
 0x73d   :  { %v4196_v7 = vmax.f32 %v4132_v28, %v4188_v32  ;;  %v10904_v49 = vpop.permute.xlu1 %5528  ;;  %v10906_v51 = vpop.permute.xlu0 %5538  ;;  %4404 = vmatprep.mubr.f32.mxu0 %v4197_v37  ;;  %4481 = vmatprep.mubr.f32.mxu1 %v4197_v37  ;;  %v4124_v28 = vsel %vm12206_vm6, %v5511_v33, %v5526_v36 }
 0x73e   :  { %v5531_v54 = vunpack.i.h.bf16 %v10904_v49 }
 0x73f   :  { %4405 = vmatmul.mubr.f32.vlgmr.msra.gmra.mxu0 %v4196_v7  ;;  %4482 = vmatmul.mubr.f32.vlgmr.msra.gmra.mxu1 %v4196_v7 }
 0x740   :  { %4503 = vmatpush1.msra.mxu0 %v10441_v24  ;;  %4580 = vmatpush1.msra.mxu1 %v10445_v27  ;;  %v5530_v24 = vunpack.i.l.bf16 %v10904_v49  ;;  %v5541_v27 = vunpack.i.h.bf16 %v10906_v51  ;;  %v12299_v49 = vld [vmem:[#allocation94_spill] sm:$0xff] }
 0x741   :  { %4504 = vmatprep.subr.mxu0 %v10447_v35  ;;  %v10913_v17 = vpop.permute.xlu1 %5533  ;;  %v10915_v32 = vpop.permute.xlu0 %5543  ;;  %4581 = vmatprep.subr.mxu1 %v10449_v50  ;;  %v5540_v35 = vunpack.i.l.bf16 %v10906_v51  ;;  %v4156_v50 = vsel %vm3502_vm9, %v5516_v46, %v5531_v54  ;;  %v12308_v51 = vld [vmem:[#allocation101_spill] sm:$0xff] }
 0x742   :  { %v5536_v37 = vunpack.i.h.bf16 %v10913_v17  ;;  %v5535_v7 = vunpack.i.l.bf16 %v10913_v17  ;;  %v5546_v21 = vunpack.i.h.bf16 %v10915_v32  ;;  %4505 = vmatpush1.msra.mxu0 %v10453_v63  ;;  %4582 = vmatpush1.msra.mxu1 %v10455_v59  ;;  %v12207_v63 = vmax.f32 %v10797_v39, 0.0  ;;  %v12310_v17 = vld [vmem:[#allocation103_spill] sm:$0xff] }
 0x743   :  { %4506 = vmatprep.subr.mxu0 %v10457_v23  ;;  %4583 = vmatprep.subr.mxu1 %v10461_v61 }
 0x744   :  { %v4180_v31 = vsel %vm3519_vm10, %v5521_v58, %v5546_v21  ;;  %v4134_v33 = vmax.f32 %v12207_v63, %v4124_v28  ;;  %4507 = vmatpush1.msra.mxu0 %v10463_v13  ;;  %4584 = vmatpush1.msra.mxu1 %v10465_v16  ;;  %v4127_v23 = vsel %vm12208_vm8, %v5535_v7, %v5536_v37  ;;  %v5545_v58 = vunpack.i.l.bf16 %v10915_v32  ;;  %v12233_v28 = vld [vmem:[#allocation38_spill] sm:$0xff]  ;;  %v12239_v63 = vld [vmem:[#allocation44_spill] sm:$0xff] }
 0x745   :  { %v4190_v0 = vmax.f32 %v4156_v50, %v4180_v31  ;;  %v10939_v59 = vpop.permute.xlu1 %5548  ;;  %4508 = vmatprep.subr.mxu0 %v10469_v29  ;;  %4585 = vmatprep.subr.mxu1 %v10471_v2  ;;  %v4159_v13 = vsel %vm3502_vm9, %v5540_v35, %v5541_v27  ;;  %v4161_v16 = vsel %vm3502_vm9, %v5530_v24, %v5540_v35  ;;  %v12236_v35 = vld [vmem:[#allocation31_spill] sm:$0xff]  ;;  %v12237_v50 = vld [vmem:[#allocation42_spill] sm:$0xff]  ;;  %v12238_v31 = vld [vmem:[#allocation33_spill] sm:$0xff] }
 0x746   :  { %v5551_v61 = vunpack.i.h.bf16 %v10939_v59  ;;  %v5550_v39 = vunpack.i.l.bf16 %v10939_v59  ;;  %4509 = vmatpush1.msra.mxu0 %v10475_v43  ;;  %4586 = vmatpush1.msra.mxu1 %v10477_v14  ;;  %v4129_v29 = vsel %vm12209_vm13, %v5525_v25, %v5535_v7  ;;  %v12210_v43 = vmax.f32 %v10847_v48, 0.0  ;;  %v12234_v7 = vld [vmem:[#allocation29_spill] sm:$0xff] }
 0x747   :  { %v10958_v3 = vmax.f32 %v4134_v33, %v4190_v0  ;;  %4510 = vmatprep.subr.mxu0 %v10481_v56  ;;  %4587 = vmatprep.subr.mxu1 %v10483_v15  ;;  %v4186_v1 = vsel %vm3519_vm10, %v5546_v21, %v10880_v47  ;;  %v12211_v15 = vmax.f32 %v10837_v52, 0.0  ;;  %v4162_v48 = vsel %vm3502_vm9, %v5531_v54, %v10891_v34  ;;  %v12224_v34 = vld [vmem:[#allocation19_spill] sm:$0xff]  ;;  %v12226_v47 = vld [vmem:[#allocation21_spill] sm:$0xff]  ;;  %v12227_v52 = vld [vmem:[#allocation32_spill] sm:$0xff] }
 0x748   :  { %v4183_v2 = vsel %vm3519_vm10, %v5550_v39, %v5551_v61  ;;  %v4185_v46 = vsel %vm3519_vm10, %v5545_v58, %v5550_v39  ;;  %4511 = vmatpush1.msra.mxu0 %v10487_v9  ;;  %4588 = vmatpush1.msra.mxu1 %v10489_v41  ;;  %v4137_v14 = vmax.f32 %v12210_v43, %v4127_v23  ;;  %v12232_v54 = vld [vmem:[#allocation27_spill] sm:$0xff]  ;;  %v12235_v21 = vld [vmem:[#allocation40_spill] sm:$0xff]  ;;  %v12241_v0 = vld [vmem:[#allocation46_spill] sm:$0xff] }
 0x749   :  { %v4193_v11 = vmax.f32 %v4159_v13, %v4183_v2  ;;  %v4192_v19 = vmax.f32 %v4161_v16, %v4185_v46  ;;  %4512 = vmatprep.subr.mxu0 %v10493_v62  ;;  %4589 = vmatprep.subr.mxu1 %v10495_v45  ;;  %v4136_v9 = vmax.f32 %v12211_v15, %v4129_v29  ;;  %v12240_v33 = vld [vmem:[#allocation35_spill] sm:$0xff]  ;;  %v12242_v23 = vld [vmem:[#allocation37_spill] sm:$0xff]  ;;  %v12243_v39 = vld [vmem:[#allocation48_spill] sm:$0xff] }
 0x74a   :  { %4513 = vmatpush1.msra.mxu0 %v10499_v38  ;;  %4590 = vmatpush1.msra.mxu1 %v10501_v44  ;;  %v4130_v41 = vsel %vm12212_vm7, %v5526_v36, %v10878_v10  ;;  %v4191_v45 = vmax.f32 %v4162_v48, %v4186_v1  ;;  %v12213_v38 = vmax.f32 %v10823_v40, 0.0  ;;  %v12225_v40 = vld [vmem:[#allocation30_spill] sm:$0xff]  ;;  %v12228_v10 = vld [vmem:[#allocation23_spill] sm:$0xff]  ;;  %v12231_v36 = vld [vmem:[#allocation36_spill] sm:$0xff] }
 0x74b   :  { %v4201_v56 = vmax.f32 %v4137_v14, %v4193_v11  ;;  %4514 = vmatprep.subr.mxu0 %v10505_v18  ;;  %4591 = vmatprep.subr.mxu1 %v10507_v55  ;;  %v4200_v62 = vmax.f32 %v4136_v9, %v4192_v19  ;;  %v12214_v55 = vld [vmem:[#allocation14_spill] sm:$0xff]  ;;  %v12244_v13 = vld [vmem:[#allocation39_spill] sm:$0xff]  ;;  %v12246_v29 = vld [vmem:[#allocation41_spill] sm:$0xff] }
 0x74c   :  { %4515 = vmatpush1.msra.mxu0 %v10511_v4  ;;  %4592 = vmatpush1.msra.mxu1 %v10513_v30  ;;  %v4135_v44 = vmax.f32 %v12213_v38, %v4130_v41  ;;  %v12215_v4 = vld [vmem:[#allocation20_spill] sm:$0xff]  ;;  %v12216_v30 = vld [vmem:[#allocation15_spill] sm:$0xff]  ;;  %v12245_v16 = vld [vmem:[#allocation50_spill] sm:$0xff] }
 0x74d   :  { %4516 = vmatprep.subr.mxu0 %v10517_v42  ;;  %4593 = vmatprep.subr.mxu1 %v10519_v26  ;;  %v12217_v42 = vld [vmem:[#allocation22_spill] sm:$0xff]  ;;  %v12218_v26 = vld [vmem:[#allocation16_spill] sm:$0xff]  ;;  %v12248_v46 = vld [vmem:[#allocation43_spill] sm:$0xff] }
 0x74e   :  { %4410 = vmatprep.mubr.f32.mxu0 %v4201_v56  ;;  %4487 = vmatprep.mubr.f32.mxu1 %v4201_v56  ;;  %v4199_v18 = vmax.f32 %v4135_v44, %v4191_v45  ;;  %v12247_v2 = vld [vmem:[#allocation52_spill] sm:$0xff]  ;;  %v12249_v43 = vld [vmem:[#allocation54_spill] sm:$0xff]  ;;  %v12250_v14 = vld [vmem:[#allocation45_spill] sm:$0xff] }
 0x74f   :  { %4517 = vmatpush1.msra.mxu0 %v10523_v5  ;;  %4594 = vmatpush1.msra.mxu1 %v10525_v8  ;;  %v12219_v5 = vld [vmem:[#allocation24_spill] sm:$0xff]  ;;  %v12220_v8 = vld [vmem:[#allocation17_spill] sm:$0xff]  ;;  %v12252_v19 = vld [vmem:[#allocation47_spill] sm:$0xff] }
 0x750   :  { %4411 = vmatmul.mubr.f32.gmra.mxu0 %v4200_v62  ;;  %4488 = vmatmul.mubr.f32.gmra.mxu1 %v4200_v62  ;;  %v12251_v11 = vld [vmem:[#allocation56_spill] sm:$0xff]  ;;  %v12253_v1 = vld [vmem:[#allocation58_spill] sm:$0xff]  ;;  %v12254_v56 = vld [vmem:[#allocation49_spill] sm:$0xff] }
 0x751   :  { %4518 = vmatprep.subr.mxu0 %v10529_v53  ;;  %4595 = vmatprep.subr.mxu1 %v10531_v60  ;;  %v12221_v53 = vld [vmem:[#allocation26_spill] sm:$0xff]  ;;  %v12255_v15 = vld [vmem:[#allocation60_spill] sm:$0xff]  ;;  %v12256_v9 = vld [vmem:[#allocation51_spill] sm:$0xff] }
 0x752   :  { %4519 = vmatpush1.msra.mxu0 %v10535_v22  ;;  %4566 = vmatprep.mubr.f32.mxu0 %v4199_v18  ;;  %v12222_v60 = vld [vmem:[#allocation18_spill] sm:$0xff]  ;;  %v12223_v22 = vld [vmem:[#allocation28_spill] sm:$0xff]  ;;  %v12258_v48 = vld [vmem:[#allocation53_spill] sm:$0xff] }
 0x753   :  { %4596 = vmatpush1.msra.mxu1 %v12214_v55  ;;  %4643 = vmatprep.mubr.f32.mxu1 %v4199_v18  ;;  %v12257_v41 = vld [vmem:[#allocation62_spill] sm:$0xff]  ;;  %v12259_v62 = vld [vmem:[#allocation64_spill] sm:$0xff]  ;;  %v12260_v45 = vld [vmem:[#allocation55_spill] sm:$0xff] }
 0x754   :  { %4520 = vmatprep.subr.mxu0 %v12215_v4  ;;  %4597 = vmatprep.subr.mxu1 %v12216_v30  ;;  %v12261_v38 = vld [vmem:[#allocation66_spill] sm:$0xff]  ;;  %v12262_v44 = vld [vmem:[#allocation57_spill] sm:$0xff]  ;;  %v12263_v18 = vld [vmem:[#allocation68_spill] sm:$0xff] }
 0x755   :  { %4521 = vmatpush1.msra.mxu0 %v12217_v42  ;;  %4598 = vmatpush1.msra.mxu1 %v12218_v26  ;;  %v12264_v55 = vld [vmem:[#allocation59_spill] sm:$0xff]  ;;  %v12265_v4 = vld [vmem:[#allocation70_spill] sm:$0xff]  ;;  %v12266_v30 = vld [vmem:[#allocation61_spill] sm:$0xff] }
 0x756   :  { %4522 = vmatprep.subr.mxu0 %v12219_v5  ;;  %4599 = vmatprep.subr.mxu1 %v12220_v8  ;;  %v12267_v42 = vld [vmem:[#allocation72_spill] sm:$0xff]  ;;  %v12268_v26 = vld [vmem:[#allocation63_spill] sm:$0xff]  ;;  %v12269_v5 = vld [vmem:[#allocation74_spill] sm:$0xff] }
 0x757   :  { %4523 = vmatpush1.msra.mxu0 %v12221_v53  ;;  %4600 = vmatpush1.msra.mxu1 %v12222_v60  ;;  %v12270_v8 = vld [vmem:[#allocation65_spill] sm:$0xff]  ;;  %v12271_v53 = vld [vmem:[#allocation76_spill] sm:$0xff] }
 0x758   :  { %4524 = vmatprep.subr.mxu0 %v12223_v22  ;;  %4601 = vmatprep.subr.mxu1 %v12224_v34  ;;  %v12272_v60 = vld [vmem:[#allocation12_spill] sm:$0xff]  ;;  %v4123_v22 = vpop.permute.xlu1 %4122  ;;  %v12273_v34 = vld [vmem:[#allocation67_spill] sm:$0xff] }
 0x759   :  { %4525 = vmatpush1.msra.mxu0 %v12225_v40  ;;  %4602 = vmatpush1.msra.mxu1 %v12226_v47  ;;  %v12274_v40 = vld [vmem:[#allocation78_spill] sm:$0xff]  ;;  %v4131_v32 = vsel %vm12295_vm15, %v4123_v22, %v5525_v25  ;;  %v4125_v59 = vsel %vm12302_vm12, %v5536_v37, %v4123_v22 }
 0x75a   :  { %4526 = vmatprep.subr.mxu0 %v12227_v52  ;;  %4603 = vmatprep.subr.mxu1 %v12228_v10  ;;  %v12275_v47 = vld [vmem:[#allocation10_spill] sm:$0xff]  ;;  %v12276_v52 = vld [vmem:[#allocation11_spill] sm:$0xff]  ;;  %v12277_v10 = vld [vmem:[#allocation69_spill] sm:$0xff] }
 0x75b   :  { %4527 = vmatpush1.msra.mxu0 %v12229_v12  ;;  %4604 = vmatpush1.msra.mxu1 %v12230_v57  ;;  %v12278_v12 = vld [vmem:[#allocation80_spill] sm:$0xff]  ;;  %v12279_v57 = vld [vmem:[#allocation71_spill] sm:$0xff] }
 0x75c   :  { %4528 = vmatprep.subr.mxu0 %v12231_v36  ;;  %4605 = vmatprep.subr.mxu1 %v12232_v54  ;;  %v12280_v36 = vld [vmem:[#allocation82_spill] sm:$0xff]  ;;  %v12281_v54 = vld [vmem:[#allocation73_spill] sm:$0xff] }
 0x75d   :  { %4529 = vmatpush1.msra.mxu0 %v12233_v28  ;;  %4606 = vmatpush1.msra.mxu1 %v12234_v7  ;;  %v12282_v28 = vld [vmem:[#allocation84_spill] sm:$0xff]  ;;  %v12283_v7 = vld [vmem:[#allocation75_spill] sm:$0xff] }
 0x75e   :  { %4530 = vmatprep.subr.mxu0 %v12235_v21  ;;  %4607 = vmatprep.subr.mxu1 %v12236_v35  ;;  %v12284_v21 = vld [vmem:[#allocation86_spill] sm:$0xff]  ;;  %v4179_v35 = vpop.permute.xlu1 %4178 }
 0x75f   :  { %4531 = vmatpush1.msra.mxu0 %v12237_v50  ;;  %4608 = vmatpush1.msra.mxu1 %v12238_v31  ;;  %v12285_v50 = vld [vmem:[#allocation77_spill] sm:$0xff]  ;;  %v12286_v31 = vld [vmem:[#allocation79_spill] sm:$0xff] }
 0x760   :  { %4532 = vmatprep.subr.mxu0 %v12239_v63  ;;  %4609 = vmatprep.subr.mxu1 %v12240_v33  ;;  %v12287_v63 = vld [vmem:[#allocation89_spill] sm:$0xff] }
 0x761   :  { %4533 = vmatpush1.msra.mxu0 %v12241_v0  ;;  %4610 = vmatpush1.msra.mxu1 %v12242_v23  ;;  %v12288_v33 = vld [vmem:[#allocation81_spill] sm:$0xff]  ;;  %v4155_v0 = vpop.permute.xlu0 %4154  ;;  %v12289_v23 = vld [vmem:[#allocation83_spill] sm:$0xff] }
 0x762   :  { %4534 = vmatprep.subr.mxu0 %v12243_v39  ;;  %4611 = vmatprep.subr.mxu1 %v12244_v13  ;;  %v12290_v39 = vld [vmem:[#allocation13_spill] sm:$0xff]  ;;  %v4187_v13 = vsel %vm3519_vm10, %v4179_v35, %v5545_v58  ;;  %v12297_v58 = vld [vmem:[#allocation91_spill] sm:$0xff]  ;;  %v4157_v25 = vsel %vm3502_vm9, %v5541_v27, %v4155_v0 }
 0x763   :  { %4535 = vmatpush2.msra.mxu0 %v12245_v16  ;;  %4612 = vmatpush2.msra.mxu1 %v12246_v29  ;;  %v12291_v16 = vld [vmem:[#allocation85_spill] sm:$0xff] }
 0x764   :  { %4536 = vmatprep.subr.mxu0 %v12247_v2  ;;  %4613 = vmatprep.subr.mxu1 %v12248_v46  ;;  %v12292_v29 = vld [vmem:[#allocation93_spill] sm:$0xff]  ;;  %v12293_v2 = vld [vmem:[#allocation87_spill] sm:$0xff]  ;;  %v12294_v46 = vld [vmem:[#allocation88_spill] sm:$0xff] }
 0x765   :  { %4537 = vmatpush2.msra.mxu0 %v12249_v43  ;;  %4614 = vmatpush2.msra.mxu1 %v12250_v14  ;;  %v4163_v43 = vsel %vm3502_vm9, %v4155_v0, %v5530_v24  ;;  %v12296_v14 = vld [vmem:[#allocation90_spill] sm:$0xff]  ;;  %v12300_v24 = vld [vmem:[#allocation95_spill] sm:$0xff]  ;;  %vm4868_vm9 = vcmask 130048  }
 0x766   :  { %4538 = vmatprep.subr.mxu0 %v12251_v11  ;;  %4615 = vmatprep.subr.mxu1 %v12252_v19  ;;  %v4181_v11 = vsel %vm3519_vm10, %v5551_v61, %v4179_v35  ;;  %v4195_v19 = vmax.f32 %v4163_v43, %v4187_v13  ;;  %v12303_v61 = vld [vmem:[#allocation104_spill] sm:$0xff]  ;;  %vm4665_vm10 = vcmask 261120  }
 0x767   :  { %4539 = vmatpush2.msra.mxu0 %v12253_v1  ;;  %4616 = vmatpush2.msra.mxu1 %v12254_v56  ;;  %v12298_v1 = vld [vmem:[#allocation92_spill] sm:$0xff]  ;;  %v4139_v56 = vmax.f32 %v12303_v61, %v4131_v32  ;;  %v4824_v61 = vld [vmem:[%s12312_s12 + $0x68] sm:$0xff] }
 0x768   :  { %4540 = vmatprep.subr.mxu0 %v12255_v15  ;;  %4617 = vmatprep.subr.mxu1 %v12256_v9  ;;  %v12304_v15 = vld [vmem:[#allocation96_spill] sm:$0xff]  ;;  %v12305_v9 = vld [vmem:[#allocation97_spill] sm:$0xff] }
 0x769   :  { %4541 = vmatpush2.msra.mxu0 %v12257_v41  ;;  %4618 = vmatpush2.msra.mxu1 %v12258_v48  ;;  %v4194_v41 = vmax.f32 %v4157_v25, %v4181_v11  ;;  %v12306_v48 = vld [vmem:[#allocation99_spill] sm:$0xff]  ;;  %v4203_v27 = vmax.f32 %v4139_v56, %v4195_v19  ;;  %v4842_v11 = vld [vmem:[%s12312_s12 + $0xf8] sm:$0xff]  ;;  %v4839_v56 = vld [vmem:[%s12312_s12 + $0xe0] sm:$0xff] }
 0x76a   :  { %4542 = vmatprep.subr.mxu0 %v12259_v62  ;;  %4619 = vmatprep.subr.mxu1 %v12260_v45  ;;  %v12307_v62 = vld [vmem:[#allocation100_spill] sm:$0xff]  ;;  %v12309_v45 = vld [vmem:[#allocation102_spill] sm:$0xff] }
 0x76b   :  { %4543 = vmatpush2.msra.mxu0 %v12261_v38  ;;  %4620 = vmatpush2.msra.mxu1 %v12262_v44  ;;  %v12311_v38 = vmax.f32 %v12310_v17, 0.0  ;;  %v5774_v44 = vmov 0.0   ;;  %v4858_v19 = vld [vmem:[%s12312_s12 + $0x178] sm:$0xff]  ;;  %v4840_v25 = vld [vmem:[%s12312_s12 + $0xe8] sm:$0xff] }
 0x76c   :  { %4544 = vmatprep.subr.mxu0 %v12263_v18  ;;  %4621 = vmatprep.subr.mxu1 %v12264_v55  ;;  %v4836_v17 = vld [vmem:[%s12312_s12 + $0xc8] sm:$0xff] }
 0x76d   :  { %4545 = vmatpush2.msra.mxu0 %v12265_v4  ;;  %4622 = vmatpush2.msra.mxu1 %v12266_v30  ;;  %v4138_v6 = vmax.f32 %v12311_v38, %v4125_v59  ;;  %v4856_v59 = vld [vmem:[%s12312_s12 + $0x168] sm:$0xff] }
 0x76e   :  { %4546 = vmatprep.subr.mxu0 %v12267_v42  ;;  %4623 = vmatprep.subr.mxu1 %v12268_v26  ;;  %v4852_v38 = vld [vmem:[%s12312_s12 + $0x148] sm:$0xff] }
 0x76f   :  { %4547 = vmatpush2.msra.mxu0 %v12269_v5  ;;  %4624 = vmatpush2.msra.mxu1 %v12270_v8  ;;  %v4202_v37 = vmax.f32 %v4138_v6, %v4194_v41  ;;  %v4838_v41 = vld [vmem:[%s12312_s12 + $0xd8] sm:$0xff]  ;;  %v4820_v6 = vld [vmem:[%s12312_s12 + $0x48] sm:$0xff] }
 0x770   :  { %4548 = vmatprep.subr.mxu0 %v12271_v53  ;;  %4625 = vmatprep.subr.mxu1 %v12272_v60 }
 0x771   :  { %4549 = vmatpush2.msra.mxu0 %v12273_v34  ;;  %4626 = vmatpush2.msra.mxu1 %v12274_v40 }
 0x772   :  { %4550 = vmatprep.subr.mxu0 %v12275_v47  ;;  %4627 = vmatprep.subr.mxu1 %v12276_v52  ;;  %v4209_v47 = vld [vmem:[%s11452_s7 + $0x28] sm:$0xff]  ;;  %v4211_v52 = vld [vmem:[%s11452_s7 + $0x38] sm:$0xff] }
 0x773   :  { %4551 = vmatpush2.msra.mxu0 %v12277_v10  ;;  %4628 = vmatpush2.msra.mxu1 %v12278_v12 }
 0x774   :  { %4552 = vmatprep.subr.mxu0 %v12279_v57  ;;  %4629 = vmatprep.subr.mxu1 %v12280_v36  ;;  %v4208_v57 = vld [vmem:[%s11452_s7 + $0x20] sm:$0xff]  ;;  %v4210_v36 = vld [vmem:[%s11452_s7 + $0x30] sm:$0xff] }
 0x775   :  { %4553 = vmatpush2.msra.mxu0 %v12281_v54  ;;  %4630 = vmatpush2.msra.mxu1 %v12282_v28 }
 0x776   :  { %4554 = vmatprep.subr.mxu0 %v12283_v7  ;;  %4631 = vmatprep.subr.mxu1 %v12284_v21  ;;  %v4205_v7 = vld [vmem:[%s11452_s7 + $0x8] sm:$0xff]  ;;  %v4207_v21 = vld [vmem:[%s11452_s7 + $0x18] sm:$0xff] }
 0x777   :  { %4555 = vmatpush2.msra.mxu0 %v12285_v50  ;;  %4632 = vmatpush2.msra.mxu1 %v12286_v31  ;;  %v4204_v31 = vld [vmem:[%s11452_s7] sm:$0xff] }
 0x778   :  { %4556 = vmatprep.subr.mxu0 %v12287_v63  ;;  %4633 = vmatprep.subr.mxu1 %v12288_v33  ;;  %v4206_v63 = vld [vmem:[%s11452_s7 + $0x10] sm:$0xff]  ;;  %s12315_s7 = sld [smem:[#allocation106_spill]] }
 0x779   :  { %4557 = vmatpush2.msra.mxu0 %v12289_v23  ;;  %4634 = vmatpush2.msra.mxu1 %v12290_v39 }
 0x77a   :  { %4558 = vmatprep.subr.mxu0 %v12291_v16  ;;  %4635 = vmatprep.subr.mxu1 %v12292_v29 }
 0x77b   :  { %4559 = vmatpush2.msra.mxu0 %v12293_v2  ;;  %4636 = vmatpush2.msra.mxu1 %v12294_v46 }
 0x77c   :  { %4560 = vmatprep.subr.mxu0 %v12296_v14  ;;  %4637 = vmatprep.subr.mxu1 %v12297_v58  ;;  %v4664_v58 = vld [vmem:[%s11453_s8] sm:$0x3] }
 0x77d   :  { %4561 = vmatpush2.msra.mxu0 %v12298_v1  ;;  %4638 = vmatpush2.msra.mxu1 %v12299_v49  ;;  %v4826_v1 = vld [vmem:[%s12312_s12 + $0x78] sm:$0xff]  ;;  %v4841_v49 = vld [vmem:[%s12312_s12 + $0xf0] sm:$0xff] }
 0x77e   :  { %4562 = vmatprep.subr.mxu0 %v12300_v24  ;;  %4639 = vmatprep.subr.mxu1 %v12301_v20  ;;  %v4857_v24 = vld [vmem:[%s12312_s12 + $0x170] sm:$0xff] }
 0x77f   :  { %4563 = vmatpush2.msra.mxu0 %v12304_v15  ;;  %4640 = vmatpush2.msra.mxu1 %v12305_v9  ;;  %v4825_v20 = vld [vmem:[%s12312_s12 + $0x70] sm:$0xff]  ;;  %v4855_v15 = vld [vmem:[%s12312_s12 + $0x160] sm:$0xff] }
 0x780   :  { %4564 = vmatprep.subr.mxu0 %v12306_v48  ;;  %4641 = vmatprep.subr.mxu1 %v12307_v62  ;;  %v4823_v9 = vld [vmem:[%s12312_s12 + $0x60] sm:$0xff]  ;;  %v4854_v48 = vld [vmem:[%s12312_s12 + $0x158] sm:$0xff] }
 0x781   :  { %4565 = vmatpush2.msra.mxu0 %v12308_v51  ;;  %4642 = vmatpush2.msra.mxu1 %v12309_v45  ;;  %v4822_v62 = vld [vmem:[%s12312_s12 + $0x58] sm:$0xff]  ;;  %v4837_v51 = vld [vmem:[%s12312_s12 + $0xd0] sm:$0xff] }
 0x782   :  { %4567 = vmatmul.mubr.f32.vlgmr.msra.gmra.mxu0 %v10958_v3  ;;  %4644 = vmatmul.mubr.f32.vlgmr.msra.gmra.mxu1 %v10958_v3  ;;  %v4853_v45 = vld [vmem:[%s12312_s12 + $0x150] sm:$0xff] }
 0x783   :  { %4572 = vmatprep.mubr.f32.mxu0 %v4203_v27  ;;  %4649 = vmatprep.mubr.f32.mxu1 %v4203_v27  ;;  %v4821_v27 = vld [vmem:[%s12312_s12 + $0x50] sm:$0xff] }
 0x786   :  { %4573 = vmatmul.mubr.f32.gmra.mxu0 %v4202_v37  ;;  %4650 = vmatmul.mubr.f32.gmra.mxu1 %v4202_v37  ;;  %v4835_v37 = vld [vmem:[%s12312_s12 + $0xc0] sm:$0xff] }
 0x787   :  { %4733 = vmatprep.mubr.f32.mxu0 %v5774_v44  ;;  %4804 = vmatprep.mubr.f32.mxu1 %v5774_v44 }
 0x7ff   :  { %v4406_v18 = vpop.f32.mrf.mxu0  ;;  %v4483_v55 = vpop.f32.mrf.mxu1 }
 0x800   :  { %v4494_v32 = vmul.f32 %v4406_v18, %v4204_v31  ;;  %v4496_v14 = vmul.f32 %v4483_v55, %v4206_v63  ;;  %v4851_v18 = vld [vmem:[%s12312_s12 + $0x140] sm:$0xff] }
 0x801   :  { %v4408_v4 = vpop.f32.mrf.mxu0  ;;  %v4485_v30 = vpop.f32.mrf.mxu1  ;;  %v4819_v55 = vld [vmem:[%s12312_s12 + $0x40] sm:$0xff] }
 0x802   :  { %v4495_v46 = vmul.f32 %v4408_v4, %v4205_v7  ;;  %v4497_v43 = vmul.f32 %v4485_v30, %v4207_v21  ;;  %v4834_v4 = vld [vmem:[%s12312_s12 + $0xb8] sm:$0xff] }
 0x803   :  { %v4850_v30 = vld [vmem:[%s12312_s12 + $0x138] sm:$0xff] }
 0x810   :  { %v4412_v42 = vpop.f32.mrf.mxu0  ;;  %v4489_v26 = vpop.f32.mrf.mxu1 }
 0x811   :  { %v4498_v29 = vmul.f32 %v4412_v42, %v4208_v57  ;;  %v4500_v2 = vmul.f32 %v4489_v26, %v4210_v36  ;;  %v4818_v42 = vld [vmem:[%s12312_s12 + $0x38] sm:$0xff]  ;;  %v4833_v26 = vld [vmem:[%s12312_s12 + $0xb0] sm:$0xff] }
 0x812   :  { %v4414_v5 = vpop.f32.mrf.mxu0  ;;  %v4491_v8 = vpop.f32.mrf.mxu1 }
 0x813   :  { %v4499_v13 = vmul.f32 %v4414_v5, %v4209_v47  ;;  %v4501_v16 = vmul.f32 %v4491_v8, %v4211_v52  ;;  %v4849_v5 = vld [vmem:[%s12312_s12 + $0x130] sm:$0xff] }
 0x814   :  { %v4817_v8 = vld [vmem:[%s12312_s12 + $0x30] sm:$0xff] }
 0x842   :  { %v4568_v53 = vpop.f32.mrf.mxu0  ;;  %v4645_v3 = vpop.f32.mrf.mxu1 }
 0x843   :  { %v4656_v23 = vmul.f32 %v4568_v53, %v4204_v31  ;;  %v4658_v39 = vmul.f32 %v4645_v3, %v4206_v63  ;;  %v4832_v53 = vld [vmem:[%s12312_s12 + $0xa8] sm:$0xff]  ;;  %v4811_v31 = vld [vmem:[%s12312_s12] sm:$0xff] }
 0x844   :  { %v4570_v60 = vpop.f32.mrf.mxu0  ;;  %v4647_v22 = vpop.f32.mrf.mxu1  ;;  %v4848_v3 = vld [vmem:[%s12312_s12 + $0x128] sm:$0xff]  ;;  %v4859_v63 = vld [vmem:[%s12312_s12 + $0x180] sm:$0xff] }
 0x845   :  { %v4657_v33 = vmul.f32 %v4570_v60, %v4205_v7  ;;  %v4659_v0 = vmul.f32 %v4647_v22, %v4207_v21  ;;  %v4816_v60 = vld [vmem:[%s12312_s12 + $0x28] sm:$0xff]  ;;  %v4831_v22 = vld [vmem:[%s12312_s12 + $0xa0] sm:$0xff] }
 0x846   :  { %v4574_v34 = vpop.f32.mrf.mxu0  ;;  %v4651_v40 = vpop.f32.mrf.mxu1  ;;  %v4843_v7 = vld [vmem:[%s12312_s12 + $0x100] sm:$0xff]  ;;  %v4812_v21 = vld [vmem:[%s12312_s12 + $0x8] sm:$0xff] }
 0x847   :  { %v4660_v35 = vmul.f32 %v4574_v34, %v4208_v57  ;;  %v4662_v50 = vmul.f32 %v4651_v40, %v4210_v36  ;;  %v4847_v34 = vld [vmem:[%s12312_s12 + $0x120] sm:$0xff]  ;;  %v4845_v57 = vld [vmem:[%s12312_s12 + $0x110] sm:$0xff] }
 0x848   :  { %v4576_v10 = vpop.f32.mrf.mxu0  ;;  %v4653_v12 = vpop.f32.mrf.mxu1  ;;  %v4815_v40 = vld [vmem:[%s12312_s12 + $0x20] sm:$0xff]  ;;  %v4813_v36 = vld [vmem:[%s12312_s12 + $0x10] sm:$0xff] }
 0x849   :  { %v4661_v54 = vmul.f32 %v4576_v10, %v4209_v47  ;;  %v4663_v28 = vmul.f32 %v4653_v12, %v4211_v52  ;;  %v4830_v47 = vld [vmem:[%s12312_s12 + $0x98] sm:$0xff]  ;;  %v4829_v12 = vld [vmem:[%s12312_s12 + $0x90] sm:$0xff] }
 0x84a   :  { %v4846_v52 = vld [vmem:[%s12312_s12 + $0x118] sm:$0xff] }
 0x84b   :  { %4693 = vmatprep.subr.mxu0 %v4661_v54  ;;  %4764 = vmatprep.subr.mxu1 %v4663_v28  ;;  %v4814_v10 = vld [vmem:[%s12312_s12 + $0x18] sm:$0xff]  ;;  %v4844_v54 = vld [vmem:[%s12312_s12 + $0x108] sm:$0xff] }
 0x84c   :  { %4694 = vmatpush1.msra.mxu0 %v4660_v35  ;;  %4765 = vmatpush1.msra.mxu1 %v4662_v50  ;;  %v4828_v28 = vld [vmem:[%s12312_s12 + $0x88] sm:$0xff]  ;;  %v4827_v35 = vld [vmem:[%s12312_s12 + $0x80] sm:$0xff] }
 0x84d   :  { %4695 = vmatprep.subr.mxu0 %v4657_v33  ;;  %4766 = vmatprep.subr.mxu1 %v4659_v0  ;;  %v4860_v50 = vld [vmem:[%s12312_s12 + $0x188] sm:$0xff]  ;;  %s5214_s12 = sshll.u32 %s5776_s30, 4  ;;  %s5215_s12 = int_to_ptr.vmem [resolvable:$true] %s5214_s12 }
 0x84e   :  { %4696 = vmatpush1.msra.mxu0 %v4656_v23  ;;  %4767 = vmatpush1.msra.mxu1 %v4658_v39  ;;  %p5723_p6 = scmp.lt.s32.totalorder %s5215_s12, %s5215_s12 }
 0x84f   :  { %4697 = vmatprep.subr.mxu0 %v4499_v13  ;;  %4768 = vmatprep.subr.mxu1 %v4501_v16  ;;  %v5027_v13 = vld [vmem:[%s12313_s3 + $0x70] sm:$0xff]  ;;  %v5026_v16 = vld [vmem:[%s12313_s3 + $0x68] sm:$0xff] }
 0x850   :  { %4698 = vmatpush1.msra.mxu0 %v4498_v29  ;;  %4769 = vmatpush1.msra.mxu1 %v4500_v2  ;;  %v5025_v29 = vld [vmem:[%s12313_s3 + $0x60] sm:$0xff]  ;;  %v5024_v2 = vld [vmem:[%s12313_s3 + $0x58] sm:$0xff] }
 0x851   :  { %4699 = vmatprep.subr.mxu0 %v4495_v46  ;;  %4770 = vmatprep.subr.mxu1 %v4497_v43  ;;  %v5023_v46 = vld [vmem:[%s12313_s3 + $0x50] sm:$0xff]  ;;  %v5022_v43 = vld [vmem:[%s12313_s3 + $0x48] sm:$0xff] }
 0x852   :  { %4700 = vmatpush1.msra.mxu0 %v4494_v32  ;;  %4771 = vmatpush1.msra.mxu1 %v4496_v14  ;;  %v5021_v32 = vld [vmem:[%s12313_s3 + $0x40] sm:$0xff]  ;;  %v5020_v14 = vld [vmem:[%s12313_s3 + $0x38] sm:$0xff] }
 0x853   :  { %5235 = vmatmul.mubr.msk.f32.vlgmr.msra.gmra.mxu0 %vm4665_vm10, %v4664_v58  ;;  %5236 = vmatmul.mubr.msk.f32.vlgmr.msra.gmra.mxu1 %vm4665_vm10, %v4664_v58  ;;  %v5019_v58 = vld [vmem:[%s12313_s3 + $0x30] sm:$0xff] }
 0x854   :  { %4942 = vmatprep.subr.mxu1 %v5774_v44  ;;  %5244 = vmatprep.subr.mxu0 %v4842_v11  ;;  %v5018_v11 = vld [vmem:[%s12313_s3 + $0x28] sm:$0xff] }
 0x855   :  { %4943 = vmatpush1.msra.mxu1 %v4858_v19  ;;  %5245 = vmatpush3.msra.mxu0 %v4826_v1  ;;  %v5017_v19 = vld [vmem:[%s12313_s3 + $0x20] sm:$0xff]  ;;  %v5016_v1 = vld [vmem:[%s12313_s3 + $0x18] sm:$0xff] }
 0x856   :  { %4944 = vmatprep.subr.mxu1 %v5774_v44  ;;  %5246 = vmatprep.subr.mxu0 %v4841_v49  ;;  %v5015_v49 = vld [vmem:[%s12313_s3 + $0x10] sm:$0xff] }
 0x857   :  { %4945 = vmatpush1.msra.mxu1 %v4857_v24  ;;  %5247 = vmatpush3.msra.mxu0 %v4825_v20  ;;  %v5014_v24 = vld [vmem:[%s12313_s3 + $0x8] sm:$0xff]  ;;  %v5013_v20 = vld [vmem:[%s12313_s3] sm:$0xff] }
 0x858   :  { %4946 = vmatprep.subr.mxu1 %v5774_v44  ;;  %5248 = vmatprep.subr.mxu0 %v4840_v25  ;;  %v5120_v25 = vld [vmem:[%s12314_s24 + $0x50] sm:$0xf] }
 0x859   :  { %4947 = vmatpush1.msra.mxu1 %v4856_v59  ;;  %5249 = vmatpush3.msra.mxu0 %v4824_v61  ;;  %v5119_v59 = vld [vmem:[%s12314_s24 + $0x48] sm:$0xff]  ;;  %v5118_v61 = vld [vmem:[%s12314_s24 + $0x40] sm:$0xff] }
 0x85a   :  { %4948 = vmatprep.subr.mxu1 %v5774_v44  ;;  %5250 = vmatprep.subr.mxu0 %v4839_v56  ;;  %v5117_v56 = vld [vmem:[%s12314_s24 + $0x38] sm:$0xff] }
 0x85b   :  { %4949 = vmatpush1.msra.mxu1 %v4855_v15  ;;  %5251 = vmatpush3.msra.mxu0 %v4823_v9  ;;  %v5116_v15 = vld [vmem:[%s12314_s24 + $0x30] sm:$0xff]  ;;  %v5115_v9 = vld [vmem:[%s12314_s24 + $0x28] sm:$0xff] }
 0x85c   :  { %4950 = vmatprep.subr.mxu1 %v5774_v44  ;;  %5252 = vmatprep.subr.mxu0 %v4838_v41  ;;  %v5114_v41 = vld [vmem:[%s12314_s24 + $0x20] sm:$0xff] }
 0x85d   :  { %4951 = vmatpush1.msra.mxu1 %v4854_v48  ;;  %5253 = vmatpush3.msra.mxu0 %v4822_v62  ;;  %v5113_v48 = vld [vmem:[%s12314_s24 + $0x18] sm:$0xff] }
 0x85e   :  { %4952 = vmatprep.subr.mxu1 %v5774_v44  ;;  %5254 = vmatprep.subr.mxu0 %v4837_v51 }
 0x85f   :  { %4953 = vmatpush1.msra.mxu1 %v4853_v45  ;;  %5255 = vmatpush3.msra.mxu0 %v4821_v27  ;;  %v5237_v27 = vld [vmem:[%s12315_s7] ss:$0 sm:$0xff] }
 0x860   :  { %4954 = vmatprep.subr.mxu1 %v5774_v44  ;;  %5256 = vmatprep.subr.mxu0 %v4836_v17 }
 0x861   :  { %4955 = vmatpush1.msra.mxu1 %v4852_v38  ;;  %5257 = vmatpush3.msra.mxu0 %v4820_v6 }
 0x862   :  { %4956 = vmatprep.subr.mxu1 %v5774_v44  ;;  %5258 = vmatprep.subr.mxu0 %v4835_v37 }
 0x863   :  { %4957 = vmatpush1.msra.mxu1 %v4851_v18  ;;  %5259 = vmatpush3.msra.mxu0 %v4819_v55  ;;  %v5112_v55 = vld [vmem:[%s12314_s24 + $0x10] sm:$0xff] }
 0x864   :  { %4958 = vmatprep.subr.mxu1 %v5774_v44  ;;  %5260 = vmatprep.subr.mxu0 %v4834_v4  ;;  %v5111_v4 = vld [vmem:[%s12314_s24 + $0x8] sm:$0xff] }
 0x865   :  { %4959 = vmatpush1.msra.mxu1 %v4850_v30  ;;  %5261 = vmatpush3.msra.mxu0 %v4818_v42  ;;  %v5110_v30 = vld [vmem:[%s12314_s24] sm:$0xff]  ;;  %s5718_s24 = scalar_lea.vmem %s5215_s12, 32 }
 0x866   :  { %4960 = vmatprep.subr.mxu1 %v5774_v44  ;;  %5262 = vmatprep.subr.mxu0 %v4833_v26  ;;  %v5239_v42 = vld [vmem:[%s12316_s21] ss:$0 sm:$0xff]  ;;  %p5719_p5 = scmp.ne.s32.totalorder %s5215_s12, %s5718_s24  ;;  %p5724_p7 = scmp.lt.s32.totalorder %s5718_s24, %s5718_s24 }
 0x867   :  { %4961 = vmatpush1.msra.mxu1 %v4849_v5  ;;  %5263 = vmatpush3.msra.mxu0 %v4817_v8 }
 0x868   :  { %4962 = vmatprep.subr.mxu1 %v5774_v44  ;;  %5264 = vmatprep.subr.mxu0 %v4832_v53  ;;  %p5725_p8 = por %p5724_p7, %p5723_p6 }
 0x869   :  { %4963 = vmatpush1.msra.mxu1 %v4848_v3  ;;  %5265 = vmatpush3.msra.mxu0 %v4816_v60  ;;  %v5241_v3 = vld [vmem:[%s12317_s16] ss:$0 sm:$0xff] }
 0x86a   :  { %4964 = vmatprep.subr.mxu1 %v5774_v44  ;;  %5266 = vmatprep.subr.mxu0 %v4831_v22  ;;  %p5726_p9 = pnand %p5725_p8, %p5719_p5 }
 0x86b   :  { %4965 = vmatpush1.msra.mxu1 %v4847_v34  ;;  %5267 = vmatpush3.msra.mxu0 %v4815_v40 }
 0x86c   :  { %4966 = vmatprep.subr.mxu1 %v5774_v44  ;;  %5268 = vmatprep.subr.mxu0 %v4830_v47 }
 0x86d   :  { %4967 = vmatpush1.msra.mxu1 %v4846_v52  ;;  %5269 = vmatpush3.msra.mxu0 %v4814_v10 }
 0x86e   :  { %4968 = vmatprep.subr.mxu1 %v5774_v44  ;;  %5270 = vmatprep.subr.mxu0 %v4829_v12 }
 0x86f   :  { %4969 = vmatpush1.msra.mxu1 %v4845_v57  ;;  %5271 = vmatpush3.msra.mxu0 %v4813_v36 }
 0x870   :  { %4970 = vmatprep.subr.mxu1 %v5774_v44  ;;  %5272 = vmatprep.subr.mxu0 %v4828_v28 }
 0x871   :  { %4971 = vmatpush1.msra.mxu1 %v4844_v54  ;;  %5273 = vmatpush3.msra.mxu0 %v4812_v21 }
 0x872   :  { %4972 = vmatprep.subr.mxu1 %v5774_v44  ;;  %5274 = vmatprep.subr.mxu0 %v4827_v35 }
 0x873   :  { %4973 = vmatpush1.msra.mxu1 %v4843_v7  ;;  %5275 = vmatpush3.msra.mxu0 %v4811_v31 }
 0x874   :  { %5002 = vmatprep.subr.mxu1 %v5774_v44  ;;  %5307 = vmatprep.subr.mxu0 %v5774_v44 }
 0x875   :  { %5003 = vmatpush2.msra.mxu1 %v4860_v50 }
 0x876   :  { %5004 = vmatprep.subr.mxu1 %v5774_v44 }
 0x877   :  { %5005 = vmatpush2.msra.mxu1 %v4859_v63 }
 0x878   :  { %5340 = vmatprep.subr.mxu1 %v5774_v44 }
 0x913   :  { %v4735_v33 = vpop.f32.mrf.mxu0  ;;  %v4806_v0 = vpop.f32.mrf.mxu1 }
 0x915   :  { %v4737_v23 = vpop.f32.mrf.mxu0  ;;  %v4808_v39 = vpop.f32.mrf.mxu1 }
 0x916   :  { %4936 = vmatprep.mubr.f32.mxu0 %v4737_v23  ;;  %5238 = vmatprep.mubr.msk.f32.mxu1 %vm4868_vm9, %v4808_v39 }
 0x917   :  { %4937 = vmatmul.mubr.f32.vlgmr.msra.gmra.mxu0 %v4735_v33  ;;  %5007 = vmatmul.mubr.f32.vlgmr.msra.gmra.mxu1 %v4806_v0 }
 0x918   :  { %5308 = vmatpush3.msra.mxu0 %v5027_v13  ;;  %5337 = vmatprep.mubr.msk.f32.mxu0 %vm5775_vm0, %v5774_v44 }
 0x919   :  { %5309 = vmatprep.subr.mxu0 %v5774_v44  ;;  %5362 = vmatprep.mubr.msk.f32.mxu1 %vm5775_vm0, %v5774_v44 }
 0x91a   :  { %5310 = vmatpush3.msra.mxu0 %v5026_v16  ;;  %5341 = vmatpush3.msk.msra.mxu1 %vm5132_vm14, %v5120_v25 }
 0x91b   :  { %5311 = vmatprep.subr.mxu0 %v5774_v44  ;;  %5342 = vmatprep.subr.mxu1 %v5774_v44 }
 0x91c   :  { %5312 = vmatpush3.msra.mxu0 %v5025_v29  ;;  %5343 = vmatpush3.msra.mxu1 %v5119_v59 }
 0x91d   :  { %5313 = vmatprep.subr.mxu0 %v5774_v44  ;;  %5344 = vmatprep.subr.mxu1 %v5774_v44 }
 0x91e   :  { %5314 = vmatpush3.msra.mxu0 %v5024_v2  ;;  %5345 = vmatpush3.msra.mxu1 %v5118_v61 }
 0x91f   :  { %5315 = vmatprep.subr.mxu0 %v5774_v44  ;;  %5346 = vmatprep.subr.mxu1 %v5774_v44 }
 0x920   :  { %5316 = vmatpush3.msra.mxu0 %v5023_v46  ;;  %5347 = vmatpush3.msra.mxu1 %v5117_v56 }
 0x921   :  { %5317 = vmatprep.subr.mxu0 %v5774_v44  ;;  %5348 = vmatprep.subr.mxu1 %v5774_v44 }
 0x922   :  { %5318 = vmatpush3.msra.mxu0 %v5022_v43  ;;  %5349 = vmatpush3.msra.mxu1 %v5116_v15 }
 0x923   :  { %5319 = vmatprep.subr.mxu0 %v5774_v44  ;;  %5350 = vmatprep.subr.mxu1 %v5774_v44 }
 0x924   :  { %5320 = vmatpush3.msra.mxu0 %v5021_v32  ;;  %5351 = vmatpush3.msra.mxu1 %v5115_v9 }
 0x925   :  { %5321 = vmatprep.subr.mxu0 %v5774_v44  ;;  %5352 = vmatprep.subr.mxu1 %v5774_v44 }
 0x926   :  { %5322 = vmatpush3.msra.mxu0 %v5020_v14  ;;  %5353 = vmatpush3.msra.mxu1 %v5114_v41 }
 0x927   :  { %5323 = vmatprep.subr.mxu0 %v5774_v44  ;;  %5354 = vmatprep.subr.mxu1 %v5774_v44 }
 0x928   :  { %5324 = vmatpush3.msra.mxu0 %v5019_v58  ;;  %5355 = vmatpush3.msra.mxu1 %v5113_v48 }
 0x929   :  { %5325 = vmatprep.subr.mxu0 %v5774_v44  ;;  %5356 = vmatprep.subr.mxu1 %v5774_v44 }
 0x92a   :  { %5326 = vmatpush3.msra.mxu0 %v5018_v11  ;;  %5357 = vmatpush3.msra.mxu1 %v5112_v55 }
 0x92b   :  { %5327 = vmatprep.subr.mxu0 %v5774_v44  ;;  %5358 = vmatprep.subr.mxu1 %v5774_v44 }
 0x92c   :  { %5328 = vmatpush3.msra.mxu0 %v5017_v19  ;;  %5359 = vmatpush3.msra.mxu1 %v5111_v4 }
 0x92d   :  { %5329 = vmatprep.subr.mxu0 %v5774_v44  ;;  %5360 = vmatprep.subr.mxu1 %v5774_v44 }
 0x92e   :  { %5330 = vmatpush3.msra.mxu0 %v5016_v1  ;;  %5361 = vmatpush3.msra.mxu1 %v5110_v30 }
 0x92f   :  { %5331 = vmatprep.subr.mxu0 %v5774_v44 }
 0x930   :  { %5332 = vmatpush3.msra.mxu0 %v5015_v49 }
 0x931   :  { %5333 = vmatprep.subr.mxu0 %v5774_v44 }
 0x932   :  { %5334 = vmatpush3.msra.mxu0 %v5014_v24 }
 0x933   :  { %5335 = vmatprep.subr.mxu0 %v5774_v44 }
 0x934   :  { %5336 = vmatpush3.msra.mxu0 %v5013_v20 }
 0x9d7   :  { %v5276_v62 = vpop.f32.mrf.mxu0  ;;  %v5008_v51 = vpop.f32.mrf.mxu1 }
 0x9d9   :  { %v5277_v45 = vpop.f32.mrf.mxu0  ;;  %v5010_v17 = vpop.f32.mrf.mxu1 }
 0x9da   :  { %v5278_v38 = vadd.f32 %v5277_v45, %v5276_v62 }
 0x9dc   :  { %v4939_v6 = vadd.f32 %v5278_v38, %v5237_v27 }
 0x9de   :  { %v5009_v37 = vadd.f32 %v5008_v51, %v4939_v6 }
 0x9e0   :  { %v5012_v18 = vmax.f32 %v5009_v37, 0.0 }
 0x9e2   :  { %5338 = vmatmul.mubr.msk.f32.vlgmr.msra.gmra.mxu0 %vm5035_vm11, %v5012_v18 }
 0xaa2   :  { %v5105_v26 = vpop.f32.mrf.mxu0 }
 0xaa3   :  { %v5106_v5 = vadd.f32 %v5239_v42, %v5105_v26 }
 0xaa4   :  { %v5339_v8 = vpop.f32.mrf.mxu0 }
 0xaa5   :  { %v5109_v53 = vmax.f32 %v5106_v5, 0.0 }
 0xaa7   :  { %5363 = vmatmul.mubr.msk.f32.vlgmr.msra.gmra.mxu1 %vm5128_vm2, %v5109_v53 }
 0xb67   :  { %v5202_v44 = vpop.f32.mrf.mxu1 }
 0xb68   :  { %v5203_v60 = vadd.f32 %v5241_v3, %v5202_v44 }
 0xb69   :  { %v5364_v22 = vpop.f32.mrf.mxu1 }
 0xb6a   :  { %5207 = vst.msk [vmem:[#allocation7] sm:$0x3] %vm5206_vm3, %v5203_v60 }
 0xb6b   :  { %5729 = shalt.err (!%p5726_p9)
}
 0xb6c   :  { %s12318_s3 = sld [smem:[#allocation111_spill]] }
 0xb72   :  { %5217 = dma.vmem_to_hbm [thread:$0]  %s5215_s12, 32, %s12318_s3, [#allocation6]  }
 0xb73   :  { %5740 = dma.done.wait [#allocation6], 32  }
 0xb74   :  { %5741 = vsyncadd [#allocation6], 4294967264 }
 0xb75   :  { %5221 = vsyncpa [#allocation5], 1 }
 0xb76   :  { %5222 = vsyncpa [#allocation6], 1 }

</bundles_post_ra>
